<compile_context>
chip_gen: v7x
topology: tpu7x:2x2x1
jax: 0.10.0
libtpu: 0.0.40
codegen_flags: <defaults>
</compile_context>

<pallas_src>
import jax
import jax.numpy as jnp
from jax.experimental import pallas as pl
from jax.experimental.pallas import tpu as pltpu

EPS = 1e-5
LANE = 128


def _round_up(v, m):
    return ((v + m - 1) // m) * m


# ------------------------------ Pallas kernels ------------------------------ #

def _conv_tile(a32, w_ref, col_keep):
    """3x3 conv of one padded image via in-VMEM im2col.

    a32:      (Hp, Wp, Ci) f32 activation, zero outside the real interior.
    w_ref:    (9*Ci, Co) bf16 tap-major weights.
    col_keep: (H*Wp, 1) bool, True on real output columns.
    Returns (H*Wp, Co) f32 conv output (alignment-pad columns zeroed).
    """
    hp, wp, ci = a32.shape
    h = hp - 2
    m = h * wp
    pieces = []
    for ky in range(3):
        b = a32[ky:ky + h].reshape(m, ci)     # outer-dim slice, aligned reshape
        for kx in range(3):
            dx = kx - 1
            p = b if dx == 0 else pltpu.roll(b, shift=(-dx) % m, axis=0)
            pieces.append(p.astype(jnp.bfloat16))
    patches = jnp.concatenate(pieces, axis=-1)            # (m, 9*Ci) bf16
    acc = jnp.dot(patches, w_ref[...], preferred_element_type=jnp.float32)
    return jnp.where(col_keep, acc, 0.0)


def _store_z_and_stats(acc, z_ref, stats_ref):
    # acc: (H*Wp, Co) f32.  Stats are taken from f32 before the bf16 cast.
    _, hp, wp, co = z_ref.shape
    h = hp - 2
    s = jnp.sum(acc, axis=0, keepdims=True)
    sq = jnp.sum(acc * acc, axis=0, keepdims=True)
    stats_ref[0] = jnp.concatenate([s, sq], axis=0)        # (2, Co), no zero pad
    zero_row = jnp.zeros((1, wp, co), z_ref.dtype)
    body = acc.astype(z_ref.dtype).reshape(h, wp, co)
    z_ref[0] = jnp.concatenate([zero_row, body, zero_row], axis=0)


def _conv_kernel(x_ref, w_ref, mask_ref, z_ref, stats_ref):
    # Input is already a valid padded activation (zeros outside the interior).
    _, hp, wp, _ = x_ref.shape
    h = hp - 2
    col_keep = mask_ref[wp:(h + 1) * wp, :] != 0.0         # real output columns
    acc = _conv_tile(x_ref[0].astype(jnp.float32), w_ref, col_keep)
    _store_z_and_stats(acc, z_ref, stats_ref)


def _bn_relu_conv_kernel(x_ref, w_ref, mask_ref, scale_ref, shift_ref,
                         z_ref, stats_ref):
    # Fused: a = relu(z_prev*scale + shift) masked to the interior, then conv.
    _, hp, wp, ci = x_ref.shape
    h = hp - 2
    keep = mask_ref[...] != 0.0                            # (Hp*Wp, 1)
    col_keep = mask_ref[wp:(h + 1) * wp, :] != 0.0
    x_flat = x_ref[0].reshape(hp * wp, ci).astype(jnp.float32)
    a_flat = jnp.maximum(x_flat * scale_ref[...] + shift_ref[...], 0.0)
    a_flat = jnp.where(keep, a_flat, 0.0)                  # restore zero padding
    acc = _conv_tile(a_flat.reshape(hp, wp, ci), w_ref, col_keep)
    _store_z_and_stats(acc, z_ref, stats_ref)


def _bn_relu_kernel(z_ref, mask_ref, scale_ref, shift_ref, o_ref):
    _, hp, wp, co = z_ref.shape
    keep = mask_ref[...] != 0.0
    z_flat = z_ref[0].reshape(hp * wp, co).astype(jnp.float32)
    y = jnp.maximum(z_flat * scale_ref[...] + shift_ref[...], 0.0)
    o_ref[0] = jnp.where(keep, y, 0.0).astype(o_ref.dtype).reshape(hp, wp, co)


def _bn_add_relu_kernel(z_ref, mask_ref, scale_ref, shift_ref, res_ref, o_ref):
    _, hp, wp, co = z_ref.shape
    keep = mask_ref[...] != 0.0
    z_flat = z_ref[0].reshape(hp * wp, co).astype(jnp.float32)
    r_flat = res_ref[0].reshape(hp * wp, co).astype(jnp.float32)
    y = jnp.maximum(z_flat * scale_ref[...] + shift_ref[...] + r_flat, 0.0)
    o_ref[0] = jnp.where(keep, y, 0.0).astype(o_ref.dtype).reshape(hp, wp, co)


# ------------------------------ kernel wrappers ----------------------------- #

def _conv_pass(h_pad, w9, mask, in_scale=None, in_shift=None):
    """One 3x3 conv over padded activations.

    Returns z (N, Hp, Wp, Co) bf16 (padded layout; halo rows / pad cols zero)
    and per-image stats (N, 2, Co) f32 (row 0 = sum, row 1 = sum of squares
    over the real interior).  If in_scale / in_shift are given, the input is
    first normalized with relu(x*scale + shift) inside the kernel (fused
    BN+ReLU, so the intermediate activation never hits HBM).
    """
    n, hp, wp, ci = h_pad.shape
    co = w9.shape[-1]
    act = pl.BlockSpec((1, hp, wp, ci), lambda i: (i, 0, 0, 0))
    wsp = pl.BlockSpec((9 * ci, co), lambda i: (0, 0))
    msk = pl.BlockSpec((hp * wp, 1), lambda i: (0, 0))
    vec = pl.BlockSpec((1, ci), lambda i: (0, 0))
    out_specs = (pl.BlockSpec((1, hp, wp, co), lambda i: (i, 0, 0, 0)),
                 pl.BlockSpec((1, 2, co), lambda i: (i, 0, 0)))
    out_shape = (jax.ShapeDtypeStruct((n, hp, wp, co), jnp.bfloat16),
                 jax.ShapeDtypeStruct((n, 2, co), jnp.float32))
    params = pltpu.CompilerParams(dimension_semantics=("parallel",))
    if in_scale is None:
        return pl.pallas_call(
            _conv_kernel, grid=(n,), in_specs=[act, wsp, msk],
            out_specs=out_specs, out_shape=out_shape, compiler_params=params,
        )(h_pad, w9, mask)
    return pl.pallas_call(
        _bn_relu_conv_kernel, grid=(n,), in_specs=[act, wsp, msk, vec, vec],
        out_specs=out_specs, out_shape=out_shape, compiler_params=params,
    )(h_pad, w9, mask, in_scale, in_shift)


def _bn_act_pass(z_pad, mask, scale, shift, residual=None):
    """BN (+ residual) + ReLU epilogue; writes the next padded activation."""
    n, hp, wp, co = z_pad.shape
    act = pl.BlockSpec((1, hp, wp, co), lambda i: (i, 0, 0, 0))
    msk = pl.BlockSpec((hp * wp, 1), lambda i: (0, 0))
    vec = pl.BlockSpec((1, co), lambda i: (0, 0))
    common = dict(
        grid=(n,),
        out_shape=jax.ShapeDtypeStruct((n, hp, wp, co), jnp.bfloat16),
        out_specs=pl.BlockSpec((1, hp, wp, co), lambda i: (i, 0, 0, 0)),
        compiler_params=pltpu.CompilerParams(
            dimension_semantics=("parallel",)),
    )
    if residual is None:
        return pl.pallas_call(
            _bn_relu_kernel, in_specs=[act, msk, vec, vec], **common,
        )(z_pad, mask, scale, shift)
    # Residual is passed in its native padded layout so the alias is a true
    # in-place donation (no defensive copy for a reshaped view).
    return pl.pallas_call(
        _bn_add_relu_kernel, in_specs=[act, msk, vec, vec, act],
        input_output_aliases={4: 0}, **common,
    )(z_pad, mask, scale, shift, residual)


def _fold_bn(stats, count, gamma, beta):
    # Fold batch mean/var + gamma/beta into one (scale, shift) per channel.
    s = jnp.sum(stats[:, 0, :], axis=0)
    sq = jnp.sum(stats[:, 1, :], axis=0)
    mean = s / count
    var = jnp.maximum(sq / count - mean * mean, 0.0)       # biased (training)
    scale = gamma * jax.lax.rsqrt(var + EPS)
    shift = beta - mean * scale
    return scale.reshape(1, -1), shift.reshape(1, -1)


# --------------------------------- forward ----------------------------------- #

def resnet_forward(x_nchw, params):
    """x_nchw: (N, 3, H, W) f32.  params: ((w0,b0,g0,be0), blocks)."""
    (w0, b0, g0, be0), blocks = params
    n, c0, hh, ww = x_nchw.shape
    ch = w0.shape[-1]                                      # hidden size
    ci0 = _round_up(c0, LANE)
    cp = _round_up(ch, LANE)
    wp = _round_up(ww + 2, 8)                              # aligned padded width
    hp = hh + 2
    count = float(n * hh * ww)

    def prep_w(wt, cip, cop):                  # (3,3,ci,co) -> (9*cip, cop) bf16
        kh, kw, ci, co = wt.shape
        wpad = jnp.pad(wt, ((0, 0), (0, 0), (0, cip - ci), (0, cop - co)))
        return wpad.reshape(kh * kw * cip, cop).astype(jnp.bfloat16)

    def prep_v(v, cpad):                       # (c,) -> (cpad,) f32
        return jnp.pad(v, (0, cpad - v.shape[0])).astype(jnp.float32)

    # Interior mask over the flattened padded (Hp, Wp) grid, shared by all
    # kernels (1.0 on rows 1..H / cols 1..W, else 0.0).
    rows = (jnp.arange(hp) >= 1) & (jnp.arange(hp) <= hh)
    cols = (jnp.arange(wp) >= 1) & (jnp.arange(wp) <= ww)
    mask = (rows[:, None] & cols[None, :]).reshape(hp * wp, 1).astype(jnp.float32)

    # One-time layout change: NCHW f32 -> persistent padded NHWC bf16.
    x = jnp.transpose(x_nchw, (0, 2, 3, 1)).astype(jnp.float32)
    x = jnp.pad(x, ((0, 0), (1, 1), (1, wp - 1 - ww), (0, ci0 - c0)))
    x = x.astype(jnp.bfloat16)

    # startBlock: conv -> BN -> ReLU (conv bias cancelled by training-mode BN).
    z0, st0 = _conv_pass(x, prep_w(w0, ci0, cp), mask)
    sc0, sh0 = _fold_bn(st0, count, prep_v(g0, cp), prep_v(be0, cp))
    h = _bn_act_pass(z0, mask, sc0, sh0)

    for (w1, b1, g1, be1, w2, b2, g2, be2) in blocks:
        z1, st1 = _conv_pass(h, prep_w(w1, cp, cp), mask)
        sc1, sh1 = _fold_bn(st1, count, prep_v(g1, cp), prep_v(be1, cp))
        # conv2 with BN1+ReLU fused into its input load (h1 never hits HBM).
        z2, st2 = _conv_pass(z1, prep_w(w2, cp, cp), mask,
                             in_scale=sc1, in_shift=sh1)
        sc2, sh2 = _fold_bn(st2, count, prep_v(g2, cp), prep_v(be2, cp))
        h = _bn_act_pass(z2, mask, sc2, sh2, residual=h)

    out = h[:, 1:hh + 1, 1:ww + 1, :ch].astype(jnp.float32)   # drop padding
    return jnp.transpose(out, (0, 3, 1, 2))                   # back to NCHW


# ------------------------ pure-JAX reference (check) ------------------------ #

def reference_forward(x, params):
    (w0, b0, g0, be0), blocks = params

    def conv(h, w, b):
        y = jax.lax.conv_general_dilated(
            h, w, window_strides=(1, 1), padding=((1, 1), (1, 1)),
            dimension_numbers=("NCHW", "HWIO", "NCHW"))
        return y + b.reshape(1, -1, 1, 1)

    def bn(y, g, be):
        mean = jnp.mean(y, axis=(0, 2, 3), keepdims=True)
        var = jnp.mean(jnp.square(y - mean), axis=(0, 2, 3), keepdims=True)
        return ((y - mean) * jax.lax.rsqrt(var + EPS) * g.reshape(1, -1, 1, 1)
                + be.reshape(1, -1, 1, 1))

    h = jax.nn.relu(bn(conv(x, w0, b0), g0, be0))
    for (w1, b1, g1, be1, w2, b2, g2, be2) in blocks:
        r = h
        h = jax.nn.relu(bn(conv(h, w1, b1), g1, be1))
        h = jax.nn.relu(bn(conv(h, w2, b2), g2, be2) + r)
    return h


# ----------------------------------- main ------------------------------------ #

if __name__ == "__main__":
    N, C_IN, H, W = 2, 3, 16, 16
    HIDDEN = 8
    LAYERS = 2

    key = jax.random.PRNGKey(0)
    kx, kstart, *kblocks = jax.random.split(key, 2 + LAYERS)

    def make_conv_bn(k, cin, cout):
        k1, k2, k3, k4 = jax.random.split(k, 4)
        w = jax.random.normal(k1, (3, 3, cin, cout), jnp.float32) / jnp.sqrt(9.0 * cin)
        b = 0.1 * jax.random.normal(k2, (cout,), jnp.float32)
        g = 1.0 + 0.1 * jax.random.normal(k3, (cout,), jnp.float32)
        be = 0.1 * jax.random.normal(k4, (cout,), jnp.float32)
        return w, b, g, be

    x = jax.random.normal(kx, (N, C_IN, H, W), jnp.float32)
    start = make_conv_bn(kstart, C_IN, HIDDEN)
    blocks = []
    for kb in kblocks:
        ka, kc = jax.random.split(kb)
        blocks.append(make_conv_bn(ka, HIDDEN, HIDDEN)
                      + make_conv_bn(kc, HIDDEN, HIDDEN))
    params = (start, tuple(blocks))

    out = jax.jit(resnet_forward)(x, params)
    out = jax.block_until_ready(out)

    ref = reference_forward(x, params)
    assert out.shape == ref.shape == (N, HIDDEN, H, W)
    # bf16 MXU inputs + bf16 z storage across 5 conv+BN layers.
    err = float(jnp.max(jnp.abs(out - ref) / (1.0 + jnp.abs(ref))))
    assert err < 0.1, f"normalized max error too large: {err}"
    print("KERNEL_OK")
</pallas_src>

<mosaic_0001>
module attributes {stable_mosaic.version = 11 : i64} {
  func.func @_conv_kernel(%arg0: i32, %arg1: memref<1x18x24x128xbf16, #tpu.memory_space<vmem>>, %arg2: memref<1152x128xbf16, #tpu.memory_space<vmem>>, %arg3: memref<432x1xf32, #tpu.memory_space<vmem>>, %arg4: memref<1x18x24x128xbf16, #tpu.memory_space<vmem>>, %arg5: memref<1x2x128xf32, #tpu.memory_space<vmem>>) attributes {dimension_semantics = [#tpu.dimension_semantics<parallel>], iteration_bounds = array<i64: 2>, scalar_prefetch = 0 : i64, scratch_operands = 0 : i64, tpu.core_type = #tpu.core_type<tc>, window_params = [{transform_indices = @transform_0, window_bounds = array<i64: 1, 18, 24, 128>}, {pipeline_mode = #tpu.pipeline_mode<synchronous>, transform_indices = @transform_1, window_bounds = array<i64: 1152, 128>}, {pipeline_mode = #tpu.pipeline_mode<synchronous>, transform_indices = @transform_2, window_bounds = array<i64: 432, 1>}, {transform_indices = @transform_3, window_bounds = array<i64: 1, 18, 24, 128>}, {transform_indices = @transform_4, window_bounds = array<i64: 1, 2, 128>}]} {
    %c24 = arith.constant 24 : index
    %c0 = arith.constant 0 : index
    %0 = vector.load %arg3[%c24, %c0] : memref<432x1xf32, #tpu.memory_space<vmem>>, vector<384x1xf32>
    %cst = arith.constant 0.000000e+00 : f32
    %1 = vector.broadcast %cst : f32 to vector<384x1xf32>
    %2 = arith.cmpf one, %0, %1 : vector<384x1xf32>
    %c0_0 = arith.constant 0 : index
    %c0_1 = arith.constant 0 : index
    %c0_2 = arith.constant 0 : index
    %c0_3 = arith.constant 0 : index
    %3 = vector.load %arg1[%c0_0, %c0_1, %c0_2, %c0_3] : memref<1x18x24x128xbf16, #tpu.memory_space<vmem>>, vector<1x18x24x128xbf16>
    %4 = vector.shape_cast %3 : vector<1x18x24x128xbf16> to vector<18x24x128xbf16>
    %5 = arith.extf %4 : vector<18x24x128xbf16> to vector<18x24x128xf32>
    %6 = vector.extract_strided_slice %5 {offsets = [0, 0, 0], sizes = [16, 24, 128], strides = [1, 1, 1]} : vector<18x24x128xf32> to vector<16x24x128xf32>
    %7 = vector.shape_cast %6 : vector<16x24x128xf32> to vector<384x128xf32>
    %c1_i32 = arith.constant 1 : i32
    %8 = tpu.dynamic_rotate %7 by %c1_i32 dim 0 : vector<384x128xf32>, i32 -> vector<384x128xf32>
    %9 = arith.truncf %8 : vector<384x128xf32> to vector<384x128xbf16>
    %10 = arith.truncf %7 : vector<384x128xf32> to vector<384x128xbf16>
    %c383_i32 = arith.constant 383 : i32
    %11 = tpu.dynamic_rotate %7 by %c383_i32 dim 0 : vector<384x128xf32>, i32 -> vector<384x128xf32>
    %12 = arith.truncf %11 : vector<384x128xf32> to vector<384x128xbf16>
    %13 = vector.extract_strided_slice %5 {offsets = [1, 0, 0], sizes = [16, 24, 128], strides = [1, 1, 1]} : vector<18x24x128xf32> to vector<16x24x128xf32>
    %14 = vector.shape_cast %13 : vector<16x24x128xf32> to vector<384x128xf32>
    %c1_i32_4 = arith.constant 1 : i32
    %15 = tpu.dynamic_rotate %14 by %c1_i32_4 dim 0 : vector<384x128xf32>, i32 -> vector<384x128xf32>
    %16 = arith.truncf %15 : vector<384x128xf32> to vector<384x128xbf16>
    %17 = arith.truncf %14 : vector<384x128xf32> to vector<384x128xbf16>
    %c383_i32_5 = arith.constant 383 : i32
    %18 = tpu.dynamic_rotate %14 by %c383_i32_5 dim 0 : vector<384x128xf32>, i32 -> vector<384x128xf32>
    %19 = arith.truncf %18 : vector<384x128xf32> to vector<384x128xbf16>
    %20 = vector.extract_strided_slice %5 {offsets = [2, 0, 0], sizes = [16, 24, 128], strides = [1, 1, 1]} : vector<18x24x128xf32> to vector<16x24x128xf32>
    %21 = vector.shape_cast %20 : vector<16x24x128xf32> to vector<384x128xf32>
    %c1_i32_6 = arith.constant 1 : i32
    %22 = tpu.dynamic_rotate %21 by %c1_i32_6 dim 0 : vector<384x128xf32>, i32 -> vector<384x128xf32>
    %23 = arith.truncf %22 : vector<384x128xf32> to vector<384x128xbf16>
    %24 = arith.truncf %21 : vector<384x128xf32> to vector<384x128xbf16>
    %c383_i32_7 = arith.constant 383 : i32
    %25 = tpu.dynamic_rotate %21 by %c383_i32_7 dim 0 : vector<384x128xf32>, i32 -> vector<384x128xf32>
    %26 = arith.truncf %25 : vector<384x128xf32> to vector<384x128xbf16>
    %27 = tpu.concatenate %9, %10, %12, %16, %17, %19, %23, %24, %26 in 1 : vector<384x128xbf16>, vector<384x128xbf16>, vector<384x128xbf16>, vector<384x128xbf16>, vector<384x128xbf16>, vector<384x128xbf16>, vector<384x128xbf16>, vector<384x128xbf16>, vector<384x128xbf16> -> vector<384x1152xbf16>
    %c0_8 = arith.constant 0 : index
    %c0_9 = arith.constant 0 : index
    %28 = vector.load %arg2[%c0_8, %c0_9] : memref<1152x128xbf16, #tpu.memory_space<vmem>>, vector<1152x128xbf16>
    %cst_10 = arith.constant dense<0.000000e+00> : vector<384x128xf32>
    %29 = tpu.matmul %27, %28, %cst_10 {dimension_numbers = #tpu.dot_dimension_numbers<[1], [0], [0], [1], [0, 0, 1, 1], [], []>} : vector<384x1152xbf16>, vector<1152x128xbf16>, vector<384x128xf32> -> vector<384x128xf32>
    %cst_11 = arith.constant 0.000000e+00 : f32
    %30 = vector.shape_cast %2 : vector<384x1xi1> to vector<384x1xi1>
    %31 = vector.broadcast %30 : vector<384x1xi1> to vector<384x128xi1>
    %32 = vector.broadcast %cst_11 : f32 to vector<384x128xf32>
    %33 = arith.select %31, %29, %32 : vector<384x128xi1>, vector<384x128xf32>
    %cst_12 = arith.constant dense<0.000000e+00> : vector<128xf32>
    %34 = vector.multi_reduction <add>, %33, %cst_12 [0] : vector<384x128xf32> to vector<128xf32>
    %35 = vector.shape_cast %34 : vector<128xf32> to vector<1x128xf32>
    %36 = arith.mulf %33, %33 : vector<384x128xf32>
    %cst_13 = arith.constant dense<0.000000e+00> : vector<128xf32>
    %37 = vector.multi_reduction <add>, %36, %cst_13 [0] : vector<384x128xf32> to vector<128xf32>
    %38 = vector.shape_cast %37 : vector<128xf32> to vector<1x128xf32>
    %39 = tpu.concatenate %35, %38 in 0 : vector<1x128xf32>, vector<1x128xf32> -> vector<2x128xf32>
    %c0_14 = arith.constant 0 : index
    %c0_15 = arith.constant 0 : index
    %c0_16 = arith.constant 0 : index
    %40 = vector.load %arg5[%c0_14, %c0_15, %c0_16] : memref<1x2x128xf32, #tpu.memory_space<vmem>>, vector<1x2x128xf32>
    %41 = vector.shape_cast %40 : vector<1x2x128xf32> to vector<2x128xf32>
    %42 = vector.shape_cast %39 : vector<2x128xf32> to vector<1x2x128xf32>
    tpu.vector_store %arg5[%c0_14, %c0_15, %c0_16], %42 {strides = array<i32>} : memref<1x2x128xf32, #tpu.memory_space<vmem>>, vector<1x2x128xf32>,
    %cst_17 = arith.constant 0.000000e+00 : bf16
    %43 = vector.broadcast %cst_17 : bf16 to vector<1x24x128xbf16>
    %44 = arith.truncf %33 : vector<384x128xf32> to vector<384x128xbf16>
    %45 = vector.shape_cast %44 : vector<384x128xbf16> to vector<16x24x128xbf16>
    %46 = tpu.concatenate %43, %45, %43 in 0 : vector<1x24x128xbf16>, vector<16x24x128xbf16>, vector<1x24x128xbf16> -> vector<18x24x128xbf16>
    %c0_18 = arith.constant 0 : index
    %c0_19 = arith.constant 0 : index
    %c0_20 = arith.constant 0 : index
    %c0_21 = arith.constant 0 : index
    %47 = vector.load %arg4[%c0_18, %c0_19, %c0_20, %c0_21] : memref<1x18x24x128xbf16, #tpu.memory_space<vmem>>, vector<1x18x24x128xbf16>
    %48 = vector.shape_cast %47 : vector<1x18x24x128xbf16> to vector<18x24x128xbf16>
    %49 = vector.shape_cast %46 : vector<18x24x128xbf16> to vector<1x18x24x128xbf16>
    tpu.vector_store %arg4[%c0_18, %c0_19, %c0_20, %c0_21], %49 {strides = array<i32>} : memref<1x18x24x128xbf16, #tpu.memory_space<vmem>>, vector<1x18x24x128xbf16>,
    return
  }
  func.func @transform_0(%arg0: i32) -> (i32, i32, i32, i32) {
    %c0_i32 = arith.constant 0 : i32
    %c0_i32_0 = arith.constant 0 : i32
    %c0_i32_1 = arith.constant 0 : i32
    %c0_i32_2 = arith.constant 0 : i32
    return %arg0, %c0_i32, %c0_i32_0, %c0_i32_1 : i32, i32, i32, i32
  }
  func.func @transform_1(%arg0: i32) -> (i32, i32) {
    %c0_i32 = arith.constant 0 : i32
    %c0_i32_0 = arith.constant 0 : i32
    %c0_i32_1 = arith.constant 0 : i32
    return %c0_i32, %c0_i32_0 : i32, i32
  }
  func.func @transform_2(%arg0: i32) -> (i32, i32) {
    %c0_i32 = arith.constant 0 : i32
    %c0_i32_0 = arith.constant 0 : i32
    %c0_i32_1 = arith.constant 0 : i32
    return %c0_i32, %c0_i32_0 : i32, i32
  }
  func.func @transform_3(%arg0: i32) -> (i32, i32, i32, i32) {
    %c0_i32 = arith.constant 0 : i32
    %c0_i32_0 = arith.constant 0 : i32
    %c0_i32_1 = arith.constant 0 : i32
    %c0_i32_2 = arith.constant 0 : i32
    return %arg0, %c0_i32, %c0_i32_0, %c0_i32_1 : i32, i32, i32, i32
  }
  func.func @transform_4(%arg0: i32) -> (i32, i32, i32) {
    %c0_i32 = arith.constant 0 : i32
    %c0_i32_0 = arith.constant 0 : i32
    %c0_i32_1 = arith.constant 0 : i32
    return %arg0, %c0_i32, %c0_i32_0 : i32, i32, i32
  }
}

module attributes {stable_mosaic.version = 11 : i64} {
  func.func @_bn_relu_kernel(%arg0: i32, %arg1: memref<1x18x24x128xbf16, #tpu.memory_space<vmem>>, %arg2: memref<432x1xf32, #tpu.memory_space<vmem>>, %arg3: memref<1x128xf32, #tpu.memory_space<vmem>>, %arg4: memref<1x128xf32, #tpu.memory_space<vmem>>, %arg5: memref<1x18x24x128xbf16, #tpu.memory_space<vmem>>) attributes {dimension_semantics = [#tpu.dimension_semantics<parallel>], iteration_bounds = array<i64: 2>, scalar_prefetch = 0 : i64, scratch_operands = 0 : i64, tpu.core_type = #tpu.core_type<tc>, window_params = [{transform_indices = @transform_0, window_bounds = array<i64: 1, 18, 24, 128>}, {pipeline_mode = #tpu.pipeline_mode<synchronous>, transform_indices = @transform_1, window_bounds = array<i64: 432, 1>}, {pipeline_mode = #tpu.pipeline_mode<synchronous>, transform_indices = @transform_2, window_bounds = array<i64: 1, 128>}, {pipeline_mode = #tpu.pipeline_mode<synchronous>, transform_indices = @transform_3, window_bounds = array<i64: 1, 128>}, {transform_indices = @transform_4, window_bounds = array<i64: 1, 18, 24, 128>}]} {
    %c0 = arith.constant 0 : index
    %c0_0 = arith.constant 0 : index
    %0 = vector.load %arg2[%c0, %c0_0] : memref<432x1xf32, #tpu.memory_space<vmem>>, vector<432x1xf32>
    %cst = arith.constant 0.000000e+00 : f32
    %1 = vector.broadcast %cst : f32 to vector<432x1xf32>
    %2 = arith.cmpf one, %0, %1 : vector<432x1xf32>
    %c0_1 = arith.constant 0 : index
    %c0_2 = arith.constant 0 : index
    %c0_3 = arith.constant 0 : index
    %c0_4 = arith.constant 0 : index
    %3 = vector.load %arg1[%c0_1, %c0_2, %c0_3, %c0_4] : memref<1x18x24x128xbf16, #tpu.memory_space<vmem>>, vector<1x18x24x128xbf16>
    %4 = vector.shape_cast %3 : vector<1x18x24x128xbf16> to vector<18x24x128xbf16>
    %5 = vector.shape_cast %4 : vector<18x24x128xbf16> to vector<432x128xbf16>
    %6 = arith.extf %5 : vector<432x128xbf16> to vector<432x128xf32>
    %c0_5 = arith.constant 0 : index
    %c0_6 = arith.constant 0 : index
    %7 = vector.load %arg3[%c0_5, %c0_6] : memref<1x128xf32, #tpu.memory_space<vmem>>, vector<1x128xf32>
    %8 = vector.broadcast %7 : vector<1x128xf32> to vector<432x128xf32>
    %9 = arith.mulf %6, %8 : vector<432x128xf32>
    %c0_7 = arith.constant 0 : index
    %c0_8 = arith.constant 0 : index
    %10 = vector.load %arg4[%c0_7, %c0_8] : memref<1x128xf32, #tpu.memory_space<vmem>>, vector<1x128xf32>
    %11 = vector.broadcast %10 : vector<1x128xf32> to vector<432x128xf32>
    %12 = arith.addf %9, %11 : vector<432x128xf32>
    %cst_9 = arith.constant 0.000000e+00 : f32
    %13 = vector.broadcast %cst_9 : f32 to vector<432x128xf32>
    %14 = arith.maximumf %12, %13 : vector<432x128xf32>
    %cst_10 = arith.constant 0.000000e+00 : f32
    %15 = vector.shape_cast %2 : vector<432x1xi1> to vector<432x1xi1>
    %16 = vector.broadcast %15 : vector<432x1xi1> to vector<432x128xi1>
    %17 = vector.broadcast %cst_10 : f32 to vector<432x128xf32>
    %18 = arith.select %16, %14, %17 : vector<432x128xi1>, vector<432x128xf32>
    %19 = arith.truncf %18 : vector<432x128xf32> to vector<432x128xbf16>
    %20 = vector.shape_cast %19 : vector<432x128xbf16> to vector<18x24x128xbf16>
    %c0_11 = arith.constant 0 : index
    %c0_12 = arith.constant 0 : index
    %c0_13 = arith.constant 0 : index
    %c0_14 = arith.constant 0 : index
    %21 = vector.load %arg5[%c0_11, %c0_12, %c0_13, %c0_14] : memref<1x18x24x128xbf16, #tpu.memory_space<vmem>>, vector<1x18x24x128xbf16>
    %22 = vector.shape_cast %21 : vector<1x18x24x128xbf16> to vector<18x24x128xbf16>
    %23 = vector.shape_cast %20 : vector<18x24x128xbf16> to vector<1x18x24x128xbf16>
    tpu.vector_store %arg5[%c0_11, %c0_12, %c0_13, %c0_14], %23 {strides = array<i32>} : memref<1x18x24x128xbf16, #tpu.memory_space<vmem>>, vector<1x18x24x128xbf16>,
    return
  }
  func.func @transform_0(%arg0: i32) -> (i32, i32, i32, i32) {
    %c0_i32 = arith.constant 0 : i32
    %c0_i32_0 = arith.constant 0 : i32
    %c0_i32_1 = arith.constant 0 : i32
    %c0_i32_2 = arith.constant 0 : i32
    return %arg0, %c0_i32, %c0_i32_0, %c0_i32_1 : i32, i32, i32, i32
  }
  func.func @transform_1(%arg0: i32) -> (i32, i32) {
    %c0_i32 = arith.constant 0 : i32
    %c0_i32_0 = arith.constant 0 : i32
    %c0_i32_1 = arith.constant 0 : i32
    return %c0_i32, %c0_i32_0 : i32, i32
  }
  func.func @transform_2(%arg0: i32) -> (i32, i32) {
    %c0_i32 = arith.constant 0 : i32
    %c0_i32_0 = arith.constant 0 : i32
    %c0_i32_1 = arith.constant 0 : i32
    return %c0_i32, %c0_i32_0 : i32, i32
  }
  func.func @transform_3(%arg0: i32) -> (i32, i32) {
    %c0_i32 = arith.constant 0 : i32
    %c0_i32_0 = arith.constant 0 : i32
    %c0_i32_1 = arith.constant 0 : i32
    return %c0_i32, %c0_i32_0 : i32, i32
  }
  func.func @transform_4(%arg0: i32) -> (i32, i32, i32, i32) {
    %c0_i32 = arith.constant 0 : i32
    %c0_i32_0 = arith.constant 0 : i32
    %c0_i32_1 = arith.constant 0 : i32
    %c0_i32_2 = arith.constant 0 : i32
    return %arg0, %c0_i32, %c0_i32_0, %c0_i32_1 : i32, i32, i32, i32
  }
}

module attributes {stable_mosaic.version = 11 : i64} {
  func.func @_bn_relu_conv_kernel(%arg0: i32, %arg1: memref<1x18x24x128xbf16, #tpu.memory_space<vmem>>, %arg2: memref<1152x128xbf16, #tpu.memory_space<vmem>>, %arg3: memref<432x1xf32, #tpu.memory_space<vmem>>, %arg4: memref<1x128xf32, #tpu.memory_space<vmem>>, %arg5: memref<1x128xf32, #tpu.memory_space<vmem>>, %arg6: memref<1x18x24x128xbf16, #tpu.memory_space<vmem>>, %arg7: memref<1x2x128xf32, #tpu.memory_space<vmem>>) attributes {dimension_semantics = [#tpu.dimension_semantics<parallel>], iteration_bounds = array<i64: 2>, scalar_prefetch = 0 : i64, scratch_operands = 0 : i64, tpu.core_type = #tpu.core_type<tc>, window_params = [{transform_indices = @transform_0, window_bounds = array<i64: 1, 18, 24, 128>}, {pipeline_mode = #tpu.pipeline_mode<synchronous>, transform_indices = @transform_1, window_bounds = array<i64: 1152, 128>}, {pipeline_mode = #tpu.pipeline_mode<synchronous>, transform_indices = @transform_2, window_bounds = array<i64: 432, 1>}, {pipeline_mode = #tpu.pipeline_mode<synchronous>, transform_indices = @transform_3, window_bounds = array<i64: 1, 128>}, {pipeline_mode = #tpu.pipeline_mode<synchronous>, transform_indices = @transform_4, window_bounds = array<i64: 1, 128>}, {transform_indices = @transform_5, window_bounds = array<i64: 1, 18, 24, 128>}, {transform_indices = @transform_6, window_bounds = array<i64: 1, 2, 128>}]} {
    %c0 = arith.constant 0 : index
    %c0_0 = arith.constant 0 : index
    %0 = vector.load %arg3[%c0, %c0_0] : memref<432x1xf32, #tpu.memory_space<vmem>>, vector<432x1xf32>
    %cst = arith.constant 0.000000e+00 : f32
    %1 = vector.broadcast %cst : f32 to vector<432x1xf32>
    %2 = arith.cmpf one, %0, %1 : vector<432x1xf32>
    %c24 = arith.constant 24 : index
    %c0_1 = arith.constant 0 : index
    %3 = vector.load %arg3[%c24, %c0_1] : memref<432x1xf32, #tpu.memory_space<vmem>>, vector<384x1xf32>
    %cst_2 = arith.constant 0.000000e+00 : f32
    %4 = vector.broadcast %cst_2 : f32 to vector<384x1xf32>
    %5 = arith.cmpf one, %3, %4 : vector<384x1xf32>
    %c0_3 = arith.constant 0 : index
    %c0_4 = arith.constant 0 : index
    %c0_5 = arith.constant 0 : index
    %c0_6 = arith.constant 0 : index
    %6 = vector.load %arg1[%c0_3, %c0_4, %c0_5, %c0_6] : memref<1x18x24x128xbf16, #tpu.memory_space<vmem>>, vector<1x18x24x128xbf16>
    %7 = vector.shape_cast %6 : vector<1x18x24x128xbf16> to vector<18x24x128xbf16>
    %8 = vector.shape_cast %7 : vector<18x24x128xbf16> to vector<432x128xbf16>
    %9 = arith.extf %8 : vector<432x128xbf16> to vector<432x128xf32>
    %c0_7 = arith.constant 0 : index
    %c0_8 = arith.constant 0 : index
    %10 = vector.load %arg4[%c0_7, %c0_8] : memref<1x128xf32, #tpu.memory_space<vmem>>, vector<1x128xf32>
    %11 = vector.broadcast %10 : vector<1x128xf32> to vector<432x128xf32>
    %12 = arith.mulf %9, %11 : vector<432x128xf32>
    %c0_9 = arith.constant 0 : index
    %c0_10 = arith.constant 0 : index
    %13 = vector.load %arg5[%c0_9, %c0_10] : memref<1x128xf32, #tpu.memory_space<vmem>>, vector<1x128xf32>
    %14 = vector.broadcast %13 : vector<1x128xf32> to vector<432x128xf32>
    %15 = arith.addf %12, %14 : vector<432x128xf32>
    %cst_11 = arith.constant 0.000000e+00 : f32
    %16 = vector.broadcast %cst_11 : f32 to vector<432x128xf32>
    %17 = arith.maximumf %15, %16 : vector<432x128xf32>
    %cst_12 = arith.constant 0.000000e+00 : f32
    %18 = vector.shape_cast %2 : vector<432x1xi1> to vector<432x1xi1>
    %19 = vector.broadcast %18 : vector<432x1xi1> to vector<432x128xi1>
    %20 = vector.broadcast %cst_12 : f32 to vector<432x128xf32>
    %21 = arith.select %19, %17, %20 : vector<432x128xi1>, vector<432x128xf32>
    %22 = vector.shape_cast %21 : vector<432x128xf32> to vector<18x24x128xf32>
    %23 = vector.extract_strided_slice %22 {offsets = [0, 0, 0], sizes = [16, 24, 128], strides = [1, 1, 1]} : vector<18x24x128xf32> to vector<16x24x128xf32>
    %24 = vector.shape_cast %23 : vector<16x24x128xf32> to vector<384x128xf32>
    %c1_i32 = arith.constant 1 : i32
    %25 = tpu.dynamic_rotate %24 by %c1_i32 dim 0 : vector<384x128xf32>, i32 -> vector<384x128xf32>
    %26 = arith.truncf %25 : vector<384x128xf32> to vector<384x128xbf16>
    %27 = arith.truncf %24 : vector<384x128xf32> to vector<384x128xbf16>
    %c383_i32 = arith.constant 383 : i32
    %28 = tpu.dynamic_rotate %24 by %c383_i32 dim 0 : vector<384x128xf32>, i32 -> vector<384x128xf32>
    %29 = arith.truncf %28 : vector<384x128xf32> to vector<384x128xbf16>
    %30 = vector.extract_strided_slice %22 {offsets = [1, 0, 0], sizes = [16, 24, 128], strides = [1, 1, 1]} : vector<18x24x128xf32> to vector<16x24x128xf32>
    %31 = vector.shape_cast %30 : vector<16x24x128xf32> to vector<384x128xf32>
    %c1_i32_13 = arith.constant 1 : i32
    %32 = tpu.dynamic_rotate %31 by %c1_i32_13 dim 0 : vector<384x128xf32>, i32 -> vector<384x128xf32>
    %33 = arith.truncf %32 : vector<384x128xf32> to vector<384x128xbf16>
    %34 = arith.truncf %31 : vector<384x128xf32> to vector<384x128xbf16>
    %c383_i32_14 = arith.constant 383 : i32
    %35 = tpu.dynamic_rotate %31 by %c383_i32_14 dim 0 : vector<384x128xf32>, i32 -> vector<384x128xf32>
    %36 = arith.truncf %35 : vector<384x128xf32> to vector<384x128xbf16>
    %37 = vector.extract_strided_slice %22 {offsets = [2, 0, 0], sizes = [16, 24, 128], strides = [1, 1, 1]} : vector<18x24x128xf32> to vector<16x24x128xf32>
    %38 = vector.shape_cast %37 : vector<16x24x128xf32> to vector<384x128xf32>
    %c1_i32_15 = arith.constant 1 : i32
    %39 = tpu.dynamic_rotate %38 by %c1_i32_15 dim 0 : vector<384x128xf32>, i32 -> vector<384x128xf32>
    %40 = arith.truncf %39 : vector<384x128xf32> to vector<384x128xbf16>
    %41 = arith.truncf %38 : vector<384x128xf32> to vector<384x128xbf16>
    %c383_i32_16 = arith.constant 383 : i32
    %42 = tpu.dynamic_rotate %38 by %c383_i32_16 dim 0 : vector<384x128xf32>, i32 -> vector<384x128xf32>
    %43 = arith.truncf %42 : vector<384x128xf32> to vector<384x128xbf16>
    %44 = tpu.concatenate %26, %27, %29, %33, %34, %36, %40, %41, %43 in 1 : vector<384x128xbf16>, vector<384x128xbf16>, vector<384x128xbf16>, vector<384x128xbf16>, vector<384x128xbf16>, vector<384x128xbf16>, vector<384x128xbf16>, vector<384x128xbf16>, vector<384x128xbf16> -> vector<384x1152xbf16>
    %c0_17 = arith.constant 0 : index
    %c0_18 = arith.constant 0 : index
    %45 = vector.load %arg2[%c0_17, %c0_18] : memref<1152x128xbf16, #tpu.memory_space<vmem>>, vector<1152x128xbf16>
    %cst_19 = arith.constant dense<0.000000e+00> : vector<384x128xf32>
    %46 = tpu.matmul %44, %45, %cst_19 {dimension_numbers = #tpu.dot_dimension_numbers<[1], [0], [0], [1], [0, 0, 1, 1], [], []>} : vector<384x1152xbf16>, vector<1152x128xbf16>, vector<384x128xf32> -> vector<384x128xf32>
    %cst_20 = arith.constant 0.000000e+00 : f32
    %47 = vector.shape_cast %5 : vector<384x1xi1> to vector<384x1xi1>
    %48 = vector.broadcast %47 : vector<384x1xi1> to vector<384x128xi1>
    %49 = vector.broadcast %cst_20 : f32 to vector<384x128xf32>
    %50 = arith.select %48, %46, %49 : vector<384x128xi1>, vector<384x128xf32>
    %cst_21 = arith.constant dense<0.000000e+00> : vector<128xf32>
    %51 = vector.multi_reduction <add>, %50, %cst_21 [0] : vector<384x128xf32> to vector<128xf32>
    %52 = vector.shape_cast %51 : vector<128xf32> to vector<1x128xf32>
    %53 = arith.mulf %50, %50 : vector<384x128xf32>
    %cst_22 = arith.constant dense<0.000000e+00> : vector<128xf32>
    %54 = vector.multi_reduction <add>, %53, %cst_22 [0] : vector<384x128xf32> to vector<128xf32>
    %55 = vector.shape_cast %54 : vector<128xf32> to vector<1x128xf32>
    %56 = tpu.concatenate %52, %55 in 0 : vector<1x128xf32>, vector<1x128xf32> -> vector<2x128xf32>
    %c0_23 = arith.constant 0 : index
    %c0_24 = arith.constant 0 : index
    %c0_25 = arith.constant 0 : index
    %57 = vector.load %arg7[%c0_23, %c0_24, %c0_25] : memref<1x2x128xf32, #tpu.memory_space<vmem>>, vector<1x2x128xf32>
    %58 = vector.shape_cast %57 : vector<1x2x128xf32> to vector<2x128xf32>
    %59 = vector.shape_cast %56 : vector<2x128xf32> to vector<1x2x128xf32>
    tpu.vector_store %arg7[%c0_23, %c0_24, %c0_25], %59 {strides = array<i32>} : memref<1x2x128xf32, #tpu.memory_space<vmem>>, vector<1x2x128xf32>,
    %cst_26 = arith.constant 0.000000e+00 : bf16
    %60 = vector.broadcast %cst_26 : bf16 to vector<1x24x128xbf16>
    %61 = arith.truncf %50 : vector<384x128xf32> to vector<384x128xbf16>
    %62 = vector.shape_cast %61 : vector<384x128xbf16> to vector<16x24x128xbf16>
    %63 = tpu.concatenate %60, %62, %60 in 0 : vector<1x24x128xbf16>, vector<16x24x128xbf16>, vector<1x24x128xbf16> -> vector<18x24x128xbf16>
    %c0_27 = arith.constant 0 : index
    %c0_28 = arith.constant 0 : index
    %c0_29 = arith.constant 0 : index
    %c0_30 = arith.constant 0 : index
    %64 = vector.load %arg6[%c0_27, %c0_28, %c0_29, %c0_30] : memref<1x18x24x128xbf16, #tpu.memory_space<vmem>>, vector<1x18x24x128xbf16>
    %65 = vector.shape_cast %64 : vector<1x18x24x128xbf16> to vector<18x24x128xbf16>
    %66 = vector.shape_cast %63 : vector<18x24x128xbf16> to vector<1x18x24x128xbf16>
    tpu.vector_store %arg6[%c0_27, %c0_28, %c0_29, %c0_30], %66 {strides = array<i32>} : memref<1x18x24x128xbf16, #tpu.memory_space<vmem>>, vector<1x18x24x128xbf16>,
    return
  }
  func.func @transform_0(%arg0: i32) -> (i32, i32, i32, i32) {
    %c0_i32 = arith.constant 0 : i32
    %c0_i32_0 = arith.constant 0 : i32
    %c0_i32_1 = arith.constant 0 : i32
    %c0_i32_2 = arith.constant 0 : i32
    return %arg0, %c0_i32, %c0_i32_0, %c0_i32_1 : i32, i32, i32, i32
  }
  func.func @transform_1(%arg0: i32) -> (i32, i32) {
    %c0_i32 = arith.constant 0 : i32
    %c0_i32_0 = arith.constant 0 : i32
    %c0_i32_1 = arith.constant 0 : i32
    return %c0_i32, %c0_i32_0 : i32, i32
  }
  func.func @transform_2(%arg0: i32) -> (i32, i32) {
    %c0_i32 = arith.constant 0 : i32
    %c0_i32_0 = arith.constant 0 : i32
    %c0_i32_1 = arith.constant 0 : i32
    return %c0_i32, %c0_i32_0 : i32, i32
  }
  func.func @transform_3(%arg0: i32) -> (i32, i32) {
    %c0_i32 = arith.constant 0 : i32
    %c0_i32_0 = arith.constant 0 : i32
    %c0_i32_1 = arith.constant 0 : i32
    return %c0_i32, %c0_i32_0 : i32, i32
  }
  func.func @transform_4(%arg0: i32) -> (i32, i32) {
    %c0_i32 = arith.constant 0 : i32
    %c0_i32_0 = arith.constant 0 : i32
    %c0_i32_1 = arith.constant 0 : i32
    return %c0_i32, %c0_i32_0 : i32, i32
  }
  func.func @transform_5(%arg0: i32) -> (i32, i32, i32, i32) {
    %c0_i32 = arith.constant 0 : i32
    %c0_i32_0 = arith.constant 0 : i32
    %c0_i32_1 = arith.constant 0 : i32
    %c0_i32_2 = arith.constant 0 : i32
    return %arg0, %c0_i32, %c0_i32_0, %c0_i32_1 : i32, i32, i32, i32
  }
  func.func @transform_6(%arg0: i32) -> (i32, i32, i32) {
    %c0_i32 = arith.constant 0 : i32
    %c0_i32_0 = arith.constant 0 : i32
    %c0_i32_1 = arith.constant 0 : i32
    return %arg0, %c0_i32, %c0_i32_0 : i32, i32, i32
  }
}

module attributes {stable_mosaic.version = 11 : i64} {
  func.func @_bn_add_relu_kernel(%arg0: i32, %arg1: memref<1x18x24x128xbf16, #tpu.memory_space<vmem>>, %arg2: memref<432x1xf32, #tpu.memory_space<vmem>>, %arg3: memref<1x128xf32, #tpu.memory_space<vmem>>, %arg4: memref<1x128xf32, #tpu.memory_space<vmem>>, %arg5: memref<1x18x24x128xbf16, #tpu.memory_space<vmem>>, %arg6: memref<1x18x24x128xbf16, #tpu.memory_space<vmem>>) attributes {dimension_semantics = [#tpu.dimension_semantics<parallel>], iteration_bounds = array<i64: 2>, scalar_prefetch = 0 : i64, scratch_operands = 0 : i64, tpu.core_type = #tpu.core_type<tc>, window_params = [{transform_indices = @transform_0, window_bounds = array<i64: 1, 18, 24, 128>}, {pipeline_mode = #tpu.pipeline_mode<synchronous>, transform_indices = @transform_1, window_bounds = array<i64: 432, 1>}, {pipeline_mode = #tpu.pipeline_mode<synchronous>, transform_indices = @transform_2, window_bounds = array<i64: 1, 128>}, {pipeline_mode = #tpu.pipeline_mode<synchronous>, transform_indices = @transform_3, window_bounds = array<i64: 1, 128>}, {transform_indices = @transform_4, window_bounds = array<i64: 1, 18, 24, 128>}, {transform_indices = @transform_5, window_bounds = array<i64: 1, 18, 24, 128>}]} {
    %c0 = arith.constant 0 : index
    %c0_0 = arith.constant 0 : index
    %0 = vector.load %arg2[%c0, %c0_0] : memref<432x1xf32, #tpu.memory_space<vmem>>, vector<432x1xf32>
    %cst = arith.constant 0.000000e+00 : f32
    %1 = vector.broadcast %cst : f32 to vector<432x1xf32>
    %2 = arith.cmpf one, %0, %1 : vector<432x1xf32>
    %c0_1 = arith.constant 0 : index
    %c0_2 = arith.constant 0 : index
    %c0_3 = arith.constant 0 : index
    %c0_4 = arith.constant 0 : index
    %3 = vector.load %arg1[%c0_1, %c0_2, %c0_3, %c0_4] : memref<1x18x24x128xbf16, #tpu.memory_space<vmem>>, vector<1x18x24x128xbf16>
    %4 = vector.shape_cast %3 : vector<1x18x24x128xbf16> to vector<18x24x128xbf16>
    %5 = vector.shape_cast %4 : vector<18x24x128xbf16> to vector<432x128xbf16>
    %6 = arith.extf %5 : vector<432x128xbf16> to vector<432x128xf32>
    %c0_5 = arith.constant 0 : index
    %c0_6 = arith.constant 0 : index
    %c0_7 = arith.constant 0 : index
    %c0_8 = arith.constant 0 : index
    %7 = vector.load %arg5[%c0_5, %c0_6, %c0_7, %c0_8] : memref<1x18x24x128xbf16, #tpu.memory_space<vmem>>, vector<1x18x24x128xbf16>
    %8 = vector.shape_cast %7 : vector<1x18x24x128xbf16> to vector<18x24x128xbf16>
    %9 = vector.shape_cast %8 : vector<18x24x128xbf16> to vector<432x128xbf16>
    %10 = arith.extf %9 : vector<432x128xbf16> to vector<432x128xf32>
    %c0_9 = arith.constant 0 : index
    %c0_10 = arith.constant 0 : index
    %11 = vector.load %arg3[%c0_9, %c0_10] : memref<1x128xf32, #tpu.memory_space<vmem>>, vector<1x128xf32>
    %12 = vector.broadcast %11 : vector<1x128xf32> to vector<432x128xf32>
    %13 = arith.mulf %6, %12 : vector<432x128xf32>
    %c0_11 = arith.constant 0 : index
    %c0_12 = arith.constant 0 : index
    %14 = vector.load %arg4[%c0_11, %c0_12] : memref<1x128xf32, #tpu.memory_space<vmem>>, vector<1x128xf32>
    %15 = vector.broadcast %14 : vector<1x128xf32> to vector<432x128xf32>
    %16 = arith.addf %13, %15 : vector<432x128xf32>
    %17 = arith.addf %16, %10 : vector<432x128xf32>
    %cst_13 = arith.constant 0.000000e+00 : f32
    %18 = vector.broadcast %cst_13 : f32 to vector<432x128xf32>
    %19 = arith.maximumf %17, %18 : vector<432x128xf32>
    %cst_14 = arith.constant 0.000000e+00 : f32
    %20 = vector.shape_cast %2 : vector<432x1xi1> to vector<432x1xi1>
    %21 = vector.broadcast %20 : vector<432x1xi1> to vector<432x128xi1>
    %22 = vector.broadcast %cst_14 : f32 to vector<432x128xf32>
    %23 = arith.select %21, %19, %22 : vector<432x128xi1>, vector<432x128xf32>
    %24 = arith.truncf %23 : vector<432x128xf32> to vector<432x128xbf16>
    %25 = vector.shape_cast %24 : vector<432x128xbf16> to vector<18x24x128xbf16>
    %c0_15 = arith.constant 0 : index
    %c0_16 = arith.constant 0 : index
    %c0_17 = arith.constant 0 : index
    %c0_18 = arith.constant 0 : index
    %26 = vector.load %arg6[%c0_15, %c0_16, %c0_17, %c0_18] : memref<1x18x24x128xbf16, #tpu.memory_space<vmem>>, vector<1x18x24x128xbf16>
    %27 = vector.shape_cast %26 : vector<1x18x24x128xbf16> to vector<18x24x128xbf16>
    %28 = vector.shape_cast %25 : vector<18x24x128xbf16> to vector<1x18x24x128xbf16>
    tpu.vector_store %arg6[%c0_15, %c0_16, %c0_17, %c0_18], %28 {strides = array<i32>} : memref<1x18x24x128xbf16, #tpu.memory_space<vmem>>, vector<1x18x24x128xbf16>,
    return
  }
  func.func @transform_0(%arg0: i32) -> (i32, i32, i32, i32) {
    %c0_i32 = arith.constant 0 : i32
    %c0_i32_0 = arith.constant 0 : i32
    %c0_i32_1 = arith.constant 0 : i32
    %c0_i32_2 = arith.constant 0 : i32
    return %arg0, %c0_i32, %c0_i32_0, %c0_i32_1 : i32, i32, i32, i32
  }
  func.func @transform_1(%arg0: i32) -> (i32, i32) {
    %c0_i32 = arith.constant 0 : i32
    %c0_i32_0 = arith.constant 0 : i32
    %c0_i32_1 = arith.constant 0 : i32
    return %c0_i32, %c0_i32_0 : i32, i32
  }
  func.func @transform_2(%arg0: i32) -> (i32, i32) {
    %c0_i32 = arith.constant 0 : i32
    %c0_i32_0 = arith.constant 0 : i32
    %c0_i32_1 = arith.constant 0 : i32
    return %c0_i32, %c0_i32_0 : i32, i32
  }
  func.func @transform_3(%arg0: i32) -> (i32, i32) {
    %c0_i32 = arith.constant 0 : i32
    %c0_i32_0 = arith.constant 0 : i32
    %c0_i32_1 = arith.constant 0 : i32
    return %c0_i32, %c0_i32_0 : i32, i32
  }
  func.func @transform_4(%arg0: i32) -> (i32, i32, i32, i32) {
    %c0_i32 = arith.constant 0 : i32
    %c0_i32_0 = arith.constant 0 : i32
    %c0_i32_1 = arith.constant 0 : i32
    %c0_i32_2 = arith.constant 0 : i32
    return %arg0, %c0_i32, %c0_i32_0, %c0_i32_1 : i32, i32, i32, i32
  }
  func.func @transform_5(%arg0: i32) -> (i32, i32, i32, i32) {
    %c0_i32 = arith.constant 0 : i32
    %c0_i32_0 = arith.constant 0 : i32
    %c0_i32_1 = arith.constant 0 : i32
    %c0_i32_2 = arith.constant 0 : i32
    return %arg0, %c0_i32, %c0_i32_0, %c0_i32_1 : i32, i32, i32, i32
  }
}

</mosaic_0001>

<bundles_post_ra>
// kernel: resnet_forward.9
= control target key start
LH: loop header
LB: loop body
LE: loop exit
PB: predicated region body
PF: predicated region fallthrough
CT: control target
= control target key end

     0   :  { %s1699_s15 = smov 0   ;;  %s2121_s0 = inlined_call_operand.vmem [shape: bf16[2,18,24,128], index: 0, kind: input, shape index: {}]   ;;  %s2122_s1 = inlined_call_operand.vmem [shape: f32[432,1], index: 1, kind: input, shape index: {}]   ;;  %s2123_s2 = inlined_call_operand.vmem [shape: f32[1,128], index: 2, kind: input, shape index: {}]   ;;  %s2124_s3 = inlined_call_operand.vmem [shape: f32[1,128], index: 3, kind: input, shape index: {}]   ;;  %s2125_s4 = inlined_call_operand.vmem [shape: bf16[2,18,24,128], index: 4, kind: output, shape index: {}]  }
   0x1 LB: > { %s1239_s16 = sadd.s32 4294967295, %s1671_s15   ;;  %p1243_p0 = scmp.ge.s32.totalorder %s1671_s15, 1  ;;  %s1671_s15 = sphi %s1699_s15, %s14_s15  }
   0x2   : > { %p162_p1 = scmp.lt.s32.totalorder %s1671_s15, 3 }
   0x4   : > { %p163_p2 = pnand %p1243_p0, %p162_p1 }
   0x5   : > { %v200_v0 = vld [vmem:[%s2122_s1 + $0x10] sm:$0xff] (!%p163_p2)  ;;  %v198_v1 = vld [vmem:[%s2122_s1] sm:$0xff] (!%p163_p2)  ;;  %v201_v2 = vld [vmem:[%s2122_s1 + $0x18] sm:$0xff] (!%p163_p2)  ;;  %v1673_v3 = vmov (!%p163_p2), 0   ;;  %p188_p3 = scmp.lt.s32.totalorder (!%p163_p2), %s1239_s16, 1 }
   0x6   : > { %166 = sbr.rel (%p163_p2) target bundleno = 245 (0xf5), region = 36  ;;  %1664 = vset.pattern.permute.xlu1 (!%p163_p2), %v1673_v3  ;;  %1663 = vset.pattern.permute.xlu0 (!%p163_p2), %v1673_v3  ;;  %vm254_vm0 = vcmp.ne.f32.partialorder (!%p163_p2), %v200_v0, 0.0  ;;  %vm252_vm1 = vcmp.ne.f32.partialorder (!%p163_p2), %v198_v1, 0.0  ;;  %vm255_vm2 = vcmp.ne.f32.partialorder (!%p163_p2), %v201_v2, 0.0  ;;  %v199_v4 = vld [vmem:[%s2122_s1 + $0x8] sm:$0xff] (!%p163_p2)  ;;  %v202_v8 = vld [vmem:[%s2122_s1 + $0x20] sm:$0xff] (!%p163_p2) }
   0x7   : > { %v592_v5 = vsel (!%p163_p2), %vm254_vm0, 1, %v1673_v3  ;;  %v590_v6 = vsel (!%p163_p2), %vm252_vm1, 1, %v1673_v3  ;;  %vm253_vm3 = vcmp.ne.f32.partialorder (!%p163_p2), %v199_v4, 0.0  ;;  %v203_v7 = vld [vmem:[%s2122_s1 + $0x28] sm:$0xff] (!%p163_p2)  ;;  %v593_v9 = vsel (!%p163_p2), %vm255_vm2, 1, %v1673_v3  ;;  %v205_v11 = vld [vmem:[%s2122_s1 + $0x38] sm:$0xff] (!%p163_p2) }
   0x8   : > { %651 = vperm.xlu1 (!%p163_p2), %1664, %v592_v5   ;;  %645 = vperm.xlu0 (!%p163_p2), %1663, %v590_v6   ;;  %v591_v10 = vsel (!%p163_p2), %vm253_vm3, 1, %v1673_v3  ;;  %vm257_vm4 = vcmp.ne.f32.partialorder (!%p163_p2), %v203_v7, 0.0  ;;  %vm256_vm5 = vcmp.ne.f32.partialorder (!%p163_p2), %v202_v8, 0.0  ;;  %v204_v12 = vld [vmem:[%s2122_s1 + $0x30] sm:$0xff] (!%p163_p2)  ;;  %vm259_vm6 = vcmp.ne.f32.partialorder (!%p163_p2), %v205_v11, 0.0  ;;  %v207_v15 = vld [vmem:[%s2122_s1 + $0x48] sm:$0xff] (!%p163_p2) }
   0x9   : > { %v595_v13 = vsel (!%p163_p2), %vm257_vm4, 1, %v1673_v3  ;;  %v594_v14 = vsel (!%p163_p2), %vm256_vm5, 1, %v1673_v3  ;;  %vm258_vm7 = vcmp.ne.f32.partialorder (!%p163_p2), %v204_v12, 0.0  ;;  %v206_v16 = vld [vmem:[%s2122_s1 + $0x40] sm:$0xff] (!%p163_p2)  ;;  %v597_v17 = vsel (!%p163_p2), %vm259_vm6, 1, %v1673_v3  ;;  %v209_v19 = vld [vmem:[%s2122_s1 + $0x58] sm:$0xff] (!%p163_p2) }
   0xa   : > { %v596_v18 = vsel (!%p163_p2), %vm258_vm7, 1, %v1673_v3  ;;  %vm261_vm8 = vcmp.ne.f32.partialorder (!%p163_p2), %v207_v15, 0.0  ;;  %vm260_vm9 = vcmp.ne.f32.partialorder (!%p163_p2), %v206_v16, 0.0  ;;  %v208_v20 = vld [vmem:[%s2122_s1 + $0x50] sm:$0xff] (!%p163_p2)  ;;  %vm263_vm10 = vcmp.ne.f32.partialorder (!%p163_p2), %v209_v19, 0.0  ;;  %v211_v23 = vld [vmem:[%s2122_s1 + $0x68] sm:$0xff] (!%p163_p2) }
   0xb   : > { %v599_v21 = vsel (!%p163_p2), %vm261_vm8, 1, %v1673_v3  ;;  %v598_v22 = vsel (!%p163_p2), %vm260_vm9, 1, %v1673_v3  ;;  %vm262_vm11 = vcmp.ne.f32.partialorder (!%p163_p2), %v208_v20, 0.0  ;;  %v210_v24 = vld [vmem:[%s2122_s1 + $0x60] sm:$0xff] (!%p163_p2)  ;;  %v601_v25 = vsel (!%p163_p2), %vm263_vm10, 1, %v1673_v3  ;;  %v213_v27 = vld [vmem:[%s2122_s1 + $0x78] sm:$0xff] (!%p163_p2) }
   0xc   : > { %654 = vperm.xlu1 (!%p163_p2), %1664, %v593_v9   ;;  %648 = vperm.xlu0 (!%p163_p2), %1663, %v591_v10   ;;  %v600_v26 = vsel (!%p163_p2), %vm262_vm11, 1, %v1673_v3  ;;  %vm265_vm12 = vcmp.ne.f32.partialorder (!%p163_p2), %v211_v23, 0.0  ;;  %vm264_vm13 = vcmp.ne.f32.partialorder (!%p163_p2), %v210_v24, 0.0  ;;  %v212_v28 = vld [vmem:[%s2122_s1 + $0x70] sm:$0xff] (!%p163_p2)  ;;  %vm267_vm14 = vcmp.ne.f32.partialorder (!%p163_p2), %v213_v27, 0.0  ;;  %v215_v31 = vld [vmem:[%s2122_s1 + $0x88] sm:$0xff] (!%p163_p2) }
   0xd   : > { %v603_v29 = vsel %vm265_vm12, 1, %v1673_v3  ;;  %v602_v30 = vsel %vm264_vm13, 1, %v1673_v3  ;;  %vm266_vm15 = vcmp.ne.f32.partialorder %v212_v28, 0.0  ;;  %v214_v32 = vld [vmem:[%s2122_s1 + $0x80] sm:$0xff]  ;;  %v605_v33 = vsel %vm267_vm14, 1, %v1673_v3  ;;  %v217_v35 = vld [vmem:[%s2122_s1 + $0x98] sm:$0xff] }
   0xe   : > { %v604_v34 = vsel %vm266_vm15, 1, %v1673_v3  ;;  %vm269_vm0 = vcmp.ne.f32.partialorder %v215_v31, 0.0  ;;  %vm268_vm1 = vcmp.ne.f32.partialorder %v214_v32, 0.0  ;;  %v216_v36 = vld [vmem:[%s2122_s1 + $0x90] sm:$0xff]  ;;  %vm271_vm2 = vcmp.ne.f32.partialorder %v217_v35, 0.0  ;;  %v219_v39 = vld [vmem:[%s2122_s1 + $0xa8] sm:$0xff] }
   0xf   : > { %v607_v37 = vsel %vm269_vm0, 1, %v1673_v3  ;;  %v606_v38 = vsel %vm268_vm1, 1, %v1673_v3  ;;  %vm270_vm3 = vcmp.ne.f32.partialorder %v216_v36, 0.0  ;;  %v218_v40 = vld [vmem:[%s2122_s1 + $0xa0] sm:$0xff]  ;;  %v609_v41 = vsel %vm271_vm2, 1, %v1673_v3  ;;  %v221_v43 = vld [vmem:[%s2122_s1 + $0xb8] sm:$0xff] }
  0x10   : > { %660 = vperm.xlu1 %1664, %v595_v13   ;;  %657 = vperm.xlu0 %1663, %v594_v14   ;;  %v608_v42 = vsel %vm270_vm3, 1, %v1673_v3  ;;  %vm273_vm4 = vcmp.ne.f32.partialorder %v219_v39, 0.0  ;;  %vm272_vm5 = vcmp.ne.f32.partialorder %v218_v40, 0.0  ;;  %v220_v44 = vld [vmem:[%s2122_s1 + $0xb0] sm:$0xff]  ;;  %vm275_vm6 = vcmp.ne.f32.partialorder %v221_v43, 0.0  ;;  %v223_v47 = vld [vmem:[%s2122_s1 + $0xc8] sm:$0xff] }
  0x11   : > { %v611_v45 = vsel %vm273_vm4, 1, %v1673_v3  ;;  %v610_v46 = vsel %vm272_vm5, 1, %v1673_v3  ;;  %vm274_vm7 = vcmp.ne.f32.partialorder %v220_v44, 0.0  ;;  %v222_v48 = vld [vmem:[%s2122_s1 + $0xc0] sm:$0xff]  ;;  %v613_v49 = vsel %vm275_vm6, 1, %v1673_v3  ;;  %v225_v51 = vld [vmem:[%s2122_s1 + $0xd8] sm:$0xff] }
  0x12   : > { %v612_v50 = vsel %vm274_vm7, 1, %v1673_v3  ;;  %vm277_vm8 = vcmp.ne.f32.partialorder %v223_v47, 0.0  ;;  %vm276_vm9 = vcmp.ne.f32.partialorder %v222_v48, 0.0  ;;  %v224_v52 = vld [vmem:[%s2122_s1 + $0xd0] sm:$0xff]  ;;  %vm279_vm10 = vcmp.ne.f32.partialorder %v225_v51, 0.0  ;;  %v227_v55 = vld [vmem:[%s2122_s1 + $0xe8] sm:$0xff] }
  0x13   : > { %v615_v53 = vsel %vm277_vm8, 1, %v1673_v3  ;;  %v614_v54 = vsel %vm276_vm9, 1, %v1673_v3  ;;  %vm278_vm11 = vcmp.ne.f32.partialorder %v224_v52, 0.0  ;;  %v226_v56 = vld [vmem:[%s2122_s1 + $0xe0] sm:$0xff]  ;;  %v617_v57 = vsel %vm279_vm10, 1, %v1673_v3  ;;  %v229_v59 = vld [vmem:[%s2122_s1 + $0xf8] sm:$0xff] }
  0x14   : > { %666 = vperm.xlu1 %1664, %v597_v17   ;;  %663 = vperm.xlu0 %1663, %v596_v18   ;;  %v616_v58 = vsel %vm278_vm11, 1, %v1673_v3  ;;  %vm281_vm12 = vcmp.ne.f32.partialorder %v227_v55, 0.0  ;;  %vm280_vm13 = vcmp.ne.f32.partialorder %v226_v56, 0.0  ;;  %v228_v60 = vld [vmem:[%s2122_s1 + $0xf0] sm:$0xff]  ;;  %vm283_vm14 = vcmp.ne.f32.partialorder %v229_v59, 0.0  ;;  %v231_v63 = vld [vmem:[%s2122_s1 + $0x108] sm:$0xff] }
  0x15   : > { %v619_v61 = vsel %vm281_vm12, 1, %v1673_v3  ;;  %v618_v62 = vsel %vm280_vm13, 1, %v1673_v3  ;;  %vm282_vm15 = vcmp.ne.f32.partialorder %v228_v60, 0.0  ;;  %v230_v0 = vld [vmem:[%s2122_s1 + $0x100] sm:$0xff]  ;;  %v621_v1 = vsel %vm283_vm14, 1, %v1673_v3  ;;  %v233_v4 = vld [vmem:[%s2122_s1 + $0x118] sm:$0xff] }
  0x16   : > { %v620_v2 = vsel %vm282_vm15, 1, %v1673_v3  ;;  %vm285_vm0 = vcmp.ne.f32.partialorder %v231_v63, 0.0  ;;  %vm284_vm1 = vcmp.ne.f32.partialorder %v230_v0, 0.0  ;;  %v232_v5 = vld [vmem:[%s2122_s1 + $0x110] sm:$0xff]  ;;  %vm287_vm2 = vcmp.ne.f32.partialorder %v233_v4, 0.0  ;;  %v235_v8 = vld [vmem:[%s2122_s1 + $0x128] sm:$0xff] }
  0x17   : > { %v623_v6 = vsel %vm285_vm0, 1, %v1673_v3  ;;  %v622_v7 = vsel %vm284_vm1, 1, %v1673_v3  ;;  %vm286_vm3 = vcmp.ne.f32.partialorder %v232_v5, 0.0  ;;  %v234_v9 = vld [vmem:[%s2122_s1 + $0x120] sm:$0xff]  ;;  %v625_v10 = vsel %vm287_vm2, 1, %v1673_v3  ;;  %v237_v12 = vld [vmem:[%s2122_s1 + $0x138] sm:$0xff] }
  0x18   : > { %672 = vperm.xlu1 %1664, %v599_v21   ;;  %669 = vperm.xlu0 %1663, %v598_v22   ;;  %v624_v11 = vsel %vm286_vm3, 1, %v1673_v3  ;;  %vm289_vm4 = vcmp.ne.f32.partialorder %v235_v8, 0.0  ;;  %vm288_vm5 = vcmp.ne.f32.partialorder %v234_v9, 0.0  ;;  %v236_v13 = vld [vmem:[%s2122_s1 + $0x130] sm:$0xff]  ;;  %vm291_vm6 = vcmp.ne.f32.partialorder %v237_v12, 0.0  ;;  %v239_v16 = vld [vmem:[%s2122_s1 + $0x148] sm:$0xff] }
  0x19   : > { %v627_v14 = vsel %vm289_vm4, 1, %v1673_v3  ;;  %v626_v15 = vsel %vm288_vm5, 1, %v1673_v3  ;;  %vm290_vm7 = vcmp.ne.f32.partialorder %v236_v13, 0.0  ;;  %v238_v17 = vld [vmem:[%s2122_s1 + $0x140] sm:$0xff]  ;;  %v629_v18 = vsel %vm291_vm6, 1, %v1673_v3  ;;  %v241_v20 = vld [vmem:[%s2122_s1 + $0x158] sm:$0xff] }
  0x1a   : > { %v628_v19 = vsel %vm290_vm7, 1, %v1673_v3  ;;  %vm293_vm8 = vcmp.ne.f32.partialorder %v239_v16, 0.0  ;;  %vm292_vm9 = vcmp.ne.f32.partialorder %v238_v17, 0.0  ;;  %v240_v21 = vld [vmem:[%s2122_s1 + $0x150] sm:$0xff]  ;;  %vm295_vm10 = vcmp.ne.f32.partialorder %v241_v20, 0.0  ;;  %v243_v24 = vld [vmem:[%s2122_s1 + $0x168] sm:$0xff] }
  0x1b   : > { %v631_v22 = vsel %vm293_vm8, 1, %v1673_v3  ;;  %v630_v23 = vsel %vm292_vm9, 1, %v1673_v3  ;;  %vm294_vm11 = vcmp.ne.f32.partialorder %v240_v21, 0.0  ;;  %vm297_vm12 = vcmp.ne.f32.partialorder %v243_v24, 0.0  ;;  %v245_v28 = vld [vmem:[%s2122_s1 + $0x178] sm:$0xff]  ;;  %v247_v32 = vld [vmem:[%s2122_s1 + $0x188] sm:$0xff] }
  0x1c   : > { %678 = vperm.xlu1 %1664, %v601_v25   ;;  %675 = vperm.xlu0 %1663, %v600_v26   ;;  %v242_v25 = vld [vmem:[%s2122_s1 + $0x160] sm:$0xff]  ;;  %v633_v26 = vsel %vm295_vm10, 1, %v1673_v3  ;;  %v632_v27 = vsel %vm294_vm11, 1, %v1673_v3  ;;  %vm299_vm14 = vcmp.ne.f32.partialorder %v245_v28, 0.0  ;;  %vm301_vm0 = vcmp.ne.f32.partialorder %v247_v32, 0.0  ;;  %v249_v36 = vld [vmem:[%s2122_s1 + $0x198] sm:$0xff] }
  0x1d   : > { %vm296_vm13 = vcmp.ne.f32.partialorder %v242_v25, 0.0  ;;  %vm303_vm2 = vcmp.ne.f32.partialorder %v249_v36, 0.0  ;;  %v251_v40 = vld [vmem:[%s2122_s1 + $0x1a8] sm:$0xff]  ;;  %s2127_s16 = smov (!%p188_p3, %s1239_s16), 1  ;;  %v1945_v52 = vld [vmem:[%s2123_s2] ss:$0 sm:$0xff] }
  0x1e   : > { %v634_v31 = vsel %vm296_vm13, 1, %v1673_v3  ;;  %vm305_vm4 = vcmp.ne.f32.partialorder %v251_v40, 0.0  ;;  %s1653_s29 = smul.u32 216, %s2127_s16  ;;  %v1955_v60 = vld [vmem:[%s2124_s3] ss:$0 sm:$0xff] }
  0x1f   : > { %v643_v44 = vsel %vm305_vm4, 1, %v1673_v3 }
  0x20   : > { %684 = vperm.xlu1 %1664, %v603_v29   ;;  %681 = vperm.xlu0 %1663, %v602_v30   ;;  %v244_v29 = vld [vmem:[%s2122_s1 + $0x170] sm:$0xff]  ;;  %v635_v30 = vsel %vm297_vm12, 1, %v1673_v3  ;;  %s1937_s6 = scalar_lea.vmem %s2121_s0, %s1653_s29  ;;  %s1979_s13 = scalar_lea.vmem %s2125_s4, %s1653_s29 }
  0x21   : > { %vm298_vm15 = vcmp.ne.f32.partialorder %v244_v29, 0.0  ;;  %v1602_v47 = vld [vmem:[%s1937_s6 + $0x10] sm:$0xff]   ;;  %v1603_v55 = vld [vmem:[%s1937_s6 + $0x18] sm:$0xff]  }
  0x22   : > { %v636_v35 = vsel %vm298_vm15, 1, %v1673_v3 }
  0x24   : > { %690 = vperm.xlu1 %1664, %v605_v33   ;;  %687 = vperm.xlu0 %1663, %v604_v34   ;;  %v246_v33 = vld [vmem:[%s2122_s1 + $0x180] sm:$0xff]  ;;  %v637_v34 = vsel %vm299_vm14, 1, %v1673_v3 }
  0x25   : > { %vm300_vm1 = vcmp.ne.f32.partialorder %v246_v33, 0.0 }
  0x26   : > { %v638_v39 = vsel %vm300_vm1, 1, %v1673_v3 }
  0x28   : > { %696 = vperm.xlu1 %1664, %v607_v37   ;;  %693 = vperm.xlu0 %1663, %v606_v38   ;;  %v248_v37 = vld [vmem:[%s2122_s1 + $0x190] sm:$0xff]  ;;  %v639_v38 = vsel %vm301_vm0, 1, %v1673_v3 }
  0x29   : > { %vm302_vm3 = vcmp.ne.f32.partialorder %v248_v37, 0.0 }
  0x2a   : > { %v640_v43 = vsel %vm302_vm3, 1, %v1673_v3 }
  0x2c   : > { %702 = vperm.xlu1 %1664, %v609_v41   ;;  %699 = vperm.xlu0 %1663, %v608_v42   ;;  %v250_v41 = vld [vmem:[%s2122_s1 + $0x1a0] sm:$0xff]  ;;  %v641_v42 = vsel %vm303_vm2, 1, %v1673_v3 }
  0x2d   : > { %vm304_vm5 = vcmp.ne.f32.partialorder %v250_v41, 0.0 }
  0x30   : > { %708 = vperm.xlu1 %1664, %v611_v45   ;;  %705 = vperm.xlu0 %1663, %v610_v46   ;;  %v642_v45 = vsel %vm304_vm5, 1, %v1673_v3  ;;  %v1601_v46 = vld [vmem:[%s1937_s6 + $0x8] sm:$0xff]   ;;  %v1359_v3 = vld [vmem:[%s1937_s6] sm:$0xff]  }
  0x31   : > { %v1364_v48 = vunpack.c.l.bf16 %v1601_v46  ;;  %v1361_v51 = vunpack.c.h.bf16 %v1359_v3 }
  0x33   : > { %v423_v56 = vmul.f32 %v1364_v48, %v1945_v52  ;;  %v422_v59 = vmul.f32 %v1361_v51, %v1945_v52 }
  0x34   : > { %714 = vperm.xlu1 %1664, %v613_v49   ;;  %711 = vperm.xlu0 %1663, %v612_v50   ;;  %v1360_v49 = vunpack.c.l.bf16 %v1359_v3  ;;  %v1365_v50 = vunpack.c.h.bf16 %v1601_v46 }
  0x38   : > { %720 = vperm.xlu1 %1664, %v615_v53   ;;  %717 = vperm.xlu0 %1663, %v614_v54   ;;  %v1369_v53 = vunpack.c.h.bf16 %v1602_v47  ;;  %v1368_v54 = vunpack.c.l.bf16 %v1602_v47 }
  0x3a   : > { %v426_v63 = vmul.f32 %v1369_v53, %v1945_v52  ;;  %v425_v0 = vmul.f32 %v1368_v54, %v1945_v52 }
  0x3c   : > { %726 = vperm.xlu1 %1664, %v617_v57   ;;  %723 = vperm.xlu0 %1663, %v616_v58   ;;  %v421_v57 = vmul.f32 %v1360_v49, %v1945_v52  ;;  %v424_v58 = vmul.f32 %v1365_v50, %v1945_v52  ;;  %v486_v12 = vadd.f32 %v1955_v60, %v425_v0  ;;  %v1608_v0 = vld [vmem:[%s1937_s6 + $0x40] sm:$0xff]  }
  0x3e   : > { %v482_v4 = vadd.f32 %v1955_v60, %v421_v57  ;;  %v485_v5 = vadd.f32 %v1955_v60, %v424_v58  ;;  %v540_v25 = vmax.f32 %v486_v12, 0.0 }
  0x40   : > { %732 = vperm.xlu1 %1664, %v619_v61   ;;  %729 = vperm.xlu0 %1663, %v618_v62   ;;  %v1373_v61 = vunpack.c.h.bf16 %v1603_v55  ;;  %v1372_v62 = vunpack.c.l.bf16 %v1603_v55  ;;  %v536_v17 = vmax.f32 %v482_v4, 0.0 }
  0x42   : > { %v427_v8 = vmul.f32 %v1372_v62, %v1945_v52 }
  0x44   : > { %738 = vperm.xlu1 %1664, %v621_v1   ;;  %735 = vperm.xlu0 %1663, %v620_v2   ;;  %v1604_v1 = vld [vmem:[%s1937_s6 + $0x20] sm:$0xff]   ;;  %v484_v2 = vadd.f32 %v1955_v60, %v423_v56  ;;  %v488_v21 = vadd.f32 %v1955_v60, %v427_v8 }
  0x45   : > { %v1377_v13 = vunpack.c.h.bf16 %v1604_v1 }
  0x46   : > { %v538_v16 = vmax.f32 %v484_v2, 0.0  ;;  %v542_v40 = vmax.f32 %v488_v21, 0.0 }
  0x48   : > { %744 = vperm.xlu1 %1664, %v623_v6   ;;  %741 = vperm.xlu0 %1663, %v622_v7   ;;  %v483_v6 = vadd.f32 %v1955_v60, %v422_v59  ;;  %v428_v7 = vmul.f32 %v1373_v61, %v1945_v52 }
  0x4a   : > { %v489_v20 = vadd.f32 %v1955_v60, %v428_v7 }
  0x4c   : > { %750 = vperm.xlu1 %1664, %v625_v10   ;;  %747 = vperm.xlu0 %1663, %v624_v11   ;;  %v487_v11 = vadd.f32 %v1955_v60, %v426_v63 }
  0x4e   : > { %v541_v24 = vmax.f32 %v487_v11, 0.0 }
  0x50   : > { %756 = vperm.xlu1 %1664, %v627_v14   ;;  %753 = vperm.xlu0 %1663, %v626_v15   ;;  %v1376_v14 = vunpack.c.l.bf16 %v1604_v1  ;;  %v1605_v15 = vld [vmem:[%s1937_s6 + $0x28] sm:$0xff]  }
  0x51   : > { %v1380_v29 = vunpack.c.l.bf16 %v1605_v15 }
  0x52   : > { %v429_v28 = vmul.f32 %v1376_v14, %v1945_v52  ;;  %v1392_v14 = vunpack.c.l.bf16 %v1608_v0 }
  0x53   : > { %v431_v48 = vmul.f32 %v1380_v29, %v1945_v52 }
  0x54   : > { %762 = vperm.xlu1 %1664, %v629_v18   ;;  %759 = vperm.xlu0 %1663, %v628_v19   ;;  %v539_v18 = vmax.f32 %v485_v5, 0.0  ;;  %v537_v19 = vmax.f32 %v483_v6, 0.0  ;;  %v490_v47 = vadd.f32 %v1955_v60, %v429_v28  ;;  %v437_v28 = vmul.f32 %v1392_v14, %v1945_v52 }
  0x55   : > { %v492_v63 = vadd.f32 %v1955_v60, %v431_v48 }
  0x56   : > { %v544_v62 = vmax.f32 %v490_v47, 0.0 }
  0x58   : > { %768 = vperm.xlu1 %1664, %v631_v22   ;;  %765 = vperm.xlu0 %1663, %v630_v23  }
  0x5c   : > { %774 = vperm.xlu1 %1664, %v633_v26   ;;  %771 = vperm.xlu0 %1663, %v632_v27   ;;  %v430_v26 = vmul.f32 %v1377_v13, %v1945_v52  ;;  %v1381_v27 = vunpack.c.h.bf16 %v1605_v15  ;;  %v546_v13 = vmax.f32 %v492_v63, 0.0  ;;  %v1609_v15 = vld [vmem:[%s1937_s6 + $0x48] sm:$0xff]  }
  0x5d   : > { %v1396_v29 = vunpack.c.l.bf16 %v1609_v15 }
  0x60   : > { %780 = vperm.xlu1 %1664, %v635_v30   ;;  %777 = vperm.xlu0 %1663, %v634_v31   ;;  %v1606_v30 = vld [vmem:[%s1937_s6 + $0x30] sm:$0xff]  }
  0x61   : > { %v1385_v41 = vunpack.c.h.bf16 %v1606_v30 }
  0x63   : > { %v434_v53 = vmul.f32 %v1385_v41, %v1945_v52 }
  0x64   : > { %786 = vperm.xlu1 %1664, %v637_v34   ;;  %783 = vperm.xlu0 %1663, %v636_v35  }
  0x65   : > { %v495_v5 = vadd.f32 %v1955_v60, %v434_v53 }
  0x68   : > { %792 = vperm.xlu1 %1664, %v639_v38   ;;  %789 = vperm.xlu0 %1663, %v638_v39   ;;  %v543_v39 = vmax.f32 %v489_v20, 0.0 }
  0x6c   : > { %798 = vperm.xlu1 %1664, %v641_v42   ;;  %795 = vperm.xlu0 %1663, %v640_v43   ;;  %v1384_v42 = vunpack.c.l.bf16 %v1606_v30  ;;  %v491_v43 = vadd.f32 %v1955_v60, %v430_v26 }
  0x6e   : > { %v433_v54 = vmul.f32 %v1384_v42, %v1945_v52  ;;  %v545_v57 = vmax.f32 %v491_v43, 0.0  ;;  %v498_v42 = vadd.f32 %v1955_v60, %v437_v28  ;;  %v439_v43 = vmul.f32 %v1396_v29, %v1945_v52 }
  0x70   : > { %804 = vperm.xlu1 %1664, %v643_v44   ;;  %801 = vperm.xlu0 %1663, %v642_v45   ;;  %v432_v44 = vmul.f32 %v1381_v27, %v1945_v52  ;;  %v1607_v45 = vld [vmem:[%s1937_s6 + $0x38] sm:$0xff]   ;;  %v494_v6 = vadd.f32 %v1955_v60, %v433_v54 }
  0x71   : > { %v1389_v55 = vunpack.c.h.bf16 %v1607_v45  ;;  %v1388_v56 = vunpack.c.l.bf16 %v1607_v45 }
  0x72   : > { %v493_v58 = vadd.f32 %v1955_v60, %v432_v44  ;;  %v548_v20 = vmax.f32 %v494_v6, 0.0 }
  0x73   : > { %v436_v7 = vmul.f32 %v1389_v55, %v1945_v52  ;;  %v435_v8 = vmul.f32 %v1388_v56, %v1945_v52  ;;  %v552_v55 = vmax.f32 %v498_v42, 0.0  ;;  %v500_v56 = vadd.f32 %v1955_v60, %v439_v43 }
  0x75   : > { %v497_v21 = vadd.f32 %v1955_v60, %v436_v7  ;;  %v554_v7 = vmax.f32 %v500_v56, 0.0 }
  0x87   : > { %v652_v9 = vpop.permute.xlu1 %651  ;;  %v646_v10 = vpop.permute.xlu0 %645 }
  0x88   : > { %vm808_vm6 = vcmp.eq.s32.totalorder %v652_v9, 1  ;;  %vm806_vm7 = vcmp.eq.s32.totalorder %v646_v10, 1  ;;  %v547_v9 = vmax.f32 %v493_v58, 0.0  ;;  %v1393_v10 = vunpack.c.h.bf16 %v1608_v0 }
  0x89   : > { %v862_v31 = vsel %vm808_vm6, %v538_v16, 0.0  ;;  %v860_v32 = vsel %vm806_vm7, %v536_v17, 0.0 }
  0x8b   : > { %v655_v22 = vpop.permute.xlu1 %654  ;;  %v649_v23 = vpop.permute.xlu0 %648 }
  0x8c   : > { %vm809_vm8 = vcmp.eq.s32.totalorder %v655_v22, 1  ;;  %vm807_vm9 = vcmp.eq.s32.totalorder %v649_v23, 1  ;;  %v496_v22 = vadd.f32 %v1955_v60, %v435_v8  ;;  %v438_v23 = vmul.f32 %v1393_v10, %v1945_v52 }
  0x8d   : > { %v863_v33 = vsel %vm809_vm8, %v539_v18, 0.0  ;;  %v861_v34 = vsel %vm807_vm9, %v537_v19, 0.0  ;;  %v549_v19 = vmax.f32 %v495_v5, 0.0 }
  0x8e   : > { %v1474_v35 = vpack.c.bf16 %v863_v33, %v862_v31  ;;  %v1469_v36 = vpack.c.bf16 %v861_v34, %v860_v32  ;;  %v551_v33 = vmax.f32 %v497_v21, 0.0  ;;  %v550_v34 = vmax.f32 %v496_v22, 0.0 }
  0x8f   : > { %v661_v37 = vpop.permute.xlu1 %660  ;;  %v658_v38 = vpop.permute.xlu0 %657 }
  0x90   : > { %1627 = vst [vmem:[%s1979_s13 + $0x8] sm:$0xff] %v1474_v35   ;;  %1470 = vst [vmem:[%s1979_s13] sm:$0xff] %v1469_v36   ;;  %vm811_vm10 = vcmp.eq.s32.totalorder %v661_v37, 1  ;;  %vm810_vm11 = vcmp.eq.s32.totalorder %v658_v38, 1  ;;  %v499_v37 = vadd.f32 %v1955_v60, %v438_v23 }
  0x91   : > { %v865_v46 = vsel %vm811_vm10, %v541_v24, 0.0  ;;  %v864_v3 = vsel %vm810_vm11, %v540_v25, 0.0  ;;  %v1397_v24 = vunpack.c.h.bf16 %v1609_v15  ;;  %v1610_v25 = vld [vmem:[%s1937_s6 + $0x50] sm:$0xff]  }
  0x92   : > { %v1479_v49 = vpack.c.bf16 %v865_v46, %v864_v3  ;;  %v1401_v35 = vunpack.c.h.bf16 %v1610_v25  ;;  %v1400_v36 = vunpack.c.l.bf16 %v1610_v25 }
  0x93   : > { %v667_v50 = vpop.permute.xlu1 %666  ;;  %v664_v51 = vpop.permute.xlu0 %663  ;;  %v440_v38 = vmul.f32 %v1397_v24, %v1945_v52 }
  0x94   : > { %1628 = vst [vmem:[%s1979_s13 + $0x10] sm:$0xff] %v1479_v49   ;;  %vm813_vm12 = vcmp.eq.s32.totalorder %v667_v50, 1  ;;  %vm812_vm13 = vcmp.eq.s32.totalorder %v664_v51, 1  ;;  %v442_v3 = vmul.f32 %v1401_v35, %v1945_v52  ;;  %v441_v47 = vmul.f32 %v1400_v36, %v1945_v52 }
  0x95   : > { %v867_v59 = vsel %vm813_vm12, %v543_v39, 0.0  ;;  %v866_v61 = vsel %vm812_vm13, %v542_v40, 0.0  ;;  %v1611_v39 = vld [vmem:[%s1937_s6 + $0x58] sm:$0xff]   ;;  %v553_v50 = vmax.f32 %v499_v37, 0.0  ;;  %v501_v51 = vadd.f32 %v1955_v60, %v440_v38 }
  0x96   : > { %v1484_v1 = vpack.c.bf16 %v867_v59, %v866_v61  ;;  %v1405_v48 = vunpack.c.h.bf16 %v1611_v39  ;;  %v1404_v49 = vunpack.c.l.bf16 %v1611_v39  ;;  %v502_v63 = vadd.f32 %v1955_v60, %v441_v47 }
  0x97   : > { %v673_v2 = vpop.permute.xlu1 %672  ;;  %v670_v4 = vpop.permute.xlu0 %669 }
  0x98   : > { %1629 = vst [vmem:[%s1979_s13 + $0x18] sm:$0xff] %v1484_v1   ;;  %vm815_vm14 = vcmp.eq.s32.totalorder %v673_v2, 1  ;;  %vm814_vm15 = vcmp.eq.s32.totalorder %v670_v4, 1  ;;  %v444_v0 = vmul.f32 %v1405_v48, %v1945_v52  ;;  %v443_v1 = vmul.f32 %v1404_v49, %v1945_v52 }
  0x99   : > { %v869_v11 = vsel %vm815_vm14, %v545_v57, 0.0  ;;  %v868_v12 = vsel %vm814_vm15, %v544_v62, 0.0  ;;  %v1612_v57 = vld [vmem:[%s1937_s6 + $0x60] sm:$0xff]   ;;  %v503_v62 = vadd.f32 %v1955_v60, %v442_v3  ;;  %v555_v2 = vmax.f32 %v501_v51, 0.0 }
  0x9a   : > { %v1489_v16 = vpack.c.bf16 %v869_v11, %v868_v12  ;;  %v1409_v4 = vunpack.c.h.bf16 %v1612_v57  ;;  %v1408_v8 = vunpack.c.l.bf16 %v1612_v57  ;;  %v556_v14 = vmax.f32 %v502_v63, 0.0  ;;  %v1616_v3 = vld [vmem:[%s1937_s6 + $0x80] sm:$0xff]  }
  0x9b   : > { %v679_v17 = vpop.permute.xlu1 %678  ;;  %v676_v18 = vpop.permute.xlu0 %675  ;;  %v505_v15 = vadd.f32 %v1955_v60, %v444_v0 }
  0x9c   : > { %1630 = vst [vmem:[%s1979_s13 + $0x20] sm:$0xff] %v1489_v16   ;;  %vm817_vm0 = vcmp.eq.s32.totalorder %v679_v17, 1  ;;  %vm816_vm1 = vcmp.eq.s32.totalorder %v676_v18, 1  ;;  %v504_v16 = vadd.f32 %v1955_v60, %v443_v1  ;;  %v446_v17 = vmul.f32 %v1409_v4, %v1945_v52 }
  0x9d   : > { %v871_v26 = vsel %vm817_vm0, %v547_v9, 0.0  ;;  %v870_v27 = vsel %vm816_vm1, %v546_v13, 0.0  ;;  %v1613_v9 = vld [vmem:[%s1937_s6 + $0x68] sm:$0xff]   ;;  %v557_v13 = vmax.f32 %v503_v62, 0.0  ;;  %v445_v22 = vmul.f32 %v1408_v8, %v1945_v52 }
  0x9e   : > { %v1494_v30 = vpack.c.bf16 %v871_v26, %v870_v27  ;;  %v1413_v18 = vunpack.c.h.bf16 %v1613_v9  ;;  %v1412_v23 = vunpack.c.l.bf16 %v1613_v9  ;;  %v559_v27 = vmax.f32 %v505_v15, 0.0  ;;  %v1617_v62 = vld [vmem:[%s1937_s6 + $0x88] sm:$0xff]  }
  0x9f   : > { %v685_v31 = vpop.permute.xlu1 %684  ;;  %v682_v32 = vpop.permute.xlu0 %681  ;;  %v558_v28 = vmax.f32 %v504_v16, 0.0  ;;  %v506_v36 = vadd.f32 %v1955_v60, %v445_v22 }
  0xa0   : > { %1631 = vst [vmem:[%s1979_s13 + $0x28] sm:$0xff] %v1494_v30   ;;  %vm819_vm2 = vcmp.eq.s32.totalorder %v685_v31, 1  ;;  %vm818_vm3 = vcmp.eq.s32.totalorder %v682_v32, 1  ;;  %v507_v31 = vadd.f32 %v1955_v60, %v446_v17  ;;  %v448_v32 = vmul.f32 %v1413_v18, %v1945_v52  ;;  %v1618_v17 = vld [vmem:[%s1937_s6 + $0x90] sm:$0xff]  }
  0xa1   : > { %v873_v40 = vsel %vm819_vm2, %v549_v19, 0.0  ;;  %v872_v41 = vsel %vm818_vm3, %v548_v20, 0.0  ;;  %v1614_v19 = vld [vmem:[%s1937_s6 + $0x70] sm:$0xff]   ;;  %v447_v37 = vmul.f32 %v1412_v23, %v1945_v52  ;;  %v560_v49 = vmax.f32 %v506_v36, 0.0 }
  0xa2   : > { %v1499_v44 = vpack.c.bf16 %v873_v40, %v872_v41  ;;  %v1417_v29 = vunpack.c.h.bf16 %v1614_v19  ;;  %v1416_v30 = vunpack.c.l.bf16 %v1614_v19 }
  0xa3   : > { %v691_v45 = vpop.permute.xlu1 %690  ;;  %v688_v46 = vpop.permute.xlu0 %687 }
  0xa4   : > { %1632 = vst [vmem:[%s1979_s13 + $0x30] sm:$0xff] %v1499_v44   ;;  %vm821_vm4 = vcmp.eq.s32.totalorder %v691_v45, 1  ;;  %vm820_vm5 = vcmp.eq.s32.totalorder %v688_v46, 1  ;;  %v450_v41 = vmul.f32 %v1417_v29, %v1945_v52  ;;  %v449_v42 = vmul.f32 %v1416_v30, %v1945_v52 }
  0xa5   : > { %v875_v53 = vsel %vm821_vm4, %v551_v33, 0.0  ;;  %v874_v54 = vsel %vm820_vm5, %v550_v34, 0.0  ;;  %v1615_v33 = vld [vmem:[%s1937_s6 + $0x78] sm:$0xff]   ;;  %v561_v45 = vmax.f32 %v507_v31, 0.0  ;;  %v509_v46 = vadd.f32 %v1955_v60, %v448_v32 }
  0xa6   : > { %v1504_v58 = vpack.c.bf16 %v875_v53, %v874_v54  ;;  %v1421_v43 = vunpack.c.h.bf16 %v1615_v33  ;;  %v1420_v44 = vunpack.c.l.bf16 %v1615_v33  ;;  %v1432_v31 = vunpack.c.l.bf16 %v1618_v17 }
  0xa7   : > { %v697_v59 = vpop.permute.xlu1 %696  ;;  %v694_v61 = vpop.permute.xlu0 %693 }
  0xa8   : > { %1633 = vst [vmem:[%s1979_s13 + $0x38] sm:$0xff] %v1504_v58   ;;  %vm823_vm6 = vcmp.eq.s32.totalorder %v697_v59, 1  ;;  %vm822_vm7 = vcmp.eq.s32.totalorder %v694_v61, 1  ;;  %v452_v56 = vmul.f32 %v1421_v43, %v1945_v52  ;;  %v451_v57 = vmul.f32 %v1420_v44, %v1945_v52 }
  0xa9   : > { %v877_v5 = vsel %vm823_vm6, %v553_v50, 0.0  ;;  %v876_v6 = vsel %vm822_vm7, %v552_v55, 0.0  ;;  %v508_v50 = vadd.f32 %v1955_v60, %v447_v37  ;;  %v511_v55 = vadd.f32 %v1955_v60, %v450_v41  ;;  %v1620_v41 = vld [vmem:[%s1937_s6 + $0xa0] sm:$0xff]  }
  0xaa   : > { %v1509_v10 = vpack.c.bf16 %v877_v5, %v876_v6  ;;  %v1425_v58 = vunpack.c.h.bf16 %v1616_v3  ;;  %v563_v59 = vmax.f32 %v509_v46, 0.0  ;;  %v510_v61 = vadd.f32 %v1955_v60, %v449_v42 }
  0xab   : > { %v703_v11 = vpop.permute.xlu1 %702  ;;  %v700_v12 = vpop.permute.xlu0 %699  ;;  %v562_v1 = vmax.f32 %v508_v50, 0.0  ;;  %v512_v8 = vadd.f32 %v1955_v60, %v451_v57  ;;  %v1441_v50 = vunpack.c.h.bf16 %v1620_v41 }
  0xac   : > { %1634 = vst [vmem:[%s1979_s13 + $0x40] sm:$0xff] %v1509_v10   ;;  %vm825_vm8 = vcmp.eq.s32.totalorder %v703_v11, 1  ;;  %vm824_vm9 = vcmp.eq.s32.totalorder %v700_v12, 1  ;;  %v454_v9 = vmul.f32 %v1425_v58, %v1945_v52  ;;  %v1429_v10 = vunpack.c.h.bf16 %v1617_v62 }
  0xad   : > { %v879_v20 = vsel %vm825_vm8, %v555_v2, 0.0  ;;  %v878_v21 = vsel %vm824_vm9, %v554_v7, 0.0  ;;  %v1424_v2 = vunpack.c.l.bf16 %v1616_v3  ;;  %v513_v7 = vadd.f32 %v1955_v60, %v452_v56 }
  0xae   : > { %v1514_v24 = vpack.c.bf16 %v879_v20, %v878_v21  ;;  %v565_v11 = vmax.f32 %v511_v55, 0.0  ;;  %v1428_v12 = vunpack.c.l.bf16 %v1617_v62  ;;  %v564_v15 = vmax.f32 %v510_v61, 0.0 }
  0xaf   : > { %v709_v25 = vpop.permute.xlu1 %708  ;;  %v706_v26 = vpop.permute.xlu0 %705  ;;  %v453_v16 = vmul.f32 %v1424_v2, %v1945_v52  ;;  %v567_v21 = vmax.f32 %v513_v7, 0.0  ;;  %v566_v22 = vmax.f32 %v512_v8, 0.0  ;;  %v515_v23 = vadd.f32 %v1955_v60, %v454_v9 }
  0xb0   : > { %1635 = vst [vmem:[%s1979_s13 + $0x48] sm:$0xff] %v1514_v24   ;;  %vm827_vm10 = vcmp.eq.s32.totalorder %v709_v25, 1  ;;  %vm826_vm11 = vcmp.eq.s32.totalorder %v706_v26, 1  ;;  %v456_v24 = vmul.f32 %v1429_v10, %v1945_v52  ;;  %v455_v25 = vmul.f32 %v1428_v12, %v1945_v52  ;;  %v1622_v12 = vld [vmem:[%s1937_s6 + $0xb0] sm:$0xff]  }
  0xb1   : > { %v881_v34 = vsel %vm827_vm10, %v557_v13, 0.0  ;;  %v880_v35 = vsel %vm826_vm11, %v556_v14, 0.0  ;;  %v1433_v26 = vunpack.c.h.bf16 %v1618_v17  ;;  %v514_v30 = vadd.f32 %v1955_v60, %v453_v16 }
  0xb2   : > { %v1519_v38 = vpack.c.bf16 %v881_v34, %v880_v35  ;;  %v569_v35 = vmax.f32 %v515_v23, 0.0  ;;  %v517_v36 = vadd.f32 %v1955_v60, %v456_v24  ;;  %v462_v2 = vmul.f32 %v1441_v50, %v1945_v52 }
  0xb3   : > { %v715_v39 = vpop.permute.xlu1 %714  ;;  %v712_v40 = vpop.permute.xlu0 %711  ;;  %v568_v44 = vmax.f32 %v514_v30, 0.0  ;;  %v1449_v24 = vunpack.c.h.bf16 %v1622_v12 }
  0xb4   : > { %1636 = vst [vmem:[%s1979_s13 + $0x50] sm:$0xff] %v1519_v38   ;;  %vm829_vm12 = vcmp.eq.s32.totalorder %v715_v39, 1  ;;  %vm828_vm13 = vcmp.eq.s32.totalorder %v712_v40, 1  ;;  %v516_v39 = vadd.f32 %v1955_v60, %v455_v25  ;;  %v458_v40 = vmul.f32 %v1433_v26, %v1945_v52 }
  0xb5   : > { %v883_v47 = vsel %vm829_vm12, %v559_v27, 0.0  ;;  %v882_v48 = vsel %vm828_vm13, %v558_v28, 0.0  ;;  %v1619_v27 = vld [vmem:[%s1937_s6 + $0x98] sm:$0xff]   ;;  %v523_v17 = vadd.f32 %v1955_v60, %v462_v2  ;;  %v1448_v25 = vunpack.c.l.bf16 %v1622_v12 }
  0xb6   : > { %v1524_v51 = vpack.c.bf16 %v883_v47, %v882_v48  ;;  %v1437_v37 = vunpack.c.h.bf16 %v1619_v27  ;;  %v1436_v38 = vunpack.c.l.bf16 %v1619_v27  ;;  %v519_v57 = vadd.f32 %v1955_v60, %v458_v40 }
  0xb7   : > { %v721_v53 = vpop.permute.xlu1 %720  ;;  %v718_v54 = vpop.permute.xlu0 %717 }
  0xb8   : > { %1637 = vst [vmem:[%s1979_s13 + $0x58] sm:$0xff] %v1524_v51   ;;  %vm831_vm14 = vcmp.eq.s32.totalorder %v721_v53, 1  ;;  %vm830_vm15 = vcmp.eq.s32.totalorder %v718_v54, 1  ;;  %v460_v48 = vmul.f32 %v1437_v37, %v1945_v52  ;;  %v1440_v51 = vunpack.c.l.bf16 %v1620_v41 }
  0xb9   : > { %v885_v63 = vsel %vm831_vm14, %v561_v45, 0.0  ;;  %v884_v0 = vsel %vm830_vm15, %v560_v49, 0.0  ;;  %v457_v45 = vmul.f32 %v1432_v31, %v1945_v52  ;;  %v459_v49 = vmul.f32 %v1436_v38, %v1945_v52 }
  0xba   : > { %v1529_v4 = vpack.c.bf16 %v885_v63, %v884_v0  ;;  %v571_v53 = vmax.f32 %v517_v36, 0.0  ;;  %v570_v54 = vmax.f32 %v516_v39, 0.0  ;;  %v521_v0 = vadd.f32 %v1955_v60, %v460_v48 }
  0xbb   : > { %v727_v5 = vpop.permute.xlu1 %726  ;;  %v724_v6 = vpop.permute.xlu0 %723  ;;  %v518_v58 = vadd.f32 %v1955_v60, %v457_v45  ;;  %v573_v9 = vmax.f32 %v519_v57, 0.0  ;;  %v466_v38 = vmul.f32 %v1449_v24, %v1945_v52  ;;  %v465_v39 = vmul.f32 %v1448_v25, %v1945_v52 }
  0xbc   : > { %1638 = vst [vmem:[%s1979_s13 + $0x60] sm:$0xff] %v1529_v4   ;;  %vm833_vm0 = vcmp.eq.s32.totalorder %v727_v5, 1  ;;  %vm832_vm1 = vcmp.eq.s32.totalorder %v724_v6, 1  ;;  %v461_v4 = vmul.f32 %v1440_v51, %v1945_v52 }
  0xbd   : > { %v887_v13 = vsel %vm833_vm0, %v563_v59, 0.0  ;;  %v886_v14 = vsel %vm832_vm1, %v562_v1, 0.0  ;;  %v1621_v59 = vld [vmem:[%s1937_s6 + $0xa8] sm:$0xff]   ;;  %v520_v1 = vadd.f32 %v1955_v60, %v459_v49  ;;  %v572_v10 = vmax.f32 %v518_v58, 0.0 }
  0xbe   : > { %v1534_v18 = vpack.c.bf16 %v887_v13, %v886_v14  ;;  %v1445_v5 = vunpack.c.h.bf16 %v1621_v59  ;;  %v1444_v6 = vunpack.c.l.bf16 %v1621_v59  ;;  %v527_v50 = vadd.f32 %v1955_v60, %v466_v38 }
  0xbf   : > { %v733_v19 = vpop.permute.xlu1 %732  ;;  %v730_v20 = vpop.permute.xlu0 %729  ;;  %v574_v16 = vmax.f32 %v520_v1, 0.0  ;;  %v526_v51 = vadd.f32 %v1955_v60, %v465_v39 }
  0xc0   : > { %1639 = vst [vmem:[%s1979_s13 + $0x68] sm:$0xff] %v1534_v18   ;;  %vm835_vm2 = vcmp.eq.s32.totalorder %v733_v19, 1  ;;  %vm834_vm3 = vcmp.eq.s32.totalorder %v730_v20, 1  ;;  %v522_v18 = vadd.f32 %v1955_v60, %v461_v4  ;;  %v464_v19 = vmul.f32 %v1445_v5, %v1945_v52 }
  0xc1   : > { %v889_v28 = vsel %vm835_vm2, %v565_v11, 0.0  ;;  %v888_v29 = vsel %vm834_vm3, %v564_v15, 0.0  ;;  %v575_v15 = vmax.f32 %v521_v0, 0.0  ;;  %v463_v20 = vmul.f32 %v1444_v6, %v1945_v52  ;;  %v1626_v6 = vld [vmem:[%s1937_s6 + $0xd0] sm:$0xff]  }
  0xc2   : > { %v1539_v32 = vpack.c.bf16 %v889_v28, %v888_v29  ;;  %v577_v29 = vmax.f32 %v523_v17, 0.0  ;;  %v576_v30 = vmax.f32 %v522_v18, 0.0  ;;  %v581_v2 = vmax.f32 %v527_v50, 0.0 }
  0xc3   : > { %v739_v33 = vpop.permute.xlu1 %738  ;;  %v736_v34 = vpop.permute.xlu0 %735  ;;  %v580_v4 = vmax.f32 %v526_v51, 0.0  ;;  %v1465_v17 = vunpack.c.h.bf16 %v1626_v6  ;;  %v1464_v18 = vunpack.c.l.bf16 %v1626_v6 }
  0xc4   : > { %1640 = vst [vmem:[%s1979_s13 + $0x70] sm:$0xff] %v1539_v32   ;;  %vm837_vm4 = vcmp.eq.s32.totalorder %v739_v33, 1  ;;  %vm836_vm5 = vcmp.eq.s32.totalorder %v736_v34, 1  ;;  %v525_v33 = vadd.f32 %v1955_v60, %v464_v19  ;;  %v524_v34 = vadd.f32 %v1955_v60, %v463_v20 }
  0xc5   : > { %v891_v42 = vsel %vm837_vm4, %v567_v21, 0.0  ;;  %v890_v43 = vsel %vm836_vm5, %v566_v22, 0.0  ;;  %v1623_v21 = vld [vmem:[%s1937_s6 + $0xb8] sm:$0xff]  }
  0xc6   : > { %v1544_v46 = vpack.c.bf16 %v891_v42, %v890_v43  ;;  %v1453_v31 = vunpack.c.h.bf16 %v1623_v21  ;;  %v1452_v32 = vunpack.c.l.bf16 %v1623_v21 }
  0xc7   : > { %v745_v3 = vpop.permute.xlu1 %744  ;;  %v742_v47 = vpop.permute.xlu0 %741 }
  0xc8   : > { %1641 = vst [vmem:[%s1979_s13 + $0x78] sm:$0xff] %v1544_v46   ;;  %vm839_vm6 = vcmp.eq.s32.totalorder %v745_v3, 1  ;;  %vm838_vm7 = vcmp.eq.s32.totalorder %v742_v47, 1  ;;  %v468_v43 = vmul.f32 %v1453_v31, %v1945_v52  ;;  %v579_v3 = vmax.f32 %v525_v33, 0.0 }
  0xc9   : > { %v893_v55 = vsel %vm839_vm6, %v569_v35, 0.0  ;;  %v892_v56 = vsel %vm838_vm7, %v568_v44, 0.0  ;;  %v1624_v35 = vld [vmem:[%s1937_s6 + $0xc0] sm:$0xff]   ;;  %v467_v44 = vmul.f32 %v1452_v32, %v1945_v52  ;;  %v578_v47 = vmax.f32 %v524_v34, 0.0 }
  0xca   : > { %v1549_v61 = vpack.c.bf16 %v893_v55, %v892_v56  ;;  %v1457_v45 = vunpack.c.h.bf16 %v1624_v35  ;;  %v1456_v46 = vunpack.c.l.bf16 %v1624_v35  ;;  %v529_v57 = vadd.f32 %v1955_v60, %v468_v43 }
  0xcb   : > { %v751_v62 = vpop.permute.xlu1 %750  ;;  %v748_v63 = vpop.permute.xlu0 %747  ;;  %v528_v58 = vadd.f32 %v1955_v60, %v467_v44 }
  0xcc   : > { %1642 = vst [vmem:[%s1979_s13 + $0x80] sm:$0xff] %v1549_v61   ;;  %vm841_vm8 = vcmp.eq.s32.totalorder %v751_v62, 1  ;;  %vm840_vm9 = vcmp.eq.s32.totalorder %v748_v63, 1  ;;  %v470_v59 = vmul.f32 %v1457_v45, %v1945_v52  ;;  %v469_v61 = vmul.f32 %v1456_v46, %v1945_v52 }
  0xcd   : > { %v895_v7 = vsel %vm841_vm8, %v571_v53, 0.0  ;;  %v894_v8 = vsel %vm840_vm9, %v570_v54, 0.0  ;;  %v1625_v53 = vld [vmem:[%s1937_s6 + $0xc8] sm:$0xff]  }
  0xce   : > { %v1554_v11 = vpack.c.bf16 %v895_v7, %v894_v8  ;;  %v1461_v62 = vunpack.c.h.bf16 %v1625_v53  ;;  %v1460_v63 = vunpack.c.l.bf16 %v1625_v53  ;;  %v530_v12 = vadd.f32 %v1955_v60, %v469_v61 }
  0xcf   : > { %v757_v13 = vpop.permute.xlu1 %756  ;;  %v754_v14 = vpop.permute.xlu0 %753 }
  0xd0   : > { %1643 = vst [vmem:[%s1979_s13 + $0x88] sm:$0xff] %v1554_v11   ;;  %vm843_vm10 = vcmp.eq.s32.totalorder %v757_v13, 1  ;;  %vm842_vm11 = vcmp.eq.s32.totalorder %v754_v14, 1  ;;  %v531_v11 = vadd.f32 %v1955_v60, %v470_v59  ;;  %v472_v13 = vmul.f32 %v1461_v62, %v1945_v52 }
  0xd1   : > { %v897_v22 = vsel %vm843_vm10, %v573_v9, 0.0  ;;  %v896_v23 = vsel %vm842_vm11, %v572_v10, 0.0  ;;  %v583_v9 = vmax.f32 %v529_v57, 0.0  ;;  %v582_v10 = vmax.f32 %v528_v58, 0.0 }
  0xd2   : > { %v1559_v26 = vpack.c.bf16 %v897_v22, %v896_v23  ;;  %v471_v14 = vmul.f32 %v1460_v63, %v1945_v52  ;;  %v585_v22 = vmax.f32 %v531_v11, 0.0  ;;  %v584_v23 = vmax.f32 %v530_v12, 0.0 }
  0xd3   : > { %v763_v27 = vpop.permute.xlu1 %762  ;;  %v760_v28 = vpop.permute.xlu0 %759  ;;  %v533_v24 = vadd.f32 %v1955_v60, %v472_v13 }
  0xd4   : > { %1644 = vst [vmem:[%s1979_s13 + $0x90] sm:$0xff] %v1559_v26   ;;  %vm845_vm12 = vcmp.eq.s32.totalorder %v763_v27, 1  ;;  %vm844_vm13 = vcmp.eq.s32.totalorder %v760_v28, 1  ;;  %v532_v25 = vadd.f32 %v1955_v60, %v471_v14  ;;  %v474_v28 = vmul.f32 %v1465_v17, %v1945_v52 }
  0xd5   : > { %v899_v36 = vsel %vm845_vm12, %v575_v15, 0.0  ;;  %v898_v37 = vsel %vm844_vm13, %v574_v16, 0.0  ;;  %v587_v33 = vmax.f32 %v533_v24, 0.0 }
  0xd6   : > { %v1564_v40 = vpack.c.bf16 %v899_v36, %v898_v37  ;;  %v586_v34 = vmax.f32 %v532_v25, 0.0  ;;  %v535_v37 = vadd.f32 %v1955_v60, %v474_v28 }
  0xd7   : > { %v769_v41 = vpop.permute.xlu1 %768  ;;  %v766_v42 = vpop.permute.xlu0 %765 }
  0xd8   : > { %1645 = vst [vmem:[%s1979_s13 + $0x98] sm:$0xff] %v1564_v40   ;;  %vm847_vm14 = vcmp.eq.s32.totalorder %v769_v41, 1  ;;  %vm846_vm15 = vcmp.eq.s32.totalorder %v766_v42, 1  ;;  %v589_v43 = vmax.f32 %v535_v37, 0.0 }
  0xd9   : > { %v901_v48 = vsel %vm847_vm14, %v577_v29, 0.0  ;;  %v900_v49 = vsel %vm846_vm15, %v576_v30, 0.0  ;;  %v473_v29 = vmul.f32 %v1464_v18, %v1945_v52 }
  0xda   : > { %v1569_v54 = vpack.c.bf16 %v901_v48, %v900_v49 }
  0xdb   : > { %v775_v55 = vpop.permute.xlu1 %774  ;;  %v772_v56 = vpop.permute.xlu0 %771  ;;  %v534_v38 = vadd.f32 %v1955_v60, %v473_v29 }
  0xdc   : > { %1646 = vst [vmem:[%s1979_s13 + $0xa0] sm:$0xff] %v1569_v54   ;;  %vm849_vm0 = vcmp.eq.s32.totalorder %v775_v55, 1  ;;  %vm848_vm1 = vcmp.eq.s32.totalorder %v772_v56, 1 }
  0xdd   : > { %v903_v0 = vsel %vm849_vm0, %v579_v3, 0.0  ;;  %v902_v1 = vsel %vm848_vm1, %v578_v47, 0.0  ;;  %v588_v44 = vmax.f32 %v534_v38, 0.0 }
  0xde   : > { %v1574_v5 = vpack.c.bf16 %v903_v0, %v902_v1 }
  0xdf   : > { %v781_v7 = vpop.permute.xlu1 %780  ;;  %v778_v8 = vpop.permute.xlu0 %777 }
  0xe0   : > { %1647 = vst [vmem:[%s1979_s13 + $0xa8] sm:$0xff] %v1574_v5   ;;  %vm851_vm2 = vcmp.eq.s32.totalorder %v781_v7, 1  ;;  %vm850_vm3 = vcmp.eq.s32.totalorder %v778_v8, 1 }
  0xe1   : > { %v905_v15 = vsel %vm851_vm2, %v581_v2, 0.0  ;;  %v904_v16 = vsel %vm850_vm3, %v580_v4, 0.0 }
  0xe2   : > { %v1579_v19 = vpack.c.bf16 %v905_v15, %v904_v16 }
  0xe3   : > { %v787_v20 = vpop.permute.xlu1 %786  ;;  %v784_v21 = vpop.permute.xlu0 %783 }
  0xe4   : > { %1648 = vst [vmem:[%s1979_s13 + $0xb0] sm:$0xff] %v1579_v19   ;;  %vm853_vm4 = vcmp.eq.s32.totalorder %v787_v20, 1  ;;  %vm852_vm5 = vcmp.eq.s32.totalorder %v784_v21, 1 }
  0xe5   : > { %v907_v26 = vsel %vm853_vm4, %v583_v9, 0.0  ;;  %v906_v27 = vsel %vm852_vm5, %v582_v10, 0.0 }
  0xe6   : > { %v1584_v30 = vpack.c.bf16 %v907_v26, %v906_v27 }
  0xe7   : > { %v793_v31 = vpop.permute.xlu1 %792  ;;  %v790_v32 = vpop.permute.xlu0 %789 }
  0xe8   : > { %1649 = vst [vmem:[%s1979_s13 + $0xb8] sm:$0xff] %v1584_v30   ;;  %vm855_vm6 = vcmp.eq.s32.totalorder %v793_v31, 1  ;;  %vm854_vm7 = vcmp.eq.s32.totalorder %v790_v32, 1 }
  0xe9   : > { %v909_v35 = vsel %vm855_vm6, %v585_v22, 0.0  ;;  %v908_v36 = vsel %vm854_vm7, %v584_v23, 0.0 }
  0xea   : > { %v1589_v39 = vpack.c.bf16 %v909_v35, %v908_v36 }
  0xeb   : > { %v799_v40 = vpop.permute.xlu1 %798  ;;  %v796_v41 = vpop.permute.xlu0 %795 }
  0xec   : > { %1650 = vst [vmem:[%s1979_s13 + $0xc0] sm:$0xff] %v1589_v39   ;;  %vm857_vm8 = vcmp.eq.s32.totalorder %v799_v40, 1  ;;  %vm856_vm9 = vcmp.eq.s32.totalorder %v796_v41, 1 }
  0xed   : > { %v911_v52 = vsel %vm857_vm8, %v587_v33, 0.0  ;;  %v910_v42 = vsel %vm856_vm9, %v586_v34, 0.0 }
  0xee   : > { %v1594_v45 = vpack.c.bf16 %v911_v52, %v910_v42 }
  0xef   : > { %v805_v46 = vpop.permute.xlu1 %804  ;;  %v802_v3 = vpop.permute.xlu0 %801 }
  0xf0   : > { %1651 = vst [vmem:[%s1979_s13 + $0xc8] sm:$0xff] %v1594_v45   ;;  %vm859_vm10 = vcmp.eq.s32.totalorder %v805_v46, 1  ;;  %vm858_vm11 = vcmp.eq.s32.totalorder %v802_v3, 1 }
  0xf1   : > { %v913_v47 = vsel %vm859_vm10, %v589_v43, 0.0  ;;  %v912_v48 = vsel %vm858_vm11, %v588_v44, 0.0 }
  0xf2   : > { %v1599_v60 = vpack.c.bf16 %v913_v47, %v912_v48 }
  0xf4   : > { %1652 = vst [vmem:[%s1979_s13 + $0xd0] sm:$0xff] %v1599_v60  }
  0xf5 PF: > { %s14_s15 = sadd.s32 1, %s1671_s15  }
  0xf6   : > { %p11_p4 = scmp.ge.s32.totalorder %s14_s15, 4  }
  0xf8   :  { %13 = sbr.rel (!%p11_p4) target bundleno = 1 (0x1), region = 66 }

// kernel: resnet_forward.12
= control target key start
LH: loop header
LB: loop body
LE: loop exit
PB: predicated region body
PF: predicated region fallthrough
CT: control target
= control target key end

     0   :  { %s2062_s18 = smov 0   ;;  %s2717_s0 = inlined_call_operand.vmem [shape: bf16[2,18,24,128], index: 0, kind: input, shape index: {}]   ;;  %s2718_s1 = inlined_call_operand.vmem [shape: f32[432,1], index: 1, kind: input, shape index: {}]   ;;  %s2719_s2 = inlined_call_operand.vmem [shape: f32[1,128], index: 2, kind: input, shape index: {}]   ;;  %s2720_s3 = inlined_call_operand.vmem [shape: f32[1,128], index: 3, kind: input, shape index: {}]   ;;  %s2721_s4 = inlined_call_operand.vmem [shape: bf16[2,18,24,128], index: 4, kind: input, shape index: {}, may-alias: {4,5}]   ;;  %s2722_s5 = inlined_call_operand.vmem [shape: bf16[2,18,24,128], index: 5, kind: output, shape index: {}, may-alias: {4,5}]  }
   0x1 LB: > { %s1460_s19 = sadd.s32 4294967295, %s2029_s18   ;;  %p1464_p0 = scmp.ge.s32.totalorder %s2029_s18, 1  ;;  %s2029_s18 = sphi %s2062_s18, %s15_s18  }
   0x2   : > { %p197_p1 = scmp.lt.s32.totalorder %s2029_s18, 3 }
   0x4   : > { %p198_p2 = pnand %p1464_p0, %p197_p1 }
   0x5   : > { %v247_v0 = vld [vmem:[%s2718_s1 + $0x10] sm:$0xff] (!%p198_p2)  ;;  %v245_v1 = vld [vmem:[%s2718_s1] sm:$0xff] (!%p198_p2)  ;;  %v248_v2 = vld [vmem:[%s2718_s1 + $0x18] sm:$0xff] (!%p198_p2)  ;;  %v2031_v3 = vmov (!%p198_p2), 0   ;;  %p230_p3 = scmp.lt.s32.totalorder (!%p198_p2), %s1460_s19, 1 }
   0x6   : > { %201 = sbr.rel (%p198_p2) target bundleno = 245 (0xf5), region = 40  ;;  %2020 = vset.pattern.permute.xlu1 (!%p198_p2), %v2031_v3  ;;  %2019 = vset.pattern.permute.xlu0 (!%p198_p2), %v2031_v3  ;;  %vm301_vm0 = vcmp.ne.f32.partialorder (!%p198_p2), %v247_v0, 0.0  ;;  %vm299_vm1 = vcmp.ne.f32.partialorder (!%p198_p2), %v245_v1, 0.0  ;;  %vm302_vm2 = vcmp.ne.f32.partialorder (!%p198_p2), %v248_v2, 0.0  ;;  %v246_v4 = vld [vmem:[%s2718_s1 + $0x8] sm:$0xff] (!%p198_p2)  ;;  %v249_v8 = vld [vmem:[%s2718_s1 + $0x20] sm:$0xff] (!%p198_p2) }
   0x7   : > { %v801_v5 = vsel (!%p198_p2), %vm301_vm0, 1, %v2031_v3  ;;  %v799_v6 = vsel (!%p198_p2), %vm299_vm1, 1, %v2031_v3  ;;  %vm300_vm3 = vcmp.ne.f32.partialorder (!%p198_p2), %v246_v4, 0.0  ;;  %v250_v7 = vld [vmem:[%s2718_s1 + $0x28] sm:$0xff] (!%p198_p2)  ;;  %v802_v9 = vsel (!%p198_p2), %vm302_vm2, 1, %v2031_v3  ;;  %v252_v11 = vld [vmem:[%s2718_s1 + $0x38] sm:$0xff] (!%p198_p2) }
   0x8   : > { %860 = vperm.xlu1 (!%p198_p2), %2020, %v801_v5   ;;  %854 = vperm.xlu0 (!%p198_p2), %2019, %v799_v6   ;;  %v800_v10 = vsel (!%p198_p2), %vm300_vm3, 1, %v2031_v3  ;;  %vm304_vm4 = vcmp.ne.f32.partialorder (!%p198_p2), %v250_v7, 0.0  ;;  %vm303_vm5 = vcmp.ne.f32.partialorder (!%p198_p2), %v249_v8, 0.0  ;;  %v251_v12 = vld [vmem:[%s2718_s1 + $0x30] sm:$0xff] (!%p198_p2)  ;;  %vm306_vm6 = vcmp.ne.f32.partialorder (!%p198_p2), %v252_v11, 0.0  ;;  %v254_v15 = vld [vmem:[%s2718_s1 + $0x48] sm:$0xff] (!%p198_p2) }
   0x9   : > { %v804_v13 = vsel (!%p198_p2), %vm304_vm4, 1, %v2031_v3  ;;  %v803_v14 = vsel (!%p198_p2), %vm303_vm5, 1, %v2031_v3  ;;  %vm305_vm7 = vcmp.ne.f32.partialorder (!%p198_p2), %v251_v12, 0.0  ;;  %v253_v16 = vld [vmem:[%s2718_s1 + $0x40] sm:$0xff] (!%p198_p2)  ;;  %v806_v17 = vsel (!%p198_p2), %vm306_vm6, 1, %v2031_v3  ;;  %v256_v19 = vld [vmem:[%s2718_s1 + $0x58] sm:$0xff] (!%p198_p2) }
   0xa   : > { %v805_v18 = vsel (!%p198_p2), %vm305_vm7, 1, %v2031_v3  ;;  %vm308_vm8 = vcmp.ne.f32.partialorder (!%p198_p2), %v254_v15, 0.0  ;;  %vm307_vm9 = vcmp.ne.f32.partialorder (!%p198_p2), %v253_v16, 0.0  ;;  %v255_v20 = vld [vmem:[%s2718_s1 + $0x50] sm:$0xff] (!%p198_p2)  ;;  %vm310_vm10 = vcmp.ne.f32.partialorder (!%p198_p2), %v256_v19, 0.0  ;;  %v258_v23 = vld [vmem:[%s2718_s1 + $0x68] sm:$0xff] (!%p198_p2) }
   0xb   : > { %v808_v21 = vsel (!%p198_p2), %vm308_vm8, 1, %v2031_v3  ;;  %v807_v22 = vsel (!%p198_p2), %vm307_vm9, 1, %v2031_v3  ;;  %vm309_vm11 = vcmp.ne.f32.partialorder (!%p198_p2), %v255_v20, 0.0  ;;  %v257_v24 = vld [vmem:[%s2718_s1 + $0x60] sm:$0xff] (!%p198_p2)  ;;  %v810_v25 = vsel (!%p198_p2), %vm310_vm10, 1, %v2031_v3  ;;  %v260_v27 = vld [vmem:[%s2718_s1 + $0x78] sm:$0xff] (!%p198_p2) }
   0xc   : > { %863 = vperm.xlu1 (!%p198_p2), %2020, %v802_v9   ;;  %857 = vperm.xlu0 (!%p198_p2), %2019, %v800_v10   ;;  %v809_v26 = vsel (!%p198_p2), %vm309_vm11, 1, %v2031_v3  ;;  %vm312_vm12 = vcmp.ne.f32.partialorder (!%p198_p2), %v258_v23, 0.0  ;;  %vm311_vm13 = vcmp.ne.f32.partialorder (!%p198_p2), %v257_v24, 0.0  ;;  %v259_v28 = vld [vmem:[%s2718_s1 + $0x70] sm:$0xff] (!%p198_p2)  ;;  %vm314_vm14 = vcmp.ne.f32.partialorder (!%p198_p2), %v260_v27, 0.0  ;;  %v262_v31 = vld [vmem:[%s2718_s1 + $0x88] sm:$0xff] (!%p198_p2) }
   0xd   : > { %v812_v29 = vsel %vm312_vm12, 1, %v2031_v3  ;;  %v811_v30 = vsel %vm311_vm13, 1, %v2031_v3  ;;  %vm313_vm15 = vcmp.ne.f32.partialorder %v259_v28, 0.0  ;;  %v261_v32 = vld [vmem:[%s2718_s1 + $0x80] sm:$0xff]  ;;  %v814_v33 = vsel %vm314_vm14, 1, %v2031_v3  ;;  %v264_v35 = vld [vmem:[%s2718_s1 + $0x98] sm:$0xff] }
   0xe   : > { %v813_v34 = vsel %vm313_vm15, 1, %v2031_v3  ;;  %vm316_vm0 = vcmp.ne.f32.partialorder %v262_v31, 0.0  ;;  %vm315_vm1 = vcmp.ne.f32.partialorder %v261_v32, 0.0  ;;  %v263_v36 = vld [vmem:[%s2718_s1 + $0x90] sm:$0xff]  ;;  %vm318_vm2 = vcmp.ne.f32.partialorder %v264_v35, 0.0  ;;  %v266_v39 = vld [vmem:[%s2718_s1 + $0xa8] sm:$0xff] }
   0xf   : > { %v816_v37 = vsel %vm316_vm0, 1, %v2031_v3  ;;  %v815_v38 = vsel %vm315_vm1, 1, %v2031_v3  ;;  %vm317_vm3 = vcmp.ne.f32.partialorder %v263_v36, 0.0  ;;  %v265_v40 = vld [vmem:[%s2718_s1 + $0xa0] sm:$0xff]  ;;  %v818_v41 = vsel %vm318_vm2, 1, %v2031_v3  ;;  %v268_v43 = vld [vmem:[%s2718_s1 + $0xb8] sm:$0xff] }
  0x10   : > { %869 = vperm.xlu1 %2020, %v804_v13   ;;  %866 = vperm.xlu0 %2019, %v803_v14   ;;  %v817_v42 = vsel %vm317_vm3, 1, %v2031_v3  ;;  %vm320_vm4 = vcmp.ne.f32.partialorder %v266_v39, 0.0  ;;  %vm319_vm5 = vcmp.ne.f32.partialorder %v265_v40, 0.0  ;;  %v267_v44 = vld [vmem:[%s2718_s1 + $0xb0] sm:$0xff]  ;;  %vm322_vm6 = vcmp.ne.f32.partialorder %v268_v43, 0.0  ;;  %v270_v47 = vld [vmem:[%s2718_s1 + $0xc8] sm:$0xff] }
  0x11   : > { %v820_v45 = vsel %vm320_vm4, 1, %v2031_v3  ;;  %v819_v46 = vsel %vm319_vm5, 1, %v2031_v3  ;;  %vm321_vm7 = vcmp.ne.f32.partialorder %v267_v44, 0.0  ;;  %v269_v48 = vld [vmem:[%s2718_s1 + $0xc0] sm:$0xff]  ;;  %v822_v49 = vsel %vm322_vm6, 1, %v2031_v3  ;;  %v272_v51 = vld [vmem:[%s2718_s1 + $0xd8] sm:$0xff] }
  0x12   : > { %v821_v50 = vsel %vm321_vm7, 1, %v2031_v3  ;;  %vm324_vm8 = vcmp.ne.f32.partialorder %v270_v47, 0.0  ;;  %vm323_vm9 = vcmp.ne.f32.partialorder %v269_v48, 0.0  ;;  %v271_v52 = vld [vmem:[%s2718_s1 + $0xd0] sm:$0xff]  ;;  %vm326_vm10 = vcmp.ne.f32.partialorder %v272_v51, 0.0  ;;  %v274_v55 = vld [vmem:[%s2718_s1 + $0xe8] sm:$0xff] }
  0x13   : > { %v824_v53 = vsel %vm324_vm8, 1, %v2031_v3  ;;  %v823_v54 = vsel %vm323_vm9, 1, %v2031_v3  ;;  %vm325_vm11 = vcmp.ne.f32.partialorder %v271_v52, 0.0  ;;  %v273_v56 = vld [vmem:[%s2718_s1 + $0xe0] sm:$0xff]  ;;  %v826_v57 = vsel %vm326_vm10, 1, %v2031_v3  ;;  %v276_v59 = vld [vmem:[%s2718_s1 + $0xf8] sm:$0xff] }
  0x14   : > { %875 = vperm.xlu1 %2020, %v806_v17   ;;  %872 = vperm.xlu0 %2019, %v805_v18   ;;  %v825_v58 = vsel %vm325_vm11, 1, %v2031_v3  ;;  %vm328_vm12 = vcmp.ne.f32.partialorder %v274_v55, 0.0  ;;  %vm327_vm13 = vcmp.ne.f32.partialorder %v273_v56, 0.0  ;;  %v275_v60 = vld [vmem:[%s2718_s1 + $0xf0] sm:$0xff]  ;;  %vm330_vm14 = vcmp.ne.f32.partialorder %v276_v59, 0.0  ;;  %v278_v63 = vld [vmem:[%s2718_s1 + $0x108] sm:$0xff] }
  0x15   : > { %v828_v61 = vsel %vm328_vm12, 1, %v2031_v3  ;;  %v827_v62 = vsel %vm327_vm13, 1, %v2031_v3  ;;  %vm329_vm15 = vcmp.ne.f32.partialorder %v275_v60, 0.0  ;;  %v277_v0 = vld [vmem:[%s2718_s1 + $0x100] sm:$0xff]  ;;  %v830_v1 = vsel %vm330_vm14, 1, %v2031_v3  ;;  %v280_v4 = vld [vmem:[%s2718_s1 + $0x118] sm:$0xff] }
  0x16   : > { %v829_v2 = vsel %vm329_vm15, 1, %v2031_v3  ;;  %vm332_vm0 = vcmp.ne.f32.partialorder %v278_v63, 0.0  ;;  %vm331_vm1 = vcmp.ne.f32.partialorder %v277_v0, 0.0  ;;  %v279_v5 = vld [vmem:[%s2718_s1 + $0x110] sm:$0xff]  ;;  %vm334_vm2 = vcmp.ne.f32.partialorder %v280_v4, 0.0  ;;  %v282_v8 = vld [vmem:[%s2718_s1 + $0x128] sm:$0xff] }
  0x17   : > { %v832_v6 = vsel %vm332_vm0, 1, %v2031_v3  ;;  %v831_v7 = vsel %vm331_vm1, 1, %v2031_v3  ;;  %vm333_vm3 = vcmp.ne.f32.partialorder %v279_v5, 0.0  ;;  %v281_v9 = vld [vmem:[%s2718_s1 + $0x120] sm:$0xff]  ;;  %v834_v10 = vsel %vm334_vm2, 1, %v2031_v3  ;;  %v284_v12 = vld [vmem:[%s2718_s1 + $0x138] sm:$0xff] }
  0x18   : > { %881 = vperm.xlu1 %2020, %v808_v21   ;;  %878 = vperm.xlu0 %2019, %v807_v22   ;;  %v833_v11 = vsel %vm333_vm3, 1, %v2031_v3  ;;  %vm336_vm4 = vcmp.ne.f32.partialorder %v282_v8, 0.0  ;;  %vm335_vm5 = vcmp.ne.f32.partialorder %v281_v9, 0.0  ;;  %v283_v13 = vld [vmem:[%s2718_s1 + $0x130] sm:$0xff]  ;;  %vm338_vm6 = vcmp.ne.f32.partialorder %v284_v12, 0.0  ;;  %v286_v16 = vld [vmem:[%s2718_s1 + $0x148] sm:$0xff] }
  0x19   : > { %v836_v14 = vsel %vm336_vm4, 1, %v2031_v3  ;;  %v835_v15 = vsel %vm335_vm5, 1, %v2031_v3  ;;  %vm337_vm7 = vcmp.ne.f32.partialorder %v283_v13, 0.0  ;;  %v285_v17 = vld [vmem:[%s2718_s1 + $0x140] sm:$0xff]  ;;  %v838_v18 = vsel %vm338_vm6, 1, %v2031_v3  ;;  %v288_v20 = vld [vmem:[%s2718_s1 + $0x158] sm:$0xff] }
  0x1a   : > { %v837_v19 = vsel %vm337_vm7, 1, %v2031_v3  ;;  %vm340_vm8 = vcmp.ne.f32.partialorder %v286_v16, 0.0  ;;  %vm339_vm9 = vcmp.ne.f32.partialorder %v285_v17, 0.0  ;;  %v287_v21 = vld [vmem:[%s2718_s1 + $0x150] sm:$0xff]  ;;  %vm342_vm10 = vcmp.ne.f32.partialorder %v288_v20, 0.0  ;;  %v290_v24 = vld [vmem:[%s2718_s1 + $0x168] sm:$0xff] }
  0x1b   : > { %v840_v22 = vsel %vm340_vm8, 1, %v2031_v3  ;;  %v839_v23 = vsel %vm339_vm9, 1, %v2031_v3  ;;  %vm341_vm11 = vcmp.ne.f32.partialorder %v287_v21, 0.0  ;;  %vm344_vm12 = vcmp.ne.f32.partialorder %v290_v24, 0.0  ;;  %v292_v28 = vld [vmem:[%s2718_s1 + $0x178] sm:$0xff]  ;;  %v294_v32 = vld [vmem:[%s2718_s1 + $0x188] sm:$0xff] }
  0x1c   : > { %887 = vperm.xlu1 %2020, %v810_v25   ;;  %884 = vperm.xlu0 %2019, %v809_v26   ;;  %v289_v25 = vld [vmem:[%s2718_s1 + $0x160] sm:$0xff]  ;;  %v842_v26 = vsel %vm342_vm10, 1, %v2031_v3  ;;  %v841_v27 = vsel %vm341_vm11, 1, %v2031_v3  ;;  %vm346_vm14 = vcmp.ne.f32.partialorder %v292_v28, 0.0  ;;  %vm348_vm0 = vcmp.ne.f32.partialorder %v294_v32, 0.0  ;;  %v296_v36 = vld [vmem:[%s2718_s1 + $0x198] sm:$0xff] }
  0x1d   : > { %vm343_vm13 = vcmp.ne.f32.partialorder %v289_v25, 0.0  ;;  %s2724_s19 = smov (!%p230_p3, %s1460_s19), 1  ;;  %vm350_vm2 = vcmp.ne.f32.partialorder %v296_v36, 0.0  ;;  %v298_v40 = vld [vmem:[%s2718_s1 + $0x1a8] sm:$0xff]  ;;  %v2320_v56 = vld [vmem:[%s2720_s3] ss:$0 sm:$0xff] }
  0x1e   : > { %v843_v31 = vsel %vm343_vm13, 1, %v2031_v3  ;;  %s2290_s11 = smul.u32 216, %s2724_s19  ;;  %vm352_vm4 = vcmp.ne.f32.partialorder %v298_v40, 0.0 }
  0x1f   : > { %v852_v44 = vsel %vm352_vm4, 1, %v2031_v3 }
  0x20   : > { %893 = vperm.xlu1 %2020, %v812_v29   ;;  %890 = vperm.xlu0 %2019, %v811_v30   ;;  %v291_v29 = vld [vmem:[%s2718_s1 + $0x170] sm:$0xff]  ;;  %v844_v30 = vsel %vm344_vm12, 1, %v2031_v3  ;;  %s2298_s14 = scalar_lea.vmem %s2717_s0, %s2290_s11  ;;  %s2311_s20 = scalar_lea.vmem %s2721_s4, %s2290_s11 }
  0x21   : > { %vm345_vm15 = vcmp.ne.f32.partialorder %v291_v29, 0.0  ;;  %v1581_v47 = vld [vmem:[%s2298_s14] sm:$0xff]   ;;  %v1933_v51 = vld [vmem:[%s2298_s14 + $0x18] sm:$0xff]   ;;  %v1958_v4 = vld [vmem:[%s2311_s20 + $0x10] sm:$0xff]   ;;  %s2460_s25 = scalar_lea.vmem %s2722_s5, %s2290_s11 }
  0x22   : > { %v845_v35 = vsel %vm345_vm15, 1, %v2031_v3  ;;  %v1594_v63 = vunpack.c.l.bf16 %v1933_v51  ;;  %v1959_v13 = vld [vmem:[%s2311_s20 + $0x18] sm:$0xff]   ;;  %v1699_v17 = vunpack.c.h.bf16 %v1958_v4  ;;  %v1960_v32 = vld [vmem:[%s2311_s20 + $0x20] sm:$0xff]  }
  0x23   : > { %v1703_v25 = vunpack.c.h.bf16 %v1959_v13  ;;  %v1707_v36 = vunpack.c.h.bf16 %v1960_v32  ;;  %v1706_v40 = vunpack.c.l.bf16 %v1960_v32  ;;  %v2429_v32 = vld [vmem:[%s2311_s20 + $0x90] sm:$0xff]  }
  0x24   : > { %899 = vperm.xlu1 %2020, %v814_v33   ;;  %896 = vperm.xlu0 %2019, %v813_v34   ;;  %v293_v33 = vld [vmem:[%s2718_s1 + $0x180] sm:$0xff]  ;;  %v846_v34 = vsel %vm346_vm14, 1, %v2031_v3 }
  0x25   : > { %vm347_vm1 = vcmp.ne.f32.partialorder %v293_v33, 0.0  ;;  %v1936_v33 = vld [vmem:[%s2298_s14 + $0x30] sm:$0xff]  }
  0x26   : > { %v847_v39 = vsel %vm347_vm1, 1, %v2031_v3 }
  0x28   : > { %905 = vperm.xlu1 %2020, %v816_v37   ;;  %902 = vperm.xlu0 %2019, %v815_v38   ;;  %v295_v37 = vld [vmem:[%s2718_s1 + $0x190] sm:$0xff]  ;;  %v848_v38 = vsel %vm348_vm0, 1, %v2031_v3 }
  0x29   : > { %vm349_vm3 = vcmp.ne.f32.partialorder %v295_v37, 0.0 }
  0x2a   : > { %v849_v43 = vsel %vm349_vm3, 1, %v2031_v3 }
  0x2c   : > { %911 = vperm.xlu1 %2020, %v818_v41   ;;  %908 = vperm.xlu0 %2019, %v817_v42   ;;  %v297_v41 = vld [vmem:[%s2718_s1 + $0x1a0] sm:$0xff]  ;;  %v850_v42 = vsel %vm350_vm2, 1, %v2031_v3 }
  0x2d   : > { %vm351_vm5 = vcmp.ne.f32.partialorder %v297_v41, 0.0 }
  0x30   : > { %917 = vperm.xlu1 %2020, %v820_v45   ;;  %914 = vperm.xlu0 %2019, %v819_v46   ;;  %v851_v45 = vsel %vm351_vm5, 1, %v2031_v3  ;;  %v1931_v46 = vld [vmem:[%s2298_s14 + $0x8] sm:$0xff]   ;;  %v1582_v3 = vunpack.c.l.bf16 %v1581_v47 }
  0x31   : > { %v1586_v48 = vunpack.c.l.bf16 %v1931_v46  ;;  %v1587_v52 = vunpack.c.h.bf16 %v1931_v46 }
  0x34   : > { %923 = vperm.xlu1 %2020, %v822_v49   ;;  %920 = vperm.xlu0 %2019, %v821_v50   ;;  %v2305_v49 = vld [vmem:[%s2719_s2] ss:$0 sm:$0xff]  ;;  %v1932_v50 = vld [vmem:[%s2298_s14 + $0x10] sm:$0xff]  }
  0x35   : > { %v578_v55 = vmul.f32 %v1586_v48, %v2305_v49  ;;  %v576_v59 = vmul.f32 %v1582_v3, %v2305_v49  ;;  %v1591_v60 = vunpack.c.h.bf16 %v1932_v50  ;;  %v1606_v48 = vunpack.c.l.bf16 %v1936_v33 }
  0x38   : > { %929 = vperm.xlu1 %2020, %v824_v53   ;;  %926 = vperm.xlu0 %2019, %v823_v54   ;;  %v1583_v53 = vunpack.c.h.bf16 %v1581_v47  ;;  %v1934_v54 = vld [vmem:[%s2298_s14 + $0x20] sm:$0xff]  }
  0x39   : > { %v1599_v0 = vunpack.c.h.bf16 %v1934_v54  ;;  %v1598_v5 = vunpack.c.l.bf16 %v1934_v54 }
  0x3c   : > { %935 = vperm.xlu1 %2020, %v826_v57   ;;  %932 = vperm.xlu0 %2019, %v825_v58   ;;  %v1957_v57 = vld [vmem:[%s2311_s20 + $0x8] sm:$0xff]   ;;  %v1689_v58 = vld [vmem:[%s2311_s20] sm:$0xff]  }
  0x3d   : > { %v1690_v8 = vunpack.c.l.bf16 %v1689_v58  ;;  %v1695_v9 = vunpack.c.h.bf16 %v1957_v57  ;;  %v1691_v16 = vunpack.c.h.bf16 %v1689_v58 }
  0x40   : > { %941 = vperm.xlu1 %2020, %v828_v61   ;;  %938 = vperm.xlu0 %2019, %v827_v62   ;;  %v1590_v61 = vunpack.c.l.bf16 %v1932_v50  ;;  %v1595_v62 = vunpack.c.h.bf16 %v1933_v51 }
  0x42   : > { %v580_v12 = vmul.f32 %v1590_v61, %v2305_v49 }
  0x44   : > { %947 = vperm.xlu1 %2020, %v830_v1   ;;  %944 = vperm.xlu0 %2019, %v829_v2   ;;  %v579_v1 = vmul.f32 %v1587_v52, %v2305_v49  ;;  %v577_v2 = vmul.f32 %v1583_v53, %v2305_v49  ;;  %v1961_v53 = vld [vmem:[%s2311_s20 + $0x28] sm:$0xff]  }
  0x45   : > { %v1711_v58 = vunpack.c.h.bf16 %v1961_v53 }
  0x46   : > { %v640_v20 = vadd.f32 %v2320_v56, %v579_v1  ;;  %v638_v21 = vadd.f32 %v2320_v56, %v577_v2  ;;  %v1937_v1 = vld [vmem:[%s2298_s14 + $0x38] sm:$0xff]  }
  0x48   : > { %953 = vperm.xlu1 %2020, %v832_v6   ;;  %950 = vperm.xlu0 %2019, %v831_v7   ;;  %v1694_v6 = vunpack.c.l.bf16 %v1957_v57  ;;  %v639_v7 = vadd.f32 %v2320_v56, %v578_v55 }
  0x4a   : > { %v2340_v24 = vadd.f32 %v1694_v6, %v639_v7  ;;  %v1962_v6 = vld [vmem:[%s2311_s20 + $0x30] sm:$0xff]   ;;  %v588_v7 = vmul.f32 %v1606_v48, %v2305_v49  ;;  %v2454_v48 = vld [vmem:[%s2311_s20 + $0xc8] sm:$0xff]  }
  0x4c   : > { %959 = vperm.xlu1 %2020, %v834_v10   ;;  %956 = vperm.xlu0 %2019, %v833_v11   ;;  %v637_v10 = vadd.f32 %v2320_v56, %v576_v59  ;;  %v581_v11 = vmul.f32 %v1591_v60, %v2305_v49  ;;  %v747_v3 = vmax.f32 %v2340_v24, 0.0  ;;  %v2405_v24 = vld [vmem:[%s2311_s20 + $0x50] sm:$0xff]  }
  0x4e   : > { %v2342_v28 = vadd.f32 %v1690_v8, %v637_v10  ;;  %v642_v29 = vadd.f32 %v2320_v56, %v581_v11  ;;  %v1715_v10 = vunpack.c.h.bf16 %v1962_v6  ;;  %v1714_v11 = vunpack.c.l.bf16 %v1962_v6 }
  0x50   : > { %965 = vperm.xlu1 %2020, %v836_v14   ;;  %962 = vperm.xlu0 %2019, %v835_v15   ;;  %v583_v14 = vmul.f32 %v1595_v62, %v2305_v49  ;;  %v1935_v15 = vld [vmem:[%s2298_s14 + $0x28] sm:$0xff]   ;;  %v745_v50 = vmax.f32 %v2342_v28, 0.0  ;;  %v1710_v62 = vunpack.c.l.bf16 %v1961_v53  ;;  %v2417_v28 = vld [vmem:[%s2311_s20 + $0x70] sm:$0xff]  }
  0x51   : > { %v2463_v53 = vld [vmem:[%s2311_s20 + $0xd0] sm:$0xff]  }
  0x54   : > { %971 = vperm.xlu1 %2020, %v838_v18   ;;  %968 = vperm.xlu0 %2019, %v837_v19   ;;  %v582_v18 = vmul.f32 %v1594_v63, %v2305_v49  ;;  %v585_v19 = vmul.f32 %v1599_v0, %v2305_v49 }
  0x56   : > { %v646_v37 = vadd.f32 %v2320_v56, %v585_v19 }
  0x58   : > { %977 = vperm.xlu1 %2020, %v840_v22   ;;  %974 = vperm.xlu0 %2019, %v839_v23   ;;  %v1698_v22 = vunpack.c.l.bf16 %v1958_v4  ;;  %v584_v23 = vmul.f32 %v1598_v5, %v2305_v49  ;;  %v2368_v52 = vadd.f32 %v1707_v36, %v646_v37  ;;  %v649_v36 = vadd.f32 %v2320_v56, %v588_v7 }
  0x5a   : > { %v645_v41 = vadd.f32 %v2320_v56, %v584_v23  ;;  %v2402_v23 = vld [vmem:[%s2311_s20 + $0x48] sm:$0xff]  }
  0x5c   : > { %983 = vperm.xlu1 %2020, %v842_v26   ;;  %980 = vperm.xlu0 %2019, %v841_v27   ;;  %v1603_v26 = vunpack.c.h.bf16 %v1935_v15  ;;  %v1602_v27 = vunpack.c.l.bf16 %v1935_v15  ;;  %v2373_v57 = vadd.f32 %v1706_v40, %v645_v41  ;;  %v2449_v40 = vld [vmem:[%s2311_s20 + $0xc0] sm:$0xff]  }
  0x60   : > { %989 = vperm.xlu1 %2020, %v844_v30   ;;  %986 = vperm.xlu0 %2019, %v843_v31   ;;  %v641_v30 = vadd.f32 %v2320_v56, %v580_v12  ;;  %v644_v31 = vadd.f32 %v2320_v56, %v583_v14  ;;  %v2387_v12 = vld [vmem:[%s2298_s14 + $0x40] sm:$0xff]   ;;  %v1611_v14 = vunpack.c.h.bf16 %v1937_v1 }
  0x61   : > { %v1615_v37 = vunpack.c.h.bf16 %v2387_v12 }
  0x62   : > { %v2360_v46 = vadd.f32 %v1698_v22, %v641_v30  ;;  %v2362_v47 = vadd.f32 %v1703_v25, %v644_v31  ;;  %v2399_v22 = vld [vmem:[%s2311_s20 + $0x40] sm:$0xff]   ;;  %v2408_v25 = vld [vmem:[%s2311_s20 + $0x58] sm:$0xff]   ;;  %v2426_v31 = vld [vmem:[%s2311_s20 + $0x88] sm:$0xff]  }
  0x63   : > { %v2423_v30 = vld [vmem:[%s2311_s20 + $0x80] sm:$0xff]   ;;  %v593_v6 = vmul.f32 %v1615_v37, %v2305_v49 }
  0x64   : > { %995 = vperm.xlu1 %2020, %v846_v34   ;;  %992 = vperm.xlu0 %2019, %v845_v35   ;;  %v1702_v34 = vunpack.c.l.bf16 %v1959_v13  ;;  %v643_v35 = vadd.f32 %v2320_v56, %v582_v18  ;;  %v749_v4 = vmax.f32 %v2360_v46, 0.0  ;;  %v752_v5 = vmax.f32 %v2362_v47, 0.0 }
  0x65   : > { %v753_v13 = vmax.f32 %v2373_v57, 0.0  ;;  %v1723_v46 = vunpack.c.h.bf16 %v2399_v22  ;;  %v1731_v57 = vunpack.c.h.bf16 %v2405_v24 }
  0x66   : > { %v2366_v51 = vadd.f32 %v1702_v34, %v643_v35  ;;  %v2435_v34 = vld [vmem:[%s2311_s20 + $0xa0] sm:$0xff]   ;;  %v2438_v35 = vld [vmem:[%s2311_s20 + $0xa8] sm:$0xff]  }
  0x68   : > { %1001 = vperm.xlu1 %2020, %v848_v38   ;;  %998 = vperm.xlu0 %2019, %v847_v39   ;;  %v2351_v38 = vadd.f32 %v1695_v9, %v640_v20  ;;  %v2353_v39 = vadd.f32 %v1691_v16, %v638_v21  ;;  %v751_v8 = vmax.f32 %v2366_v51, 0.0  ;;  %v754_v9 = vmax.f32 %v2368_v52, 0.0  ;;  %v2396_v20 = vld [vmem:[%s2311_s20 + $0x38] sm:$0xff]  }
  0x69   : > { %v1610_v21 = vunpack.c.l.bf16 %v1937_v1  ;;  %v2473_v1 = vadd.f32 %v1714_v11, %v649_v36  ;;  %v1727_v51 = vunpack.c.h.bf16 %v2402_v23 }
  0x6a   : > { %v748_v54 = vmax.f32 %v2351_v38, 0.0  ;;  %v746_v55 = vmax.f32 %v2353_v39, 0.0  ;;  %v2443_v38 = vld [vmem:[%s2311_s20 + $0xb0] sm:$0xff]   ;;  %v2446_v39 = vld [vmem:[%s2311_s20 + $0xb8] sm:$0xff]  }
  0x6c   : > { %1007 = vperm.xlu1 %2020, %v850_v42   ;;  %1004 = vperm.xlu0 %2019, %v849_v43   ;;  %v587_v42 = vmul.f32 %v1603_v26, %v2305_v49  ;;  %v586_v43 = vmul.f32 %v1602_v27, %v2305_v49  ;;  %v2411_v26 = vld [vmem:[%s2311_s20 + $0x60] sm:$0xff]   ;;  %v2414_v27 = vld [vmem:[%s2311_s20 + $0x68] sm:$0xff]  }
  0x6e   : > { %v648_v61 = vadd.f32 %v2320_v56, %v587_v42  ;;  %v647_v63 = vadd.f32 %v2320_v56, %v586_v43 }
  0x70   : > { %1013 = vperm.xlu1 %2020, %v852_v44   ;;  %1010 = vperm.xlu0 %2019, %v851_v45   ;;  %v1607_v44 = vunpack.c.h.bf16 %v1936_v33  ;;  %v2358_v45 = vadd.f32 %v1699_v17, %v642_v29  ;;  %v2390_v17 = vadd.f32 %v1711_v58, %v648_v61  ;;  %v2392_v18 = vadd.f32 %v1710_v62, %v647_v63  ;;  %v2420_v29 = vld [vmem:[%s2311_s20 + $0x78] sm:$0xff]  }
  0x71   : > { %v2432_v33 = vld [vmem:[%s2311_s20 + $0x98] sm:$0xff]   ;;  %v1718_v62 = vunpack.c.l.bf16 %v2396_v20  ;;  %v590_v63 = vmul.f32 %v1610_v21, %v2305_v49 }
  0x72   : > { %v589_v0 = vmul.f32 %v1607_v44, %v2305_v49  ;;  %v750_v2 = vmax.f32 %v2358_v45, 0.0 }
  0x73   : > { %v651_v45 = vadd.f32 %v2320_v56, %v590_v63 }
  0x74   : > { %v650_v19 = vadd.f32 %v2320_v56, %v589_v0  ;;  %v1614_v0 = vunpack.c.l.bf16 %v2387_v12  ;;  %v755_v12 = vmax.f32 %v2392_v18, 0.0 }
  0x87   : > { %v861_v59 = vpop.permute.xlu1 %860  ;;  %v855_v60 = vpop.permute.xlu0 %854 }
  0x88   : > { %vm1017_vm6 = vcmp.eq.s32.totalorder %v861_v59, 1  ;;  %vm1015_vm7 = vcmp.eq.s32.totalorder %v855_v60, 1  ;;  %v1719_v59 = vunpack.c.h.bf16 %v2396_v20  ;;  %v2468_v60 = vadd.f32 %v1715_v10, %v650_v19  ;;  %v1940_v20 = vld [vmem:[%s2298_s14 + $0x50] sm:$0xff]  }
  0x89   : > { %v1071_v41 = vsel %vm1017_vm6, %v747_v3, 0.0  ;;  %v1069_v42 = vsel %vm1015_vm7, %v745_v50, 0.0  ;;  %v591_v3 = vmul.f32 %v1611_v14, %v2305_v49  ;;  %v1939_v50 = vld [vmem:[%s2298_s14 + $0x48] sm:$0xff]   ;;  %v756_v14 = vmax.f32 %v2390_v17, 0.0 }
  0x8a   : > { %v1618_v19 = vunpack.c.l.bf16 %v1939_v50  ;;  %v758_v37 = vmax.f32 %v2468_v60, 0.0  ;;  %v654_v17 = vadd.f32 %v2320_v56, %v593_v6  ;;  %v1734_v60 = vunpack.c.l.bf16 %v2408_v25 }
  0x8b   : > { %v864_v15 = vpop.permute.xlu1 %863  ;;  %v858_v16 = vpop.permute.xlu0 %857  ;;  %v652_v11 = vadd.f32 %v2320_v56, %v591_v3 }
  0x8c   : > { %vm1018_vm8 = vcmp.eq.s32.totalorder %v864_v15, 1  ;;  %vm1016_vm9 = vcmp.eq.s32.totalorder %v858_v16, 1  ;;  %v1619_v15 = vunpack.c.h.bf16 %v1939_v50  ;;  %v594_v3 = vmul.f32 %v1618_v19, %v2305_v49 }
  0x8d   : > { %v1072_v43 = vsel %vm1018_vm8, %v748_v54, 0.0  ;;  %v1070_v44 = vsel %vm1016_vm9, %v746_v55, 0.0  ;;  %v2507_v63 = vadd.f32 %v1723_v46, %v654_v17 }
  0x8e   : > { %v1804_v58 = vpack.c.bf16 %v1072_v43, %v1071_v41  ;;  %v1799_v61 = vpack.c.bf16 %v1070_v44, %v1069_v42  ;;  %v595_v42 = vmul.f32 %v1619_v15, %v2305_v49  ;;  %v1623_v43 = vunpack.c.h.bf16 %v1940_v20 }
  0x8f   : > { %v870_v54 = vpop.permute.xlu1 %869  ;;  %v867_v55 = vpop.permute.xlu0 %866  ;;  %v655_v15 = vadd.f32 %v2320_v56, %v594_v3 }
  0x90   : > { %vm1020_vm10 = vcmp.eq.s32.totalorder %v870_v54, 1  ;;  %vm1019_vm11 = vcmp.eq.s32.totalorder %v867_v55, 1  ;;  %1800 = vst [vmem:[%s2460_s25] sm:$0xff] %v1799_v61   ;;  %1983 = vst [vmem:[%s2460_s25 + $0x8] sm:$0xff] %v1804_v58   ;;  %v2498_v58 = vadd.f32 %v1719_v59, %v652_v11  ;;  %v1722_v61 = vunpack.c.l.bf16 %v2399_v22 }
  0x91   : > { %v1074_v7 = vsel %vm1020_vm10, %v750_v2, 0.0  ;;  %v1073_v10 = vsel %vm1019_vm11, %v749_v4, 0.0  ;;  %v592_v2 = vmul.f32 %v1614_v0, %v2305_v49  ;;  %v757_v4 = vmax.f32 %v2473_v1, 0.0 }
  0x92   : > { %v1809_v16 = vpack.c.bf16 %v1074_v7, %v1073_v10  ;;  %v2502_v55 = vadd.f32 %v1718_v62, %v651_v45  ;;  %v1726_v59 = vunpack.c.l.bf16 %v2402_v23  ;;  %v656_v0 = vadd.f32 %v2320_v56, %v595_v42 }
  0x93   : > { %v876_v21 = vpop.permute.xlu1 %875  ;;  %v873_v36 = vpop.permute.xlu0 %872  ;;  %v653_v47 = vadd.f32 %v2320_v56, %v592_v2  ;;  %v597_v6 = vmul.f32 %v1623_v43, %v2305_v49  ;;  %v760_v10 = vmax.f32 %v2498_v58, 0.0 }
  0x94   : > { %vm1022_vm12 = vcmp.eq.s32.totalorder %v876_v21, 1  ;;  %vm1021_vm13 = vcmp.eq.s32.totalorder %v873_v36, 1  ;;  %1984 = vst [vmem:[%s2460_s25 + $0x10] sm:$0xff] %v1809_v16   ;;  %v759_v19 = vmax.f32 %v2502_v55, 0.0  ;;  %v2527_v46 = vadd.f32 %v1727_v51, %v656_v0 }
  0x95   : > { %v1076_v18 = vsel %vm1022_vm12, %v752_v5, 0.0  ;;  %v1075_v41 = vsel %vm1021_vm13, %v751_v8, 0.0  ;;  %v1622_v5 = vunpack.c.l.bf16 %v1940_v20  ;;  %v1941_v8 = vld [vmem:[%s2298_s14 + $0x58] sm:$0xff]   ;;  %v2520_v52 = vadd.f32 %v1722_v61, %v653_v47 }
  0x96   : > { %v1814_v44 = vpack.c.bf16 %v1076_v18, %v1075_v41  ;;  %v1627_v16 = vunpack.c.h.bf16 %v1941_v8  ;;  %v762_v20 = vmax.f32 %v2507_v63, 0.0  ;;  %v1626_v21 = vunpack.c.l.bf16 %v1941_v8 }
  0x97   : > { %v882_v50 = vpop.permute.xlu1 %881  ;;  %v879_v54 = vpop.permute.xlu0 %878  ;;  %v658_v2 = vadd.f32 %v2320_v56, %v597_v6  ;;  %v2530_v18 = vadd.f32 %v1726_v59, %v655_v15  ;;  %v761_v58 = vmax.f32 %v2520_v52, 0.0  ;;  %v1730_v61 = vunpack.c.l.bf16 %v2405_v24 }
  0x98   : > { %vm1024_vm14 = vcmp.eq.s32.totalorder %v882_v50, 1  ;;  %vm1023_vm15 = vcmp.eq.s32.totalorder %v879_v54, 1  ;;  %1985 = vst [vmem:[%s2460_s25 + $0x18] sm:$0xff] %v1814_v44   ;;  %v599_v41 = vmul.f32 %v1627_v16, %v2305_v49  ;;  %v598_v3 = vmul.f32 %v1626_v21, %v2305_v49  ;;  %v1943_v54 = vld [vmem:[%s2298_s14 + $0x68] sm:$0xff]  }
  0x99   : > { %v1078_v22 = vsel %vm1024_vm14, %v754_v9, 0.0  ;;  %v1077_v62 = vsel %vm1023_vm15, %v753_v13, 0.0  ;;  %v596_v9 = vmul.f32 %v1622_v5, %v2305_v49  ;;  %v1942_v13 = vld [vmem:[%s2298_s14 + $0x60] sm:$0xff]   ;;  %v764_v24 = vmax.f32 %v2527_v46, 0.0 }
  0x9a   : > { %v1819_v7 = vpack.c.bf16 %v1078_v22, %v1077_v62  ;;  %v1631_v42 = vunpack.c.h.bf16 %v1942_v13  ;;  %v1630_v50 = vunpack.c.l.bf16 %v1942_v13  ;;  %v2545_v51 = vadd.f32 %v1731_v57, %v658_v2 }
  0x9b   : > { %v888_v23 = vpop.permute.xlu1 %887  ;;  %v885_v11 = vpop.permute.xlu0 %884  ;;  %v763_v8 = vmax.f32 %v2530_v18, 0.0  ;;  %v660_v59 = vadd.f32 %v2320_v56, %v599_v41  ;;  %v1635_v1 = vunpack.c.h.bf16 %v1943_v54  ;;  %v1739_v52 = vunpack.c.h.bf16 %v2411_v26  ;;  %v1945_v18 = vld [vmem:[%s2298_s14 + $0x78] sm:$0xff]  }
  0x9c   : > { %vm1026_vm0 = vcmp.eq.s32.totalorder %v888_v23, 1  ;;  %vm1025_vm1 = vcmp.eq.s32.totalorder %v885_v11, 1  ;;  %1986 = vst [vmem:[%s2460_s25 + $0x20] sm:$0xff] %v1819_v7   ;;  %v601_v22 = vmul.f32 %v1631_v42, %v2305_v49  ;;  %v659_v7 = vadd.f32 %v2320_v56, %v598_v3 }
  0x9d   : > { %v1080_v36 = vsel %vm1026_vm0, %v756_v14, 0.0  ;;  %v1079_v45 = vsel %vm1025_vm1, %v755_v12, 0.0  ;;  %v657_v14 = vadd.f32 %v2320_v56, %v596_v9  ;;  %v1735_v12 = vunpack.c.h.bf16 %v2408_v25 }
  0x9e   : > { %v1824_v17 = vpack.c.bf16 %v1080_v36, %v1079_v45  ;;  %v600_v15 = vmul.f32 %v1630_v50, %v2305_v49  ;;  %v766_v11 = vmax.f32 %v2545_v51, 0.0  ;;  %v662_v9 = vadd.f32 %v2320_v56, %v601_v22  ;;  %v1946_v51 = vld [vmem:[%s2298_s14 + $0x80] sm:$0xff]  }
  0x9f   : > { %v894_v43 = vpop.permute.xlu1 %893  ;;  %v891_v44 = vpop.permute.xlu0 %890  ;;  %v2550_v6 = vadd.f32 %v1730_v61, %v657_v14  ;;  %v2559_v25 = vadd.f32 %v1735_v12, %v660_v59  ;;  %v1738_v46 = vunpack.c.l.bf16 %v2411_v26  ;;  %v2566_v2 = vadd.f32 %v1734_v60, %v659_v7 }
  0xa0   : > { %vm1028_vm2 = vcmp.eq.s32.totalorder %v894_v43, 1  ;;  %vm1027_vm3 = vcmp.eq.s32.totalorder %v891_v44, 1  ;;  %1987 = vst [vmem:[%s2460_s25 + $0x28] sm:$0xff] %v1824_v17   ;;  %v661_v17 = vadd.f32 %v2320_v56, %v600_v15  ;;  %v1743_v43 = vunpack.c.h.bf16 %v2414_v27 }
  0xa1   : > { %v1082_v55 = vsel %vm1028_vm2, %v758_v37, 0.0  ;;  %v1081_v47 = vsel %vm1027_vm3, %v757_v4, 0.0  ;;  %v1634_v37 = vunpack.c.l.bf16 %v1943_v54  ;;  %v1944_v4 = vld [vmem:[%s2298_s14 + $0x70] sm:$0xff]   ;;  %v765_v45 = vmax.f32 %v2550_v6, 0.0 }
  0xa2   : > { %v1829_v5 = vpack.c.bf16 %v1082_v55, %v1081_v47  ;;  %v1639_v13 = vunpack.c.h.bf16 %v1944_v4  ;;  %v1638_v26 = vunpack.c.l.bf16 %v1944_v4  ;;  %v768_v61 = vmax.f32 %v2559_v25, 0.0 }
  0xa3   : > { %v900_v62 = vpop.permute.xlu1 %899  ;;  %v897_v0 = vpop.permute.xlu0 %896  ;;  %v2575_v14 = vadd.f32 %v1739_v52, %v662_v9  ;;  %v1742_v63 = vunpack.c.l.bf16 %v2414_v27  ;;  %v767_v55 = vmax.f32 %v2566_v2, 0.0  ;;  %v2582_v47 = vadd.f32 %v1738_v46, %v661_v17  ;;  %v1947_v9 = vld [vmem:[%s2298_s14 + $0x88] sm:$0xff]  }
  0xa4   : > { %vm1030_vm4 = vcmp.eq.s32.totalorder %v900_v62, 1  ;;  %vm1029_vm5 = vcmp.eq.s32.totalorder %v897_v0, 1  ;;  %1988 = vst [vmem:[%s2460_s25 + $0x30] sm:$0xff] %v1829_v5   ;;  %v605_v12 = vmul.f32 %v1639_v13, %v2305_v49  ;;  %v1747_v22 = vunpack.c.h.bf16 %v2417_v28 }
  0xa5   : > { %v1084_v16 = vsel %vm1030_vm4, %v760_v10, 0.0  ;;  %v1083_v23 = vsel %vm1029_vm5, %v759_v19, 0.0  ;;  %v603_v10 = vmul.f32 %v1635_v1, %v2305_v49  ;;  %v602_v19 = vmul.f32 %v1634_v37, %v2305_v49 }
  0xa6   : > { %v1834_v57 = vpack.c.bf16 %v1084_v16, %v1083_v23  ;;  %v604_v62 = vmul.f32 %v1638_v26, %v2305_v49  ;;  %v770_v27 = vmax.f32 %v2575_v14, 0.0  ;;  %v666_v6 = vadd.f32 %v2320_v56, %v605_v12 }
  0xa7   : > { %v906_v21 = vpop.permute.xlu1 %905  ;;  %v903_v36 = vpop.permute.xlu0 %902  ;;  %v664_v54 = vadd.f32 %v2320_v56, %v603_v10  ;;  %v1642_v60 = vunpack.c.l.bf16 %v1945_v18  ;;  %v769_v15 = vmax.f32 %v2582_v47, 0.0  ;;  %v1746_v16 = vunpack.c.l.bf16 %v2417_v28 }
  0xa8   : > { %vm1032_vm6 = vcmp.eq.s32.totalorder %v906_v21, 1  ;;  %vm1031_vm7 = vcmp.eq.s32.totalorder %v903_v36, 1  ;;  %1989 = vst [vmem:[%s2460_s25 + $0x38] sm:$0xff] %v1834_v57   ;;  %v665_v57 = vadd.f32 %v2320_v56, %v604_v62  ;;  %v1751_v25 = vunpack.c.h.bf16 %v2420_v29  ;;  %v1949_v62 = vld [vmem:[%s2298_s14 + $0x98] sm:$0xff]  }
  0xa9   : > { %v1086_v41 = vsel %vm1032_vm6, %v762_v20, 0.0  ;;  %v1085_v42 = vsel %vm1031_vm7, %v761_v58, 0.0  ;;  %v663_v20 = vadd.f32 %v2320_v56, %v602_v19  ;;  %v1643_v58 = vunpack.c.h.bf16 %v1945_v18 }
  0xaa   : > { %v1839_v44 = vpack.c.bf16 %v1086_v41, %v1085_v42  ;;  %v2590_v4 = vadd.f32 %v1743_v43, %v664_v54  ;;  %v2601_v21 = vadd.f32 %v1747_v22, %v666_v6  ;;  %v606_v36 = vmul.f32 %v1642_v60, %v2305_v49  ;;  %v1948_v41 = vld [vmem:[%s2298_s14 + $0x90] sm:$0xff]  }
  0xab   : > { %v912_v3 = vpop.permute.xlu1 %911  ;;  %v909_v50 = vpop.permute.xlu0 %908  ;;  %v2592_v7 = vadd.f32 %v1742_v63, %v663_v20  ;;  %v1646_v46 = vunpack.c.l.bf16 %v1946_v51  ;;  %v1750_v17 = vunpack.c.l.bf16 %v2420_v29  ;;  %v1651_v18 = vunpack.c.h.bf16 %v1947_v9 }
  0xac   : > { %vm1034_vm8 = vcmp.eq.s32.totalorder %v912_v3, 1  ;;  %vm1033_vm9 = vcmp.eq.s32.totalorder %v909_v50, 1  ;;  %1990 = vst [vmem:[%s2460_s25 + $0x40] sm:$0xff] %v1839_v44   ;;  %v772_v28 = vmax.f32 %v2590_v4, 0.0  ;;  %v719_v26 = vadd.f32 %v1746_v16, %v665_v57 }
  0xad   : > { %v1088_v5 = vsel %vm1034_vm8, %v764_v24, 0.0  ;;  %v1087_v59 = vsel %vm1033_vm9, %v763_v8, 0.0  ;;  %v607_v24 = vmul.f32 %v1643_v58, %v2305_v49  ;;  %v1647_v8 = vunpack.c.h.bf16 %v1946_v51 }
  0xae   : > { %v1844_v0 = vpack.c.bf16 %v1088_v5, %v1087_v59  ;;  %v1650_v44 = vunpack.c.l.bf16 %v1947_v9  ;;  %v774_v12 = vmax.f32 %v2601_v21, 0.0  ;;  %v667_v3 = vadd.f32 %v2320_v56, %v606_v36  ;;  %v1950_v36 = vld [vmem:[%s2298_s14 + $0xa0] sm:$0xff]  }
  0xaf   : > { %v918_v1 = vpop.permute.xlu1 %917  ;;  %v915_v37 = vpop.permute.xlu0 %914  ;;  %v609_v2 = vmul.f32 %v1647_v8, %v2305_v49  ;;  %v608_v50 = vmul.f32 %v1646_v46, %v2305_v49  ;;  %v1755_v29 = vunpack.c.h.bf16 %v2423_v30  ;;  %v1655_v58 = vunpack.c.h.bf16 %v1948_v41 }
  0xb0   : > { %vm1036_vm10 = vcmp.eq.s32.totalorder %v918_v1, 1  ;;  %vm1035_vm11 = vcmp.eq.s32.totalorder %v915_v37, 1  ;;  %1991 = vst [vmem:[%s2460_s25 + $0x48] sm:$0xff] %v1844_v0   ;;  %v611_v47 = vmul.f32 %v1651_v18, %v2305_v49  ;;  %v773_v59 = vmax.f32 %v719_v26, 0.0 }
  0xb1   : > { %v1090_v23 = vsel %vm1036_vm10, %v766_v11, 0.0  ;;  %v1089_v52 = vsel %vm1035_vm11, %v765_v45, 0.0  ;;  %v771_v11 = vmax.f32 %v2592_v7, 0.0  ;;  %v668_v45 = vadd.f32 %v2320_v56, %v607_v24 }
  0xb2   : > { %v1849_v13 = vpack.c.bf16 %v1090_v23, %v1089_v52  ;;  %v610_v22 = vmul.f32 %v1650_v44, %v2305_v49  ;;  %v721_v6 = vadd.f32 %v1750_v17, %v667_v3  ;;  %v669_v60 = vadd.f32 %v2320_v56, %v608_v50 }
  0xb3   : > { %v924_v10 = vpop.permute.xlu1 %923  ;;  %v921_v19 = vpop.permute.xlu0 %920  ;;  %v2614_v20 = vadd.f32 %v1751_v25, %v668_v45  ;;  %v1654_v1 = vunpack.c.l.bf16 %v1948_v41  ;;  %v613_v24 = vmul.f32 %v1655_v58, %v2305_v49  ;;  %v672_v8 = vadd.f32 %v2320_v56, %v611_v47 }
  0xb4   : > { %vm1038_vm12 = vcmp.eq.s32.totalorder %v924_v10, 1  ;;  %vm1037_vm13 = vcmp.eq.s32.totalorder %v921_v19, 1  ;;  %1992 = vst [vmem:[%s2460_s25 + $0x50] sm:$0xff] %v1849_v13   ;;  %v1758_v52 = vunpack.c.l.bf16 %v2426_v31  ;;  %v671_v57 = vadd.f32 %v2320_v56, %v610_v22 }
  0xb5   : > { %v1092_v42 = vsel %vm1038_vm12, %v768_v61, 0.0  ;;  %v1091_v43 = vsel %vm1037_vm13, %v767_v55, 0.0  ;;  %v670_v61 = vadd.f32 %v2320_v56, %v609_v2  ;;  %v1754_v55 = vunpack.c.l.bf16 %v2423_v30 }
  0xb6   : > { %v1854_v14 = vpack.c.bf16 %v1092_v42, %v1091_v43  ;;  %v776_v7 = vmax.f32 %v2614_v20, 0.0  ;;  %v775_v9 = vmax.f32 %v721_v6, 0.0  ;;  %v612_v21 = vmul.f32 %v1654_v1, %v2305_v49 }
  0xb7   : > { %v930_v54 = vpop.permute.xlu1 %929  ;;  %v927_v63 = vpop.permute.xlu0 %926  ;;  %v2625_v30 = vadd.f32 %v1755_v29, %v670_v61  ;;  %v723_v13 = vadd.f32 %v1754_v55, %v669_v60  ;;  %v1763_v45 = vunpack.c.h.bf16 %v2429_v32  ;;  %v725_v41 = vadd.f32 %v1758_v52, %v671_v57  ;;  %v1951_v29 = vld [vmem:[%s2298_s14 + $0xa8] sm:$0xff]  }
  0xb8   : > { %vm1040_vm14 = vcmp.eq.s32.totalorder %v930_v54, 1  ;;  %vm1039_vm15 = vcmp.eq.s32.totalorder %v927_v63, 1  ;;  %1993 = vst [vmem:[%s2460_s25 + $0x58] sm:$0xff] %v1854_v14   ;;  %v1663_v42 = vunpack.c.h.bf16 %v1950_v36  ;;  %v1762_v44 = vunpack.c.l.bf16 %v2429_v32 }
  0xb9   : > { %v1094_v51 = vsel %vm1040_vm14, %v770_v27, 0.0  ;;  %v1093_v5 = vsel %vm1039_vm15, %v769_v15, 0.0  ;;  %v1759_v27 = vunpack.c.h.bf16 %v2426_v31  ;;  %v1659_v15 = vunpack.c.h.bf16 %v1949_v62 }
  0xba   : > { %v1859_v0 = vpack.c.bf16 %v1094_v51, %v1093_v5  ;;  %v778_v19 = vmax.f32 %v2625_v30, 0.0  ;;  %v777_v26 = vmax.f32 %v723_v13, 0.0  ;;  %v673_v14 = vadd.f32 %v2320_v56, %v612_v21 }
  0xbb   : > { %v936_v37 = vpop.permute.xlu1 %935  ;;  %v933_v4 = vpop.permute.xlu0 %932  ;;  %v2638_v31 = vadd.f32 %v1759_v27, %v672_v8  ;;  %v615_v2 = vmul.f32 %v1659_v15, %v2305_v49  ;;  %v1767_v63 = vunpack.c.h.bf16 %v2432_v33  ;;  %v779_v47 = vmax.f32 %v725_v41, 0.0 }
  0xbc   : > { %vm1042_vm0 = vcmp.eq.s32.totalorder %v936_v37, 1  ;;  %vm1041_vm1 = vcmp.eq.s32.totalorder %v933_v4, 1  ;;  %1994 = vst [vmem:[%s2460_s25 + $0x60] sm:$0xff] %v1859_v0   ;;  %v617_v51 = vmul.f32 %v1663_v42, %v2305_v49  ;;  %v1766_v22 = vunpack.c.l.bf16 %v2432_v33  ;;  %v1952_v0 = vld [vmem:[%s2298_s14 + $0xb0] sm:$0xff]  }
  0xbd   : > { %v1096_v16 = vsel %vm1042_vm0, %v772_v28, 0.0  ;;  %v1095_v23 = vsel %vm1041_vm1, %v771_v11, 0.0  ;;  %v674_v28 = vadd.f32 %v2320_v56, %v613_v24  ;;  %v1658_v11 = vunpack.c.l.bf16 %v1949_v62 }
  0xbe   : > { %v1864_v25 = vpack.c.bf16 %v1096_v16, %v1095_v23  ;;  %v780_v61 = vmax.f32 %v2638_v31, 0.0  ;;  %v676_v58 = vadd.f32 %v2320_v56, %v615_v2  ;;  %v1667_v62 = vunpack.c.h.bf16 %v1951_v29 }
  0xbf   : > { %v942_v46 = vpop.permute.xlu1 %941  ;;  %v939_v10 = vpop.permute.xlu0 %938  ;;  %v2644_v54 = vadd.f32 %v1763_v45, %v674_v28  ;;  %v614_v20 = vmul.f32 %v1658_v11, %v2305_v49  ;;  %v1771_v4 = vunpack.c.h.bf16 %v2435_v34  ;;  %v1666_v27 = vunpack.c.l.bf16 %v1951_v29 }
  0xc0   : > { %vm1044_vm2 = vcmp.eq.s32.totalorder %v942_v46, 1  ;;  %vm1043_vm3 = vcmp.eq.s32.totalorder %v939_v10, 1  ;;  %1995 = vst [vmem:[%s2460_s25 + $0x68] sm:$0xff] %v1864_v25   ;;  %v2659_v30 = vadd.f32 %v1767_v63, %v676_v58  ;;  %v678_v8 = vadd.f32 %v2320_v56, %v617_v51  ;;  %v1953_v10 = vld [vmem:[%s2298_s14 + $0xb8] sm:$0xff]   ;;  %v1954_v63 = vld [vmem:[%s2298_s14 + $0xc0] sm:$0xff]  }
  0xc1   : > { %v1098_v17 = vsel %vm1044_vm2, %v774_v12, 0.0  ;;  %v1097_v18 = vsel %vm1043_vm3, %v773_v59, 0.0  ;;  %v1662_v12 = vunpack.c.l.bf16 %v1950_v36  ;;  %v727_v59 = vadd.f32 %v1762_v44, %v673_v14 }
  0xc2   : > { %v1869_v43 = vpack.c.bf16 %v1098_v17, %v1097_v18  ;;  %v782_v1 = vmax.f32 %v2644_v54, 0.0  ;;  %v675_v37 = vadd.f32 %v2320_v56, %v614_v20  ;;  %v1671_v15 = vunpack.c.h.bf16 %v1952_v0 }
  0xc3   : > { %v948_v3 = vpop.permute.xlu1 %947  ;;  %v945_v50 = vpop.permute.xlu0 %944  ;;  %v781_v23 = vmax.f32 %v727_v59, 0.0  ;;  %v1770_v52 = vunpack.c.l.bf16 %v2435_v34  ;;  %v619_v57 = vmul.f32 %v1667_v62, %v2305_v49  ;;  %v1775_v36 = vunpack.c.h.bf16 %v2438_v35 }
  0xc4   : > { %vm1046_vm4 = vcmp.eq.s32.totalorder %v948_v3, 1  ;;  %vm1045_vm5 = vcmp.eq.s32.totalorder %v945_v50, 1  ;;  %1996 = vst [vmem:[%s2460_s25 + $0x70] sm:$0xff] %v1869_v43   ;;  %v729_v13 = vadd.f32 %v1766_v22, %v675_v37  ;;  %v1670_v46 = vunpack.c.l.bf16 %v1952_v0 }
  0xc5   : > { %v1100_v32 = vsel %vm1046_vm4, %v776_v7, 0.0  ;;  %v1099_v55 = vsel %vm1045_vm5, %v775_v9, 0.0  ;;  %v616_v7 = vmul.f32 %v1662_v12, %v2305_v49  ;;  %v618_v45 = vmul.f32 %v1666_v27, %v2305_v49 }
  0xc6   : > { %v1874_v5 = vpack.c.bf16 %v1100_v32, %v1099_v55  ;;  %v732_v11 = vadd.f32 %v1771_v4, %v678_v8  ;;  %v621_v31 = vmul.f32 %v1671_v15, %v2305_v49  ;;  %v680_v17 = vadd.f32 %v2320_v56, %v619_v57 }
  0xc7   : > { %v954_v6 = vpop.permute.xlu1 %953  ;;  %v951_v60 = vpop.permute.xlu0 %950  ;;  %v677_v21 = vadd.f32 %v2320_v56, %v616_v7  ;;  %v1774_v18 = vunpack.c.l.bf16 %v2438_v35  ;;  %v1675_v41 = vunpack.c.h.bf16 %v1953_v10  ;;  %v620_v14 = vmul.f32 %v1670_v46, %v2305_v49 }
  0xc8   : > { %vm1048_vm6 = vcmp.eq.s32.totalorder %v954_v6, 1  ;;  %vm1047_vm7 = vcmp.eq.s32.totalorder %v951_v60, 1  ;;  %1997 = vst [vmem:[%s2460_s25 + $0x78] sm:$0xff] %v1874_v5   ;;  %v1674_v3 = vunpack.c.l.bf16 %v1953_v10  ;;  %v679_v50 = vadd.f32 %v2320_v56, %v618_v45  ;;  %v1955_v60 = vld [vmem:[%s2298_s14 + $0xc8] sm:$0xff]  }
  0xc9   : > { %v1102_v33 = vsel %vm1048_vm6, %v778_v19, 0.0  ;;  %v1101_v24 = vsel %vm1047_vm7, %v777_v26, 0.0  ;;  %v784_v19 = vmax.f32 %v2659_v30, 0.0  ;;  %v783_v26 = vmax.f32 %v729_v13, 0.0 }
  0xca   : > { %v1879_v16 = vpack.c.bf16 %v1102_v33, %v1101_v24  ;;  %v731_v44 = vadd.f32 %v1770_v52, %v677_v21  ;;  %v1779_v54 = vunpack.c.h.bf16 %v2443_v38  ;;  %v786_v29 = vmax.f32 %v732_v11, 0.0 }
  0xcb   : > { %v960_v25 = vpop.permute.xlu1 %959  ;;  %v957_v9 = vpop.permute.xlu0 %956  ;;  %v682_v35 = vadd.f32 %v2320_v56, %v621_v31  ;;  %v734_v58 = vadd.f32 %v1775_v36, %v680_v17  ;;  %v1778_v32 = vunpack.c.l.bf16 %v2443_v38  ;;  %v623_v55 = vmul.f32 %v1675_v41, %v2305_v49 }
  0xcc   : > { %vm1050_vm8 = vcmp.eq.s32.totalorder %v960_v25, 1  ;;  %vm1049_vm9 = vcmp.eq.s32.totalorder %v957_v9, 1  ;;  %1998 = vst [vmem:[%s2460_s25 + $0x80] sm:$0xff] %v1879_v16   ;;  %v785_v5 = vmax.f32 %v731_v44, 0.0  ;;  %v681_v59 = vadd.f32 %v2320_v56, %v620_v14 }
  0xcd   : > { %v1104_v28 = vsel %vm1050_vm8, %v780_v61, 0.0  ;;  %v1103_v34 = vsel %vm1049_vm9, %v779_v47, 0.0  ;;  %v622_v22 = vmul.f32 %v1674_v3, %v2305_v49  ;;  %v1679_v62 = vunpack.c.h.bf16 %v1954_v63 }
  0xce   : > { %v1884_v2 = vpack.c.bf16 %v1104_v28, %v1103_v34  ;;  %v733_v0 = vadd.f32 %v1774_v18, %v679_v50  ;;  %v1678_v6 = vunpack.c.l.bf16 %v1954_v63  ;;  %v736_v4 = vadd.f32 %v1779_v54, %v682_v35  ;;  %v2022_v18 = vld [vmem:[%s2720_s3] ss:$0 sm:$0xff] }
  0xcf   : > { %v966_v42 = vpop.permute.xlu1 %965  ;;  %v963_v43 = vpop.permute.xlu0 %962  ;;  %v1783_v38 = vunpack.c.h.bf16 %v2446_v39  ;;  %v788_v30 = vmax.f32 %v734_v58, 0.0  ;;  %v684_v27 = vadd.f32 %v2320_v56, %v623_v55  ;;  %v1782_v33 = vunpack.c.l.bf16 %v2446_v39  ;;  %v1956_v39 = vld [vmem:[%s2298_s14 + $0xd0] sm:$0xff]  }
  0xd0   : > { %vm1052_vm10 = vcmp.eq.s32.totalorder %v966_v42, 1  ;;  %vm1051_vm11 = vcmp.eq.s32.totalorder %v963_v43, 1  ;;  %1999 = vst [vmem:[%s2460_s25 + $0x88] sm:$0xff] %v1884_v2   ;;  %v735_v15 = vadd.f32 %v1778_v32, %v681_v59  ;;  %v683_v16 = vadd.f32 %v2320_v56, %v622_v22 }
  0xd1   : > { %v1106_v20 = vsel %vm1052_vm10, %v782_v1, 0.0  ;;  %v1105_v12 = vsel %vm1051_vm11, %v781_v23, 0.0  ;;  %v625_v23 = vmul.f32 %v1679_v62, %v2305_v49  ;;  %v1683_v52 = vunpack.c.h.bf16 %v1955_v60 }
  0xd2   : > { %v1889_v61 = vpack.c.bf16 %v1106_v20, %v1105_v12  ;;  %v787_v57 = vmax.f32 %v733_v0, 0.0  ;;  %v624_v25 = vmul.f32 %v1678_v6, %v2305_v49  ;;  %v790_v21 = vmax.f32 %v736_v4, 0.0  ;;  %v2021_v49 = vld [vmem:[%s2719_s2] ss:$0 sm:$0xff] }
  0xd3   : > { %v972_v47 = vpop.permute.xlu1 %971  ;;  %v969_v51 = vpop.permute.xlu0 %968  ;;  %v1682_v36 = vunpack.c.l.bf16 %v1955_v60  ;;  %v738_v10 = vadd.f32 %v1783_v38, %v684_v27  ;;  %v1786_v45 = vunpack.c.l.bf16 %v2449_v40  ;;  %v789_v11 = vmax.f32 %v735_v15, 0.0 }
  0xd4   : > { %vm1054_vm12 = vcmp.eq.s32.totalorder %v972_v47, 1  ;;  %vm1053_vm13 = vcmp.eq.s32.totalorder %v969_v51, 1  ;;  %2000 = vst [vmem:[%s2460_s25 + $0x90] sm:$0xff] %v1889_v61   ;;  %v737_v31 = vadd.f32 %v1782_v33, %v683_v16  ;;  %v686_v2 = vadd.f32 %v2320_v56, %v625_v23 }
  0xd5   : > { %v1108_v1 = vsel %vm1054_vm12, %v784_v19, 0.0  ;;  %v1107_v37 = vsel %vm1053_vm13, %v783_v26, 0.0  ;;  %v1787_v19 = vunpack.c.h.bf16 %v2449_v40  ;;  %v627_v17 = vmul.f32 %v2021_v49, %v1683_v52 }
  0xd6   : > { %v1894_v7 = vpack.c.bf16 %v1108_v1, %v1107_v37  ;;  %v685_v41 = vadd.f32 %v2022_v18, %v624_v25  ;;  %v1687_v42 = vunpack.c.h.bf16 %v1956_v39  ;;  %v626_v26 = vmul.f32 %v2021_v49, %v1682_v36 }
  0xd7   : > { %v978_v24 = vpop.permute.xlu1 %977  ;;  %v975_v8 = vpop.permute.xlu0 %974  ;;  %v1686_v44 = vunpack.c.l.bf16 %v1956_v39  ;;  %v792_v14 = vmax.f32 %v738_v10, 0.0  ;;  %v1791_v3 = vunpack.c.h.bf16 %v2454_v48  ;;  %v791_v63 = vmax.f32 %v737_v31, 0.0 }
  0xd8   : > { %vm1056_vm14 = vcmp.eq.s32.totalorder %v978_v24, 1  ;;  %vm1055_vm15 = vcmp.eq.s32.totalorder %v975_v8, 1  ;;  %2001 = vst [vmem:[%s2460_s25 + $0x98] sm:$0xff] %v1894_v7   ;;  %v740_v20 = vadd.f32 %v1787_v19, %v686_v2  ;;  %v688_v12 = vadd.f32 %v2022_v18, %v627_v17 }
  0xd9   : > { %v1110_v9 = vsel %vm1056_vm14, %v786_v29, 0.0  ;;  %v1109_v13 = vsel %vm1055_vm15, %v785_v5, 0.0  ;;  %v1790_v29 = vunpack.c.l.bf16 %v2454_v48  ;;  %v739_v35 = vadd.f32 %v1786_v45, %v685_v41 }
  0xda   : > { %v1899_v46 = vpack.c.bf16 %v1110_v9, %v1109_v13  ;;  %v629_v61 = vmul.f32 %v2021_v49, %v1687_v42  ;;  %v687_v55 = vadd.f32 %v2022_v18, %v626_v26  ;;  %v628_v47 = vmul.f32 %v2021_v49, %v1686_v44 }
  0xdb   : > { %v984_v28 = vpop.permute.xlu1 %983  ;;  %v981_v34 = vpop.permute.xlu0 %980  ;;  %v794_v22 = vmax.f32 %v740_v20, 0.0  ;;  %v742_v62 = vadd.f32 %v1791_v3, %v688_v12  ;;  %v1795_v0 = vunpack.c.h.bf16 %v2463_v53  ;;  %v1794_v6 = vunpack.c.l.bf16 %v2463_v53 }
  0xdc   : > { %vm1058_vm0 = vcmp.eq.s32.totalorder %v984_v28, 1  ;;  %vm1057_vm1 = vcmp.eq.s32.totalorder %v981_v34, 1  ;;  %2002 = vst [vmem:[%s2460_s25 + $0xa0] sm:$0xff] %v1899_v46   ;;  %v793_v48 = vmax.f32 %v739_v35, 0.0  ;;  %v690_v60 = vadd.f32 %v2022_v18, %v629_v61 }
  0xdd   : > { %v1112_v40 = vsel %vm1058_vm0, %v788_v30, 0.0  ;;  %v1111_v43 = vsel %vm1057_vm1, %v787_v57, 0.0  ;;  %v741_v4 = vadd.f32 %v1790_v29, %v687_v55  ;;  %v689_v38 = vadd.f32 %v2022_v18, %v628_v47 }
  0xde   : > { %v1904_v56 = vpack.c.bf16 %v1112_v40, %v1111_v43  ;;  %v796_v33 = vmax.f32 %v742_v62, 0.0  ;;  %v744_v24 = vadd.f32 %v1795_v0, %v690_v60 }
  0xdf   : > { %v990_v50 = vpop.permute.xlu1 %989  ;;  %v987_v54 = vpop.permute.xlu0 %986  ;;  %v795_v15 = vmax.f32 %v741_v4, 0.0  ;;  %v743_v16 = vadd.f32 %v1794_v6, %v689_v38 }
  0xe0   : > { %vm1060_vm2 = vcmp.eq.s32.totalorder %v990_v50, 1  ;;  %vm1059_vm3 = vcmp.eq.s32.totalorder %v987_v54, 1  ;;  %2003 = vst [vmem:[%s2460_s25 + $0xa8] sm:$0xff] %v1904_v56   ;;  %v798_v13 = vmax.f32 %v744_v24, 0.0 }
  0xe1   : > { %v1114_v58 = vsel %vm1060_vm2, %v790_v21, 0.0  ;;  %v1113_v32 = vsel %vm1059_vm3, %v789_v11, 0.0  ;;  %v797_v21 = vmax.f32 %v743_v16, 0.0 }
  0xe2   : > { %v1909_v51 = vpack.c.bf16 %v1114_v58, %v1113_v32 }
  0xe3   : > { %v996_v5 = vpop.permute.xlu1 %995  ;;  %v993_v59 = vpop.permute.xlu0 %992 }
  0xe4   : > { %vm1062_vm4 = vcmp.eq.s32.totalorder %v996_v5, 1  ;;  %vm1061_vm5 = vcmp.eq.s32.totalorder %v993_v59, 1  ;;  %2004 = vst [vmem:[%s2460_s25 + $0xb0] sm:$0xff] %v1909_v51  }
  0xe5   : > { %v1116_v1 = vsel %vm1062_vm4, %v792_v14, 0.0  ;;  %v1115_v37 = vsel %vm1061_vm5, %v791_v63, 0.0 }
  0xe6   : > { %v1914_v7 = vpack.c.bf16 %v1116_v1, %v1115_v37 }
  0xe7   : > { %v1002_v30 = vpop.permute.xlu1 %1001  ;;  %v999_v27 = vpop.permute.xlu0 %998 }
  0xe8   : > { %vm1064_vm6 = vcmp.eq.s32.totalorder %v1002_v30, 1  ;;  %vm1063_vm7 = vcmp.eq.s32.totalorder %v999_v27, 1  ;;  %2005 = vst [vmem:[%s2460_s25 + $0xb8] sm:$0xff] %v1914_v7  }
  0xe9   : > { %v1118_v53 = vsel %vm1064_vm6, %v794_v22, 0.0  ;;  %v1117_v8 = vsel %vm1063_vm7, %v793_v48, 0.0 }
  0xea   : > { %v1919_v23 = vpack.c.bf16 %v1118_v53, %v1117_v8 }
  0xeb   : > { %v1008_v52 = vpop.permute.xlu1 %1007  ;;  %v1005_v57 = vpop.permute.xlu0 %1004 }
  0xec   : > { %vm1066_vm8 = vcmp.eq.s32.totalorder %v1008_v52, 1  ;;  %vm1065_vm9 = vcmp.eq.s32.totalorder %v1005_v57, 1  ;;  %2006 = vst [vmem:[%s2460_s25 + $0xc0] sm:$0xff] %v1919_v23  }
  0xed   : > { %v1120_v25 = vsel %vm1066_vm8, %v796_v33, 0.0  ;;  %v1119_v9 = vsel %vm1065_vm9, %v795_v15, 0.0 }
  0xee   : > { %v1924_v36 = vpack.c.bf16 %v1120_v25, %v1119_v9 }
  0xef   : > { %v1014_v39 = vpop.permute.xlu1 %1013  ;;  %v1011_v46 = vpop.permute.xlu0 %1010 }
  0xf0   : > { %vm1068_vm10 = vcmp.eq.s32.totalorder %v1014_v39, 1  ;;  %2007 = vst [vmem:[%s2460_s25 + $0xc8] sm:$0xff] %v1924_v36   ;;  %vm1067_vm11 = vcmp.eq.s32.totalorder %v1011_v46, 1 }
  0xf1   : > { %v1122_v10 = vsel %vm1068_vm10, %v798_v13, 0.0  ;;  %v1121_v19 = vsel %vm1067_vm11, %v797_v21, 0.0 }
  0xf2   : > { %v1929_v45 = vpack.c.bf16 %v1122_v10, %v1121_v19 }
  0xf4   : > { %2008 = vst [vmem:[%s2460_s25 + $0xd0] sm:$0xff] %v1929_v45  }
  0xf5 PF: > { %s15_s18 = sadd.s32 1, %s2029_s18  }
  0xf6   : > { %p12_p4 = scmp.ge.s32.totalorder %s15_s18, 4  }
  0xf8   :  { %14 = sbr.rel (!%p12_p4) target bundleno = 1 (0x1), region = 73 }

// kernel: resnet_forward.8
= control target key start
LH: loop header
LB: loop body
LE: loop exit
PB: predicated region body
PF: predicated region fallthrough
CT: control target
= control target key end

     0   :  { %s4186_s15 = smov 0   ;;  %s6836_s0 = inlined_call_operand.vmem [shape: bf16[2,18,24,128], index: 0, kind: input, shape index: {}]   ;;  %s6837_s1 = inlined_call_operand.vmem [shape: bf16[1152,128], index: 1, kind: input, shape index: {}]   ;;  %s6838_s2 = inlined_call_operand.vmem [shape: f32[432,1], index: 2, kind: input, shape index: {}]   ;;  %s6839_s3 = inlined_call_operand.vmem [shape: bf16[2,18,24,128], index: 3, kind: output, shape index: {0}]   ;;  %s6840_s4 = inlined_call_operand.vmem [shape: f32[2,2,128], index: 4, kind: output, shape index: {1}]  }
   0x1 LB: > { %s3278_s16 = sadd.s32 4294967295, %s4158_s15   ;;  %p3282_p0 = scmp.ge.s32.totalorder %s4158_s15, 1  ;;  %s4158_s15 = sphi %s4186_s15, %s15_s15  }
   0x2   : > { %p165_p1 = scmp.lt.s32.totalorder %s4158_s15, 3 }
   0x4   : > { %p166_p2 = pnand %p3282_p0, %p165_p1 }
   0x6   : > { %169 = sbr.rel (%p166_p2) target bundleno = 812 (0x32c), region = 32 }
   0xd   : > { %v3991_v0 = vld [vmem:[%s6837_s1] sm:$0xff]   ;;  %v6847_v1 = vmov 0   ;;  %v3993_v3 = vld [vmem:[%s6837_s1 + $0x8] sm:$0xff]   ;;  %v3995_v5 = vld [vmem:[%s6837_s1 + $0x10] sm:$0xff]   ;;  %p195_p3 = scmp.lt.s32.totalorder %s3278_s16, 1  ;;  %v462_v17 = vlaneseq }
   0xe   : > { %1369 = vmatprep.subr.bf16.mxu1 %v6847_v1  ;;  %1594 = vmatprep.subr.bf16.mxu0 %v6847_v1  ;;  %v3992_v2 = vld [vmem:[%s6837_s1 + $0x80] sm:$0xff]   ;;  %v3994_v4 = vld [vmem:[%s6837_s1 + $0x88] sm:$0xff]   ;;  %v3996_v6 = vld [vmem:[%s6837_s1 + $0x90] sm:$0xff]  }
   0xf   : > { %1370 = vmatpush1.bf16.msra.mxu1 %v3991_v0  ;;  %3989 = vset.pattern.permute.xlu0 %v6847_v1  ;;  %v3997_v7 = vld [vmem:[%s6837_s1 + $0x18] sm:$0xff]   ;;  %v3999_v9 = vld [vmem:[%s6837_s1 + $0x20] sm:$0xff]   ;;  %v4001_v11 = vld [vmem:[%s6837_s1 + $0x28] sm:$0xff]   ;;  %s7263_s16 = smov (!%p195_p3, %s3278_s16), 1  ;;  %v4281_v20 = vshrl.u32 %v462_v17, 7 }
  0x10   : > { %1595 = vmatpush1.bf16.msra.mxu0 %v3992_v2  ;;  %1371 = vmatprep.subr.bf16.mxu1 %v6847_v1  ;;  %v3998_v8 = vld [vmem:[%s6837_s1 + $0x98] sm:$0xff]   ;;  %v4000_v10 = vld [vmem:[%s6837_s1 + $0xa0] sm:$0xff]   ;;  %v4002_v12 = vld [vmem:[%s6837_s1 + $0xa8] sm:$0xff]   ;;  %s3979_s21 = smul.u32 216, %s7263_s16 }
  0x11   : > { %1596 = vmatprep.subr.bf16.mxu0 %v6847_v1  ;;  %3990 = vset.pattern.permute.xlu1 %v6847_v1  ;;  %v4003_v13 = vld [vmem:[%s6837_s1 + $0x30] sm:$0xff]   ;;  %v4005_v15 = vld [vmem:[%s6837_s1 + $0x38] sm:$0xff]   ;;  %v4007_v18 = vld [vmem:[%s6837_s1 + $0x40] sm:$0xff]   ;;  %vm464_vm0 = vcmp.lt.s32.totalorder %v4281_v20, 1  ;;  %vm609_vm1 = vcmp.lt.s32.totalorder %v4281_v20, 7 }
  0x12   : > { %v4004_v14 = vld [vmem:[%s6837_s1 + $0xb0] sm:$0xff]   ;;  %v4006_v16 = vld [vmem:[%s6837_s1 + $0xb8] sm:$0xff]   ;;  %s4272_s28 = scalar_lea.vmem %s6836_s0, %s3979_s21  ;;  %v4008_v19 = vld [vmem:[%s6837_s1 + $0xc0] sm:$0xff]   ;;  %s6139_s30 = scalar_lea.vmem %s6839_s3, %s3979_s21 }
  0x13   : > { %1372 = vmatpush1.bf16.msra.mxu1 %v3993_v3  ;;  %v4285_v21 = vld [vmem:[%s4272_s28] sm:$0xff]   ;;  %v4288_v22 = vld [vmem:[%s4272_s28 + $0xc] sm:$0xf]  ;;  %v4291_v23 = vld [vmem:[%s4272_s28 + $0x10] sm:$0xf]  ;;  %s3285_s21 = sshll.u32 %s7263_s16, 1 }
  0x14   : > { %1597 = vmatpush1.bf16.msra.mxu0 %v3994_v4  ;;  %1373 = vmatprep.subr.bf16.mxu1 %v6847_v1  ;;  %v4294_v24 = vld [vmem:[%s4272_s28 + $0xc8] sm:$0xf]  ;;  %v363_v25 = vunpack.c.l.bf16 %v4288_v22  ;;  %v364_v27 = vunpack.c.l.bf16 %v4291_v23  ;;  %v4011_v33 = vld [vmem:[%s6837_s1 + $0x50] sm:$0xff]   ;;  %v4013_v38 = vld [vmem:[%s6837_s1 + $0x58] sm:$0xff]   ;;  %v360_v44 = vunpack.c.l.bf16 %v4285_v21  ;;  %v361_v48 = vunpack.c.h.bf16 %v4285_v21  ;;  %s208_s7 = scalar_lea.vmem %s6840_s4, %s3285_s21 }
  0x15   : > { %1598 = vmatprep.subr.bf16.mxu0 %v6847_v1  ;;  %6960 = vst [vmem:[#allocation2_spill] sm:$0xff] %v4294_v24  ;;  %v4009_v26 = vld [vmem:[%s6837_s1 + $0x48] sm:$0xff]   ;;  %v6841_v28 = vunpack.c.l.bf16 %v4294_v24  ;;  %1401 = vmatprep.mubr.bf16.mxu1 %v4285_v21  ;;  %v4012_v36 = vld [vmem:[%s6837_s1 + $0xd0] sm:$0xff]   ;;  %v4014_v39 = vld [vmem:[%s6837_s1 + $0xd8] sm:$0xff]  }
  0x16   : > { %v4010_v29 = vld [vmem:[%s6837_s1 + $0xc8] sm:$0xff]   ;;  %v4311_v30 = vrot.slane %v363_v25, 7  ;;  %v4315_v31 = vrot.slane %v364_v27, 7  ;;  %v4015_v40 = vld [vmem:[%s6837_s1 + $0x60] sm:$0xff]   ;;  %v4356_v42 = vld [vmem:[%s4272_s28 + $0xbc] sm:$0xf] }
  0x17   : > { %1374 = vmatpush1.bf16.msra.mxu1 %v3995_v5  ;;  %v4319_v32 = vrot.slane %v6841_v28, 7  ;;  %v4016_v41 = vld [vmem:[%s6837_s1 + $0xe0] sm:$0xff]   ;;  %v4360_v43 = vld [vmem:[%s4272_s28 + $0x8] sm:$0xf]  ;;  %v4364_v45 = vld [vmem:[%s4272_s28 + $0x14] sm:$0xf]  ;;  %v6842_v49 = vunpack.c.l.bf16 %v4356_v42 }
  0x18   : > { %1599 = vmatpush1.bf16.msra.mxu0 %v3996_v6  ;;  %1375 = vmatprep.subr.bf16.mxu1 %v6847_v1  ;;  %v4328_v34 = vsel %vm464_vm0, %v4311_v30, %v4315_v31  ;;  %v4367_v46 = vld [vmem:[%s4272_s28 + $0x18] sm:$0xf]  ;;  %v4017_v47 = vld [vmem:[%s6837_s1 + $0x68] sm:$0xff]   ;;  %v362_v51 = vunpack.c.l.bf16 %v4360_v43  ;;  %v365_v52 = vunpack.c.l.bf16 %v4364_v45  ;;  %v4019_v54 = vld [vmem:[%s6837_s1 + $0x70] sm:$0xff]   ;;  %v414_v55 = vrot.slane %v360_v44, 7 }
  0x19   : > { %1600 = vmatprep.subr.bf16.mxu0 %v6847_v1  ;;  %v688_v35 = vsel %vm464_vm0, %v4319_v32, %v4311_v30  ;;  %v4018_v50 = vld [vmem:[%s6837_s1 + $0xe8] sm:$0xff]   ;;  %v366_v53 = vunpack.c.l.bf16 %v4367_v46  ;;  %v415_v56 = vrot.slane %v361_v48, 7  ;;  %v4387_v57 = vrot.slane %v6842_v49, 7  ;;  %v4020_v58 = vld [vmem:[%s6837_s1 + $0xf0] sm:$0xff]   ;;  %v4404_v0 = vld [vmem:[%s4272_s28 + $0x1c] sm:$0xf] }
  0x1a   : > { %v689_v37 = vpack.c.bf16 %v4328_v34, %v688_v35  ;;  %v4393_v59 = vrot.slane %v360_v44, 1  ;;  %v562_v60 = vrot.slane %v361_v48, 1  ;;  %v563_v61 = vrot.slane %v362_v51, 1  ;;  %v4407_v2 = vld [vmem:[%s4272_s28 + $0x20] sm:$0xf]  ;;  %v4021_v3 = vld [vmem:[%s6837_s1 + $0x78] sm:$0xff]  }
  0x1b   : > { %1376 = vmatpush1.bf16.msra.mxu1 %v3997_v7  ;;  %v419_v62 = vrot.slane %v365_v52, 7  ;;  %v4401_v63 = vrot.slane %v366_v53, 7  ;;  %v511_v4 = vsel %vm464_vm0, %v414_v55, %v415_v56  ;;  %v512_v5 = vsel %vm464_vm0, %v4387_v57, %v414_v55  ;;  %v4022_v6 = vld [vmem:[%s6837_s1 + $0xf8] sm:$0xff]  }
  0x1c   : > { %1601 = vmatpush1.bf16.msra.mxu0 %v3998_v8  ;;  %1377 = vmatprep.subr.bf16.mxu1 %v6847_v1  ;;  %v655_v7 = vsel %vm609_vm1, %v562_v60, %v563_v61  ;;  %v656_v8 = vsel %vm609_vm1, %v4393_v59, %v562_v60  ;;  %v416_v17 = vrot.slane %v362_v51, 7  ;;  %v565_v21 = vrot.slane %v364_v27, 1  ;;  %v4508_v51 = vld [vmem:[%s4272_s28 + $0x2c] sm:$0xf] }
  0x1d   : > { %1602 = vmatprep.subr.bf16.mxu0 %v6847_v1  ;;  %1626 = vmatprep.mubr.bf16.mxu0 %v689_v37  ;;  %6961 = vst [vmem:[#allocation3_spill] sm:$0xff] %v4401_v63  ;;  %v4026_v37 = vld [vmem:[%s6837_s1 + $0x108] sm:$0xff]   ;;  %v566_v48 = vrot.slane %v365_v52, 1  ;;  %v4514_v55 = vrot.slane %v366_v53, 1  ;;  %v4045_v52 = vld [vmem:[%s6837_s1 + $0x190] sm:$0xff]   ;;  %v371_v60 = vunpack.c.l.bf16 %v4508_v51 }
  0x1e   : > { %v509_v27 = vsel %vm464_vm0, %v416_v17, %v4311_v30 }
  0x1f   : > { %1378 = vmatpush1.bf16.msra.mxu1 %v3999_v9  ;;  %v4430_v9 = vsel %vm464_vm0, %v4315_v31, %v419_v62  ;;  %6964 = vst [vmem:[#allocation6_spill] sm:$0xff] %v4514_v55  ;;  %v4531_v53 = vsel %vm609_vm1, %v566_v48, %v4514_v55 }
  0x20   : > { %1603 = vmatpush1.bf16.msra.mxu0 %v4000_v10  ;;  %1379 = vmatprep.subr.bf16.mxu1 %v6847_v1  ;;  %v4435_v10 = vsel %vm464_vm0, %v419_v62, %v4401_v63 }
  0x21   : > { %1604 = vmatprep.subr.bf16.mxu0 %v6847_v1 }
  0x23   : > { %1380 = vmatpush1.bf16.msra.mxu1 %v4001_v11  ;;  %v367_v11 = vunpack.c.l.bf16 %v4404_v0 }
  0x24   : > { %1605 = vmatpush1.bf16.msra.mxu0 %v4002_v12  ;;  %1381 = vmatprep.subr.bf16.mxu1 %v6847_v1  ;;  %v368_v12 = vunpack.c.l.bf16 %v4407_v2 }
  0x25   : > { %1606 = vmatprep.subr.bf16.mxu0 %v6847_v1 }
  0x26   : > { %v422_v31 = vrot.slane %v368_v12, 7 }
  0x27   : > { %1382 = vmatpush1.bf16.msra.mxu1 %v4003_v13  ;;  %v513_v13 = vpack.c.bf16 %v511_v4, %v512_v5  ;;  %v4049_v5 = vld [vmem:[%s6837_s1 + $0x198] sm:$0xff]  }
  0x28   : > { %1607 = vmatpush1.bf16.msra.mxu0 %v4004_v14  ;;  %1383 = vmatprep.subr.bf16.mxu1 %v6847_v1  ;;  %v658_v14 = vpack.c.bf16 %v655_v7, %v656_v8  ;;  %v4557_v7 = vld [vmem:[%s4272_s28 + $0x34] sm:$0xf] }
  0x29   : > { %1608 = vmatprep.subr.bf16.mxu0 %v6847_v1 }
  0x2b   : > { %1384 = vmatpush1.bf16.msra.mxu1 %v4005_v15  ;;  %v4024_v15 = vld [vmem:[%s6837_s1 + $0x100] sm:$0xff]  }
  0x2c   : > { %1609 = vmatpush1.bf16.msra.mxu0 %v4006_v16  ;;  %1385 = vmatprep.subr.bf16.mxu1 %v6847_v1  ;;  %v3287_v16 = vcombine.low %v4360_v43, %v4288_v22  ;;  %v4038_v22 = vld [vmem:[%s6837_s1 + $0x180] sm:$0xff]  }
  0x2d   : > { %1610 = vmatprep.subr.bf16.mxu0 %v6847_v1 }
  0x2f   : > { %1386 = vmatpush1.bf16.msra.mxu1 %v4007_v18  ;;  %v690_v18 = vpack.c.bf16 %v4435_v10, %v4430_v9 }
  0x30   : > { %1611 = vmatpush1.bf16.msra.mxu0 %v4008_v19  ;;  %1387 = vmatprep.subr.bf16.mxu1 %v6847_v1  ;;  %v4448_v19 = vrot.slane %v363_v25, 1  ;;  %v4465_v25 = vld [vmem:[%s4272_s28 + $0x28] sm:$0xf] }
  0x31   : > { %1612 = vmatprep.subr.bf16.mxu0 %v6847_v1 }
  0x32   : > { %6962 = vst [vmem:[#allocation4_spill] sm:$0xff] %v4448_v19  ;;  %v4475_v35 = vsel %vm609_vm1, %v4448_v19, %v565_v21 }
  0x33   : > { %1388 = vmatpush1.bf16.msra.mxu1 %v4009_v26  ;;  %v4453_v26 = vld [vmem:[%s4272_s28 + $0x24] sm:$0xf] }
  0x34   : > { %1613 = vmatpush1.bf16.msra.mxu0 %v4010_v29  ;;  %1389 = vmatprep.subr.bf16.mxu1 %v6847_v1  ;;  %v421_v29 = vrot.slane %v367_v11, 7  ;;  %v369_v30 = vunpack.c.l.bf16 %v4453_v26 }
  0x35   : > { %1614 = vmatprep.subr.bf16.mxu0 %v6847_v1 }
  0x37   : > { %1390 = vmatpush1.bf16.msra.mxu1 %v4011_v33  ;;  %v510_v33 = vsel %vm464_vm0, %v415_v56, %v416_v17  ;;  %v4525_v56 = vld [vmem:[%s4272_s28 + $0x30] sm:$0xf]  ;;  %v425_v17 = vrot.slane %v371_v60, 7 }
  0x38   : > { %1615 = vmatpush1.bf16.msra.mxu0 %v4012_v36  ;;  %1391 = vmatprep.subr.bf16.mxu1 %v6847_v1  ;;  %v654_v36 = vsel %vm609_vm1, %v563_v61, %v4448_v19  ;;  %v514_v43 = vpack.c.bf16 %v509_v27, %v510_v33  ;;  %v4031_v61 = vld [vmem:[%s6837_s1 + $0x118] sm:$0xff]   ;;  %v372_v4 = vunpack.c.l.bf16 %v4525_v56  ;;  %v4056_v27 = vld [vmem:[%s6837_s1 + $0x1a8] sm:$0xff]  }
  0x39   : > { %1616 = vmatprep.subr.bf16.mxu0 %v6847_v1  ;;  %v659_v44 = vpack.c.bf16 %v4475_v35, %v654_v36  ;;  %v570_v36 = vrot.slane %v369_v30, 1 }
  0x3b   : > { %1392 = vmatpush1.bf16.msra.mxu1 %v4013_v38  ;;  %v4487_v38 = vsel %vm464_vm0, %v421_v29, %v422_v31 }
  0x3c   : > { %1617 = vmatpush1.bf16.msra.mxu0 %v4014_v39  ;;  %1393 = vmatprep.subr.bf16.mxu1 %v6847_v1  ;;  %v4492_v39 = vsel %vm464_vm0, %v4401_v63, %v421_v29  ;;  %v4036_v29 = vld [vmem:[%s6837_s1 + $0x128] sm:$0xff]  }
  0x3d   : > { %1618 = vmatprep.subr.bf16.mxu0 %v6847_v1  ;;  %6963 = vst [vmem:[#allocation5_spill] sm:$0xff] %v4492_v39  ;;  %v516_v33 = vpack.c.bf16 %v4492_v39, %v4435_v10 }
  0x3f   : > { %1394 = vmatpush1.bf16.msra.mxu1 %v4015_v40  ;;  %v370_v40 = vunpack.c.l.bf16 %v4465_v25 }
  0x40   : > { %1619 = vmatpush1.bf16.msra.mxu0 %v4016_v41  ;;  %1395 = vmatprep.subr.bf16.mxu1 %v6847_v1  ;;  %v4042_v41 = vld [vmem:[%s6837_s1 + $0x188] sm:$0xff]  }
  0x41   : > { %1620 = vmatprep.subr.bf16.mxu0 %v6847_v1  ;;  %v571_v10 = vrot.slane %v370_v40, 1 }
  0x43   : > { %1396 = vmatpush1.bf16.msra.mxu1 %v4017_v47  ;;  %v3288_v47 = vcombine.low %v4291_v23, %v4364_v45  ;;  %v423_v23 = vrot.slane %v369_v30, 7  ;;  %v424_v45 = vrot.slane %v370_v40, 7  ;;  %v4655_v40 = vsel %vm609_vm1, %v570_v36, %v571_v10 }
  0x44   : > { %1621 = vmatpush1.bf16.msra.mxu0 %v4018_v50  ;;  %1397 = vmatprep.subr.bf16.mxu1 %v6847_v1  ;;  %v4029_v50 = vld [vmem:[%s6837_s1 + $0x110] sm:$0xff]  }
  0x45   : > { %1622 = vmatprep.subr.bf16.mxu0 %v6847_v1  ;;  %v4543_v62 = vsel %vm464_vm0, %v423_v23, %v424_v45 }
  0x47   : > { %1398 = vmatpush1.bf16.msra.mxu1 %v4019_v54  ;;  %v691_v54 = vpack.c.bf16 %v4487_v38, %v4492_v39 }
  0x48   : > { %1623 = vmatpush1.bf16.msra.mxu0 %v4020_v58  ;;  %1399 = vmatprep.subr.bf16.mxu1 %v6847_v1  ;;  %v4535_v58 = vsel %vm609_vm1, %v565_v21, %v566_v48  ;;  %v4641_v48 = vld [vmem:[%s6837_s1 + $0x1b0] sm:$0xff]  }
  0x49   : > { %1624 = vmatprep.subr.bf16.mxu0 %v6847_v1  ;;  %v660_v8 = vpack.c.bf16 %v4531_v53, %v4535_v58 }
  0x4b   : > { %1400 = vmatpush1.bf16.msra.mxu1 %v4021_v3  ;;  %v4547_v3 = vsel %vm464_vm0, %v422_v31, %v423_v23 }
  0x4c   : > { %1625 = vmatpush1.bf16.msra.mxu0 %v4022_v6  ;;  %3743 = vmatprep.subr.bf16.mxu1 %v6847_v1  ;;  %v515_v6 = vpack.c.bf16 %v4430_v9, %v4328_v34  ;;  %v4034_v34 = vld [vmem:[%s6837_s1 + $0x120] sm:$0xff]   ;;  %v692_v9 = vpack.c.bf16 %v4543_v62, %v4547_v3 }
  0x4d   : > { %1819 = vmatprep.subr.bf16.mxu0 %v6847_v1 }
  0x4e   : > { %1402 = vmatmul.mubr.bf16.vlgmr.msra.gmra.mrb[0].mxu1 %v513_v13  ;;  %v4564_v13 = vcombine.low %v4367_v46, %v4404_v0  ;;  %v426_v46 = vrot.slane %v372_v4, 7  ;;  %v4052_v0 = vld [vmem:[%s6837_s1 + $0x1a0] sm:$0xff]  }
  0x4f   : > { %1627 = vmatmul.mubr.bf16.vlgmr.msra.gmra.mrb[0].mxu0 %v658_v14  ;;  %1409 = vmatprep.mubr.bf16.mxu1 %v3287_v16  ;;  %v568_v14 = vrot.slane %v367_v11, 1  ;;  %v569_v16 = vrot.slane %v368_v12, 1  ;;  %v373_v11 = vunpack.c.l.bf16 %v4557_v7 }
  0x50   : > { %1820 = vmatpush1.bf16.msra.mxu0 %v4024_v15  ;;  %1634 = vmatprep.mubr.bf16.mxu0 %v690_v18  ;;  %6965 = vst [vmem:[#allocation7_spill] sm:$0xff] %v4564_v13  ;;  %v4569_v15 = vld [vmem:[%s4272_s28 + $0x38] sm:$0xf]  ;;  %v4604_v31 = vsel %vm464_vm0, %v425_v17, %v426_v46 }
  0x51   : > { %1821 = vmatprep.subr.bf16.mxu0 %v6847_v1  ;;  %3759 = vmatpush1.bf16.msra.mxu1 %v4038_v22  ;;  %v4591_v12 = vsel %vm609_vm1, %v568_v14, %v569_v16  ;;  %v4596_v18 = vsel %vm609_vm1, %v4514_v55, %v568_v14  ;;  %v374_v21 = vunpack.c.l.bf16 %v4569_v15  ;;  %v4608_v22 = vsel %vm464_vm0, %v424_v45, %v425_v17 }
  0x52   : > { %3744 = vmatprep.subr.bf16.mxu1 %v6847_v1  ;;  %v427_v30 = vrot.slane %v373_v11, 7  ;;  %v4692_v14 = vcombine.low %v4465_v25, %v4508_v51  ;;  %v4711_v51 = vld [vmem:[%s4272_s28 + $0x44] sm:$0xf] }
  0x54   : > { %1822 = vmatpush1.bf16.msra.mxu0 %v4026_v37  ;;  %v4040_v37 = vld [vmem:[%s6837_s1 + $0x130] sm:$0xff]   ;;  %v4670_v45 = vsel %vm464_vm0, %v426_v46, %v427_v30  ;;  %6970 = vst [vmem:[#allocation12_spill] sm:$0xff] %v4692_v14 }
  0x55   : > { %1823 = vmatprep.subr.bf16.mxu0 %v6847_v1  ;;  %3760 = vmatpush1.bf16.msra.mxu1 %v4042_v41  ;;  %v4624_v41 = vpack.c.bf16 %v4591_v12, %v4596_v18 }
  0x56   : > { %1410 = vmatmul.mubr.bf16.gmra.mrb[4].mxu1 %v514_v43  ;;  %3745 = vmatprep.subr.bf16.mxu1 %v6847_v1  ;;  %v4628_v43 = vcombine.low %v4407_v2, %v4453_v26  ;;  %v4645_v2 = vld [vmem:[%s4272_s28 + $0x3c] sm:$0xf]  ;;  %v4648_v26 = vld [vmem:[%s4272_s28 + $0x40] sm:$0xf] }
  0x57   : > { %1635 = vmatmul.mubr.bf16.gmra.mrb[4].mxu0 %v659_v44  ;;  %1417 = vmatprep.mubr.bf16.mxu1 %v3288_v47  ;;  %6966 = vst [vmem:[#allocation8_spill] sm:$0xff] %v4624_v41  ;;  %v693_v44 = vpack.c.bf16 %v4604_v31, %v4608_v22  ;;  %v428_v47 = vrot.slane %v374_v21, 7 }
  0x58   : > { %1642 = vmatprep.mubr.bf16.mxu0 %v691_v54  ;;  %1824 = vmatpush1.bf16.msra.mxu0 %v4029_v50  ;;  %6967 = vst [vmem:[#allocation9_spill] sm:$0xff] %v4628_v43  ;;  %v4659_v50 = vsel %vm609_vm1, %v569_v16, %v570_v36  ;;  %v4043_v54 = vld [vmem:[%s6837_s1 + $0x138] sm:$0xff]  }
  0x59   : > { %1825 = vmatprep.subr.bf16.mxu0 %v6847_v1  ;;  %3761 = vmatpush1.bf16.msra.mxu1 %v4045_v52  ;;  %v4666_v23 = vsel %vm464_vm0, %v427_v30, %v428_v47  ;;  %v375_v52 = vunpack.c.l.bf16 %v4645_v2 }
  0x5a   : > { %3746 = vmatprep.subr.bf16.mxu1 %v6847_v1 }
  0x5b   : > { %v429_v16 = vrot.slane %v375_v52, 7 }
  0x5c   : > { %1826 = vmatpush1.bf16.msra.mxu0 %v4031_v61  ;;  %v376_v61 = vunpack.c.l.bf16 %v4648_v26 }
  0x5d   : > { %1827 = vmatprep.subr.bf16.mxu0 %v6847_v1  ;;  %3762 = vmatpush1.bf16.msra.mxu1 %v4049_v5  ;;  %v4679_v5 = vld [vmem:[%s6837_s1 + $0x1b8] sm:$0xff]  }
  0x5e   : > { %1418 = vmatmul.mubr.bf16.gmra.mrb[8].mxu1 %v515_v6  ;;  %3747 = vmatprep.subr.bf16.mxu1 %v6847_v1  ;;  %v4683_v6 = vpack.c.bf16 %v4547_v3, %v4487_v38  ;;  %v573_v38 = vrot.slane %v372_v4, 1  ;;  %v4047_v3 = vld [vmem:[%s6837_s1 + $0x140] sm:$0xff]   ;;  %v430_v25 = vrot.slane %v376_v61, 7 }
  0x5f   : > { %1643 = vmatmul.mubr.bf16.gmra.mrb[8].mxu0 %v660_v8  ;;  %1425 = vmatprep.mubr.bf16.mxu1 %v4564_v13  ;;  %v4688_v8 = vpack.c.bf16 %v4655_v40, %v4659_v50  ;;  %v4720_v4 = vld [vmem:[%s6837_s1 + $0x1c0] sm:$0xff]  }
  0x60   : > { %1650 = vmatprep.mubr.bf16.mxu0 %v692_v9  ;;  %1828 = vmatpush1.bf16.msra.mxu0 %v4034_v34  ;;  %6968 = vst [vmem:[#allocation10_spill] sm:$0xff] %v4683_v6  ;;  %v694_v34 = vpack.c.bf16 %v4666_v23, %v4670_v45  ;;  %v572_v9 = vrot.slane %v371_v60, 1  ;;  %v4714_v60 = vld [vmem:[%s4272_s28 + $0x48] sm:$0xf]  ;;  %6971 = vst [vmem:[#allocation13_spill] sm:$0xff] %v4720_v4 }
  0x61   : > { %1829 = vmatprep.subr.bf16.mxu0 %v6847_v1  ;;  %3763 = vmatpush1.bf16.msra.mxu1 %v4052_v0  ;;  %6969 = vst [vmem:[#allocation11_spill] sm:$0xff] %v4688_v8  ;;  %v4050_v0 = vld [vmem:[%s6837_s1 + $0x148] sm:$0xff]   ;;  %v6843_v36 = vunpack.c.l.bf16 %v4714_v60 }
  0x62   : > { %3748 = vmatprep.subr.bf16.mxu1 %v6847_v1  ;;  %v4726_v17 = vsel %vm609_vm1, %v572_v9, %v573_v38  ;;  %v4730_v46 = vsel %vm609_vm1, %v571_v10, %v572_v9  ;;  %v4754_v10 = vpack.c.bf16 %v4608_v22, %v4543_v62  ;;  %v575_v62 = vrot.slane %v374_v21, 1  ;;  %v4054_v22 = vld [vmem:[%s6837_s1 + $0x150] sm:$0xff]  }
  0x63   : > { %v4759_v30 = vpack.c.bf16 %v4726_v17, %v4730_v46  ;;  %v4791_v21 = vld [vmem:[%s6837_s1 + $0x1d0] sm:$0xff]  }
  0x64   : > { %1830 = vmatpush1.bf16.msra.mxu0 %v4036_v29  ;;  %v4737_v29 = vsel %vm464_vm0, %v429_v16, %v430_v25  ;;  %6973 = vst [vmem:[#allocation15_spill] sm:$0xff] %v4754_v10  ;;  %6978 = vst [vmem:[#allocation20_spill] sm:$0xff] %v4791_v21 }
  0x65   : > { %1831 = vmatprep.subr.bf16.mxu0 %v6847_v1  ;;  %3764 = vmatpush1.bf16.msra.mxu1 %v4056_v27  ;;  %v4741_v27 = vsel %vm464_vm0, %v428_v47, %v429_v16  ;;  %6974 = vst [vmem:[#allocation16_spill] sm:$0xff] %v4759_v30  ;;  %v4057_v16 = vld [vmem:[%s6837_s1 + $0x158] sm:$0xff]  }
  0x66   : > { %1426 = vmatmul.mubr.bf16.gmra.mrb[12].mxu1 %v516_v33  ;;  %3749 = vmatprep.subr.bf16.mxu1 %v6847_v1  ;;  %v6844_v33 = vunpack.c.l.bf16 %v4711_v51  ;;  %v695_v47 = vpack.c.bf16 %v4737_v29, %v4741_v27 }
  0x67   : > { %1651 = vmatmul.mubr.bf16.gmra.mrb[12].mxu0 %v4624_v41  ;;  %1433 = vmatprep.mubr.bf16.mxu1 %v4628_v43 }
  0x68   : > { %1658 = vmatprep.mubr.bf16.mxu0 %v693_v44  ;;  %1832 = vmatpush1.bf16.msra.mxu0 %v4040_v37  ;;  %v4750_v37 = vld [vmem:[%s6837_s1 + $0x1c8] sm:$0xff]   ;;  %v4763_v44 = vcombine.low %v4525_v56, %v4557_v7  ;;  %v432_v56 = vrot.slane %v6843_v36, 7  ;;  %v576_v36 = vrot.slane %v375_v52, 1  ;;  %v4856_v52 = vld [vmem:[%s4272_s28 + $0x58] sm:$0xf] }
  0x69   : > { %1833 = vmatprep.subr.bf16.mxu0 %v6847_v1  ;;  %3765 = vmatpush1.bf16.msra.mxu1 %v4641_v48  ;;  %6972 = vst [vmem:[#allocation14_spill] sm:$0xff] %v4750_v37  ;;  %v4782_v7 = vld [vmem:[%s4272_s28 + $0x4c] sm:$0xf]  ;;  %6984 = vst [vmem:[#allocation26_spill] sm:$0xff] %v4856_v52  ;;  %v6995_v43 = vunpack.c.l.bf16 %v4856_v52 }
  0x6a   : > { %3750 = vmatprep.subr.bf16.mxu1 %v6847_v1  ;;  %6975 = vst [vmem:[#allocation17_spill] sm:$0xff] %v4763_v44  ;;  %6976 = vst [vmem:[#allocation18_spill] sm:$0xff] %v4782_v7  ;;  %v6846_v28 = vunpack.c.l.bf16 %v4782_v7  ;;  %v7004_v13 = vunpack.c.l.bf16 %v4782_v7 }
  0x6c   : > { %1834 = vmatpush1.bf16.msra.mxu0 %v4043_v54  ;;  %v574_v54 = vrot.slane %v373_v11, 1  ;;  %v4785_v11 = vld [vmem:[%s4272_s28 + $0x50] sm:$0xf]  ;;  %v580_v63 = vrot.slane %v7004_v13, 1 }
  0x6d   : > { %1835 = vmatprep.subr.bf16.mxu0 %v6847_v1  ;;  %3766 = vmatpush1.bf16.msra.mxu1 %v4679_v5  ;;  %6977 = vst [vmem:[#allocation19_spill] sm:$0xff] %v4785_v11  ;;  %v6845_v49 = vunpack.c.l.bf16 %v4785_v11  ;;  %v7005_v19 = vunpack.c.l.bf16 %v4785_v11 }
  0x6e   : > { %1434 = vmatmul.mubr.bf16.gmra.mrb[16].mxu1 %v4683_v6  ;;  %3751 = vmatprep.subr.bf16.mxu1 %v6847_v1  ;;  %v4797_v9 = vsel %vm609_vm1, %v574_v54, %v575_v62 }
  0x6f   : > { %1659 = vmatmul.mubr.bf16.gmra.mrb[16].mxu0 %v4688_v8  ;;  %1441 = vmatprep.mubr.bf16.mxu1 %v4692_v14 }
  0x70   : > { %1666 = vmatprep.mubr.bf16.mxu0 %v694_v34  ;;  %1836 = vmatpush1.bf16.msra.mxu0 %v4047_v3  ;;  %v431_v34 = vrot.slane %v6844_v33, 7  ;;  %v4801_v3 = vsel %vm609_vm1, %v573_v38, %v574_v54  ;;  %v4821_v38 = vld [vmem:[%s6837_s1 + $0x1d8] sm:$0xff]   ;;  %v4825_v54 = vpack.c.bf16 %v4670_v45, %v4604_v31  ;;  %v577_v31 = vrot.slane %v376_v61, 1  ;;  %v4061_v45 = vld [vmem:[%s6837_s1 + $0x160] sm:$0xff]  }
  0x71   : > { %1837 = vmatprep.subr.bf16.mxu0 %v6847_v1  ;;  %3767 = vmatpush1.bf16.msra.mxu1 %v4720_v4  ;;  %6979 = vst [vmem:[#allocation21_spill] sm:$0xff] %v4821_v38  ;;  %v433_v33 = vrot.slane %v6846_v28, 7  ;;  %v4862_v61 = vld [vmem:[%s6837_s1 + $0x1e0] sm:$0xff]   ;;  %v4064_v28 = vld [vmem:[%s6837_s1 + $0x168] sm:$0xff]   ;;  %v343_v4 = vld [vmem:[%s4272_s28 + $0x94] sm:$0xf] }
  0x72   : > { %3752 = vmatprep.subr.bf16.mxu1 %v6847_v1  ;;  %6980 = vst [vmem:[#allocation22_spill] sm:$0xff] %v4825_v54  ;;  %6985 = vst [vmem:[#allocation27_spill] sm:$0xff] %v4862_v61 }
  0x74   : > { %1838 = vmatpush1.bf16.msra.mxu0 %v4050_v0  ;;  %v4808_v0 = vsel %vm464_vm0, %v431_v34, %v432_v56 }
  0x75   : > { %1839 = vmatprep.subr.bf16.mxu0 %v6847_v1  ;;  %3768 = vmatpush1.bf16.msra.mxu1 %v4750_v37 }
  0x76   : > { %1442 = vmatmul.mubr.bf16.gmra.mrb[20].mxu1 %v4754_v10  ;;  %3753 = vmatprep.subr.bf16.mxu1 %v6847_v1  ;;  %v6993_v10 = vunpack.c.l.bf16 %v4714_v60 }
  0x77   : > { %1667 = vmatmul.mubr.bf16.gmra.mrb[20].mxu0 %v4759_v30  ;;  %1449 = vmatprep.mubr.bf16.mxu1 %v4763_v44  ;;  %v6987_v44 = vmov 0  }
  0x78   : > { %1674 = vmatprep.mubr.bf16.mxu0 %v695_v47  ;;  %1840 = vmatpush1.bf16.msra.mxu0 %v4054_v22  ;;  %v4812_v47 = vsel %vm464_vm0, %v430_v25, %v431_v34  ;;  %v4830_v25 = vpack.c.bf16 %v4797_v9, %v4801_v3  ;;  %v4834_v22 = vcombine.low %v4569_v15, %v4645_v2  ;;  %v434_v15 = vrot.slane %v6845_v49, 7  ;;  %v4853_v2 = vld [vmem:[%s4272_s28 + $0x54] sm:$0xf] }
  0x79   : > { %1841 = vmatprep.subr.bf16.mxu0 %v6847_v1  ;;  %3769 = vmatpush1.bf16.msra.mxu1 %v4791_v21  ;;  %v696_v34 = vpack.c.bf16 %v4808_v0, %v4812_v47  ;;  %6983 = vst [vmem:[#allocation25_spill] sm:$0xff] %v4853_v2  ;;  %v4872_v49 = vsel %vm609_vm1, %v575_v62, %v576_v36  ;;  %v579_v14 = vrot.slane %v6993_v10, 1  ;;  %v4924_v10 = vld [vmem:[%s4272_s28 + $0x60] sm:$0xf]  ;;  %v7011_v41 = vunpack.c.l.bf16 %v4853_v2  ;;  %v5134_v21 = vld [vmem:[%s4272_s28 + $0x84] sm:$0xf] }
  0x7a   : > { %3754 = vmatprep.subr.bf16.mxu1 %v6847_v1  ;;  %6981 = vst [vmem:[#allocation23_spill] sm:$0xff] %v4830_v25  ;;  %6982 = vst [vmem:[#allocation24_spill] sm:$0xff] %v4834_v22  ;;  %v4894_v62 = vpack.c.bf16 %v4741_v27, %v4666_v23  ;;  %v4069_v23 = vld [vmem:[%s6837_s1 + $0x170] sm:$0xff]   ;;  %v6994_v27 = vunpack.c.l.bf16 %v4853_v2  ;;  %v384_v39 = vunpack.c.l.bf16 %v4924_v10 }
  0x7b   : > { %6997 = vst [vmem:[#allocation34_spill] sm:$0xff] %v4924_v10  ;;  %v4995_v13 = vsel %vm609_vm1, %v579_v14, %v580_v63  ;;  %7028 = vst [vmem:[#allocation61_spill] sm:$0xff] %v5134_v21 }
  0x7c   : > { %1842 = vmatpush1.bf16.msra.mxu0 %v4057_v16  ;;  %v4868_v16 = vsel %vm609_vm1, %v576_v36, %v577_v31  ;;  %v4890_v36 = vld [vmem:[%s6837_s1 + $0x1e8] sm:$0xff]   ;;  %6989 = vst [vmem:[#allocation30_spill] sm:$0xff] %v4894_v62  ;;  %v435_v6 = vrot.slane %v6994_v27, 7  ;;  %v4074_v27 = vld [vmem:[%s6837_s1 + $0x178] sm:$0xff]   ;;  %7009 = vst [vmem:[#allocation44_spill] sm:$0xff] %v4995_v13 }
  0x7d   : > { %1843 = vmatprep.subr.bf16.mxu0 %v6847_v1  ;;  %3770 = vmatpush1.bf16.msra.mxu1 %v4821_v38  ;;  %6986 = vst [vmem:[#allocation28_spill] sm:$0xff] %v4868_v16  ;;  %6988 = vst [vmem:[#allocation29_spill] sm:$0xff] %v4890_v36 }
  0x7e   : > { %1450 = vmatmul.mubr.bf16.gmra.mrb[24].mxu1 %v4825_v54  ;;  %3755 = vmatprep.subr.bf16.mxu1 %v6847_v1  ;;  %v4879_v1 = vsel %vm464_vm0, %v433_v33, %v434_v15  ;;  %v6992_v54 = vunpack.c.l.bf16 %v4711_v51 }
  0x7f   : > { %1675 = vmatmul.mubr.bf16.gmra.mrb[24].mxu0 %v4830_v25  ;;  %1457 = vmatprep.mubr.bf16.mxu1 %v4834_v22  ;;  %v4982_v25 = vld [vmem:[%s4272_s28 + $0x64] sm:$0xf] }
  0x80   : > { %1682 = vmatprep.mubr.bf16.mxu0 %v696_v34  ;;  %1844 = vmatpush1.bf16.msra.mxu0 %v4061_v45  ;;  %v493_v34 = vsel %vm464_vm0, %v432_v56, %v433_v33  ;;  %v4899_v33 = vpack.c.bf16 %v4868_v16, %v4872_v49  ;;  %v4903_v56 = vcombine.low %v4648_v26, %v4711_v51  ;;  %v578_v22 = vrot.slane %v6992_v54, 1  ;;  %v4921_v51 = vld [vmem:[%s4272_s28 + $0x5c] sm:$0xf] }
  0x81   : > { %1845 = vmatprep.subr.bf16.mxu0 %v6987_v44  ;;  %3771 = vmatpush1.bf16.msra.mxu1 %v4862_v61  ;;  %v697_v45 = vpack.c.bf16 %v4879_v1, %v493_v34  ;;  %v436_v26 = vrot.slane %v6995_v43, 7  ;;  %6996 = vst [vmem:[#allocation33_spill] sm:$0xff] %v4921_v51  ;;  %7006 = vst [vmem:[#allocation41_spill] sm:$0xff] %v4982_v25  ;;  %v5006_v30 = vpack.c.bf16 %v493_v34, %v4808_v0  ;;  %v5023_v0 = vld [vmem:[%s4272_s28 + $0x6c] sm:$0xf] }
  0x82   : > { %3756 = vmatprep.subr.bf16.mxu1 %v6987_v44  ;;  %6990 = vst [vmem:[#allocation31_spill] sm:$0xff] %v4899_v33  ;;  %6991 = vst [vmem:[#allocation32_spill] sm:$0xff] %v4903_v56  ;;  %v4936_v43 = vsel %vm609_vm1, %v578_v22, %v579_v14  ;;  %v4940_v54 = vsel %vm609_vm1, %v577_v31, %v578_v22  ;;  %v4958_v22 = vld [vmem:[%s6837_s1 + $0x1f8] sm:$0xff]   ;;  %v4962_v31 = vpack.c.bf16 %v4812_v47, %v4737_v29  ;;  %v5026_v34 = vld [vmem:[%s4272_s28 + $0x70] sm:$0xf] }
  0x83   : > { %6999 = vst [vmem:[#allocation36_spill] sm:$0xff] %v4936_v43  ;;  %7000 = vst [vmem:[#allocation37_spill] sm:$0xff] %v4940_v54  ;;  %v438_v47 = vrot.slane %v384_v39, 7  ;;  %v5060_v61 = vld [vmem:[%s4272_s28 + $0x74] sm:$0xf] }
  0x84   : > { %1846 = vmatpush1.bf16.msra.mxu0 %v4064_v28  ;;  %v4930_v28 = vld [vmem:[%s6837_s1 + $0x1f0] sm:$0xff]   ;;  %7001 = vst [vmem:[#allocation38_spill] sm:$0xff] %v4958_v22  ;;  %7002 = vst [vmem:[#allocation39_spill] sm:$0xff] %v4962_v31 }
  0x85   : > { %1847 = vmatprep.subr.bf16.mxu0 %v6987_v44  ;;  %3772 = vmatpush1.bf16.msra.mxu1 %v4890_v36  ;;  %6998 = vst [vmem:[#allocation35_spill] sm:$0xff] %v4930_v28  ;;  %7013 = vst [vmem:[#allocation46_spill] sm:$0xff] %v5023_v0 }
  0x86   : > { %1458 = vmatmul.mubr.bf16.gmra.mrb[28].mxu1 %v4894_v62  ;;  %3757 = vmatprep.subr.bf16.mxu1 %v6987_v44  ;;  %v4947_v62 = vsel %vm464_vm0, %v435_v6, %v436_v26  ;;  %7014 = vst [vmem:[#allocation47_spill] sm:$0xff] %v5026_v34  ;;  %7018 = vst [vmem:[#allocation51_spill] sm:$0xff] %v5060_v61 }
  0x87   : > { %1683 = vmatmul.mubr.bf16.gmra.mrb[28].mxu0 %v4899_v33  ;;  %1465 = vmatprep.mubr.bf16.mxu1 %v4903_v56  ;;  %v383_v56 = vunpack.c.l.bf16 %v4921_v51  ;;  %v581_v33 = vrot.slane %v7005_v19, 1 }
  0x88   : > { %1690 = vmatprep.mubr.bf16.mxu0 %v697_v45  ;;  %1848 = vmatpush1.bf16.msra.mxu0 %v4069_v23  ;;  %v491_v45 = vsel %vm464_vm0, %v434_v15, %v435_v6  ;;  %v4967_v6 = vpack.c.bf16 %v4936_v43, %v4940_v54  ;;  %v4971_v15 = vcombine.low %v4714_v60, %v4782_v7  ;;  %v4985_v60 = vld [vmem:[%s4272_s28 + $0x68] sm:$0xf]  ;;  %v387_v7 = vunpack.c.l.bf16 %v5023_v0  ;;  %v5171_v54 = vld [vmem:[%s4272_s28 + $0x8c] sm:$0xf] }
  0x89   : > { %1849 = vmatprep.subr.bf16.mxu0 %v6987_v44  ;;  %3773 = vmatpush1.bf16.msra.mxu1 %v4930_v28  ;;  %v698_v23 = vpack.c.bf16 %v4947_v62, %v491_v45  ;;  %v437_v29 = vrot.slane %v383_v56, 7  ;;  %7007 = vst [vmem:[#allocation42_spill] sm:$0xff] %v4985_v60  ;;  %v4991_v19 = vsel %vm609_vm1, %v580_v63, %v581_v33  ;;  %v584_v36 = vrot.slane %v383_v56, 1 }
  0x8a   : > { %3758 = vmatprep.subr.bf16.mxu1 %v6987_v44  ;;  %7003 = vst [vmem:[#allocation40_spill] sm:$0xff] %v4967_v6  ;;  %7008 = vst [vmem:[#allocation43_spill] sm:$0xff] %v4991_v19  ;;  %v5010_v8 = vpack.c.bf16 %v4991_v19, %v4995_v13  ;;  %v5014_v63 = vcombine.low %v4785_v11, %v4853_v2  ;;  %v5047_v11 = vpack.c.bf16 %v491_v45, %v4879_v1  ;;  %v5063_v1 = vld [vmem:[%s4272_s28 + $0x78] sm:$0xf]  ;;  %v5097_v13 = vld [vmem:[%s4272_s28 + $0x7c] sm:$0xf] }
  0x8b   : > { %v585_v19 = vrot.slane %v384_v39, 1  ;;  %7019 = vst [vmem:[#allocation52_spill] sm:$0xff] %v5063_v1  ;;  %7023 = vst [vmem:[#allocation56_spill] sm:$0xff] %v5097_v13 }
  0x8c   : > { %1850 = vmatpush1.bf16.msra.mxu0 %v4074_v27  ;;  %v4999_v27 = vsel %vm464_vm0, %v437_v29, %v438_v47  ;;  %7010 = vst [vmem:[#allocation45_spill] sm:$0xff] %v5010_v8  ;;  %7035 = vst [vmem:[#allocation68_spill] sm:$0xff] %v5171_v54 }
  0x8d   : > { %3774 = vmatpush1.bf16.msra.mxu1 %v4958_v22  ;;  %2044 = vmatprep.subr.bf16.mxu0 %v6987_v44  ;;  %v5069_v45 = vsel %vm609_vm1, %v584_v36, %v585_v19 }
  0x8e   : > { %1466 = vmatmul.mubr.bf16.gmra.mrb[32].mxu1 %v4962_v31  ;;  %v489_v31 = vsel %vm464_vm0, %v436_v26, %v437_v29  ;;  %v582_v26 = vrot.slane %v7011_v41, 1  ;;  %v7012_v29 = vunpack.c.l.bf16 %v4856_v52  ;;  %7020 = vst [vmem:[#allocation53_spill] sm:$0xff] %v5069_v45 }
  0x8f   : > { %1691 = vmatmul.mubr.bf16.gmra.mrb[32].mxu0 %v4967_v6  ;;  %1473 = vmatprep.mubr.bf16.mxu1 %v4971_v15  ;;  %v385_v6 = vunpack.c.l.bf16 %v4982_v25  ;;  %v699_v14 = vpack.c.bf16 %v4999_v27, %v489_v31 }
  0x90   : > { %1698 = vmatprep.mubr.bf16.mxu0 %v698_v23  ;;  %v386_v23 = vunpack.c.l.bf16 %v4985_v60  ;;  %v583_v55 = vrot.slane %v7012_v29, 1  ;;  %v5036_v29 = vsel %vm609_vm1, %v581_v33, %v582_v26  ;;  %v5055_v33 = vcombine.low %v4856_v52, %v4921_v51 }
  0x91   : > { %v439_v24 = vrot.slane %v385_v6, 7  ;;  %7016 = vst [vmem:[#allocation49_spill] sm:$0xff] %v5036_v29  ;;  %v389_v51 = vunpack.c.l.bf16 %v5060_v61  ;;  %v5084_v52 = vpack.c.bf16 %v489_v31, %v4947_v62  ;;  %v5100_v62 = vld [vmem:[%s4272_s28 + $0x80] sm:$0xf] }
  0x92   : > { %v440_v22 = vrot.slane %v386_v23, 7  ;;  %v5032_v41 = vsel %vm609_vm1, %v582_v26, %v583_v55  ;;  %v5073_v39 = vsel %vm609_vm1, %v583_v55, %v584_v36  ;;  %v5092_v55 = vcombine.low %v4924_v10, %v4982_v25  ;;  %7024 = vst [vmem:[#allocation57_spill] sm:$0xff] %v5100_v62 }
  0x93   : > { %7015 = vst [vmem:[#allocation48_spill] sm:$0xff] %v5032_v41  ;;  %v5051_v28 = vpack.c.bf16 %v5032_v41, %v5036_v29  ;;  %7021 = vst [vmem:[#allocation54_spill] sm:$0xff] %v5073_v39  ;;  %v5088_v41 = vpack.c.bf16 %v5069_v45, %v5073_v39  ;;  %v586_v29 = vrot.slane %v385_v6, 1  ;;  %v587_v38 = vrot.slane %v386_v23, 1 }
  0x94   : > { %v5040_v2 = vsel %vm464_vm0, %v439_v24, %v440_v22  ;;  %v391_v25 = vunpack.c.l.bf16 %v5097_v13  ;;  %v588_v39 = vrot.slane %v387_v7, 1 }
  0x95   : > { %7017 = vst [vmem:[#allocation50_spill] sm:$0xff] %v5051_v28  ;;  %7022 = vst [vmem:[#allocation55_spill] sm:$0xff] %v5088_v41  ;;  %v5106_v31 = vsel %vm609_vm1, %v586_v29, %v587_v38  ;;  %v5110_v6 = vsel %vm609_vm1, %v585_v19, %v586_v29  ;;  %v5129_v19 = vcombine.low %v4985_v60, %v5023_v0  ;;  %v393_v0 = vunpack.c.l.bf16 %v5134_v21 }
  0x96   : > { %1474 = vmatmul.mubr.bf16.gmra.mrb[36].mxu1 %v5006_v30  ;;  %7025 = vst [vmem:[#allocation58_spill] sm:$0xff] %v5106_v31  ;;  %7026 = vst [vmem:[#allocation59_spill] sm:$0xff] %v5110_v6  ;;  %v5125_v45 = vpack.c.bf16 %v5106_v31, %v5110_v6  ;;  %v590_v6 = vrot.slane %v389_v51, 1 }
  0x97   : > { %1699 = vmatmul.mubr.bf16.gmra.mrb[36].mxu0 %v5010_v8  ;;  %1481 = vmatprep.mubr.bf16.mxu1 %v5014_v63  ;;  %v487_v8 = vsel %vm464_vm0, %v438_v47, %v439_v24  ;;  %v441_v24 = vrot.slane %v387_v7, 7  ;;  %v5147_v7 = vsel %vm609_vm1, %v587_v38, %v588_v39  ;;  %v5166_v38 = vcombine.low %v5026_v34, %v5060_v61 }
  0x98   : > { %1706 = vmatprep.mubr.bf16.mxu0 %v699_v14  ;;  %v388_v14 = vunpack.c.l.bf16 %v5026_v34  ;;  %v700_v26 = vpack.c.bf16 %v5040_v2, %v487_v8  ;;  %v5121_v10 = vpack.c.bf16 %v487_v8, %v4999_v27  ;;  %7027 = vst [vmem:[#allocation60_spill] sm:$0xff] %v5125_v45  ;;  %v5137_v8 = vld [vmem:[%s4272_s28 + $0x88] sm:$0xf]  ;;  %7031 = vst [vmem:[#allocation64_spill] sm:$0xff] %v5147_v7  ;;  %v395_v61 = vunpack.c.l.bf16 %v5171_v54 }
  0x99   : > { %7029 = vst [vmem:[#allocation62_spill] sm:$0xff] %v5137_v8  ;;  %7034 = vst [vmem:[#allocation67_spill] sm:$0xff] %v5166_v38 }
  0x9a   : > { %v442_v47 = vrot.slane %v388_v14, 7  ;;  %v589_v43 = vrot.slane %v388_v14, 1 }
  0x9c   : > { %v5077_v56 = vsel %vm464_vm0, %v441_v24, %v442_v47  ;;  %v5143_v27 = vsel %vm609_vm1, %v588_v39, %v589_v43 }
  0x9d   : > { %7030 = vst [vmem:[#allocation63_spill] sm:$0xff] %v5143_v27  ;;  %v5162_v31 = vpack.c.bf16 %v5143_v27, %v5147_v7  ;;  %v592_v7 = vrot.slane %v391_v25, 1 }
  0x9e   : > { %1482 = vmatmul.mubr.bf16.gmra.mrb[40].mxu1 %v5047_v11 }
  0x9f   : > { %1707 = vmatmul.mubr.bf16.gmra.mrb[40].mxu0 %v5051_v28  ;;  %1489 = vmatprep.mubr.bf16.mxu1 %v5055_v33  ;;  %v485_v28 = vsel %vm464_vm0, %v440_v22, %v441_v24  ;;  %v443_v22 = vrot.slane %v389_v51, 7  ;;  %7033 = vst [vmem:[#allocation66_spill] sm:$0xff] %v5162_v31  ;;  %v5184_v51 = vsel %vm609_vm1, %v589_v43, %v590_v6 }
  0xa0   : > { %1714 = vmatprep.mubr.bf16.mxu0 %v700_v26  ;;  %v390_v26 = vunpack.c.l.bf16 %v5063_v1  ;;  %v701_v36 = vpack.c.bf16 %v5077_v56, %v485_v28  ;;  %v5158_v60 = vpack.c.bf16 %v485_v28, %v5040_v2  ;;  %v5174_v2 = vld [vmem:[%s4272_s28 + $0x90] sm:$0xf]  ;;  %7038 = vst [vmem:[#allocation71_spill] sm:$0xff] %v5184_v51  ;;  %v5203_v43 = vcombine.low %v5063_v1, %v5097_v13 }
  0xa1   : > { %7036 = vst [vmem:[#allocation69_spill] sm:$0xff] %v5174_v2 }
  0xa2   : > { %v444_v24 = vrot.slane %v390_v26, 7  ;;  %7032 = vst [vmem:[#allocation65_spill] sm:$0xff] %v5158_v60  ;;  %v591_v37 = vrot.slane %v390_v26, 1  ;;  %7041 = vst [vmem:[#allocation74_spill] sm:$0xff] %v5203_v43 }
  0xa4   : > { %v5114_v23 = vsel %vm464_vm0, %v443_v22, %v444_v24  ;;  %v5180_v28 = vsel %vm609_vm1, %v590_v6, %v591_v37 }
  0xa5   : > { %7037 = vst [vmem:[#allocation70_spill] sm:$0xff] %v5180_v28  ;;  %v5199_v27 = vpack.c.bf16 %v5180_v28, %v5184_v51  ;;  %v594_v28 = vrot.slane %v393_v0, 1 }
  0xa6   : > { %1490 = vmatmul.mubr.bf16.gmra.mrb[44].mxu1 %v5084_v52 }
  0xa7   : > { %1715 = vmatmul.mubr.bf16.gmra.mrb[44].mxu0 %v5088_v41  ;;  %1497 = vmatprep.mubr.bf16.mxu1 %v5092_v55  ;;  %v483_v41 = vsel %vm464_vm0, %v442_v47, %v443_v22  ;;  %v445_v47 = vrot.slane %v391_v25, 7  ;;  %7040 = vst [vmem:[#allocation73_spill] sm:$0xff] %v5199_v27  ;;  %v5219_v25 = vsel %vm609_vm1, %v591_v37, %v592_v7 }
  0xa8   : > { %1722 = vmatprep.mubr.bf16.mxu0 %v701_v36  ;;  %v392_v36 = vunpack.c.l.bf16 %v5100_v62  ;;  %v702_v29 = vpack.c.bf16 %v5114_v23, %v483_v41  ;;  %v5195_v34 = vpack.c.bf16 %v483_v41, %v5077_v56  ;;  %7043 = vst [vmem:[#allocation76_spill] sm:$0xff] %v5219_v25  ;;  %v5237_v37 = vcombine.low %v5100_v62, %v5134_v21 }
  0xaa   : > { %v446_v22 = vrot.slane %v392_v36, 7  ;;  %7039 = vst [vmem:[#allocation72_spill] sm:$0xff] %v5195_v34  ;;  %v593_v16 = vrot.slane %v392_v36, 1  ;;  %7046 = vst [vmem:[#allocation79_spill] sm:$0xff] %v5237_v37 }
  0xac   : > { %v5151_v14 = vsel %vm464_vm0, %v445_v47, %v446_v22  ;;  %v5215_v41 = vsel %vm609_vm1, %v592_v7, %v593_v16 }
  0xad   : > { %7042 = vst [vmem:[#allocation75_spill] sm:$0xff] %v5215_v41  ;;  %v5233_v1 = vpack.c.bf16 %v5215_v41, %v5219_v25  ;;  %v596_v41 = vrot.slane %v395_v61, 1 }
  0xae   : > { %1498 = vmatmul.mubr.bf16.gmra.mrb[48].mxu1 %v5121_v10 }
  0xaf   : > { %1723 = vmatmul.mubr.bf16.gmra.mrb[48].mxu0 %v5125_v45  ;;  %1505 = vmatprep.mubr.bf16.mxu1 %v5129_v19  ;;  %v481_v45 = vsel %vm464_vm0, %v444_v24, %v445_v47  ;;  %v447_v24 = vrot.slane %v393_v0, 7  ;;  %7045 = vst [vmem:[#allocation78_spill] sm:$0xff] %v5233_v1  ;;  %v5253_v0 = vsel %vm609_vm1, %v593_v16, %v594_v28 }
  0xb0   : > { %1730 = vmatprep.mubr.bf16.mxu0 %v702_v29  ;;  %v394_v29 = vunpack.c.l.bf16 %v5137_v8  ;;  %v703_v39 = vpack.c.bf16 %v5151_v14, %v481_v45  ;;  %v5229_v13 = vpack.c.bf16 %v481_v45, %v5114_v23  ;;  %7048 = vst [vmem:[#allocation81_spill] sm:$0xff] %v5253_v0  ;;  %v5271_v16 = vcombine.low %v5137_v8, %v5171_v54 }
  0xb2   : > { %v448_v47 = vrot.slane %v394_v29, 7  ;;  %7044 = vst [vmem:[#allocation77_spill] sm:$0xff] %v5229_v13  ;;  %v595_v51 = vrot.slane %v394_v29, 1  ;;  %7051 = vst [vmem:[#allocation84_spill] sm:$0xff] %v5271_v16 }
  0xb4   : > { %v5188_v26 = vsel %vm464_vm0, %v447_v24, %v448_v47  ;;  %v5249_v45 = vsel %vm609_vm1, %v594_v28, %v595_v51 }
  0xb5   : > { %7047 = vst [vmem:[#allocation80_spill] sm:$0xff] %v5249_v45  ;;  %v5267_v62 = vpack.c.bf16 %v5249_v45, %v5253_v0 }
  0xb6   : > { %1506 = vmatmul.mubr.bf16.gmra.mrb[52].mxu1 %v5158_v60  ;;  %v5316_v60 = vld [vmem:[%s4272_s28 + $0xb0] sm:$0xf] }
  0xb7   : > { %1731 = vmatmul.mubr.bf16.gmra.mrb[52].mxu0 %v5162_v31  ;;  %1513 = vmatprep.mubr.bf16.mxu1 %v5166_v38  ;;  %v479_v31 = vsel %vm464_vm0, %v446_v22, %v447_v24  ;;  %v449_v22 = vrot.slane %v395_v61, 7  ;;  %v5209_v38 = vld [vmem:[%s4272_s28 + $0x98] sm:$0xf]  ;;  %7050 = vst [vmem:[#allocation83_spill] sm:$0xff] %v5267_v62 }
  0xb8   : > { %1738 = vmatprep.mubr.bf16.mxu0 %v703_v39  ;;  %v396_v39 = vunpack.c.l.bf16 %v5174_v2  ;;  %v704_v6 = vpack.c.bf16 %v5188_v26, %v479_v31  ;;  %v5263_v21 = vpack.c.bf16 %v479_v31, %v5151_v14  ;;  %v5284_v31 = vld [vmem:[%s6837_s1 + $0x200] sm:$0xff]   ;;  %v5292_v14 = vsel %vm609_vm1, %v595_v51, %v596_v41 }
  0xb9   : > { %v477_v36 = vsel %vm464_vm0, %v448_v47, %v449_v22  ;;  %7053 = vst [vmem:[#allocation86_spill] sm:$0xff] %v5292_v14  ;;  %3679 = vmatprep.subr.bf16.mxu1 %v5284_v31 }
  0xba   : > { %v450_v24 = vrot.slane %v396_v39, 7  ;;  %7049 = vst [vmem:[#allocation82_spill] sm:$0xff] %v5263_v21  ;;  %v597_v25 = vrot.slane %v396_v39, 1  ;;  %v5303_v8 = vpack.c.bf16 %v477_v36, %v5188_v26 }
  0xbc   : > { %v5223_v56 = vsel %vm464_vm0, %v449_v22, %v450_v24  ;;  %v345_v22 = vld [vmem:[%s4272_s28 + $0x9c] sm:$0xf]  ;;  %v5288_v61 = vsel %vm609_vm1, %v596_v41, %v597_v25  ;;  %7054 = vst [vmem:[#allocation87_spill] sm:$0xff] %v5303_v8  ;;  %v5310_v41 = vcombine.low %v5174_v2, %v343_v4 }
  0xbd   : > { %v705_v7 = vpack.c.bf16 %v5223_v56, %v477_v36  ;;  %7052 = vst [vmem:[#allocation85_spill] sm:$0xff] %v5288_v61  ;;  %v5307_v51 = vpack.c.bf16 %v5288_v61, %v5292_v14  ;;  %v5341_v61 = vcombine.low %v5209_v38, %v345_v22 }
  0xbe   : > { %1514 = vmatmul.mubr.bf16.gmra.mrb[56].mxu1 %v5195_v34  ;;  %v5243_v34 = vld [vmem:[%s4272_s28 + $0xa0] sm:$0xf]  ;;  %7056 = vst [vmem:[#allocation89_spill] sm:$0xff] %v5310_v41 }
  0xbf   : > { %1739 = vmatmul.mubr.bf16.gmra.mrb[56].mxu0 %v5199_v27  ;;  %1521 = vmatprep.mubr.bf16.mxu1 %v5203_v43  ;;  %v397_v27 = vunpack.c.l.bf16 %v343_v4  ;;  %7055 = vst [vmem:[#allocation88_spill] sm:$0xff] %v5307_v51  ;;  %7061 = vst [vmem:[#allocation94_spill] sm:$0xff] %v5341_v61 }
  0xc0   : > { %1746 = vmatprep.mubr.bf16.mxu0 %v704_v6  ;;  %v398_v6 = vunpack.c.l.bf16 %v5209_v38 }
  0xc1   : > { %v451_v43 = vrot.slane %v397_v27, 7  ;;  %v598_v0 = vrot.slane %v397_v27, 1 }
  0xc2   : > { %v452_v47 = vrot.slane %v398_v6, 7 }
  0xc3   : > { %v475_v29 = vsel %vm464_vm0, %v450_v24, %v451_v43  ;;  %v347_v24 = vld [vmem:[%s4272_s28 + $0xa4] sm:$0xf]  ;;  %v5326_v27 = vsel %vm609_vm1, %v597_v25, %v598_v0 }
  0xc4   : > { %v5257_v23 = vsel %vm464_vm0, %v451_v43, %v452_v47  ;;  %v401_v54 = vunpack.c.l.bf16 %v347_v24  ;;  %7058 = vst [vmem:[#allocation91_spill] sm:$0xff] %v5326_v27 }
  0xc5   : > { %v706_v28 = vpack.c.bf16 %v5257_v23, %v475_v29 }
  0xc6   : > { %1522 = vmatmul.mubr.bf16.gmra.mrb[60].mxu1 %v5229_v13  ;;  %v5277_v13 = vld [vmem:[%s4272_s28 + $0xa8] sm:$0xf] }
  0xc7   : > { %1747 = vmatmul.mubr.bf16.gmra.mrb[60].mxu0 %v5233_v1  ;;  %1529 = vmatprep.mubr.bf16.mxu1 %v5237_v37  ;;  %v399_v1 = vunpack.c.l.bf16 %v345_v22 }
  0xc8   : > { %1754 = vmatprep.mubr.bf16.mxu0 %v705_v7  ;;  %v400_v7 = vunpack.c.l.bf16 %v5243_v34 }
  0xc9   : > { %v453_v37 = vrot.slane %v399_v1, 7 }
  0xca   : > { %v454_v43 = vrot.slane %v400_v7, 7  ;;  %v601_v14 = vrot.slane %v400_v7, 1 }
  0xcc   : > { %v5296_v39 = vsel %vm464_vm0, %v453_v37, %v454_v43 }
  0xce   : > { %1530 = vmatmul.mubr.bf16.gmra.mrb[64].mxu1 %v5263_v21  ;;  %v349_v21 = vld [vmem:[%s4272_s28 + $0xac] sm:$0xf] }
  0xcf   : > { %1755 = vmatmul.mubr.bf16.gmra.mrb[64].mxu0 %v5267_v62  ;;  %1537 = vmatprep.mubr.bf16.mxu1 %v5271_v16  ;;  %v473_v62 = vsel %vm464_vm0, %v452_v47, %v453_v37  ;;  %v599_v16 = vrot.slane %v398_v6, 1  ;;  %v455_v37 = vrot.slane %v401_v54, 7  ;;  %v403_v6 = vunpack.c.l.bf16 %v349_v21 }
  0xd0   : > { %1762 = vmatprep.mubr.bf16.mxu0 %v706_v28  ;;  %v402_v28 = vunpack.c.l.bf16 %v5277_v13  ;;  %v707_v45 = vpack.c.bf16 %v5296_v39, %v473_v62 }
  0xd1   : > { %v5322_v4 = vsel %vm609_vm1, %v598_v0, %v599_v16  ;;  %v471_v36 = vsel %vm464_vm0, %v454_v43, %v455_v37  ;;  %v600_v0 = vrot.slane %v399_v1, 1  ;;  %v351_v43 = vld [vmem:[%s4272_s28 + $0xb4] sm:$0xf] }
  0xd2   : > { %v456_v47 = vrot.slane %v402_v28, 7  ;;  %7057 = vst [vmem:[#allocation90_spill] sm:$0xff] %v5322_v4  ;;  %v5338_v2 = vpack.c.bf16 %v5322_v4, %v5326_v27  ;;  %v5371_v4 = vcombine.low %v5243_v34, %v347_v24  ;;  %v603_v27 = vrot.slane %v402_v28, 1 }
  0xd3   : > { %v5352_v38 = vsel %vm609_vm1, %v600_v0, %v601_v14  ;;  %v5356_v1 = vsel %vm609_vm1, %v599_v16, %v600_v0  ;;  %v602_v0 = vrot.slane %v401_v54, 1  ;;  %v5393_v28 = vpack.c.bf16 %v471_v36, %v5296_v39 }
  0xd4   : > { %v470_v26 = vsel %vm464_vm0, %v455_v37, %v456_v47  ;;  %7060 = vst [vmem:[#allocation93_spill] sm:$0xff] %v5338_v2  ;;  %v5346_v37 = vld [vmem:[%s4272_s28 + $0xb8] sm:$0xf]  ;;  %7062 = vst [vmem:[#allocation95_spill] sm:$0xff] %v5352_v38 }
  0xd5   : > { %v708_v25 = vpack.c.bf16 %v470_v26, %v471_v36  ;;  %v406_v7 = vunpack.c.l.bf16 %v5346_v37  ;;  %v5385_v54 = vsel %vm609_vm1, %v601_v14, %v602_v0 }
  0xd6   : > { %1538 = vmatmul.mubr.bf16.gmra.mrb[68].mxu1 %v5303_v8 }
  0xd7   : > { %1763 = vmatmul.mubr.bf16.gmra.mrb[68].mxu0 %v5307_v51  ;;  %1545 = vmatprep.mubr.bf16.mxu1 %v5310_v41  ;;  %v404_v51 = vunpack.c.l.bf16 %v5316_v60  ;;  %v457_v41 = vrot.slane %v403_v6, 7 }
  0xd8   : > { %1770 = vmatprep.mubr.bf16.mxu0 %v707_v45  ;;  %v5334_v45 = vpack.c.bf16 %v475_v29, %v5223_v56  ;;  %v405_v29 = vunpack.c.l.bf16 %v351_v43 }
  0xd9   : > { %v458_v8 = vrot.slane %v404_v51, 7  ;;  %v469_v22 = vsel %vm464_vm0, %v456_v47, %v457_v41 }
  0xda   : > { %7059 = vst [vmem:[#allocation92_spill] sm:$0xff] %v5334_v45  ;;  %v5427_v36 = vpack.c.bf16 %v469_v22, %v470_v26 }
  0xdb   : > { %v468_v56 = vsel %vm464_vm0, %v457_v41, %v458_v8  ;;  %v5375_v41 = vld [vmem:[%s4272_s28 + $0xc0] sm:$0xf] }
  0xdc   : > { %v709_v16 = vpack.c.bf16 %v468_v56, %v469_v22  ;;  %v6945_v24 = vunpack.c.l.bf16 %v5375_v41 }
  0xde   : > { %1546 = vmatmul.mubr.bf16.gmra.mrb[72].mxu1 %v5334_v45  ;;  %v460_v45 = vrot.slane %v406_v7, 7 }
  0xdf   : > { %1771 = vmatmul.mubr.bf16.gmra.mrb[72].mxu0 %v5338_v2  ;;  %1553 = vmatprep.mubr.bf16.mxu1 %v5341_v61  ;;  %v5368_v2 = vpack.c.bf16 %v5352_v38, %v5356_v1  ;;  %v459_v61 = vrot.slane %v405_v29, 7  ;;  %v682_v38 = vrot.slane %v6945_v24, 7 }
  0xe0   : > { %1778 = vmatprep.mubr.bf16.mxu0 %v708_v25  ;;  %v5364_v25 = vpack.c.bf16 %v473_v62, %v5257_v23  ;;  %v5381_v62 = vsel %vm609_vm1, %v602_v0, %v603_v27  ;;  %v604_v0 = vrot.slane %v403_v6, 1 }
  0xe1   : > { %7063 = vst [vmem:[#allocation96_spill] sm:$0xff] %v5368_v2  ;;  %v466_v34 = vsel %vm464_vm0, %v459_v61, %v460_v45  ;;  %v467_v23 = vsel %vm464_vm0, %v458_v8, %v459_v61  ;;  %v5397_v47 = vpack.c.bf16 %v5381_v62, %v5385_v54  ;;  %v5406_v8 = vld [vmem:[%s4272_s28 + $0xc4] sm:$0xf]  ;;  %v5424_v39 = vsel %vm464_vm0, %v4387_v57, %v682_v38 }
  0xe2   : > { %v710_v14 = vpack.c.bf16 %v466_v34, %v467_v23 }
  0xe6   : > { %1554 = vmatmul.mubr.bf16.gmra.mrb[76].mxu1 %v5364_v25 }
  0xe7   : > { %1779 = vmatmul.mubr.bf16.gmra.mrb[76].mxu0 %v5368_v2  ;;  %1561 = vmatprep.mubr.bf16.mxu1 %v5371_v4  ;;  %v605_v2 = vrot.slane %v404_v51, 1  ;;  %v6944_v51 = vunpack.c.l.bf16 %v5406_v8 }
  0xe8   : > { %1786 = vmatprep.mubr.bf16.mxu0 %v709_v16  ;;  %v5400_v16 = vcombine.low %v5277_v13, %v349_v21  ;;  %v5416_v21 = vsel %vm609_vm1, %v603_v27, %v604_v0  ;;  %v465_v13 = vsel %vm464_vm0, %v460_v45, %v4387_v57  ;;  %v5434_v27 = vcombine.low %v5316_v60, %v351_v43 }
  0xe9   : > { %v5412_v61 = vsel %vm609_vm1, %v604_v0, %v605_v2  ;;  %v606_v45 = vrot.slane %v405_v29, 1  ;;  %v607_v0 = vrot.slane %v406_v7, 1  ;;  %v683_v57 = vrot.slane %v6944_v51, 7 }
  0xea   : > { %v5431_v6 = vpack.c.bf16 %v5412_v61, %v5416_v21  ;;  %v5459_v29 = vpack.c.bf16 %v467_v23, %v468_v56  ;;  %v7064_v51 = vunpack.c.l.bf16 %v4356_v42  ;;  %v5490_v56 = vpack.c.bf16 %v465_v13, %v466_v34 }
  0xeb   : > { %v5444_v26 = vsel %vm609_vm1, %v606_v45, %v607_v0  ;;  %v5448_v60 = vsel %vm609_vm1, %v605_v2, %v606_v45  ;;  %v5453_v43 = vsel %vm464_vm0, %v683_v57, %v4319_v32  ;;  %v5457_v22 = vsel %vm464_vm0, %v682_v38, %v683_v57  ;;  %v4118_v57 = vld [vmem:[%s4272_s28 + $0x10] sm:$0xf] }
  0xec   : > { %v5463_v7 = vpack.c.bf16 %v5444_v26, %v5448_v60  ;;  %v712_v45 = vpack.c.bf16 %v5453_v43, %v5457_v22  ;;  %v5476_v38 = vrot.slane %v7064_v51, 1  ;;  %v744_v51 = vpack.c.bf16 %v4535_v58, %v4475_v35  ;;  %v4091_v35 = vld [vmem:[%s6837_s1 + $0x208] sm:$0xff]   ;;  %v4119_v58 = vld [vmem:[%s6837_s1 + $0x180] sm:$0xff]  }
  0xed   : > { %v746_v34 = vpack.c.bf16 %v4659_v50, %v4591_v12  ;;  %v4102_v12 = vld [vmem:[%s6837_s1 + $0x220] sm:$0xff]   ;;  %v4124_v50 = vld [vmem:[%s4272_s28 + $0x1c] sm:$0xf] }
  0xee   : > { %1562 = vmatmul.mubr.bf16.gmra.mrb[80].mxu1 %v5393_v28  ;;  %v657_v42 = vsel %vm609_vm1, %v5476_v38, %v4393_v59  ;;  %v745_v59 = vpack.c.bf16 %v4596_v18, %v4531_v53  ;;  %v4095_v53 = vld [vmem:[%s6837_s1 + $0x210] sm:$0xff]  }
  0xef   : > { %1787 = vmatmul.mubr.bf16.gmra.mrb[80].mxu0 %v5397_v47  ;;  %1569 = vmatprep.mubr.bf16.mxu1 %v5400_v16  ;;  %v4120_v18 = vld [vmem:[%s4272_s28 + $0x14] sm:$0xf] }
  0xf0   : > { %1794 = vmatprep.mubr.bf16.mxu0 %v710_v14  ;;  %v711_v14 = vpack.c.bf16 %v5424_v39, %v465_v13  ;;  %v4123_v13 = vld [vmem:[%s6837_s1 + $0x190] sm:$0xff]  }
  0xf6   : > { %1570 = vmatmul.mubr.bf16.gmra.mrb[84].mxu1 %v5427_v36 }
  0xf7   : > { %1795 = vmatmul.mubr.bf16.gmra.mrb[84].mxu0 %v5431_v6  ;;  %1577 = vmatprep.mubr.bf16.mxu1 %v5434_v27 }
  0xf8   : > { %1802 = vmatprep.mubr.bf16.mxu0 %v711_v14  ;;  %v5466_v14 = vld [vmem:[%s4272_s28 + $0xbc] sm:$0xf] }
  0xf9   : > { %v5470_v2 = vcombine.low %v5346_v37, %v5466_v14  ;;  %v5484_v37 = vsel %vm609_vm1, %v607_v0, %v5476_v38  ;;  %v4117_v0 = vld [vmem:[%s4272_s28 + $0xc] sm:$0xf] }
  0xfa   : > { %v681_v23 = vpack.c.bf16 %v657_v42, %v5484_v37 }
  0xfe   : > { %1578 = vmatmul.mubr.bf16.gmra.mrb[88].mxu1 %v5459_v29 }
  0xff   : > { %1803 = vmatmul.mubr.bf16.gmra.mrb[88].mxu0 %v5463_v7  ;;  %1585 = vmatprep.mubr.bf16.mxu1 %v5470_v2 }
 0x100   : > { %1810 = vmatprep.mubr.bf16.mxu0 %v712_v45  ;;  %v3310_v45 = vcombine.low %v4117_v0, %v4118_v57  ;;  %v4106_v0 = vld [vmem:[%s6837_s1 + $0x230] sm:$0xff]   ;;  %v4128_v57 = vld [vmem:[%s4272_s28 + $0x24] sm:$0xf] }
 0x106   : > { %1586 = vmatmul.mubr.bf16.gmra.mrb[92].mxu1 %v5490_v56 }
 0x107   : > { %1811 = vmatmul.mubr.bf16.gmra.mrb[92].mxu0 %v681_v23  ;;  %2124 = vmatprep.mubr.bf16.mxu1 %v4971_v15  ;;  %v4126_v23 = vld [vmem:[%s6837_s1 + $0x198] sm:$0xff]  }
 0x108   : > { %1851 = vmatprep.mubr.bf16.mxu0 %v744_v51  ;;  %v4103_v51 = vld [vmem:[%s6837_s1 + $0x228] sm:$0xff]  }
 0x10e   : > { %2125 = vmatmul.mubr.bf16.vlgmr.msra.gmra.mrb[96].mxu1 %v5006_v30  ;;  %v4121_v30 = vld [vmem:[%s4272_s28 + $0x18] sm:$0xf] }
 0x10f   : > { %1852 = vmatmul.mubr.bf16.vlgmr.msra.gmra.mrb[0].mxu0 %v3310_v45  ;;  %2132 = vmatprep.mubr.bf16.mxu1 %v5014_v63  ;;  %v3311_v15 = vcombine.low %v4120_v18, %v4121_v30  ;;  %v4122_v63 = vld [vmem:[%s6837_s1 + $0x188] sm:$0xff]   ;;  %v4107_v18 = vld [vmem:[%s6837_s1 + $0x238] sm:$0xff]  }
 0x110   : > { %2045 = vmatpush1.bf16.msra.mxu0 %v4119_v58  ;;  %1859 = vmatprep.mubr.bf16.mxu0 %v745_v59  ;;  %v4129_v45 = vld [vmem:[%s4272_s28 + $0x28] sm:$0xf]  ;;  %v4131_v30 = vld [vmem:[%s4272_s28 + $0x2c] sm:$0xf] }
 0x111   : > { %2046 = vmatprep.subr.bf16.mxu0 %v6987_v44  ;;  %3680 = vmatpush3.bf16.msra.mxu1 %v5284_v31  ;;  %v4099_v31 = vld [vmem:[%s6837_s1 + $0x218] sm:$0xff]   ;;  %v4130_v58 = vld [vmem:[%s6837_s1 + $0x1a8] sm:$0xff]  }
 0x112   : > { %3681 = vmatprep.subr.bf16.mxu1 %v4091_v35 }
 0x114   : > { %2047 = vmatpush1.bf16.msra.mxu0 %v4122_v63 }
 0x115   : > { %2048 = vmatprep.subr.bf16.mxu0 %v6987_v44  ;;  %3682 = vmatpush3.bf16.msra.mxu1 %v4091_v35  ;;  %v748_v35 = vpack.c.bf16 %v4801_v3, %v4726_v17 }
 0x116   : > { %2133 = vmatmul.mubr.bf16.gmra.mrb[100].mxu1 %v5047_v11  ;;  %3683 = vmatprep.subr.bf16.mxu1 %v4095_v53  ;;  %v4125_v11 = vld [vmem:[%s4272_s28 + $0x20] sm:$0xf] }
 0x117   : > { %1860 = vmatmul.mubr.bf16.gmra.mrb[4].mxu0 %v3311_v15  ;;  %2140 = vmatprep.mubr.bf16.mxu1 %v5055_v33  ;;  %v3312_v42 = vcombine.low %v4124_v50, %v4125_v11  ;;  %v747_v33 = vpack.c.bf16 %v4730_v46, %v4655_v40  ;;  %v4127_v40 = vld [vmem:[%s6837_s1 + $0x1a0] sm:$0xff]  }
 0x118   : > { %1867 = vmatprep.mubr.bf16.mxu0 %v746_v34  ;;  %2049 = vmatpush1.bf16.msra.mxu0 %v4123_v13  ;;  %v7069_v34 = vld [vmem:[#allocation65_spill] sm:$0xff] }
 0x119   : > { %2050 = vmatprep.subr.bf16.mxu0 %v6987_v44  ;;  %3684 = vmatpush3.bf16.msra.mxu1 %v4095_v53  ;;  %v7071_v13 = vld [vmem:[#allocation13_spill] sm:$0xff] }
 0x11a   : > { %3685 = vmatprep.subr.bf16.mxu1 %v4099_v31 }
 0x11c   : > { %2051 = vmatpush1.bf16.msra.mxu0 %v4126_v23 }
 0x11d   : > { %2052 = vmatprep.subr.bf16.mxu0 %v6987_v44  ;;  %3686 = vmatpush3.bf16.msra.mxu1 %v4099_v31  ;;  %v7070_v31 = vld [vmem:[#allocation67_spill] sm:$0xff] }
 0x11e   : > { %2141 = vmatmul.mubr.bf16.gmra.mrb[104].mxu1 %v5084_v52  ;;  %3687 = vmatprep.subr.bf16.mxu1 %v4102_v12 }
 0x11f   : > { %1868 = vmatmul.mubr.bf16.gmra.mrb[8].mxu0 %v3312_v42  ;;  %2148 = vmatprep.mubr.bf16.mxu1 %v5092_v55  ;;  %v3313_v55 = vcombine.low %v4128_v57, %v4129_v45  ;;  %v7074_v42 = vld [vmem:[#allocation28_spill] sm:$0xff] }
 0x120   : > { %1875 = vmatprep.mubr.bf16.mxu0 %v747_v33  ;;  %2053 = vmatpush1.bf16.msra.mxu0 %v4127_v40  ;;  %v7075_v33 = vld [vmem:[#allocation37_spill] sm:$0xff]  ;;  %v7076_v40 = vld [vmem:[#allocation14_spill] sm:$0xff]  ;;  %v7079_v57 = vld [vmem:[#allocation20_spill] sm:$0xff] }
 0x121   : > { %2054 = vmatprep.subr.bf16.mxu0 %v6987_v44  ;;  %v5551_v46 = vpop.f32.mrb[0].mxu1  ;;  %3688 = vmatpush3.bf16.msra.mxu1 %v4102_v12  ;;  %v750_v23 = vpack.c.bf16 %v7075_v33, %v7074_v42  ;;  %v7090_v33 = vld [vmem:[#allocation43_spill] sm:$0xff] }
 0x122   : > { %7065 = vst [vmem:[#allocation97_spill] sm:$0xff] %v5551_v46  ;;  %v1405_v52 = vpop.f32.mrb[1].mxu1  ;;  %3689 = vmatprep.subr.bf16.mxu1 %v4103_v51 }
 0x123   : > { %v5558_v59 = vpop.f32.mrb[2].mxu1  ;;  %v7077_v52 = vld [vmem:[#allocation72_spill] sm:$0xff] }
 0x124   : > { %7066 = vst [vmem:[#allocation98_spill] sm:$0xff] %v5558_v59  ;;  %2055 = vmatpush1.bf16.msra.mxu0 %v4130_v58  ;;  %v1408_v53 = vpop.f32.mrb[3].mxu1  ;;  %v4136_v58 = vld [vmem:[%s4272_s28 + $0x40] sm:$0xf] }
 0x125   : > { %2056 = vmatprep.subr.bf16.mxu0 %v6987_v44  ;;  %3690 = vmatpush3.bf16.msra.mxu1 %v4103_v51 }
 0x126   : > { %2149 = vmatmul.mubr.bf16.gmra.mrb[108].mxu1 %v5121_v10  ;;  %3691 = vmatprep.subr.bf16.mxu1 %v4106_v0  ;;  %v4132_v10 = vld [vmem:[%s4272_s28 + $0x30] sm:$0xf] }
 0x127   : > { %1876 = vmatmul.mubr.bf16.gmra.mrb[12].mxu0 %v3313_v55  ;;  %2156 = vmatprep.mubr.bf16.mxu1 %v5129_v19  ;;  %v3314_v15 = vcombine.low %v4131_v30, %v4132_v10  ;;  %v749_v19 = vpack.c.bf16 %v4872_v49, %v4797_v9  ;;  %v4133_v49 = vld [vmem:[%s4272_s28 + $0x34] sm:$0xf] }
 0x128   : > { %1883 = vmatprep.mubr.bf16.mxu0 %v748_v35  ;;  %2057 = vmatpush1.bf16.msra.mxu0 %v4641_v48  ;;  %v4135_v35 = vld [vmem:[%s4272_s28 + $0x3c] sm:$0xf]  ;;  %v7083_v30 = vld [vmem:[#allocation44_spill] sm:$0xff] }
 0x129   : > { %2058 = vmatprep.subr.bf16.mxu0 %v6987_v44  ;;  %v5573_v17 = vpop.f32.mrb[4].mxu1  ;;  %3692 = vmatpush3.bf16.msra.mxu1 %v4106_v0  ;;  %v7078_v0 = vld [vmem:[#allocation74_spill] sm:$0xff]  ;;  %v3316_v53 = vcombine.low %v4135_v35, %v4136_v58 }
 0x12a   : > { %7067 = vst [vmem:[#allocation99_spill] sm:$0xff] %v5573_v17  ;;  %v1413_v3 = vpop.f32.mrb[5].mxu1  ;;  %3693 = vmatprep.subr.bf16.mxu1 %v4107_v18 }
 0x12b   : > { %v5577_v63 = vpop.f32.mrb[6].mxu1  ;;  %v7082_v3 = vld [vmem:[#allocation36_spill] sm:$0xff] }
 0x12c   : > { %7068 = vst [vmem:[#allocation100_spill] sm:$0xff] %v5577_v63  ;;  %2059 = vmatpush1.bf16.msra.mxu0 %v4679_v5  ;;  %v1416_v48 = vpop.f32.mrb[7].mxu1  ;;  %v4134_v5 = vld [vmem:[%s4272_s28 + $0x38] sm:$0xf]  ;;  %v751_v10 = vpack.c.bf16 %v7083_v30, %v7082_v3  ;;  %v7098_v3 = vld [vmem:[#allocation18_spill] sm:$0xff] }
 0x12d   : > { %2060 = vmatprep.subr.bf16.mxu0 %v6987_v44  ;;  %3694 = vmatpush3.bf16.msra.mxu1 %v4107_v18  ;;  %v3315_v9 = vcombine.low %v4133_v49, %v4134_v5  ;;  %v7085_v48 = vld [vmem:[#allocation77_spill] sm:$0xff]  ;;  %v4137_v49 = vld [vmem:[%s4272_s28 + $0x44] sm:$0xf]  ;;  %v4138_v5 = vld [vmem:[%s4272_s28 + $0x48] sm:$0xf] }
 0x12e   : > { %2157 = vmatmul.mubr.bf16.gmra.mrb[112].mxu1 %v7069_v34  ;;  %v7086_v34 = vld [vmem:[#allocation79_spill] sm:$0xff] }
 0x12f   : > { %1884 = vmatmul.mubr.bf16.gmra.mrb[16].mxu0 %v3314_v15  ;;  %2164 = vmatprep.mubr.bf16.mxu1 %v7070_v31  ;;  %v7087_v31 = vld [vmem:[#allocation27_spill] sm:$0xff] }
 0x130   : > { %1891 = vmatprep.mubr.bf16.mxu0 %v749_v19  ;;  %2061 = vmatpush1.bf16.msra.mxu0 %v7071_v13  ;;  %v7084_v19 = vld [vmem:[#allocation21_spill] sm:$0xff] }
 0x131   : > { %v5586_v12 = vpop.f32.mrb[8].mxu1  ;;  %2062 = vmatprep.subr.bf16.mxu0 %v6987_v44 }
 0x132   : > { %7072 = vst [vmem:[#allocation65_spill] sm:$0xff] %v5586_v12  ;;  %v1421_v50 = vpop.f32.mrb[9].mxu1 }
 0x133   : > { %v5591_v11 = vpop.f32.mrb[10].mxu1 }
 0x134   : > { %7073 = vst [vmem:[#allocation67_spill] sm:$0xff] %v5591_v11  ;;  %v1424_v51 = vpop.f32.mrb[11].mxu1  ;;  %2063 = vmatpush1.bf16.msra.mxu0 %v7076_v40 }
 0x135   : > { %2064 = vmatprep.subr.bf16.mxu0 %v6987_v44 }
 0x136   : > { %2165 = vmatmul.mubr.bf16.gmra.mrb[116].mxu1 %v7077_v52  ;;  %v7092_v52 = vld [vmem:[#allocation29_spill] sm:$0xff] }
 0x137   : > { %1892 = vmatmul.mubr.bf16.gmra.mrb[20].mxu0 %v3315_v9  ;;  %2172 = vmatprep.mubr.bf16.mxu1 %v7078_v0  ;;  %v3317_v9 = vcombine.low %v4137_v49, %v4138_v5  ;;  %v7093_v0 = vld [vmem:[#allocation82_spill] sm:$0xff]  ;;  %v7104_v49 = vld [vmem:[#allocation89_spill] sm:$0xff] }
 0x138   : > { %1899 = vmatprep.mubr.bf16.mxu0 %v750_v23  ;;  %2065 = vmatpush1.bf16.msra.mxu0 %v7079_v57  ;;  %v7091_v23 = vld [vmem:[#allocation49_spill] sm:$0xff]  ;;  %v7094_v57 = vld [vmem:[#allocation84_spill] sm:$0xff] }
 0x139   : > { %v5600_v45 = vpop.f32.mrb[12].mxu1  ;;  %2066 = vmatprep.subr.bf16.mxu0 %v6987_v44  ;;  %v752_v51 = vpack.c.bf16 %v7091_v23, %v7090_v33  ;;  %v7105_v33 = vld [vmem:[#allocation26_spill] sm:$0xff]  ;;  %v7106_v23 = vld [vmem:[#allocation25_spill] sm:$0xff] }
 0x13a   : > { %7080 = vst [vmem:[#allocation13_spill] sm:$0xff] %v5600_v45  ;;  %v1429_v55 = vpop.f32.mrb[13].mxu1 }
 0x13b   : > { %v5605_v18 = vpop.f32.mrb[14].mxu1  ;;  %v7095_v55 = vld [vmem:[#allocation35_spill] sm:$0xff] }
 0x13c   : > { %7081 = vst [vmem:[#allocation28_spill] sm:$0xff] %v5605_v18  ;;  %v1432_v15 = vpop.f32.mrb[15].mxu1  ;;  %2067 = vmatpush1.bf16.msra.mxu0 %v7084_v19  ;;  %v7101_v19 = vld [vmem:[#allocation54_spill] sm:$0xff] }
 0x13d   : > { %2068 = vmatprep.subr.bf16.mxu0 %v6987_v44  ;;  %v7100_v15 = vld [vmem:[#allocation48_spill] sm:$0xff] }
 0x13e   : > { %2173 = vmatmul.mubr.bf16.gmra.mrb[120].mxu1 %v7085_v48  ;;  %v753_v48 = vpack.c.bf16 %v7101_v19, %v7100_v15 }
 0x13f   : > { %1900 = vmatmul.mubr.bf16.gmra.mrb[24].mxu0 %v3316_v53  ;;  %2180 = vmatprep.mubr.bf16.mxu1 %v7086_v34  ;;  %v7097_v53 = vld [vmem:[#allocation19_spill] sm:$0xff] }
 0x140   : > { %1907 = vmatprep.mubr.bf16.mxu0 %v751_v10  ;;  %2069 = vmatpush1.bf16.msra.mxu0 %v7087_v31  ;;  %v3318_v30 = vcombine.low %v7098_v3, %v7097_v53  ;;  %v7102_v31 = vld [vmem:[#allocation38_spill] sm:$0xff]  ;;  %v210_v3 = vld [vmem:[%s6838_s2 + $0x18] sm:$0xff] }
 0x141   : > { %v5614_v13 = vpop.f32.mrb[16].mxu1  ;;  %2070 = vmatprep.subr.bf16.mxu0 %v6987_v44  ;;  %v7110_v53 = vld [vmem:[#allocation94_spill] sm:$0xff]  ;;  %vm258_vm2 = vcmp.ne.f32.partialorder %v210_v3, 0.0 }
 0x142   : > { %7088 = vst [vmem:[#allocation37_spill] sm:$0xff] %v5614_v13  ;;  %v1437_v50 = vpop.f32.mrb[17].mxu1  ;;  %v2494_v15 = vsel %vm258_vm2, 1, %v6987_v44 }
 0x143   : > { %v5619_v42 = vpop.f32.mrb[18].mxu1  ;;  %v7103_v50 = vld [vmem:[#allocation87_spill] sm:$0xff]  ;;  %2543 = vperm.xlu0 %3989, %v2494_v15   ;;  %v7115_v15 = vld [vmem:[#allocation42_spill] sm:$0xff] }
 0x144   : > { %7089 = vst [vmem:[#allocation14_spill] sm:$0xff] %v5619_v42  ;;  %v1440_v40 = vpop.f32.mrb[19].mxu1  ;;  %2071 = vmatpush1.bf16.msra.mxu0 %v7092_v52  ;;  %v7107_v52 = vld [vmem:[#allocation53_spill] sm:$0xff] }
 0x145   : > { %2072 = vmatprep.subr.bf16.mxu0 %v6987_v44 }
 0x146   : > { %2181 = vmatmul.mubr.bf16.gmra.mrb[124].mxu1 %v7093_v0  ;;  %v7108_v0 = vld [vmem:[#allocation59_spill] sm:$0xff] }
 0x147   : > { %1908 = vmatmul.mubr.bf16.gmra.mrb[28].mxu0 %v3317_v9  ;;  %2188 = vmatprep.mubr.bf16.mxu1 %v7094_v57  ;;  %v754_v57 = vpack.c.bf16 %v7108_v0, %v7107_v52  ;;  %v211_v52 = vld [vmem:[%s6838_s2 + $0x20] sm:$0xff] }
 0x148   : > { %1915 = vmatprep.mubr.bf16.mxu0 %v752_v51  ;;  %2073 = vmatpush1.bf16.msra.mxu0 %v7095_v55  ;;  %v3319_v51 = vcombine.low %v7106_v23, %v7105_v33  ;;  %vm259_vm4 = vcmp.ne.f32.partialorder %v211_v52, 0.0  ;;  %v5696_v52 = vld [vmem:[%s4272_s28 + $0xcc] sm:$0xf] }
 0x149   : > { %v5628_v35 = vpop.f32.mrb[20].mxu1  ;;  %2074 = vmatprep.subr.bf16.mxu0 %v6987_v44 }
 0x14a   : > { %7096 = vst [vmem:[#allocation72_spill] sm:$0xff] %v5628_v35  ;;  %v1445_v58 = vpop.f32.mrb[21].mxu1  ;;  %v7129_v35 = vld [vmem:[#allocation6_spill] sm:$0xff] }
 0x14b   : > { %v5633_v10 = vpop.f32.mrb[22].mxu1  ;;  %v7109_v58 = vld [vmem:[#allocation92_spill] sm:$0xff] }
 0x14c   : > { %7099 = vst [vmem:[#allocation74_spill] sm:$0xff] %v5633_v10  ;;  %v1448_v34 = vpop.f32.mrb[23].mxu1  ;;  %2075 = vmatpush1.bf16.msra.mxu0 %v7102_v31 }
 0x14d   : > { %v7112_v34 = vld [vmem:[#allocation33_spill] sm:$0xff] }
 0x14e   : > { %2189 = vmatmul.mubr.bf16.gmra.mrb[128].mxu1 %v7103_v50 }
 0x14f   : > { %1916 = vmatmul.mubr.bf16.gmra.mrb[32].mxu0 %v3318_v30  ;;  %2196 = vmatprep.mubr.bf16.mxu1 %v7104_v49  ;;  %v7113_v49 = vld [vmem:[#allocation58_spill] sm:$0xff] }
 0x150   : > { %1923 = vmatprep.mubr.bf16.mxu0 %v753_v48  ;;  %v7111_v48 = vld [vmem:[#allocation34_spill] sm:$0xff] }
 0x151   : > { %v5640_v5 = vpop.f32.mrb[24].mxu1  ;;  %v3320_v31 = vcombine.low %v7112_v34, %v7111_v48 }
 0x152   : > { %v1453_v9 = vpop.f32.mrb[25].mxu1 }
 0x153   : > { %v5644_v40 = vpop.f32.mrb[26].mxu1  ;;  %v7114_v9 = vld [vmem:[#allocation64_spill] sm:$0xff] }
 0x154   : > { %v1456_v55 = vpop.f32.mrb[27].mxu1  ;;  %v755_v33 = vpack.c.bf16 %v7114_v9, %v7113_v49  ;;  %v7118_v49 = vld [vmem:[#allocation71_spill] sm:$0xff] }
 0x155   : > { %v213_v55 = vld [vmem:[%s6838_s2 + $0x30] sm:$0xff] }
 0x156   : > { %2197 = vmatmul.mubr.bf16.gmra.mrb[132].mxu1 %v7109_v58  ;;  %v214_v58 = vld [vmem:[%s6838_s2 + $0x38] sm:$0xff]  ;;  %vm261_vm5 = vcmp.ne.f32.partialorder %v213_v55, 0.0 }
 0x157   : > { %1924 = vmatmul.mubr.bf16.gmra.mrb[36].mxu0 %v3319_v51  ;;  %2204 = vmatprep.mubr.bf16.mxu1 %v7110_v53  ;;  %v212_v51 = vld [vmem:[%s6838_s2 + $0x28] sm:$0xff]  ;;  %vm262_vm6 = vcmp.ne.f32.partialorder %v214_v58, 0.0  ;;  %v217_v58 = vld [vmem:[%s6838_s2 + $0x50] sm:$0xff] }
 0x158   : > { %1931 = vmatprep.mubr.bf16.mxu0 %v754_v57  ;;  %vm260_vm3 = vcmp.ne.f32.partialorder %v212_v51, 0.0  ;;  %v2495_v57 = vsel %vm259_vm4, 1, %v6987_v44  ;;  %v2498_v3 = vsel %vm262_vm6, 1, %v6987_v44  ;;  %v216_v51 = vld [vmem:[%s6838_s2 + $0x48] sm:$0xff]  ;;  %vm265_vm9 = vcmp.ne.f32.partialorder %v217_v58, 0.0 }
 0x159   : > { %v5653_v30 = vpop.f32.mrb[28].mxu1  ;;  %v2496_v0 = vsel %vm260_vm3, 1, %v6987_v44  ;;  %2546 = vperm.xlu0 %3989, %v2495_v57   ;;  %vm264_vm8 = vcmp.ne.f32.partialorder %v216_v51, 0.0 }
 0x15a   : > { %v1461_v19 = vpop.f32.mrb[29].mxu1  ;;  %2549 = vperm.xlu1 %3990, %v2496_v0   ;;  %v5700_v0 = vld [vmem:[%s4272_s28 + $0xd0] sm:$0xff]   ;;  %v2500_v55 = vsel %vm264_vm8, 1, %v6987_v44 }
 0x15b   : > { %v5658_v50 = vpop.f32.mrb[30].mxu1  ;;  %v7116_v19 = vld [vmem:[#allocation41_spill] sm:$0xff] }
 0x15c   : > { %v1464_v23 = vpop.f32.mrb[31].mxu1  ;;  %v3321_v48 = vcombine.low %v7116_v19, %v7115_v15 }
 0x15d   : > { %2555 = vperm.xlu0 %3989, %v2498_v3   ;;  %v215_v23 = vld [vmem:[%s6838_s2 + $0x40] sm:$0xff]  ;;  %v6947_v3 = vunpack.c.l.bf16 %v5700_v0 }
 0x15e   : > { %2205 = vmatmul.mubr.bf16.gmra.mrb[136].mxu1 %v5364_v25  ;;  %vm263_vm7 = vcmp.ne.f32.partialorder %v215_v23, 0.0  ;;  %v7122_v23 = vld [vmem:[#allocation76_spill] sm:$0xff] }
 0x15f   : > { %1932 = vmatmul.mubr.bf16.gmra.mrb[40].mxu0 %v3320_v31  ;;  %2212 = vmatprep.mubr.bf16.mxu1 %v5371_v4  ;;  %v2497_v4 = vsel %vm261_vm5, 1, %v6987_v44  ;;  %v7117_v31 = vld [vmem:[#allocation63_spill] sm:$0xff]  ;;  %v2499_v57 = vsel %vm263_vm7, 1, %v6987_v44 }
 0x160   : > { %1939 = vmatprep.mubr.bf16.mxu0 %v755_v33  ;;  %v756_v9 = vpack.c.bf16 %v7118_v49, %v7117_v31  ;;  %2552 = vperm.xlu1 %3990, %v2497_v4   ;;  %v7120_v31 = vld [vmem:[#allocation46_spill] sm:$0xff] }
 0x161   : > { %v5678_v25 = vpop.f32.mrb[32].mxu1  ;;  %2561 = vperm.xlu0 %3989, %v2500_v55   ;;  %v783_v55 = vrot.slane %v6947_v3, 1  ;;  %v7127_v3 = vld [vmem:[#allocation75_spill] sm:$0xff] }
 0x162   : > { %v1469_v53 = vpop.f32.mrb[33].mxu1 }
 0x163   : > { %v5684_v34 = vpop.f32.mrb[34].mxu1  ;;  %v6948_v53 = vunpack.c.l.bf16 %v5696_v52 }
 0x164   : > { %v1472_v33 = vpop.f32.mrb[35].mxu1  ;;  %2558 = vperm.xlu1 %3990, %v2499_v57  }
 0x165   : > { %v782_v57 = vrot.slane %v6948_v53, 1  ;;  %v7128_v53 = vld [vmem:[#allocation81_spill] sm:$0xff] }
 0x166   : > { %2213 = vmatmul.mubr.bf16.gmra.mrb[140].mxu1 %v5393_v28  ;;  %v218_v28 = vld [vmem:[%s6838_s2 + $0x58] sm:$0xff] }
 0x167   : > { %1940 = vmatmul.mubr.bf16.gmra.mrb[44].mxu0 %v3321_v48  ;;  %2220 = vmatprep.mubr.bf16.mxu1 %v5400_v16  ;;  %vm266_vm10 = vcmp.ne.f32.partialorder %v218_v28, 0.0  ;;  %v2501_v16 = vsel %vm265_vm9, 1, %v6987_v44  ;;  %v7119_v48 = vld [vmem:[#allocation47_spill] sm:$0xff]  ;;  %v6946_v28 = vunpack.c.h.bf16 %v5700_v0 }
 0x168   : > { %1947 = vmatprep.mubr.bf16.mxu0 %v756_v9  ;;  %v2502_v19 = vsel %vm266_vm10, 1, %v6987_v44  ;;  %v3322_v49 = vcombine.low %v7120_v31, %v7119_v48  ;;  %v7121_v9 = vld [vmem:[#allocation70_spill] sm:$0xff]  ;;  %2564 = vperm.xlu1 %3990, %v2501_v16   ;;  %v220_v48 = vld [vmem:[%s6838_s2 + $0x68] sm:$0xff] }
 0x169   : > { %v5710_v4 = vpop.f32.mrb[36].mxu1  ;;  %v757_v51 = vpack.c.bf16 %v7122_v23, %v7121_v9  ;;  %2567 = vperm.xlu0 %3989, %v2502_v19   ;;  %v7123_v31 = vld [vmem:[#allocation2_spill] sm:$0xff]  ;;  %vm268_vm12 = vcmp.ne.f32.partialorder %v220_v48, 0.0  ;;  %v784_v16 = vrot.slane %v6946_v28, 1 }
 0x16a   : > { %v1477_v15 = vpop.f32.mrb[37].mxu1  ;;  %v7124_v9 = vunpack.c.l.bf16 %v7123_v31  ;;  %v222_v31 = vld [vmem:[%s6838_s2 + $0x78] sm:$0xff] }
 0x16b   : > { %v5718_v33 = vpop.f32.mrb[38].mxu1  ;;  %v219_v15 = vld [vmem:[%s6838_s2 + $0x60] sm:$0xff]  ;;  %vm270_vm14 = vcmp.ne.f32.partialorder %v222_v31, 0.0  ;;  %v7126_v31 = vld [vmem:[#allocation51_spill] sm:$0xff] }
 0x16c   : > { %v1480_v58 = vpop.f32.mrb[39].mxu1  ;;  %v5736_v23 = vrot.slane %v7124_v9, 1  ;;  %vm267_vm11 = vcmp.ne.f32.partialorder %v219_v15, 0.0 }
 0x16d   : > { %v2503_v19 = vsel %vm267_vm11, 1, %v6987_v44  ;;  %v2504_v58 = vsel %vm268_vm12, 1, %v6987_v44 }
 0x16e   : > { %2221 = vmatmul.mubr.bf16.gmra.mrb[144].mxu1 %v5427_v36  ;;  %v221_v36 = vld [vmem:[%s6838_s2 + $0x70] sm:$0xff]  ;;  %2570 = vperm.xlu1 %3990, %v2503_v19   ;;  %v2506_v19 = vsel %vm270_vm14, 1, %v6987_v44 }
 0x16f   : > { %1948 = vmatmul.mubr.bf16.gmra.mrb[48].mxu0 %v3322_v49  ;;  %2228 = vmatprep.mubr.bf16.mxu1 %v5434_v27  ;;  %vm269_vm13 = vcmp.ne.f32.partialorder %v221_v36, 0.0  ;;  %v5751_v27 = vsel %vm609_vm1, %v782_v57, %v783_v55  ;;  %v5756_v49 = vsel %vm609_vm1, %v5736_v23, %v782_v57  ;;  %v7125_v36 = vld [vmem:[#allocation52_spill] sm:$0xff]  ;;  %v758_v57 = vpack.c.bf16 %v7128_v53, %v7127_v3 }
 0x170   : > { %1955 = vmatprep.mubr.bf16.mxu0 %v757_v51  ;;  %2573 = vperm.xlu0 %3989, %v2504_v58   ;;  %v2505_v48 = vsel %vm269_vm13, 1, %v6987_v44  ;;  %v3323_v24 = vcombine.low %v7126_v31, %v7125_v36  ;;  %v5772_v58 = vsel %vm609_vm1, %v783_v55, %v784_v16  ;;  %v223_v31 = vld [vmem:[%s6838_s2 + $0x80] sm:$0xff]  ;;  %v225_v3 = vld [vmem:[%s6838_s2 + $0x90] sm:$0xff]  ;;  %v226_v55 = vld [vmem:[%s6838_s2 + $0x98] sm:$0xff] }
 0x171   : > { %v5758_v15 = vpop.f32.mrb[40].mxu1  ;;  %vm271_vm15 = vcmp.ne.f32.partialorder %v223_v31, 0.0  ;;  %vm273_vm3 = vcmp.ne.f32.partialorder %v225_v3, 0.0  ;;  %vm274_vm4 = vcmp.ne.f32.partialorder %v226_v55, 0.0  ;;  %v7130_v31 = vld [vmem:[#allocation57_spill] sm:$0xff]  ;;  %v229_v3 = vld [vmem:[%s6838_s2 + $0xb0] sm:$0xff] }
 0x172   : > { %v1485_v9 = vpop.f32.mrb[41].mxu1  ;;  %2576 = vperm.xlu1 %3990, %v2505_v48   ;;  %v7133_v55 = vld [vmem:[#allocation86_spill] sm:$0xff]  ;;  %vm277_vm7 = vcmp.ne.f32.partialorder %v229_v3, 0.0 }
 0x173   : > { %v5766_v28 = vpop.f32.mrb[42].mxu1  ;;  %v5777_v9 = vsel %vm609_vm1, %v784_v16, %v7129_v35  ;;  %v2507_v35 = vsel %vm271_vm15, 1, %v6987_v44  ;;  %v2509_v16 = vsel %vm273_vm3, 1, %v6987_v44 }
 0x174   : > { %v1488_v10 = vpop.f32.mrb[43].mxu1  ;;  %2579 = vperm.xlu0 %3989, %v2506_v19   ;;  %v2510_v19 = vsel %vm274_vm4, 1, %v6987_v44 }
 0x175   : > { %v224_v10 = vld [vmem:[%s6838_s2 + $0x88] sm:$0xff] }
 0x176   : > { %2229 = vmatmul.mubr.bf16.gmra.mrb[148].mxu1 %v5459_v29  ;;  %vm272_vm2 = vcmp.ne.f32.partialorder %v224_v10, 0.0  ;;  %v227_v29 = vld [vmem:[%s6838_s2 + $0xa0] sm:$0xff]  ;;  %2582 = vperm.xlu1 %3990, %v2507_v35   ;;  %v7131_v10 = vld [vmem:[#allocation56_spill] sm:$0xff] }
 0x177   : > { %1956 = vmatmul.mubr.bf16.gmra.mrb[52].mxu0 %v3323_v24  ;;  %2236 = vmatprep.mubr.bf16.mxu1 %v5470_v2  ;;  %v2508_v53 = vsel %vm272_vm2, 1, %v6987_v44  ;;  %v228_v24 = vld [vmem:[%s6838_s2 + $0xa8] sm:$0xff]  ;;  %vm275_vm5 = vcmp.ne.f32.partialorder %v227_v29, 0.0  ;;  %v3324_v36 = vcombine.low %v7131_v10, %v7130_v31  ;;  %v230_v29 = vld [vmem:[%s6838_s2 + $0xb8] sm:$0xff] }
 0x178   : > { %1963 = vmatprep.mubr.bf16.mxu0 %v758_v57  ;;  %2585 = vperm.xlu0 %3989, %v2508_v53   ;;  %v3334_v57 = vcombine.low %v5375_v41, %v5406_v8  ;;  %vm276_vm6 = vcmp.ne.f32.partialorder %v228_v24, 0.0  ;;  %v7132_v53 = vld [vmem:[#allocation80_spill] sm:$0xff]  ;;  %v2511_v31 = vsel %vm275_vm5, 1, %v6987_v44  ;;  %vm278_vm8 = vcmp.ne.f32.partialorder %v230_v29, 0.0 }
 0x179   : > { %v5803_v2 = vpop.f32.mrb[44].mxu1  ;;  %v759_v51 = vpack.c.bf16 %v7133_v55, %v7132_v53  ;;  %v2512_v24 = vsel %vm276_vm6, 1, %v6987_v44  ;;  %v2514_v3 = vsel %vm278_vm8, 1, %v6987_v44  ;;  %v7134_v53 = vld [vmem:[#allocation62_spill] sm:$0xff]  ;;  %v7135_v55 = vld [vmem:[#allocation61_spill] sm:$0xff] }
 0x17a   : > { %v1493_v48 = vpop.f32.mrb[45].mxu1  ;;  %2588 = vperm.xlu1 %3990, %v2509_v16   ;;  %v231_v16 = vld [vmem:[%s6838_s2 + $0xc0] sm:$0xff] }
 0x17b   : > { %v5811_v35 = vpop.f32.mrb[46].mxu1  ;;  %vm279_vm9 = vcmp.ne.f32.partialorder %v231_v16, 0.0  ;;  %v7138_v16 = vld [vmem:[#allocation91_spill] sm:$0xff] }
 0x17c   : > { %v1496_v48 = vpop.f32.mrb[47].mxu1  ;;  %2591 = vperm.xlu0 %3989, %v2510_v19   ;;  %v232_v19 = vld [vmem:[%s6838_s2 + $0xc8] sm:$0xff] }
 0x17d   : > { %v7136_v48 = vunpack.c.l.bf16 %v5696_v52  ;;  %vm280_vm10 = vcmp.ne.f32.partialorder %v232_v19, 0.0 }
 0x17e   : > { %2237 = vmatmul.mubr.bf16.gmra.mrb[152].mxu1 %v5490_v56  ;;  %2594 = vperm.xlu1 %3990, %v2511_v31   ;;  %v2513_v56 = vsel %vm277_vm7, 1, %v6987_v44  ;;  %v5841_v31 = vld [vmem:[%s4272_s28 + $0xc8] sm:$0xf] }
 0x17f   : > { %1964 = vmatmul.mubr.bf16.gmra.mrb[56].mxu0 %v3324_v36  ;;  %2244 = vmatprep.mubr.bf16.mxu1 %v3334_v57  ;;  %v776_v36 = vpack.c.bf16 %v5457_v22, %v5424_v39  ;;  %v768_v29 = vrot.slane %v7136_v48, 7  ;;  %v233_v39 = vld [vmem:[%s6838_s2 + $0xd0] sm:$0xff]  ;;  %v7137_v22 = vld [vmem:[#allocation85_spill] sm:$0xff] }
 0x180   : > { %1971 = vmatprep.mubr.bf16.mxu0 %v759_v51  ;;  %2597 = vperm.xlu0 %3989, %v2512_v24   ;;  %v3325_v51 = vcombine.low %v7135_v55, %v7134_v53  ;;  %v3335_v24 = vcombine.low %v5841_v31, %v5696_v52  ;;  %v234_v53 = vld [vmem:[%s6838_s2 + $0xd8] sm:$0xff]  ;;  %v2515_v55 = vsel %vm279_vm9, 1, %v6987_v44  ;;  %v2516_v52 = vsel %vm280_vm10, 1, %v6987_v44  ;;  %v7140_v48 = vld [vmem:[#allocation68_spill] sm:$0xff] }
 0x181   : > { %v5830_v10 = vpop.f32.mrb[48].mxu1  ;;  %vm281_vm11 = vcmp.ne.f32.partialorder %v233_v39, 0.0  ;;  %v773_v19 = vsel %vm464_vm0, %v4319_v32, %v768_v29  ;;  %vm282_vm12 = vcmp.ne.f32.partialorder %v234_v53, 0.0  ;;  %v7142_v53 = vunpack.c.h.bf16 %v5700_v0 }
 0x182   : > { %v1501_v57 = vpop.f32.mrb[49].mxu1  ;;  %2600 = vperm.xlu1 %3990, %v2513_v56   ;;  %v236_v56 = vld [vmem:[%s6838_s2 + $0xe8] sm:$0xff]  ;;  %v777_v32 = vpack.c.bf16 %v773_v19, %v5453_v43 }
 0x183   : > { %v5845_v42 = vpop.f32.mrb[50].mxu1  ;;  %v760_v57 = vpack.c.bf16 %v7138_v16, %v7137_v22  ;;  %v2518_v22 = vsel %vm282_vm12, 1, %v6987_v44  ;;  %v7141_v16 = vunpack.c.l.bf16 %v5700_v0  ;;  %vm284_vm14 = vcmp.ne.f32.partialorder %v236_v56, 0.0 }
 0x184   : > { %v1504_v13 = vpop.f32.mrb[51].mxu1  ;;  %2603 = vperm.xlu0 %3989, %v2514_v3   ;;  %v2517_v3 = vsel %vm281_vm11, 1, %v6987_v44  ;;  %v2520_v19 = vsel %vm284_vm14, 1, %v6987_v44 }
 0x185   : > { %v235_v13 = vld [vmem:[%s6838_s2 + $0xe0] sm:$0xff] }
 0x186   : > { %2245 = vmatmul.mubr.bf16.gmra.mrb[156].mxu1 %v776_v36  ;;  %2606 = vperm.xlu1 %3990, %v2515_v55   ;;  %vm283_vm13 = vcmp.ne.f32.partialorder %v235_v13, 0.0  ;;  %v5877_v55 = vrot.slane %v7142_v53, 7 }
 0x187   : > { %1972 = vmatmul.mubr.bf16.gmra.mrb[60].mxu0 %v3325_v51  ;;  %2252 = vmatprep.mubr.bf16.mxu1 %v3335_v24  ;;  %v7139_v51 = vld [vmem:[#allocation69_spill] sm:$0xff]  ;;  %v2519_v43 = vsel %vm283_vm13, 1, %v6987_v44 }
 0x188   : > { %1979 = vmatprep.mubr.bf16.mxu0 %v760_v57  ;;  %2609 = vperm.xlu0 %3989, %v2516_v52   ;;  %v3326_v24 = vcombine.low %v7140_v48, %v7139_v51  ;;  %v769_v57 = vrot.slane %v7141_v16, 7  ;;  %v7143_v52 = vld [vmem:[#allocation90_spill] sm:$0xff] }
 0x189   : > { %v5866_v36 = vpop.f32.mrb[52].mxu1  ;;  %v761_v45 = vpack.c.bf16 %v5356_v1, %v7143_v52 }
 0x18a   : > { %v1509_v39 = vpop.f32.mrb[53].mxu1  ;;  %2612 = vperm.xlu1 %3990, %v2517_v3   ;;  %v771_v13 = vsel %vm464_vm0, %v769_v57, %v5877_v55  ;;  %v772_v1 = vsel %vm464_vm0, %v768_v29, %v769_v57  ;;  %v237_v3 = vld [vmem:[%s6838_s2 + $0xf0] sm:$0xff]  ;;  %v7144_v57 = vld [vmem:[#allocation95_spill] sm:$0xff] }
 0x18b   : > { %v5879_v18 = vpop.f32.mrb[54].mxu1  ;;  %v778_v48 = vpack.c.bf16 %v771_v13, %v772_v1  ;;  %vm285_vm15 = vcmp.ne.f32.partialorder %v237_v3, 0.0  ;;  %v4141_v39 = vld [vmem:[%s4272_s28 + $0x98] sm:$0xf]  ;;  %v762_v53 = vpack.c.bf16 %v5385_v54, %v7144_v57  ;;  %v241_v3 = vld [vmem:[%s6838_s2 + $0x110] sm:$0xff]  ;;  %v763_v57 = vpack.c.bf16 %v5416_v21, %v5381_v62 }
 0x18c   : > { %v1512_v51 = vpop.f32.mrb[55].mxu1  ;;  %2615 = vperm.xlu0 %3989, %v2518_v22   ;;  %v2521_v22 = vsel %vm285_vm15, 1, %v6987_v44  ;;  %vm289_vm5 = vcmp.ne.f32.partialorder %v241_v3, 0.0  ;;  %v246_v3 = vld [vmem:[%s6838_s2 + $0x138] sm:$0xff] }
 0x18d   : > { %v239_v51 = vld [vmem:[%s6838_s2 + $0x100] sm:$0xff]  ;;  %vm294_vm10 = vcmp.ne.f32.partialorder %v246_v3, 0.0 }
 0x18e   : > { %2253 = vmatmul.mubr.bf16.gmra.mrb[160].mxu1 %v777_v32  ;;  %2618 = vperm.xlu1 %3990, %v2519_v43   ;;  %v4140_v32 = vld [vmem:[%s4272_s28 + $0x94] sm:$0xf]  ;;  %v240_v43 = vld [vmem:[%s6838_s2 + $0x108] sm:$0xff]  ;;  %vm287_vm3 = vcmp.ne.f32.partialorder %v239_v51, 0.0 }
 0x18f   : > { %1980 = vmatmul.mubr.bf16.gmra.mrb[64].mxu0 %v3326_v24  ;;  %2260 = vmatprep.mubr.bf16.mxu1 %v5700_v0  ;;  %v238_v0 = vld [vmem:[%s6838_s2 + $0xf8] sm:$0xff]  ;;  %v3327_v29 = vcombine.low %v4140_v32, %v4141_v39  ;;  %vm288_vm4 = vcmp.ne.f32.partialorder %v240_v43, 0.0  ;;  %v2523_v54 = vsel %vm287_vm3, 1, %v6987_v44  ;;  %v4143_v32 = vld [vmem:[%s4272_s28 + $0xa0] sm:$0xf]  ;;  %v244_v51 = vld [vmem:[%s6838_s2 + $0x128] sm:$0xff] }
 0x190   : > { %1987 = vmatprep.mubr.bf16.mxu0 %v761_v45  ;;  %2621 = vperm.xlu0 %3989, %v2520_v19   ;;  %vm286_vm2 = vcmp.ne.f32.partialorder %v238_v0, 0.0  ;;  %v7145_v19 = vld [vmem:[#allocation8_spill] sm:$0xff]  ;;  %v2524_v13 = vsel %vm288_vm4, 1, %v6987_v44  ;;  %v242_v0 = vld [vmem:[%s6838_s2 + $0x118] sm:$0xff]  ;;  %v7146_v43 = vld [vmem:[#allocation11_spill] sm:$0xff]  ;;  %vm292_vm8 = vcmp.ne.f32.partialorder %v244_v51, 0.0 }
 0x191   : > { %v5891_v56 = vpop.f32.mrb[56].mxu1  ;;  %v2522_v16 = vsel %vm286_vm2, 1, %v6987_v44  ;;  %vm290_vm6 = vcmp.ne.f32.partialorder %v242_v0, 0.0  ;;  %v2528_v21 = vsel %vm292_vm8, 1, %v6987_v44  ;;  %v248_v51 = vld [vmem:[%s6838_s2 + $0x148] sm:$0xff] }
 0x192   : > { %v1517_v24 = vpop.f32.mrb[57].mxu1  ;;  %2624 = vperm.xlu1 %3990, %v2521_v22   ;;  %v2525_v22 = vsel %vm289_vm5, 1, %v6987_v44  ;;  %vm296_vm12 = vcmp.ne.f32.partialorder %v248_v51, 0.0 }
 0x193   : > { %v5901_v45 = vpop.f32.mrb[58].mxu1  ;;  %v4142_v24 = vld [vmem:[%s4272_s28 + $0x9c] sm:$0xf] }
 0x194   : > { %v1520_v52 = vpop.f32.mrb[59].mxu1  ;;  %2627 = vperm.xlu0 %3989, %v2522_v16   ;;  %v3328_v39 = vcombine.low %v4142_v24, %v4143_v32  ;;  %v2526_v16 = vsel %vm290_vm6, 1, %v6987_v44  ;;  %v4145_v24 = vld [vmem:[%s4272_s28 + $0xa8] sm:$0xf] }
 0x195   : > { %v243_v52 = vld [vmem:[%s6838_s2 + $0x120] sm:$0xff] }
 0x196   : > { %2261 = vmatmul.mubr.bf16.gmra.mrb[164].mxu1 %v778_v48  ;;  %2630 = vperm.xlu1 %3990, %v2523_v54   ;;  %vm291_vm7 = vcmp.ne.f32.partialorder %v243_v52, 0.0  ;;  %v247_v52 = vld [vmem:[%s6838_s2 + $0x140] sm:$0xff] }
 0x197   : > { %1988 = vmatmul.mubr.bf16.gmra.mrb[68].mxu0 %v3327_v29  ;;  %3695 = vmatprep.mubr.bf16.mxu1 %v7145_v19  ;;  %v7147_v19 = vld [vmem:[#allocation16_spill] sm:$0xff]  ;;  %v2527_v62 = vsel %vm291_vm7, 1, %v6987_v44  ;;  %vm295_vm11 = vcmp.ne.f32.partialorder %v247_v52, 0.0  ;;  %v7150_v52 = vunpack.c.l.bf16 %v5375_v41  ;;  %v7153_v41 = vld [vmem:[#allocation45_spill] sm:$0xff] }
 0x198   : > { %1995 = vmatprep.mubr.bf16.mxu0 %v762_v53  ;;  %2633 = vperm.xlu0 %3989, %v2524_v13   ;;  %v245_v13 = vld [vmem:[%s6838_s2 + $0x130] sm:$0xff] }
 0x199   : > { %v5916_v1 = vpop.f32.mrb[60].mxu1  ;;  %vm293_vm9 = vcmp.ne.f32.partialorder %v245_v13, 0.0  ;;  %v250_v13 = vld [vmem:[%s6838_s2 + $0x158] sm:$0xff]  ;;  %v737_v51 = vrot.slane %v7150_v52, 1 }
 0x19a   : > { %v1525_v48 = vpop.f32.mrb[61].mxu1  ;;  %2636 = vperm.xlu1 %3990, %v2525_v22   ;;  %v2529_v22 = vsel %vm293_vm9, 1, %v6987_v44  ;;  %vm298_vm14 = vcmp.ne.f32.partialorder %v250_v13, 0.0 }
 0x19b   : > { %v5926_v29 = vpop.f32.mrb[62].mxu1  ;;  %v4144_v48 = vld [vmem:[%s4272_s28 + $0xa4] sm:$0xf] }
 0x19c   : > { %v1528_v53 = vpop.f32.mrb[63].mxu1  ;;  %2639 = vperm.xlu0 %3989, %v2526_v16   ;;  %v3329_v32 = vcombine.low %v4144_v48, %v4145_v24  ;;  %v2530_v16 = vsel %vm294_vm10, 1, %v6987_v44  ;;  %v4147_v48 = vld [vmem:[%s4272_s28 + $0xb0] sm:$0xf] }
 0x19e   : > { %3696 = vmatmul.mubr.bf16.vlgmr.msra.gmra.mrb[168].mxu1 %v7146_v43  ;;  %2642 = vperm.xlu1 %3990, %v2527_v62   ;;  %v7148_v43 = vld [vmem:[#allocation23_spill] sm:$0xff] }
 0x19f   : > { %1996 = vmatmul.mubr.bf16.gmra.mrb[72].mxu0 %v3328_v39  ;;  %3699 = vmatprep.mubr.bf16.mxu1 %v7147_v19  ;;  %v7149_v19 = vld [vmem:[#allocation31_spill] sm:$0xff] }
 0x1a0   : > { %2003 = vmatprep.mubr.bf16.mxu0 %v763_v57  ;;  %2645 = vperm.xlu0 %3989, %v2528_v21   ;;  %v764_v57 = vpack.c.bf16 %v5448_v60, %v5412_v61  ;;  %v2531_v61 = vsel %vm295_vm11, 1, %v6987_v44  ;;  %v2532_v60 = vsel %vm296_vm12, 1, %v6987_v44  ;;  %v249_v21 = vld [vmem:[%s6838_s2 + $0x150] sm:$0xff] }
 0x1a1   : > { %v5942_v54 = vpop.f32.mrb[64].mxu1  ;;  %vm297_vm13 = vcmp.ne.f32.partialorder %v249_v21, 0.0  ;;  %v7152_v21 = vld [vmem:[#allocation40_spill] sm:$0xff] }
 0x1a2   : > { %v1533_v0 = vpop.f32.mrb[65].mxu1  ;;  %2648 = vperm.xlu1 %3990, %v2529_v22   ;;  %v2533_v22 = vsel %vm297_vm13, 1, %v6987_v44 }
 0x1a3   : > { %v5952_v39 = vpop.f32.mrb[66].mxu1  ;;  %v4146_v0 = vld [vmem:[%s4272_s28 + $0xac] sm:$0xf] }
 0x1a4   : > { %v1536_v53 = vpop.f32.mrb[67].mxu1  ;;  %2651 = vperm.xlu0 %3989, %v2530_v16   ;;  %v3330_v24 = vcombine.low %v4146_v0, %v4147_v48  ;;  %v2534_v16 = vsel %vm298_vm14, 1, %v6987_v44  ;;  %v253_v48 = vld [vmem:[%s6838_s2 + $0x170] sm:$0xff] }
 0x1a5   : > { %vm301_vm3 = vcmp.ne.f32.partialorder %v253_v48, 0.0 }
 0x1a6   : > { %3700 = vmatmul.mubr.bf16.gmra.mrb[172].mxu1 %v7148_v43  ;;  %2654 = vperm.xlu1 %3990, %v2531_v61   ;;  %v7151_v43 = vunpack.c.l.bf16 %v5406_v8  ;;  %v251_v61 = vld [vmem:[%s6838_s2 + $0x160] sm:$0xff] }
 0x1a7   : > { %2004 = vmatmul.mubr.bf16.gmra.mrb[76].mxu0 %v3329_v32  ;;  %3703 = vmatprep.mubr.bf16.mxu1 %v7149_v19  ;;  %vm299_vm15 = vcmp.ne.f32.partialorder %v251_v61, 0.0 }
 0x1a8   : > { %2011 = vmatprep.mubr.bf16.mxu0 %v764_v57  ;;  %2657 = vperm.xlu0 %3989, %v2532_v60   ;;  %v765_v57 = vpack.c.bf16 %v5484_v37, %v5444_v26  ;;  %v738_v19 = vrot.slane %v7151_v43, 1  ;;  %v252_v60 = vld [vmem:[%s6838_s2 + $0x168] sm:$0xff]  ;;  %v2535_v8 = vsel %vm299_vm15, 1, %v6987_v44 }
 0x1a9   : > { %v5968_v62 = vpop.f32.mrb[68].mxu1  ;;  %vm300_vm2 = vcmp.ne.f32.partialorder %v252_v60, 0.0  ;;  %v255_v60 = vld [vmem:[%s6838_s2 + $0x180] sm:$0xff] }
 0x1aa   : > { %v1541_v3 = vpop.f32.mrb[69].mxu1  ;;  %2660 = vperm.xlu1 %3990, %v2533_v22   ;;  %v2536_v26 = vsel %vm300_vm2, 1, %v6987_v44  ;;  %v6000_v13 = vsel %vm609_vm1, %v737_v51, %v738_v19  ;;  %vm303_vm5 = vcmp.ne.f32.partialorder %v255_v60, 0.0 }
 0x1ab   : > { %v5978_v32 = vpop.f32.mrb[70].mxu1  ;;  %v6005_v3 = vsel %vm609_vm1, %v5476_v38, %v737_v51  ;;  %v2537_v38 = vsel %vm301_vm3, 1, %v6987_v44 }
 0x1ac   : > { %v1544_v53 = vpop.f32.mrb[71].mxu1  ;;  %2663 = vperm.xlu0 %3989, %v2534_v16   ;;  %v4148_v16 = vld [vmem:[%s4272_s28 + $0xb4] sm:$0xf]  ;;  %v766_v43 = vpack.c.bf16 %v6000_v13, %v6005_v3 }
 0x1ae   : > { %3704 = vmatmul.mubr.bf16.gmra.mrb[176].mxu1 %v7152_v21  ;;  %2666 = vperm.xlu1 %3990, %v2535_v8   ;;  %v256_v21 = vld [vmem:[%s6838_s2 + $0x188] sm:$0xff] }
 0x1af   : > { %2012 = vmatmul.mubr.bf16.gmra.mrb[80].mxu0 %v3330_v24  ;;  %3707 = vmatprep.mubr.bf16.mxu1 %v7153_v41  ;;  %v254_v24 = vld [vmem:[%s6838_s2 + $0x178] sm:$0xff]  ;;  %v7154_v41 = vld [vmem:[#allocation50_spill] sm:$0xff]  ;;  %vm304_vm6 = vcmp.ne.f32.partialorder %v256_v21, 0.0  ;;  %v7155_v8 = vld [vmem:[#allocation55_spill] sm:$0xff] }
 0x1b0   : > { %2019 = vmatprep.mubr.bf16.mxu0 %v765_v57  ;;  %2669 = vperm.xlu0 %3989, %v2536_v26   ;;  %vm302_vm4 = vcmp.ne.f32.partialorder %v254_v24, 0.0  ;;  %v4149_v57 = vld [vmem:[%s4272_s28 + $0xb8] sm:$0xf]  ;;  %v2539_v26 = vsel %vm303_vm5, 1, %v6987_v44  ;;  %v2540_v48 = vsel %vm304_vm6, 1, %v6987_v44  ;;  %v6036_v24 = vsel %vm609_vm1, %v738_v19, %v5736_v23  ;;  %v7157_v21 = vld [vmem:[#allocation60_spill] sm:$0xff] }
 0x1b1   : > { %v6007_v0 = vpop.f32.mrb[72].mxu1  ;;  %v3331_v53 = vcombine.low %v4148_v16, %v4149_v57  ;;  %v2538_v51 = vsel %vm302_vm4, 1, %v6987_v44 }
 0x1b2   : > { %v1549_v22 = vpop.f32.mrb[73].mxu1  ;;  %2672 = vperm.xlu1 %3990, %v2537_v38  }
 0x1b3   : > { %v6017_v52 = vpop.f32.mrb[74].mxu1  ;;  %v7156_v22 = vld [vmem:[#allocation4_spill] sm:$0xff] }
 0x1b4   : > { %v1552_v61 = vpop.f32.mrb[75].mxu1  ;;  %2675 = vperm.xlu0 %3989, %v2538_v51   ;;  %v743_v16 = vsel %vm609_vm1, %v5736_v23, %v7156_v22  ;;  %v4150_v51 = vld [vmem:[%s4272_s28 + $0xc0] sm:$0xf] }
 0x1b5   : > { %v767_v60 = vpack.c.bf16 %v743_v16, %v6036_v24  ;;  %v7160_v16 = vld [vmem:[#allocation78_spill] sm:$0xff] }
 0x1b6   : > { %3708 = vmatmul.mubr.bf16.gmra.mrb[180].mxu1 %v7154_v41  ;;  %2678 = vperm.xlu1 %3990, %v2539_v26   ;;  %v7158_v41 = vld [vmem:[#allocation66_spill] sm:$0xff] }
 0x1b7   : > { %2020 = vmatmul.mubr.bf16.gmra.mrb[84].mxu0 %v3331_v53  ;;  %3711 = vmatprep.mubr.bf16.mxu1 %v7155_v8  ;;  %v257_v53 = vld [vmem:[%s6838_s2 + $0x190] sm:$0xff] }
 0x1b8   : > { %2027 = vmatprep.mubr.bf16.mxu0 %v766_v43  ;;  %2681 = vperm.xlu0 %3989, %v2540_v48   ;;  %vm305_vm7 = vcmp.ne.f32.partialorder %v257_v53, 0.0  ;;  %v3332_v43 = vcombine.low %v5466_v14, %v4150_v51  ;;  %v4151_v48 = vld [vmem:[%s4272_s28 + $0xc4] sm:$0xf]  ;;  %v7161_v51 = vld [vmem:[#allocation3_spill] sm:$0xff] }
 0x1b9   : > { %v6042_v57 = vpop.f32.mrb[76].mxu1  ;;  %v2541_v61 = vsel %vm305_vm7, 1, %v6987_v44  ;;  %v3333_v14 = vcombine.low %v4151_v48, %v5841_v31  ;;  %v7164_v48 = vld [vmem:[#allocation83_spill] sm:$0xff] }
 0x1ba   : > { %v1557_v38 = vpop.f32.mrb[77].mxu1  ;;  %2684 = vperm.xlu1 %3990, %v2541_v61   ;;  %v7162_v61 = vld [vmem:[#allocation7_spill] sm:$0xff] }
 0x1bb   : > { %v6049_v19 = vpop.f32.mrb[78].mxu1  ;;  %v7159_v38 = vld [vmem:[#allocation73_spill] sm:$0xff] }
 0x1bc   : > { %v1560_v23 = vpop.f32.mrb[79].mxu1 }
 0x1be   : > { %3712 = vmatmul.mubr.bf16.gmra.mrb[184].mxu1 %v7157_v21  ;;  %v7163_v21 = vld [vmem:[#allocation5_spill] sm:$0xff] }
 0x1bf   : > { %2028 = vmatmul.mubr.bf16.gmra.mrb[88].mxu0 %v3332_v43  ;;  %3715 = vmatprep.mubr.bf16.mxu1 %v7158_v41  ;;  %v774_v43 = vsel %vm464_vm0, %v5877_v55, %v7161_v51  ;;  %v7167_v51 = vld [vmem:[#allocation93_spill] sm:$0xff] }
 0x1c0   : > { %2035 = vmatprep.mubr.bf16.mxu0 %v767_v60  ;;  %v775_v31 = vpack.c.bf16 %v7163_v21, %v774_v43  ;;  %v7169_v43 = vld [vmem:[#allocation96_spill] sm:$0xff] }
 0x1c1   : > { %v6055_v8 = vpop.f32.mrb[80].mxu1 }
 0x1c2   : > { %v1565_v26 = vpop.f32.mrb[81].mxu1 }
 0x1c3   : > { %v6059_v22 = vpop.f32.mrb[82].mxu1 }
 0x1c4   : > { %v1568_v53 = vpop.f32.mrb[83].mxu1 }
 0x1c5   : > { %v7166_v53 = vld [vmem:[#allocation9_spill] sm:$0xff] }
 0x1c6   : > { %3716 = vmatmul.mubr.bf16.gmra.mrb[188].mxu1 %v7159_v38 }
 0x1c7   : > { %2036 = vmatmul.mubr.bf16.gmra.mrb[92].mxu0 %v3333_v14  ;;  %3719 = vmatprep.mubr.bf16.mxu1 %v7160_v16  ;;  %v7165_v14 = vld [vmem:[#allocation88_spill] sm:$0xff] }
 0x1c8   : > { %2076 = vmatprep.mubr.bf16.mxu0 %v7162_v61  ;;  %v7168_v61 = vld [vmem:[#allocation10_spill] sm:$0xff] }
 0x1c9   : > { %v6068_v60 = vpop.f32.mrb[84].mxu1 }
 0x1ca   : > { %v1573_v23 = vpop.f32.mrb[85].mxu1 }
 0x1cb   : > { %v6071_v41 = vpop.f32.mrb[86].mxu1  ;;  %v7170_v23 = vld [vmem:[#allocation12_spill] sm:$0xff] }
 0x1cc   : > { %v1576_v26 = vpop.f32.mrb[87].mxu1 }
 0x1ce   : > { %3720 = vmatmul.mubr.bf16.gmra.mrb[192].mxu1 %v7164_v48 }
 0x1cf   : > { %2077 = vmatmul.mubr.bf16.vlgmr.msra.gmra.mrb[0].mxu0 %v775_v31  ;;  %3723 = vmatprep.mubr.bf16.mxu1 %v7165_v14  ;;  %v7171_v14 = vld [vmem:[#allocation15_spill] sm:$0xff] }
 0x1d0   : > { %2084 = vmatprep.mubr.bf16.mxu0 %v7166_v53  ;;  %v7172_v53 = vld [vmem:[#allocation17_spill] sm:$0xff] }
 0x1d1   : > { %v6076_v38 = vpop.f32.mrb[88].mxu1 }
 0x1d2   : > { %v1581_v20 = vpop.f32.mrb[89].mxu1 }
 0x1d3   : > { %v6078_v55 = vpop.f32.mrb[90].mxu1 }
 0x1d4   : > { %v1584_v16 = vpop.f32.mrb[91].mxu1 }
 0x1d6   : > { %3724 = vmatmul.mubr.bf16.gmra.mrb[196].mxu1 %v7167_v51  ;;  %v789_v51 = vpack.c.bf16 %v6005_v3, %v5484_v37  ;;  %v7176_v37 = vpack.c.bf16 %v5751_v27, %v5756_v49 }
 0x1d7   : > { %2085 = vmatmul.mubr.bf16.gmra.mrb[4].mxu0 %v7168_v61  ;;  %3727 = vmatprep.mubr.bf16.mxu1 %v7169_v43 }
 0x1d8   : > { %2092 = vmatprep.mubr.bf16.mxu0 %v7170_v23  ;;  %v7173_v23 = vld [vmem:[#allocation22_spill] sm:$0xff] }
 0x1d9   : > { %v6084_v21 = vpop.f32.mrb[92].mxu1 }
 0x1da   : > { %v1589_v31 = vpop.f32.mrb[93].mxu1 }
 0x1db   : > { %v6086_v26 = vpop.f32.mrb[94].mxu1  ;;  %v7174_v31 = vld [vmem:[#allocation24_spill] sm:$0xff] }
 0x1dc   : > { %v1592_v48 = vpop.f32.mrb[95].mxu1 }
 0x1de   : > { %3728 = vmatmul.mubr.bf16.gmra.mrb[200].mxu1 %v5397_v47 }
 0x1df   : > { %2093 = vmatmul.mubr.bf16.gmra.mrb[8].mxu0 %v7171_v14  ;;  %3731 = vmatprep.mubr.bf16.mxu1 %v5431_v6  ;;  %v790_v6 = vpack.c.bf16 %v6036_v24, %v6000_v13  ;;  %v7178_v13 = vpack.c.bf16 %v5777_v9, %v5772_v58  ;;  %v7179_v24 = vld [vmem:[#allocation39_spill] sm:$0xff] }
 0x1e0   : > { %2100 = vmatprep.mubr.bf16.mxu0 %v7172_v53 }
 0x1e1   : > { %v2126_v20 = vpop.f32.mrb[96].mxu1 }
 0x1e2   : > { %v2128_v16 = vpop.f32.mrb[97].mxu1 }
 0x1e3   : > { %v2129_v61 = vpop.f32.mrb[98].mxu1  ;;  %v7175_v16 = vld [vmem:[#allocation30_spill] sm:$0xff] }
 0x1e4   : > { %v2131_v43 = vpop.f32.mrb[99].mxu1 }
 0x1e6   : > { %3732 = vmatmul.mubr.bf16.gmra.mrb[204].mxu1 %v5463_v7  ;;  %v7177_v7 = vld [vmem:[#allocation32_spill] sm:$0xff] }
 0x1e7   : > { %2101 = vmatmul.mubr.bf16.gmra.mrb[12].mxu0 %v7173_v23  ;;  %3735 = vmatprep.mubr.bf16.mxu1 %v789_v51 }
 0x1e8   : > { %2108 = vmatprep.mubr.bf16.mxu0 %v7174_v31 }
 0x1e9   : > { %v2134_v47 = vpop.f32.mrb[100].mxu1 }
 0x1ea   : > { %v2136_v48 = vpop.f32.mrb[101].mxu1 }
 0x1eb   : > { %v2137_v14 = vpop.f32.mrb[102].mxu1 }
 0x1ec   : > { %v2139_v53 = vpop.f32.mrb[103].mxu1 }
 0x1ee   : > { %3736 = vmatmul.mubr.bf16.gmra.mrb[208].mxu1 %v790_v6 }
 0x1ef   : > { %2109 = vmatmul.mubr.bf16.gmra.mrb[16].mxu0 %v7175_v16  ;;  %3739 = vmatprep.mubr.bf16.mxu1 %v7176_v37 }
 0x1f0   : > { %2116 = vmatprep.mubr.bf16.mxu0 %v7177_v7 }
 0x1f1   : > { %v6104_v3 = vpop.f32.mrb[104].mxu1 }
 0x1f2   : > { %v2144_v51 = vpop.f32.mrb[105].mxu1 }
 0x1f3   : > { %v6106_v43 = vpop.f32.mrb[106].mxu1 }
 0x1f4   : > { %v2147_v23 = vpop.f32.mrb[107].mxu1 }
 0x1f5   : > { %v6124_v23 = vpop.permute.xlu0 %2543 }
 0x1f6   : > { %3740 = vmatmul.mubr.bf16.gmra.mrb[212].mxu1 %v7178_v13  ;;  %7180 = vst [vmem:[#allocation20_spill] sm:$0xff] %v6124_v23  ;;  %v3409_v13 = vcombine.low %v6987_v44, %v6987_v44 }
 0x1f7   : > { %2117 = vmatmul.mubr.bf16.gmra.mrb[20].mxu0 %v7179_v24  ;;  %v3410_v24 = vcombine.high %v6987_v44, %v6987_v44 }
 0x1f8   : > { %3138 = vst [vmem:[%s6139_s30] sm:$0xf] %v3409_v13  ;;  %3140 = vst [vmem:[%s6139_s30 + $0x8] sm:$0xf] %v3409_v13 }
 0x1f9   : > { %v6112_v31 = vpop.f32.mrb[108].mxu1  ;;  %3139 = vst [vmem:[%s6139_s30 + $0x4] sm:$0xf] %v3410_v24  ;;  %3189 = vst [vmem:[%s6139_s30 + $0xcc] sm:$0xf] %v3409_v13 }
 0x1fa   : > { %v2152_v6 = vpop.f32.mrb[109].mxu1  ;;  %3190 = vst [vmem:[%s6139_s30 + $0xd0] sm:$0xf] %v3410_v24  ;;  %3191 = vst [vmem:[%s6139_s30 + $0xd4] sm:$0xf] %v3409_v13 }
 0x1fb   : > { %v6114_v27 = vpop.f32.mrb[110].mxu1 }
 0x1fc   : > { %v2155_v49 = vpop.f32.mrb[111].mxu1 }
 0x1fd   : > { %v6132_v49 = vpop.permute.xlu1 %2549 }
 0x1fe   : > { %7181 = vst [vmem:[#allocation36_spill] sm:$0xff] %v6132_v49 }
 0x201   : > { %v6116_v48 = vpop.f32.mrb[112].mxu1  ;;  %v6159_v24 = vpop.permute.xlu1 %2552 }
 0x202   : > { %v2160_v53 = vpop.f32.mrb[113].mxu1  ;;  %7183 = vst [vmem:[#allocation21_spill] sm:$0xff] %v6159_v24 }
 0x203   : > { %v6118_v16 = vpop.f32.mrb[114].mxu1 }
 0x204   : > { %v2163_v37 = vpop.f32.mrb[115].mxu1 }
 0x205   : > { %v6173_v24 = vpop.permute.xlu1 %2558 }
 0x206   : > { %7185 = vst [vmem:[#allocation79_spill] sm:$0xff] %v6173_v24 }
 0x209   : > { %v6120_v7 = vpop.f32.mrb[116].mxu1 }
 0x20a   : > { %v2168_v51 = vpop.f32.mrb[117].mxu1 }
 0x20b   : > { %v6122_v58 = vpop.f32.mrb[118].mxu1 }
 0x20c   : > { %v2171_v9 = vpop.f32.mrb[119].mxu1 }
 0x211   : > { %v6130_v6 = vpop.f32.mrb[120].mxu1 }
 0x212   : > { %v1901_v53 = vpop.f32.mrb[24].mxu0  ;;  %v2176_v37 = vpop.f32.mrb[121].mxu1 }
 0x213   : > { %v3787_v44 = vadd.f32 %v1901_v53, %v5640_v5  ;;  %v1903_v51 = vpop.f32.mrb[25].mxu0  ;;  %v6148_v9 = vpop.f32.mrb[122].mxu1 }
 0x214   : > { %v1904_v11 = vpop.f32.mrb[26].mxu0  ;;  %v2179_v12 = vpop.f32.mrb[123].mxu1 }
 0x215   : > { %v3789_v63 = vadd.f32 %v1904_v11, %v5644_v40  ;;  %v6151_v17 = vadd.f32 %v3787_v44, %v2126_v20  ;;  %v1906_v49 = vpop.f32.mrb[27].mxu0  ;;  %v6155_v37 = vpop.permute.xlu0 %2546 }
 0x216   : > { %7182 = vst [vmem:[#allocation44_spill] sm:$0xff] %v6155_v37 }
 0x217   : > { %v6153_v59 = vadd.f32 %v3789_v63, %v2129_v61 }
 0x219   : > { %v6157_v23 = vpop.f32.mrb[124].mxu1  ;;  %v6169_v49 = vpop.permute.xlu0 %2555 }
 0x21a   : > { %v1909_v13 = vpop.f32.mrb[28].mxu0  ;;  %v2184_v5 = vpop.f32.mrb[125].mxu1  ;;  %7184 = vst [vmem:[#allocation77_spill] sm:$0xff] %v6169_v49 }
 0x21b   : > { %v3791_v53 = vadd.f32 %v1909_v13, %v5653_v30  ;;  %v1911_v51 = vpop.f32.mrb[29].mxu0  ;;  %v6162_v46 = vpop.f32.mrb[126].mxu1 }
 0x21c   : > { %v1912_v12 = vpop.f32.mrb[30].mxu0  ;;  %v2187_v11 = vpop.f32.mrb[127].mxu1 }
 0x21d   : > { %v3793_v40 = vadd.f32 %v1912_v12, %v5658_v50  ;;  %v6165_v20 = vadd.f32 %v3791_v53, %v2134_v47  ;;  %v1914_v63 = vpop.f32.mrb[31].mxu0 }
 0x21f   : > { %v6167_v61 = vadd.f32 %v3793_v40, %v2137_v14  ;;  %v6185_v40 = vpop.permute.xlu0 %2561 }
 0x220   : > { %7186 = vst [vmem:[#allocation27_spill] sm:$0xff] %v6185_v40 }
 0x221   : > { %v6171_v44 = vpop.f32.mrb[128].mxu1 }
 0x222   : > { %v1917_v5 = vpop.f32.mrb[32].mxu0  ;;  %v2192_v30 = vpop.f32.mrb[129].mxu1 }
 0x223   : > { %v3795_v13 = vadd.f32 %v1917_v5, %v5678_v25  ;;  %v1919_v51 = vpop.f32.mrb[33].mxu0  ;;  %v6176_v37 = vpop.f32.mrb[130].mxu1 }
 0x224   : > { %v1920_v11 = vpop.f32.mrb[34].mxu0  ;;  %v2195_v50 = vpop.f32.mrb[131].mxu1 }
 0x225   : > { %v3797_v47 = vadd.f32 %v1920_v11, %v5684_v34  ;;  %v6180_v14 = vadd.f32 %v3795_v13, %v6104_v3  ;;  %v1922_v53 = vpop.f32.mrb[35].mxu0  ;;  %v6189_v30 = vpop.permute.xlu1 %2564 }
 0x226   : > { %7187 = vst [vmem:[#allocation43_spill] sm:$0xff] %v6189_v30  ;;  %v6201_v53 = vpop.permute.xlu0 %2567 }
 0x227   : > { %v6183_v12 = vadd.f32 %v3797_v47, %v6106_v43  ;;  %7188 = vst [vmem:[#allocation49_spill] sm:$0xff] %v6201_v53 }
 0x229   : > { %v6187_v63 = vpop.f32.mrb[132].mxu1 }
 0x22a   : > { %v1925_v25 = vpop.f32.mrb[36].mxu0  ;;  %v2200_v5 = vpop.f32.mrb[133].mxu1 }
 0x22b   : > { %v3799_v51 = vadd.f32 %v1925_v25, %v5710_v4  ;;  %v1927_v50 = vpop.f32.mrb[37].mxu0  ;;  %v6192_v24 = vpop.f32.mrb[134].mxu1 }
 0x22c   : > { %v1928_v34 = vpop.f32.mrb[38].mxu0  ;;  %v2203_v3 = vpop.f32.mrb[135].mxu1 }
 0x22d   : > { %v3801_v13 = vadd.f32 %v1928_v34, %v5718_v33  ;;  %v6196_v43 = vadd.f32 %v3799_v51, %v6112_v31  ;;  %v1930_v11 = vpop.f32.mrb[39].mxu0  ;;  %v6205_v5 = vpop.permute.xlu1 %2570 }
 0x22e   : > { %7189 = vst [vmem:[#allocation29_spill] sm:$0xff] %v6205_v5  ;;  %v6217_v11 = vpop.permute.xlu0 %2573 }
 0x22f   : > { %v6199_v47 = vadd.f32 %v3801_v13, %v6114_v27  ;;  %7191 = vst [vmem:[#allocation84_spill] sm:$0xff] %v6217_v11 }
 0x231   : > { %v6203_v30 = vpop.f32.mrb[136].mxu1 }
 0x232   : > { %v1933_v4 = vpop.f32.mrb[40].mxu0  ;;  %v2208_v25 = vpop.f32.mrb[137].mxu1 }
 0x233   : > { %v3803_v50 = vadd.f32 %v1933_v4, %v5758_v15  ;;  %v1935_v3 = vpop.f32.mrb[41].mxu0  ;;  %v6208_v40 = vpop.f32.mrb[138].mxu1 }
 0x234   : > { %v1936_v33 = vpop.f32.mrb[42].mxu0  ;;  %v2211_v31 = vpop.f32.mrb[139].mxu1 }
 0x235   : > { %v3805_v51 = vadd.f32 %v1936_v33, %v5766_v28  ;;  %v6212_v27 = vadd.f32 %v3803_v50, %v6116_v48  ;;  %v1938_v34 = vpop.f32.mrb[43].mxu0  ;;  %v6221_v25 = vpop.permute.xlu1 %2576 }
 0x236   : > { %7192 = vst [vmem:[#allocation35_spill] sm:$0xff] %v6221_v25  ;;  %v6233_v34 = vpop.permute.xlu0 %2579 }
 0x237   : > { %v6215_v13 = vadd.f32 %v3805_v51, %v6118_v16  ;;  %vm2698_vm0 = vcmp.eq.s32.totalorder %v6233_v34, 1 }
 0x239   : > { %7190 = vst [vmem:[#allocation82_spill] sm:$0xff] %v6215_v13  ;;  %v6219_v5 = vpop.f32.mrb[140].mxu1 }
 0x23a   : > { %v1941_v15 = vpop.f32.mrb[44].mxu0  ;;  %v2216_v4 = vpop.f32.mrb[141].mxu1 }
 0x23b   : > { %v3807_v3 = vadd.f32 %v1941_v15, %v5803_v2  ;;  %v1943_v31 = vpop.f32.mrb[45].mxu0  ;;  %v6224_v53 = vpop.f32.mrb[142].mxu1 }
 0x23c   : > { %v1944_v28 = vpop.f32.mrb[46].mxu0  ;;  %v2219_v48 = vpop.f32.mrb[143].mxu1 }
 0x23d   : > { %v3809_v50 = vadd.f32 %v1944_v28, %v5811_v35  ;;  %v6228_v16 = vadd.f32 %v3807_v3, %v6120_v7  ;;  %v1946_v33 = vpop.f32.mrb[47].mxu0  ;;  %v6237_v4 = vpop.permute.xlu1 %2582 }
 0x23e   : > { %v6249_v33 = vpop.permute.xlu0 %2585  ;;  %vm2699_vm1 = vcmp.eq.s32.totalorder %v6237_v4, 1 }
 0x23f   : > { %v6231_v51 = vadd.f32 %v3809_v50, %v6122_v58  ;;  %vm2700_vm8 = vcmp.eq.s32.totalorder %v6249_v33, 1 }
 0x241   : > { %v6235_v25 = vpop.f32.mrb[144].mxu1 }
 0x242   : > { %v1949_v2 = vpop.f32.mrb[48].mxu0  ;;  %v2224_v15 = vpop.f32.mrb[145].mxu1 }
 0x243   : > { %v3811_v31 = vadd.f32 %v1949_v2, %v5830_v10  ;;  %v1951_v48 = vpop.f32.mrb[49].mxu0  ;;  %v6240_v11 = vpop.f32.mrb[146].mxu1 }
 0x244   : > { %v1952_v35 = vpop.f32.mrb[50].mxu0  ;;  %v2227_v7 = vpop.f32.mrb[147].mxu1 }
 0x245   : > { %v3813_v3 = vadd.f32 %v1952_v35, %v5845_v42  ;;  %v6244_v58 = vadd.f32 %v3811_v31, %v6130_v6  ;;  %v1954_v28 = vpop.f32.mrb[51].mxu0  ;;  %v6253_v15 = vpop.permute.xlu1 %2588 }
 0x246   : > { %v6265_v28 = vpop.permute.xlu0 %2591  ;;  %vm2701_vm9 = vcmp.eq.s32.totalorder %v6253_v15, 1 }
 0x247   : > { %7193 = vst [vmem:[#allocation19_spill] sm:$0xff] %v6244_v58  ;;  %v6247_v50 = vadd.f32 %v3813_v3, %v6148_v9  ;;  %vm2702_vm10 = vcmp.eq.s32.totalorder %v6265_v28, 1 }
 0x249   : > { %7194 = vst [vmem:[#allocation18_spill] sm:$0xff] %v6247_v50  ;;  %v6251_v49 = vpop.f32.mrb[148].mxu1 }
 0x24a   : > { %v1957_v10 = vpop.f32.mrb[52].mxu0  ;;  %v2232_v2 = vpop.f32.mrb[149].mxu1 }
 0x24b   : > { %v3815_v48 = vadd.f32 %v1957_v10, %v5866_v36  ;;  %v1959_v7 = vpop.f32.mrb[53].mxu0  ;;  %v6256_v13 = vpop.f32.mrb[150].mxu1 }
 0x24c   : > { %v1960_v42 = vpop.f32.mrb[54].mxu0  ;;  %v2235_v6 = vpop.f32.mrb[151].mxu1 }
 0x24d   : > { %v3817_v31 = vadd.f32 %v1960_v42, %v5879_v18  ;;  %v6260_v9 = vadd.f32 %v3815_v48, %v6157_v23  ;;  %v1962_v35 = vpop.f32.mrb[55].mxu0  ;;  %v6269_v2 = vpop.permute.xlu1 %2594 }
 0x24e   : > { %v6281_v35 = vpop.permute.xlu0 %2597  ;;  %vm2703_vm11 = vcmp.eq.s32.totalorder %v6269_v2, 1 }
 0x24f   : > { %7195 = vst [vmem:[#allocation48_spill] sm:$0xff] %v6260_v9  ;;  %v6263_v3 = vadd.f32 %v3817_v31, %v6162_v46  ;;  %vm2704_vm12 = vcmp.eq.s32.totalorder %v6281_v35, 1 }
 0x251   : > { %7196 = vst [vmem:[#allocation54_spill] sm:$0xff] %v6263_v3  ;;  %v6267_v50 = vpop.f32.mrb[152].mxu1 }
 0x252   : > { %v1965_v36 = vpop.f32.mrb[56].mxu0  ;;  %v2240_v10 = vpop.f32.mrb[153].mxu1 }
 0x253   : > { %v3819_v7 = vadd.f32 %v1965_v36, %v5891_v56  ;;  %v1967_v6 = vpop.f32.mrb[57].mxu0  ;;  %v6272_v58 = vpop.f32.mrb[154].mxu1 }
 0x254   : > { %v1968_v18 = vpop.f32.mrb[58].mxu0  ;;  %v2243_v23 = vpop.f32.mrb[155].mxu1 }
 0x255   : > { %v3821_v48 = vadd.f32 %v1968_v18, %v5901_v45  ;;  %v6276_v46 = vadd.f32 %v3819_v7, %v6171_v44  ;;  %v1970_v42 = vpop.f32.mrb[59].mxu0  ;;  %v6285_v10 = vpop.permute.xlu1 %2600 }
 0x256   : > { %v6297_v42 = vpop.permute.xlu0 %2603  ;;  %vm2705_vm13 = vcmp.eq.s32.totalorder %v6285_v10, 1 }
 0x257   : > { %7197 = vst [vmem:[#allocation38_spill] sm:$0xff] %v6276_v46  ;;  %v6279_v31 = vadd.f32 %v3821_v48, %v6176_v37  ;;  %vm2706_vm14 = vcmp.eq.s32.totalorder %v6297_v42, 1 }
 0x259   : > { %7198 = vst [vmem:[#allocation87_spill] sm:$0xff] %v6279_v31  ;;  %v6283_v3 = vpop.f32.mrb[156].mxu1 }
 0x25a   : > { %v1973_v56 = vpop.f32.mrb[60].mxu0  ;;  %v2248_v36 = vpop.f32.mrb[157].mxu1 }
 0x25b   : > { %v3823_v6 = vadd.f32 %v1973_v56, %v5916_v1  ;;  %v1975_v23 = vpop.f32.mrb[61].mxu0  ;;  %v6288_v9 = vpop.f32.mrb[158].mxu1 }
 0x25c   : > { %v1976_v45 = vpop.f32.mrb[62].mxu0  ;;  %v2251_v44 = vpop.f32.mrb[159].mxu1 }
 0x25d   : > { %v6291_v7 = vadd.f32 %v3823_v6, %v6187_v63  ;;  %v3825_v37 = vadd.f32 %v1976_v45, %v5926_v29  ;;  %v1978_v18 = vpop.f32.mrb[63].mxu0  ;;  %v6301_v36 = vpop.permute.xlu1 %2606 }
 0x25e   : > { %v6313_v18 = vpop.permute.xlu0 %2609  ;;  %vm2707_vm15 = vcmp.eq.s32.totalorder %v6301_v36, 1 }
 0x25f   : > { %7199 = vst [vmem:[#allocation89_spill] sm:$0xff] %v6291_v7  ;;  %v6295_v48 = vadd.f32 %v3825_v37, %v6192_v24  ;;  %vm2708_vm2 = vcmp.eq.s32.totalorder %v6313_v18, 1 }
 0x261   : > { %7200 = vst [vmem:[#allocation26_spill] sm:$0xff] %v6295_v48  ;;  %v6299_v31 = vpop.f32.mrb[160].mxu1 }
 0x262   : > { %v1981_v1 = vpop.f32.mrb[64].mxu0  ;;  %v2256_v56 = vpop.f32.mrb[161].mxu1 }
 0x263   : > { %v3827_v23 = vadd.f32 %v1981_v1, %v5942_v54  ;;  %v1983_v44 = vpop.f32.mrb[65].mxu0  ;;  %v6304_v46 = vpop.f32.mrb[162].mxu1 }
 0x264   : > { %v1984_v63 = vpop.f32.mrb[66].mxu0  ;;  %v2259_v6 = vpop.f32.mrb[163].mxu1 }
 0x265   : > { %v3829_v29 = vadd.f32 %v1984_v63, %v5952_v39  ;;  %v1986_v45 = vpop.f32.mrb[67].mxu0  ;;  %v6308_v24 = vadd.f32 %v3827_v23, %v6203_v30  ;;  %v6317_v56 = vpop.permute.xlu1 %2612 }
 0x266   : > { %v6329_v45 = vpop.permute.xlu0 %2615  ;;  %vm2709_vm3 = vcmp.eq.s32.totalorder %v6317_v56, 1 }
 0x267   : > { %7201 = vst [vmem:[#allocation25_spill] sm:$0xff] %v6308_v24  ;;  %v6311_v37 = vadd.f32 %v3829_v29, %v6208_v40  ;;  %vm2710_vm4 = vcmp.eq.s32.totalorder %v6329_v45, 1 }
 0x269   : > { %7202 = vst [vmem:[#allocation53_spill] sm:$0xff] %v6311_v37  ;;  %v6315_v48 = vpop.f32.mrb[164].mxu1 }
 0x26a   : > { %v1989_v54 = vpop.f32.mrb[68].mxu0  ;;  %v2264_v1 = vpop.f32.mrb[165].mxu1 }
 0x26b   : > { %v3831_v44 = vadd.f32 %v1989_v54, %v5968_v62  ;;  %v1991_v6 = vpop.f32.mrb[69].mxu0  ;;  %v6320_v7 = vpop.f32.mrb[166].mxu1 }
 0x26c   : > { %v1992_v39 = vpop.f32.mrb[70].mxu0  ;;  %v2267_v63 = vpop.f32.mrb[167].mxu1 }
 0x26d   : > { %v3833_v30 = vadd.f32 %v1992_v39, %v5978_v32  ;;  %v1994_v23 = vpop.f32.mrb[71].mxu0  ;;  %v6324_v40 = vadd.f32 %v3831_v44, %v6219_v5  ;;  %v6333_v1 = vpop.permute.xlu1 %2618 }
 0x26e   : > { %vm2711_vm6 = vcmp.eq.s32.totalorder %v6333_v1, 1 }
 0x26f   : > { %7203 = vst [vmem:[#allocation59_spill] sm:$0xff] %v6324_v40  ;;  %v6327_v29 = vadd.f32 %v3833_v30, %v6224_v53 }
 0x271   : > { %7204 = vst [vmem:[#allocation92_spill] sm:$0xff] %v6327_v29  ;;  %v6331_v37 = vpop.f32.mrb[168].mxu1  ;;  %v6349_v29 = vpop.permute.xlu0 %2621 }
 0x272   : > { %v1997_v62 = vpop.f32.mrb[72].mxu0  ;;  %v6335_v54 = vpop.f32.mrb[169].mxu1  ;;  %vm2712_vm7 = vcmp.eq.s32.totalorder %v6349_v29, 1 }
 0x273   : > { %v3835_v6 = vadd.f32 %v1997_v62, %v6007_v0  ;;  %v1999_v63 = vpop.f32.mrb[73].mxu0  ;;  %v6338_v32 = vpop.f32.mrb[170].mxu1 }
 0x274   : > { %7205 = vst [vmem:[#allocation94_spill] sm:$0xff] %v6338_v32  ;;  %v2000_v39 = vpop.f32.mrb[74].mxu0  ;;  %v6340_v5 = vpop.f32.mrb[171].mxu1 }
 0x275   : > { %v3837_v53 = vadd.f32 %v2000_v39, %v6017_v52  ;;  %v2002_v44 = vpop.f32.mrb[75].mxu0  ;;  %v6344_v30 = vadd.f32 %v3835_v6, %v6235_v25  ;;  %v6353_v0 = vpop.permute.xlu1 %2624 }
 0x277   : > { %7206 = vst [vmem:[#allocation34_spill] sm:$0xff] %v6344_v30  ;;  %v6347_v23 = vadd.f32 %v3837_v53, %v6240_v11 }
 0x279   : > { %7207 = vst [vmem:[#allocation33_spill] sm:$0xff] %v6347_v23  ;;  %v6351_v24 = vpop.f32.mrb[172].mxu1  ;;  %v6369_v23 = vpop.permute.xlu0 %2627 }
 0x27a   : > { %7208 = vst [vmem:[#allocation58_spill] sm:$0xff] %v6351_v24  ;;  %v2005_v62 = vpop.f32.mrb[76].mxu0  ;;  %v6355_v63 = vpop.f32.mrb[173].mxu1 }
 0x27b   : > { %v3839_v40 = vadd.f32 %v2005_v62, %v6042_v57  ;;  %v2007_v32 = vpop.f32.mrb[77].mxu0  ;;  %v6358_v52 = vpop.f32.mrb[174].mxu1 }
 0x27c   : > { %7209 = vst [vmem:[#allocation64_spill] sm:$0xff] %v6358_v52  ;;  %v2008_v39 = vpop.f32.mrb[78].mxu0  ;;  %v6360_v25 = vpop.f32.mrb[175].mxu1 }
 0x27d   : > { %v3841_v11 = vadd.f32 %v2008_v39, %v6049_v19  ;;  %v2010_v6 = vpop.f32.mrb[79].mxu0  ;;  %v6364_v53 = vadd.f32 %v3839_v40, %v6251_v49  ;;  %v6373_v57 = vpop.permute.xlu1 %2630 }
 0x27f   : > { %v6367_v44 = vadd.f32 %v3841_v11, %v6256_v13 }
 0x281   : > { %7210 = vst [vmem:[#allocation42_spill] sm:$0xff] %v6367_v44  ;;  %v6371_v24 = vpop.f32.mrb[176].mxu1  ;;  %v6391_v44 = vpop.permute.xlu1 %2636 }
 0x282   : > { %7211 = vst [vmem:[#allocation41_spill] sm:$0xff] %v6371_v24  ;;  %v2013_v32 = vpop.f32.mrb[80].mxu0  ;;  %v6375_v62 = vpop.f32.mrb[177].mxu1 }
 0x283   : > { %7212 = vst [vmem:[#allocation63_spill] sm:$0xff] %v6375_v62  ;;  %v3843_v52 = vadd.f32 %v2013_v32, %v6055_v8  ;;  %v2015_v30 = vpop.f32.mrb[81].mxu0  ;;  %v6378_v19 = vpop.f32.mrb[178].mxu1 }
 0x284   : > { %v2016_v39 = vpop.f32.mrb[82].mxu0  ;;  %v6380_v49 = vpop.f32.mrb[179].mxu1 }
 0x285   : > { %v3845_v13 = vadd.f32 %v2016_v39, %v6059_v22  ;;  %v2018_v40 = vpop.f32.mrb[83].mxu0  ;;  %v6384_v11 = vadd.f32 %v3843_v52, %v6267_v50  ;;  %v6389_v24 = vpop.permute.xlu0 %2633 }
 0x287   : > { %v6387_v6 = vadd.f32 %v3845_v13, %v6272_v58 }
 0x289   : > { %v3709_v62 = vpop.f32.mrb[180].mxu1 }
 0x28a   : > { %v2021_v8 = vpop.f32.mrb[84].mxu0  ;;  %v2360_v30 = vadd.f32 %v6165_v20, %v3709_v62  ;;  %v2351_v32 = vpop.f32.mrb[181].mxu1 }
 0x28b   : > { %v3847_v22 = vadd.f32 %v2021_v8, %v6068_v60  ;;  %v2023_v39 = vpop.f32.mrb[85].mxu0  ;;  %v2352_v50 = vadd.f32 %v6151_v17, %v2351_v32  ;;  %v3710_v52 = vpop.f32.mrb[182].mxu1 }
 0x28c   : > { %v2024_v58 = vpop.f32.mrb[86].mxu0  ;;  %v2363_v13 = vadd.f32 %v6167_v61, %v3710_v52  ;;  %v2354_v40 = vpop.f32.mrb[183].mxu1  ;;  %v6407_v17 = vsel %vm2700_vm8, %v2360_v30, 0.0  ;;  %vm2714_vm8 = vcmp.eq.s32.totalorder %v6369_v23, 1 }
 0x28d   : > { %v6400_v34 = vsel %vm2698_vm0, %v2352_v50, 0.0  ;;  %v3849_v20 = vadd.f32 %v2024_v58, %v6071_v41  ;;  %v2026_v62 = vpop.f32.mrb[87].mxu0  ;;  %v2355_v60 = vadd.f32 %v6153_v59, %v2354_v40  ;;  %v6405_v8 = vadd.f32 %v3847_v22, %v6283_v3  ;;  %v6416_v32 = vpop.permute.xlu0 %2639 }
 0x28e   : > { %v6418_v41 = vpop.permute.xlu1 %2642  ;;  %v6429_v40 = vsel %vm2701_vm9, %v2363_v13, 0.0 }
 0x28f   : > { %v6409_v4 = vsel %vm2699_vm1, %v2355_v60, 0.0  ;;  %v6412_v33 = vadd.f32 %v3849_v20, %v6288_v9  ;;  %vm2713_vm1 = vcmp.eq.s32.totalorder %v6353_v0, 1 }
 0x290   : > { %v3542_v61 = vpack.c.bf16 %v6407_v17, %v6409_v4 }
 0x291   : > { %v3713_v39 = vpop.f32.mrb[184].mxu1  ;;  %v6450_v60 = vpop.permute.xlu0 %2645 }
 0x292   : > { %3630 = vst [vmem:[%s6139_s30 + $0x40] sm:$0xff] %v3542_v61   ;;  %v2029_v59 = vpop.f32.mrb[88].mxu0  ;;  %v2376_v3 = vadd.f32 %v6196_v43, %v3713_v39  ;;  %v2367_v30 = vpop.f32.mrb[185].mxu1 }
 0x293   : > { %v3851_v9 = vadd.f32 %v2029_v59, %v6076_v38  ;;  %v2031_v22 = vpop.f32.mrb[89].mxu0  ;;  %v2368_v50 = vadd.f32 %v6180_v14, %v2367_v30  ;;  %v3714_v52 = vpop.f32.mrb[186].mxu1 }
 0x294   : > { %v2032_v58 = vpop.f32.mrb[90].mxu0  ;;  %v2379_v15 = vadd.f32 %v6199_v47, %v3714_v52  ;;  %v2370_v28 = vpop.f32.mrb[187].mxu1  ;;  %v6440_v35 = vsel %vm2704_vm12, %v2376_v3, 0.0 }
 0x295   : > { %v6431_v20 = vsel %vm2702_vm10, %v2368_v50, 0.0  ;;  %v3853_v38 = vadd.f32 %v2032_v58, %v6078_v55  ;;  %v2034_v43 = vpop.f32.mrb[91].mxu0  ;;  %v2371_v14 = vadd.f32 %v6183_v12, %v2370_v28  ;;  %v6438_v2 = vadd.f32 %v3851_v9, %v6299_v31  ;;  %v6452_v61 = vpop.permute.xlu1 %2648  ;;  %v7213_v58 = vld [vmem:[#allocation82_spill] sm:$0xff] }
 0x296   : > { %v3547_v62 = vpack.c.bf16 %v6431_v20, %v6429_v40  ;;  %v6463_v50 = vsel %vm2705_vm13, %v2379_v15, 0.0  ;;  %vm2715_vm10 = vcmp.eq.s32.totalorder %v6373_v57, 1  ;;  %vm2717_vm13 = vcmp.eq.s32.totalorder %v6391_v44, 1  ;;  %v7233_v57 = vld [vmem:[#allocation59_spill] sm:$0xff] }
 0x297   : > { %v6442_v47 = vsel %vm2703_vm11, %v2371_v14, 0.0  ;;  %v6445_v13 = vadd.f32 %v3853_v38, %v6304_v46  ;;  %v6484_v38 = vpop.permute.xlu0 %2651  ;;  %vm2716_vm11 = vcmp.eq.s32.totalorder %v6389_v24, 1  ;;  %v7228_v24 = vld [vmem:[#allocation21_spill] sm:$0xff] }
 0x298   : > { %3631 = vst [vmem:[%s6139_s30 + $0x48] sm:$0xff] %v3547_v62   ;;  %v3552_v55 = vpack.c.bf16 %v6440_v35, %v6442_v47  ;;  %v7214_v62 = vld [vmem:[#allocation48_spill] sm:$0xff]  ;;  %vm2689_vm12 = vcmp.eq.s32.totalorder %v7228_v24, 1 }
 0x299   : > { %v3717_v12 = vpop.f32.mrb[188].mxu1  ;;  %v6486_v14 = vpop.permute.xlu1 %2654 }
 0x29a   : > { %3632 = vst [vmem:[%s6139_s30 + $0x50] sm:$0xff] %v3552_v55   ;;  %v2037_v31 = vpop.f32.mrb[92].mxu0  ;;  %v2392_v39 = vadd.f32 %v6228_v16, %v3717_v12  ;;  %v2383_v59 = vpop.f32.mrb[189].mxu1 }
 0x29b   : > { %v3855_v46 = vadd.f32 %v2037_v31, %v6084_v21  ;;  %v2039_v3 = vpop.f32.mrb[93].mxu0  ;;  %v2384_v30 = vadd.f32 %v6212_v27, %v2383_v59  ;;  %v3718_v9 = vpop.f32.mrb[190].mxu1  ;;  %v7216_v59 = vld [vmem:[#allocation19_spill] sm:$0xff] }
 0x29c   : > { %v2040_v22 = vpop.f32.mrb[94].mxu0  ;;  %v2395_v10 = vadd.f32 %v6231_v51, %v3718_v9  ;;  %v2386_v42 = vpop.f32.mrb[191].mxu1  ;;  %v6474_v18 = vsel %vm2708_vm2, %v2392_v39, 0.0  ;;  %vm2719_vm2 = vcmp.eq.s32.totalorder %v6418_v41, 1  ;;  %v7241_v41 = vld [vmem:[#allocation13_spill] sm:$0xff] }
 0x29d   : > { %v6465_v52 = vsel %vm2706_vm14, %v2384_v30, 0.0  ;;  %v3857_v21 = vadd.f32 %v2040_v22, %v6086_v26  ;;  %v2042_v16 = vpop.f32.mrb[95].mxu0  ;;  %v2387_v27 = vadd.f32 %v7213_v58, %v2386_v42  ;;  %v6472_v36 = vadd.f32 %v3855_v46, %v6315_v48  ;;  %v7217_v30 = vld [vmem:[#allocation20_spill] sm:$0xff]  ;;  %v7218_v22 = vld [vmem:[#allocation54_spill] sm:$0xff] }
 0x29e   : > { %v3557_v28 = vpack.c.bf16 %v6465_v52, %v6463_v50  ;;  %vm2686_vm5 = vcmp.eq.s32.totalorder %v7217_v30, 1  ;;  %v6500_v16 = vsel %vm2709_vm3, %v2395_v10, 0.0  ;;  %vm2718_vm14 = vcmp.eq.s32.totalorder %v6416_v32, 1 }
 0x29f   : > { %v6476_v51 = vsel %vm2707_vm15, %v2387_v27, 0.0  ;;  %v6479_v15 = vadd.f32 %v3857_v21, %v6320_v7  ;;  %v7215_v7 = vld [vmem:[#allocation97_spill] sm:$0xff]  ;;  %vm2720_vm3 = vcmp.eq.s32.totalorder %v6450_v60, 1  ;;  %v7239_v60 = vld [vmem:[#allocation79_spill] sm:$0xff] }
 0x2a0   : > { %3633 = vst [vmem:[%s6139_s30 + $0x58] sm:$0xff] %v3557_v28   ;;  %v3562_v26 = vpack.c.bf16 %v6474_v18, %v6476_v51  ;;  %v7219_v28 = vld [vmem:[#allocation98_spill] sm:$0xff] }
 0x2a1   : > { %v3721_v43 = vpop.f32.mrb[192].mxu1 }
 0x2a2   : > { %3634 = vst [vmem:[%s6139_s30 + $0x60] sm:$0xff] %v3562_v26   ;;  %v2078_v48 = vpop.f32.mrb[0].mxu0  ;;  %v2408_v55 = vadd.f32 %v7214_v62, %v3721_v43  ;;  %v2399_v12 = vpop.f32.mrb[193].mxu1  ;;  %v7221_v62 = vld [vmem:[#allocation18_spill] sm:$0xff] }
 0x2a3   : > { %v3775_v31 = vadd.f32 %v2078_v48, %v7215_v7  ;;  %v2080_v39 = vpop.f32.mrb[1].mxu0  ;;  %v2400_v46 = vadd.f32 %v7216_v59, %v2399_v12  ;;  %v3722_v3 = vpop.f32.mrb[194].mxu1  ;;  %v7220_v48 = vld [vmem:[#allocation44_spill] sm:$0xff] }
 0x2a4   : > { %v2081_v9 = vpop.f32.mrb[2].mxu0  ;;  %v2411_v42 = vadd.f32 %v7218_v22, %v3722_v3  ;;  %v2402_v21 = vpop.f32.mrb[195].mxu1  ;;  %vm2687_vm0 = vcmp.eq.s32.totalorder %v7220_v48, 1  ;;  %v7225_v48 = vld [vmem:[#allocation38_spill] sm:$0xff] }
 0x2a5   : > { %v2304_v58 = vadd.f32 %v3775_v31, %v6335_v54  ;;  %v6505_v27 = vsel %vm2710_vm4, %v2400_v46, 0.0  ;;  %v3776_v26 = vadd.f32 %v2081_v9, %v7219_v28  ;;  %v2083_v43 = vpop.f32.mrb[3].mxu0  ;;  %v2403_v12 = vadd.f32 %v7221_v62, %v2402_v21  ;;  %v6520_v31 = vpop.permute.xlu0 %2657  ;;  %v7222_v9 = vld [vmem:[#allocation89_spill] sm:$0xff]  ;;  %v7224_v28 = vld [vmem:[#allocation99_spill] sm:$0xff] }
 0x2a6   : > { %v3567_v29 = vpack.c.bf16 %v6505_v27, %v6500_v16  ;;  %v6513_v54 = vsel %vm2712_vm7, %v2408_v55, 0.0  ;;  %v6526_v46 = vpop.permute.xlu1 %2660  ;;  %vm2691_vm4 = vcmp.eq.s32.totalorder %v7239_v60, 1  ;;  %v7242_v60 = vld [vmem:[#allocation34_spill] sm:$0xff]  ;;  %vm2722_vm7 = vcmp.eq.s32.totalorder %v6484_v38, 1 }
 0x2a7   : > { %v2734_v56 = vsel %vm2686_vm5, %v2304_v58, 0.0  ;;  %v2307_v10 = vadd.f32 %v3776_v26, %v6340_v5  ;;  %v6518_v45 = vsel %vm2711_vm6, %v2403_v12, 0.0  ;;  %v7223_v58 = vld [vmem:[#allocation36_spill] sm:$0xff]  ;;  %vm2721_vm5 = vcmp.eq.s32.totalorder %v6452_v61, 1 }
 0x2a8   : > { %v3461_v7 = vpack.c.bf16 %v2734_v56, %v2734_v56  ;;  %3635 = vst [vmem:[%s6139_s30 + $0x68] sm:$0xff] %v3567_v29   ;;  %v3572_v59 = vpack.c.bf16 %v6513_v54, %v6518_v45  ;;  %v2835_v55 = vmul.f32 %v2734_v56, %v2734_v56  ;;  %vm2688_vm9 = vcmp.eq.s32.totalorder %v7223_v58, 1 }
 0x2a9   : > { %v2735_v39 = vsel %vm2687_vm0, %v2307_v10, 0.0  ;;  %v3725_v5 = vpop.f32.mrb[196].mxu1  ;;  %v7226_v10 = vld [vmem:[#allocation26_spill] sm:$0xff] }
 0x2aa   : > { %3141 = vst [vmem:[%s6139_s30 + $0xc] sm:$0xf] %v3461_v7  ;;  %v2782_v3 = vadd.f32 %v2735_v39, %v2734_v56  ;;  %v2836_v1 = vmul.f32 %v2735_v39, %v2735_v39  ;;  %v2086_v30 = vpop.f32.mrb[4].mxu0  ;;  %v2424_v22 = vadd.f32 %v7222_v9, %v3725_v5  ;;  %v2415_v21 = vpop.f32.mrb[197].mxu1  ;;  %3636 = vst [vmem:[%s6139_s30 + $0x70] sm:$0xff] %v3572_v59   ;;  %v6539_v9 = vsel %vm2713_vm1, %v2411_v42, 0.0 }
 0x2ab   : > { %v3777_v26 = vadd.f32 %v2086_v30, %v7224_v28  ;;  %v2088_v43 = vpop.f32.mrb[5].mxu0  ;;  %v2416_v29 = vadd.f32 %v7225_v48, %v2415_v21  ;;  %v3726_v62 = vpop.f32.mrb[198].mxu1  ;;  %v7227_v21 = vld [vmem:[#allocation100_spill] sm:$0xff]  ;;  %vm2724_vm1 = vcmp.eq.s32.totalorder %v6520_v31, 1 }
 0x2ac   : > { %v2883_v12 = vadd.f32 %v2836_v1, %v2835_v55  ;;  %v2089_v56 = vpop.f32.mrb[6].mxu0  ;;  %v2427_v7 = vadd.f32 %v7226_v10, %v3726_v62  ;;  %v2418_v5 = vpop.f32.mrb[199].mxu1  ;;  %v7229_v1 = vld [vmem:[#allocation87_spill] sm:$0xff]  ;;  %v6553_v42 = vsel %vm2716_vm11, %v2424_v22, 0.0 }
 0x2ad   : > { %v2312_v59 = vadd.f32 %v3777_v26, %v6331_v37  ;;  %v6544_v30 = vsel %vm2714_vm8, %v2416_v29, 0.0  ;;  %v3778_v28 = vadd.f32 %v2089_v56, %v7227_v21  ;;  %v2091_v43 = vpop.f32.mrb[7].mxu0  ;;  %v2419_v48 = vadd.f32 %v7229_v1, %v2418_v5  ;;  %7230 = vst [vmem:[#allocation71_spill] sm:$0xff] %v6553_v42  ;;  %v7231_v37 = vld [vmem:[#allocation94_spill] sm:$0xff]  ;;  %v6557_v56 = vpop.permute.xlu0 %2663  ;;  %v7235_v1 = vld [vmem:[#allocation65_spill] sm:$0xff] }
 0x2ae   : > { %v3577_v55 = vpack.c.bf16 %v6544_v30, %v6539_v9  ;;  %v6567_v5 = vpop.permute.xlu1 %2666  ;;  %vm2723_vm8 = vcmp.eq.s32.totalorder %v6486_v14, 1  ;;  %vm2726_vm11 = vcmp.eq.s32.totalorder %v6557_v56, 1 }
 0x2af   : > { %v2736_v0 = vsel %vm2688_vm9, %v2312_v59, 0.0  ;;  %v2315_v23 = vadd.f32 %v3778_v28, %v7231_v37  ;;  %v6561_v10 = vsel %vm2715_vm10, %v2419_v48, 0.0  ;;  %v7236_v37 = vld [vmem:[#allocation25_spill] sm:$0xff]  ;;  %vm2725_vm10 = vcmp.eq.s32.totalorder %v6526_v46, 1 }
 0x2b0   : > { %v2783_v26 = vadd.f32 %v2782_v3, %v2736_v0  ;;  %v2837_v29 = vmul.f32 %v2736_v0, %v2736_v0  ;;  %v3512_v62 = vpack.c.bf16 %v2736_v0, %v2735_v39  ;;  %3637 = vst [vmem:[%s6139_s30 + $0x78] sm:$0xff] %v3577_v55   ;;  %7232 = vst [vmem:[#allocation47_spill] sm:$0xff] %v6561_v10  ;;  %v7234_v55 = vld [vmem:[#allocation77_spill] sm:$0xff] }
 0x2b1   : > { %v2737_v58 = vsel %vm2689_vm12, %v2315_v23, 0.0  ;;  %v3582_v22 = vpack.c.bf16 %v6553_v42, %v6561_v10  ;;  %v3729_v3 = vpop.f32.mrb[200].mxu1  ;;  %vm2690_vm15 = vcmp.eq.s32.totalorder %v7234_v55, 1  ;;  %v6597_v32 = vpop.permute.xlu0 %2669 }
 0x2b2   : > { %v2884_v39 = vadd.f32 %v2883_v12, %v2837_v29  ;;  %3624 = vst [vmem:[%s6139_s30 + $0x10] sm:$0xff] %v3512_v62   ;;  %v2784_v59 = vadd.f32 %v2783_v26, %v2737_v58  ;;  %v2838_v21 = vmul.f32 %v2737_v58, %v2737_v58  ;;  %v2094_v28 = vpop.f32.mrb[8].mxu0  ;;  %v2440_v43 = vadd.f32 %v7233_v57, %v3729_v3  ;;  %v2431_v24 = vpop.f32.mrb[201].mxu1  ;;  %v7237_v29 = vld [vmem:[#allocation92_spill] sm:$0xff]  ;;  %v7238_v57 = vld [vmem:[#allocation67_spill] sm:$0xff] }
 0x2b3   : > { %3638 = vst [vmem:[%s6139_s30 + $0x80] sm:$0xff] %v3582_v22   ;;  %v3779_v48 = vadd.f32 %v2094_v28, %v7235_v1  ;;  %v2096_v0 = vpop.f32.mrb[9].mxu0  ;;  %v2432_v23 = vadd.f32 %v7236_v37, %v2431_v24  ;;  %v3730_v42 = vpop.f32.mrb[202].mxu1  ;;  %v6580_v3 = vsel %vm2717_vm13, %v2427_v7, 0.0  ;;  %vm2728_vm13 = vcmp.eq.s32.totalorder %v6597_v32, 1 }
 0x2b4   : > { %v2885_v12 = vadd.f32 %v2884_v39, %v2838_v21  ;;  %v2097_v26 = vpop.f32.mrb[10].mxu0  ;;  %v2443_v62 = vadd.f32 %v7237_v29, %v3730_v42  ;;  %v2434_v10 = vpop.f32.mrb[203].mxu1  ;;  %v7240_v39 = vld [vmem:[#allocation53_spill] sm:$0xff]  ;;  %v6594_v7 = vsel %vm2720_vm3, %v2440_v43, 0.0 }
 0x2b5   : > { %v2320_v22 = vadd.f32 %v3779_v48, %v6355_v63  ;;  %v6585_v28 = vsel %vm2718_vm14, %v2432_v23, 0.0  ;;  %v3780_v24 = vadd.f32 %v2097_v26, %v7238_v57  ;;  %v2099_v1 = vpop.f32.mrb[11].mxu0  ;;  %v2435_v21 = vadd.f32 %v7240_v39, %v2434_v10  ;;  %v6605_v10 = vpop.permute.xlu1 %2672 }
 0x2b6   : > { %v3587_v42 = vpack.c.bf16 %v6585_v28, %v6580_v3  ;;  %vm2727_vm14 = vcmp.eq.s32.totalorder %v6567_v5, 1  ;;  %vm2729_vm3 = vcmp.eq.s32.totalorder %v6605_v10, 1  ;;  %v7258_v10 = vld [vmem:[#allocation41_spill] sm:$0xff] }
 0x2b7   : > { %v2738_v44 = vsel %vm2690_vm15, %v2320_v22, 0.0  ;;  %v2323_v63 = vadd.f32 %v3780_v24, %v6360_v25  ;;  %v6602_v23 = vsel %vm2719_vm2, %v2435_v21, 0.0  ;;  %v7243_v21 = vld [vmem:[#allocation27_spill] sm:$0xff] }
 0x2b8   : > { %v2785_v48 = vadd.f32 %v2784_v59, %v2738_v44  ;;  %v2839_v0 = vmul.f32 %v2738_v44, %v2738_v44  ;;  %v3517_v37 = vpack.c.bf16 %v2738_v44, %v2737_v58  ;;  %3639 = vst [vmem:[%s6139_s30 + $0x88] sm:$0xff] %v3587_v42   ;;  %v3592_v43 = vpack.c.bf16 %v6594_v7, %v6602_v23 }
 0x2b9   : > { %v2739_v55 = vsel %vm2691_vm4, %v2323_v63, 0.0  ;;  %v3733_v25 = vpop.f32.mrb[204].mxu1  ;;  %vm2692_vm6 = vcmp.eq.s32.totalorder %v7243_v21, 1  ;;  %v7244_v63 = vld [vmem:[#allocation42_spill] sm:$0xff] }
 0x2ba   : > { %v2886_v26 = vadd.f32 %v2885_v12, %v2839_v0  ;;  %3625 = vst [vmem:[%s6139_s30 + $0x18] sm:$0xff] %v3517_v37   ;;  %v2786_v59 = vadd.f32 %v2785_v48, %v2739_v55  ;;  %v2840_v29 = vmul.f32 %v2739_v55, %v2739_v55  ;;  %v2102_v22 = vpop.f32.mrb[12].mxu0  ;;  %v2456_v58 = vadd.f32 %v6364_v53, %v3733_v25  ;;  %v2447_v57 = vpop.f32.mrb[205].mxu1  ;;  %v7245_v37 = vld [vmem:[#allocation58_spill] sm:$0xff] }
 0x2bb   : > { %3640 = vst [vmem:[%s6139_s30 + $0x90] sm:$0xff] %v3592_v43   ;;  %v3781_v24 = vadd.f32 %v2102_v22, %v7241_v41  ;;  %v2104_v1 = vpop.f32.mrb[13].mxu0  ;;  %v2448_v42 = vadd.f32 %v7242_v60, %v2447_v57  ;;  %v3734_v39 = vpop.f32.mrb[206].mxu1  ;;  %v6619_v53 = vsel %vm2721_vm5, %v2443_v62, 0.0  ;;  %v7246_v22 = vld [vmem:[#allocation28_spill] sm:$0xff] }
 0x2bc   : > { %v2887_v44 = vadd.f32 %v2886_v26, %v2840_v29  ;;  %v2105_v12 = vpop.f32.mrb[14].mxu0  ;;  %v2459_v48 = vadd.f32 %v7244_v63, %v3734_v39  ;;  %v2450_v0 = vpop.f32.mrb[207].mxu1  ;;  %v7247_v1 = vld [vmem:[#allocation43_spill] sm:$0xff]  ;;  %v7248_v26 = vld [vmem:[#allocation33_spill] sm:$0xff]  ;;  %v6633_v62 = vsel %vm2724_vm1, %v2456_v58, 0.0 }
 0x2bd   : > { %v2328_v43 = vadd.f32 %v3781_v24, %v7245_v37  ;;  %v6622_v25 = vsel %vm2722_vm7, %v2448_v42, 0.0  ;;  %v3782_v57 = vadd.f32 %v2105_v12, %v7246_v22  ;;  %v2107_v41 = vpop.f32.mrb[15].mxu0  ;;  %vm2693_vm0 = vcmp.eq.s32.totalorder %v7247_v1, 1  ;;  %v7249_v24 = vld [vmem:[#allocation64_spill] sm:$0xff]  ;;  %v6636_v42 = vpop.permute.xlu0 %2675  ;;  %v7250_v1 = vld [vmem:[#allocation49_spill] sm:$0xff] }
 0x2be   : > { %v3597_v38 = vpack.c.bf16 %v6622_v25, %v6619_v53  ;;  %v2451_v29 = vadd.f32 %v7248_v26, %v2450_v0  ;;  %v6641_v0 = vpop.permute.xlu1 %2678  ;;  %vm2694_vm9 = vcmp.eq.s32.totalorder %v7250_v1, 1  ;;  %vm2730_vm4 = vcmp.eq.s32.totalorder %v6636_v42, 1 }
 0x2bf   : > { %v2740_v61 = vsel %vm2692_vm6, %v2328_v43, 0.0  ;;  %v2331_v60 = vadd.f32 %v3782_v57, %v7249_v24  ;;  %vm2731_vm5 = vcmp.eq.s32.totalorder %v6641_v0, 1 }
 0x2c0   : > { %v2787_v39 = vadd.f32 %v2786_v59, %v2740_v61  ;;  %v2841_v12 = vmul.f32 %v2740_v61, %v2740_v61  ;;  %v3522_v31 = vpack.c.bf16 %v2740_v61, %v2739_v55  ;;  %3641 = vst [vmem:[%s6139_s30 + $0x98] sm:$0xff] %v3597_v38   ;;  %v6639_v63 = vsel %vm2723_vm8, %v2451_v29, 0.0  ;;  %v7251_v55 = vld [vmem:[#allocation37_spill] sm:$0xff] }
 0x2c1   : > { %v2741_v37 = vsel %vm2693_vm0, %v2331_v60, 0.0  ;;  %v3602_v14 = vpack.c.bf16 %v6633_v62, %v6639_v63  ;;  %v3737_v21 = vpop.f32.mrb[208].mxu1  ;;  %vm2936_vm0 = vcmask 1040384  }
 0x2c2   : > { %v2888_v58 = vadd.f32 %v2887_v44, %v2841_v12  ;;  %3626 = vst [vmem:[%s6139_s30 + $0x20] sm:$0xff] %v3522_v31   ;;  %v2788_v43 = vadd.f32 %v2787_v39, %v2741_v37  ;;  %v2842_v22 = vmul.f32 %v2741_v37, %v2741_v37  ;;  %v2110_v57 = vpop.f32.mrb[16].mxu0  ;;  %v2472_v59 = vadd.f32 %v6405_v8, %v3737_v21  ;;  %v2463_v41 = vpop.f32.mrb[209].mxu1  ;;  %v7252_v12 = vld [vmem:[#allocation63_spill] sm:$0xff]  ;;  %v7253_v21 = vld [vmem:[#allocation14_spill] sm:$0xff] }
 0x2c3   : > { %3642 = vst [vmem:[%s6139_s30 + $0xa0] sm:$0xff] %v3602_v14   ;;  %v3783_v38 = vadd.f32 %v2110_v57, %v7251_v55  ;;  %v2112_v26 = vpop.f32.mrb[17].mxu0  ;;  %v2464_v29 = vadd.f32 %v6384_v11, %v2463_v41  ;;  %v3738_v61 = vpop.f32.mrb[210].mxu1  ;;  %v6654_v8 = vsel %vm2725_vm10, %v2459_v48, 0.0  ;;  %v7254_v41 = vld [vmem:[#allocation29_spill] sm:$0xff] }
 0x2c4   : > { %v2889_v44 = vadd.f32 %v2888_v58, %v2842_v22  ;;  %v2113_v24 = vpop.f32.mrb[18].mxu0  ;;  %v2475_v60 = vadd.f32 %v6412_v33, %v3738_v61  ;;  %v2466_v39 = vpop.f32.mrb[211].mxu1  ;;  %vm2695_vm12 = vcmp.eq.s32.totalorder %v7254_v41, 1  ;;  %v6668_v48 = vsel %vm2728_vm13, %v2472_v59, 0.0 }
 0x2c5   : > { %v2336_v31 = vadd.f32 %v3783_v38, %v7252_v12  ;;  %v6657_v14 = vsel %vm2726_vm11, %v2464_v29, 0.0  ;;  %v3784_v57 = vadd.f32 %v2113_v24, %v7253_v21  ;;  %v2115_v11 = vpop.f32.mrb[19].mxu0  ;;  %v2467_v33 = vadd.f32 %v6387_v6, %v2466_v39  ;;  %v2682_v22 = vpop.permute.xlu0 %2681  ;;  %v7255_v29 = vld [vmem:[#allocation84_spill] sm:$0xff]  ;;  %v7256_v6 = vld [vmem:[#allocation35_spill] sm:$0xff] }
 0x2c6   : > { %v3607_v46 = vpack.c.bf16 %v6657_v14, %v6654_v8  ;;  %vm2696_vm15 = vcmp.eq.s32.totalorder %v7255_v29, 1  ;;  %vm2697_vm2 = vcmp.eq.s32.totalorder %v7256_v6, 1  ;;  %v2685_v5 = vpop.permute.xlu1 %2684  ;;  %vm2732_vm7 = vcmp.eq.s32.totalorder %v2682_v22, 1 }
 0x2c7   : > { %v2742_v56 = vsel %vm2694_vm9, %v2336_v31, 0.0  ;;  %v2339_v58 = vadd.f32 %v3784_v57, %v6380_v49  ;;  %v6672_v32 = vsel %vm2727_vm14, %v2467_v33, 0.0  ;;  %v7257_v31 = vld [vmem:[#allocation72_spill] sm:$0xff]  ;;  %vm2733_vm6 = vcmp.eq.s32.totalorder %v2685_v5, 1 }
 0x2c8   : > { %v2789_v55 = vadd.f32 %v2788_v43, %v2742_v56  ;;  %v2843_v38 = vmul.f32 %v2742_v56, %v2742_v56  ;;  %v3527_v26 = vpack.c.bf16 %v2742_v56, %v2741_v37  ;;  %3643 = vst [vmem:[%s6139_s30 + $0xa8] sm:$0xff] %v3607_v46   ;;  %v3612_v59 = vpack.c.bf16 %v6668_v48, %v6672_v32 }
 0x2c9   : > { %v2743_v1 = vsel %vm2695_vm12, %v2339_v58, 0.0  ;;  %v3741_v49 = vpop.f32.mrb[212].mxu1  ;;  %v6689_v56 = vsel %vm2729_vm3, %v2475_v60, 0.0  ;;  %v2848_v6 = vmul.f32 %v6409_v4, %v6409_v4 }
 0x2ca   : > { %v2890_v61 = vadd.f32 %v2889_v44, %v2843_v38  ;;  %3627 = vst [vmem:[%s6139_s30 + $0x28] sm:$0xff] %v3527_v26   ;;  %v2790_v43 = vadd.f32 %v2789_v55, %v2743_v1  ;;  %v2844_v37 = vmul.f32 %v2743_v1, %v2743_v1  ;;  %v2118_v24 = vpop.f32.mrb[20].mxu0  ;;  %v2488_v39 = vadd.f32 %v6472_v36, %v3741_v49  ;;  %v2479_v12 = vpop.f32.mrb[213].mxu1  ;;  %v7259_v55 = vld [vmem:[#allocation74_spill] sm:$0xff] }
 0x2cb   : > { %3644 = vst [vmem:[%s6139_s30 + $0xb0] sm:$0xff] %v3612_v59   ;;  %v3785_v21 = vadd.f32 %v2118_v24, %v7257_v31  ;;  %v2120_v57 = vpop.f32.mrb[21].mxu0  ;;  %v2480_v11 = vadd.f32 %v6438_v2, %v2479_v12  ;;  %v3742_v41 = vpop.f32.mrb[214].mxu1 }
 0x2cc   : > { %v2891_v44 = vadd.f32 %v2890_v61, %v2844_v37  ;;  %v2121_v46 = vpop.f32.mrb[22].mxu0  ;;  %v2491_v33 = vadd.f32 %v6479_v15, %v3742_v41  ;;  %v2482_v36 = vpop.f32.mrb[215].mxu1  ;;  %v6702_v59 = vsel %vm2732_vm7, %v2488_v39, 0.0  ;;  %v2849_v41 = vmul.f32 %v6407_v17, %v6407_v17 }
 0x2cd   : > { %v2344_v42 = vadd.f32 %v3785_v21, %v7258_v10  ;;  %v6692_v58 = vsel %vm2730_vm4, %v2480_v11, 0.0  ;;  %v3786_v38 = vadd.f32 %v2121_v46, %v7259_v55  ;;  %v2123_v2 = vpop.f32.mrb[23].mxu0  ;;  %v2483_v15 = vadd.f32 %v6445_v13, %v2482_v36 }
 0x2ce   : > { %v3617_v26 = vpack.c.bf16 %v6692_v58, %v6689_v56  ;;  %v6697_v5 = vsel %vm2733_vm6, %v2491_v33, 0.0  ;;  %v2850_v33 = vmul.f32 %v6429_v40, %v6429_v40  ;;  %v2851_v10 = vmul.f32 %v6431_v20, %v6431_v20 }
 0x2cf   : > { %v2744_v60 = vsel %vm2696_vm15, %v2344_v42, 0.0  ;;  %v2347_v49 = vadd.f32 %v3786_v38, %v6378_v19  ;;  %v3508_v61 = vpack.c.bf16 %v6697_v5, %v6697_v5  ;;  %v6710_v12 = vsel %vm2731_vm5, %v2483_v15, 0.0 }
 0x2d0   : > { %v2791_v22 = vadd.f32 %v2790_v43, %v2744_v60  ;;  %v2845_v37 = vmul.f32 %v2744_v60, %v2744_v60  ;;  %v3532_v24 = vpack.c.bf16 %v2744_v60, %v2743_v1  ;;  %3645 = vst [vmem:[%s6139_s30 + $0xb8] sm:$0xff] %v3617_v26   ;;  %v3622_v29 = vpack.c.bf16 %v6702_v59, %v6710_v12 }
 0x2d1   : > { %v2745_v13 = vsel %vm2697_vm2, %v2347_v49, 0.0  ;;  %3188 = vst [vmem:[%s6139_s30 + $0xc8] sm:$0xf] %v3508_v61  ;;  %v2847_v1 = vmul.f32 %v6400_v34, %v6400_v34 }
 0x2d2   : > { %v2892_v19 = vadd.f32 %v2891_v44, %v2845_v37  ;;  %3628 = vst [vmem:[%s6139_s30 + $0x30] sm:$0xff] %v3532_v24   ;;  %v2792_v39 = vadd.f32 %v2791_v22, %v2745_v13  ;;  %v2846_v31 = vmul.f32 %v2745_v13, %v2745_v13  ;;  %v3537_v43 = vpack.c.bf16 %v6400_v34, %v2745_v13 }
 0x2d3   : > { %3646 = vst [vmem:[%s6139_s30 + $0xc0] sm:$0xff] %v3622_v29  }
 0x2d4   : > { %v2793_v0 = vadd.f32 %v2792_v39, %v6400_v34  ;;  %v2893_v21 = vadd.f32 %v2892_v19, %v2846_v31  ;;  %3629 = vst [vmem:[%s6139_s30 + $0x38] sm:$0xff] %v3537_v43  }
 0x2d6   : > { %v2794_v57 = vadd.f32 %v2793_v0, %v6409_v4  ;;  %v2894_v11 = vadd.f32 %v2893_v21, %v2847_v1  ;;  %v2852_v4 = vmul.f32 %v6442_v47, %v6442_v47 }
 0x2d8   : > { %v2795_v44 = vadd.f32 %v2794_v57, %v6407_v17  ;;  %v2895_v46 = vadd.f32 %v2894_v11, %v2848_v6  ;;  %v2853_v17 = vmul.f32 %v6440_v35, %v6440_v35 }
 0x2da   : > { %v2796_v36 = vadd.f32 %v2795_v44, %v6429_v40  ;;  %v2896_v34 = vadd.f32 %v2895_v46, %v2849_v41  ;;  %v2854_v40 = vmul.f32 %v6463_v50, %v6463_v50 }
 0x2dc   : > { %v2797_v42 = vadd.f32 %v2796_v36, %v6431_v20  ;;  %v2897_v55 = vadd.f32 %v2896_v34, %v2850_v33  ;;  %v2855_v20 = vmul.f32 %v6465_v52, %v6465_v52 }
 0x2de   : > { %v2798_v38 = vadd.f32 %v2797_v42, %v6442_v47  ;;  %v2898_v2 = vadd.f32 %v2897_v55, %v2851_v10  ;;  %v2856_v47 = vmul.f32 %v6476_v51, %v6476_v51 }
 0x2e0   : > { %v2799_v26 = vadd.f32 %v2798_v38, %v6440_v35  ;;  %v2899_v15 = vadd.f32 %v2898_v2, %v2852_v4  ;;  %v2857_v35 = vmul.f32 %v6474_v18, %v6474_v18 }
 0x2e2   : > { %v2800_v60 = vadd.f32 %v2799_v26, %v6463_v50  ;;  %v2900_v49 = vadd.f32 %v2899_v15, %v2853_v17  ;;  %v2858_v50 = vmul.f32 %v6500_v16, %v6500_v16  ;;  %v2868_v17 = vmul.f32 %v6602_v23, %v6602_v23 }
 0x2e4   : > { %v2801_v61 = vadd.f32 %v2800_v60, %v6465_v52  ;;  %v2901_v22 = vadd.f32 %v2900_v49, %v2854_v40  ;;  %v2859_v52 = vmul.f32 %v6505_v27, %v6505_v27  ;;  %v2869_v40 = vmul.f32 %v6594_v7, %v6594_v7 }
 0x2e6   : > { %v2802_v37 = vadd.f32 %v2801_v61, %v6476_v51  ;;  %v2902_v24 = vadd.f32 %v2901_v22, %v2855_v20  ;;  %v2860_v51 = vmul.f32 %v6518_v45, %v6518_v45 }
 0x2e8   : > { %v2803_v13 = vadd.f32 %v2802_v37, %v6474_v18  ;;  %v2903_v29 = vadd.f32 %v2902_v24, %v2856_v47  ;;  %v2861_v18 = vmul.f32 %v6513_v54, %v6513_v54 }
 0x2ea   : > { %v2804_v19 = vadd.f32 %v2803_v13, %v6500_v16  ;;  %v2904_v39 = vadd.f32 %v2903_v29, %v2857_v35  ;;  %v2862_v16 = vmul.f32 %v6539_v9, %v6539_v9 }
 0x2ec   : > { %v2805_v31 = vadd.f32 %v2804_v19, %v6505_v27  ;;  %v2905_v43 = vadd.f32 %v2904_v39, %v2858_v50  ;;  %v2863_v27 = vmul.f32 %v6544_v30, %v6544_v30 }
 0x2ee   : > { %v2806_v1 = vadd.f32 %v2805_v31, %v6518_v45  ;;  %v2906_v0 = vadd.f32 %v2905_v43, %v2859_v52  ;;  %v7260_v45 = vld [vmem:[#allocation47_spill] sm:$0xff] }
 0x2ef   : > { %v2864_v46 = vmul.f32 %v7260_v45, %v7260_v45 }
 0x2f0   : > { %v2807_v21 = vadd.f32 %v2806_v1, %v6513_v54  ;;  %v2907_v6 = vadd.f32 %v2906_v0, %v2860_v51  ;;  %v7261_v54 = vld [vmem:[#allocation71_spill] sm:$0xff] }
 0x2f1   : > { %v2865_v34 = vmul.f32 %v7261_v54, %v7261_v54 }
 0x2f2   : > { %v2808_v57 = vadd.f32 %v2807_v21, %v6539_v9  ;;  %v2908_v11 = vadd.f32 %v2907_v6, %v2861_v18  ;;  %v2866_v9 = vmul.f32 %v6580_v3, %v6580_v3  ;;  %v2880_v6 = vmul.f32 %v6710_v12, %v6710_v12 }
 0x2f4   : > { %v2909_v41 = vadd.f32 %v2908_v11, %v2862_v16  ;;  %v2809_v44 = vadd.f32 %v2808_v57, %v6544_v30  ;;  %v2867_v30 = vmul.f32 %v6585_v28, %v6585_v28  ;;  %v2882_v11 = vmul.f32 %v6697_v5, %v6697_v5 }
 0x2f6   : > { %v2810_v33 = vadd.f32 %v2809_v44, %v7260_v45  ;;  %v2910_v36 = vadd.f32 %v2909_v41, %v2863_v27 }
 0x2f8   : > { %v2811_v10 = vadd.f32 %v2810_v33, %v7261_v54  ;;  %v2911_v42 = vadd.f32 %v2910_v36, %v2864_v46 }
 0x2fa   : > { %v2812_v55 = vadd.f32 %v2811_v10, %v6580_v3  ;;  %v2912_v4 = vadd.f32 %v2911_v42, %v2865_v34  ;;  %v2870_v3 = vmul.f32 %v6619_v53, %v6619_v53 }
 0x2fc   : > { %v2813_v38 = vadd.f32 %v2812_v55, %v6585_v28  ;;  %v2913_v2 = vadd.f32 %v2912_v4, %v2866_v9  ;;  %v2871_v28 = vmul.f32 %v6622_v25, %v6622_v25 }
 0x2fe   : > { %v2814_v26 = vadd.f32 %v2813_v38, %v6602_v23  ;;  %v2914_v15 = vadd.f32 %v2913_v2, %v2867_v30  ;;  %v2872_v23 = vmul.f32 %v6639_v63, %v6639_v63 }
 0x300   : > { %v2815_v60 = vadd.f32 %v2814_v26, %v6594_v7  ;;  %v2915_v49 = vadd.f32 %v2914_v15, %v2868_v17  ;;  %v2873_v7 = vmul.f32 %v6633_v62, %v6633_v62 }
 0x302   : > { %v2816_v20 = vadd.f32 %v2815_v60, %v6619_v53  ;;  %v2916_v61 = vadd.f32 %v2915_v49, %v2869_v40  ;;  %v2874_v53 = vmul.f32 %v6654_v8, %v6654_v8 }
 0x304   : > { %v2817_v22 = vadd.f32 %v2816_v20, %v6622_v25  ;;  %v2917_v47 = vadd.f32 %v2916_v61, %v2870_v3  ;;  %v2875_v25 = vmul.f32 %v6657_v14, %v6657_v14 }
 0x306   : > { %v2818_v37 = vadd.f32 %v2817_v22, %v6639_v63  ;;  %v2918_v24 = vadd.f32 %v2917_v47, %v2871_v28  ;;  %v2876_v63 = vmul.f32 %v6672_v32, %v6672_v32 }
 0x308   : > { %v2819_v35 = vadd.f32 %v2818_v37, %v6633_v62  ;;  %v2919_v13 = vadd.f32 %v2918_v24, %v2872_v23  ;;  %v2877_v62 = vmul.f32 %v6668_v48, %v6668_v48 }
 0x30a   : > { %v2820_v29 = vadd.f32 %v2819_v35, %v6654_v8  ;;  %v2920_v50 = vadd.f32 %v2919_v13, %v2873_v7  ;;  %v2878_v8 = vmul.f32 %v6689_v56, %v6689_v56 }
 0x30c   : > { %v2821_v19 = vadd.f32 %v2820_v29, %v6657_v14  ;;  %v2921_v39 = vadd.f32 %v2920_v50, %v2874_v53  ;;  %v2879_v14 = vmul.f32 %v6692_v58, %v6692_v58 }
 0x30e   : > { %v2822_v52 = vadd.f32 %v2821_v19, %v6672_v32  ;;  %v2922_v31 = vadd.f32 %v2921_v39, %v2875_v25 }
 0x310   : > { %v2823_v43 = vadd.f32 %v2822_v52, %v6668_v48  ;;  %v2923_v51 = vadd.f32 %v2922_v31, %v2876_v63  ;;  %v2881_v48 = vmul.f32 %v6702_v59, %v6702_v59 }
 0x312   : > { %v2824_v1 = vadd.f32 %v2823_v43, %v6689_v56  ;;  %v2924_v0 = vadd.f32 %v2923_v51, %v2877_v62 }
 0x314   : > { %v2825_v18 = vadd.f32 %v2824_v1, %v6692_v58  ;;  %v2925_v21 = vadd.f32 %v2924_v0, %v2878_v8 }
 0x316   : > { %v2826_v32 = vadd.f32 %v2825_v18, %v6710_v12  ;;  %v2926_v16 = vadd.f32 %v2925_v21, %v2879_v14 }
 0x318   : > { %v2827_v57 = vadd.f32 %v2826_v32, %v6702_v59  ;;  %v2927_v56 = vadd.f32 %v2926_v16, %v2880_v6 }
 0x31a   : > { %v2828_v27 = vadd.f32 %v2827_v57, %v6697_v5  ;;  %v2928_v58 = vadd.f32 %v2927_v56, %v2881_v48 }
 0x31c   : > { %v2829_v41 = vrot.slane %v2828_v27, 4  ;;  %v2929_v44 = vadd.f32 %v2928_v58, %v2882_v11 }
 0x31e   : > { %v2830_v45 = vadd.f32 %v2829_v41, %v2828_v27  ;;  %v2930_v46 = vrot.slane %v2929_v44, 4 }
 0x320   : > { %v2831_v33 = vrot.slane %v2830_v45, 2  ;;  %v2931_v12 = vadd.f32 %v2930_v46, %v2929_v44 }
 0x322   : > { %v2832_v36 = vadd.f32 %v2831_v33, %v2830_v45  ;;  %v2932_v54 = vrot.slane %v2931_v12, 2 }
 0x324   : > { %v2833_v34 = vrot.slane %v2832_v36, 1  ;;  %v2933_v10 = vadd.f32 %v2932_v54, %v2931_v12 }
 0x326   : > { %v2934_v42 = vrot.slane %v2933_v10, 1  ;;  %v2834_v59 = vadd.f32 %v2833_v34, %v2832_v36 }
 0x328   : > { %v2935_v5 = vadd.f32 %v2934_v42, %v2933_v10 }
 0x32a   : > { %v2937_v9 = vsel %vm2936_vm0, %v2834_v59, %v2935_v5 }
 0x32b   : > { %2938 = vst [vmem:[%s208_s7] sm:$0x3] %v2937_v9 }
 0x32c PF: > { %s15_s15 = sadd.s32 1, %s4158_s15  }
 0x32d   : > { %p12_p4 = scmp.ge.s32.totalorder %s15_s15, 4  }
 0x32f   :  { %14 = sbr.rel (!%p12_p4) target bundleno = 1 (0x1), region = 74 }

// kernel: resnet_forward.11
= control target key start
LH: loop header
LB: loop body
LE: loop exit
PB: predicated region body
PF: predicated region fallthrough
CT: control target
= control target key end

     0   :  { %s4932_s21 = smov 0   ;;  %s8970_s0 = inlined_call_operand.vmem [shape: bf16[2,18,24,128], index: 0, kind: input, shape index: {}]   ;;  %s8971_s1 = inlined_call_operand.vmem [shape: bf16[1152,128], index: 1, kind: input, shape index: {}]   ;;  %s8972_s2 = inlined_call_operand.vmem [shape: f32[432,1], index: 2, kind: input, shape index: {}]   ;;  %s8973_s3 = inlined_call_operand.vmem [shape: f32[1,128], index: 3, kind: input, shape index: {}]   ;;  %s8974_s4 = inlined_call_operand.vmem [shape: f32[1,128], index: 4, kind: input, shape index: {}]   ;;  %s8975_s5 = inlined_call_operand.vmem [shape: bf16[2,18,24,128], index: 5, kind: output, shape index: {0}]   ;;  %s8976_s6 = inlined_call_operand.vmem [shape: f32[2,2,128], index: 6, kind: output, shape index: {1}]  }
   0x1 LB: > { %s3796_s22 = sadd.s32 4294967295, %s4894_s21   ;;  %p3800_p0 = scmp.ge.s32.totalorder %s4894_s21, 1  ;;  %s4894_s21 = sphi %s4932_s21, %s17_s21  }
   0x2   : > { %p215_p1 = scmp.lt.s32.totalorder %s4894_s21, 3 }
   0x4   : > { %p216_p2 = pnand %p3800_p0, %p215_p1 }
   0x6   : > { %219 = sbr.rel (%p216_p2) target bundleno = 942 (0x3ae), region = 40 }
   0xd   : > { %v314_v0 = vld [vmem:[%s8972_s2 + $0x190] sm:$0xff]  ;;  %v267_v1 = vld [vmem:[%s8972_s2 + $0x18] sm:$0xff]  ;;  %v268_v2 = vld [vmem:[%s8972_s2 + $0x20] sm:$0xff]  ;;  %v8979_v3 = vmov 0   ;;  %p249_p3 = scmp.lt.s32.totalorder %s3796_s22, 1 }
   0xe   : > { %4809 = vset.pattern.permute.xlu1 %v8979_v3  ;;  %4808 = vset.pattern.permute.xlu0 %v8979_v3  ;;  %vm368_vm0 = vcmp.ne.f32.partialorder %v314_v0, 0.0  ;;  %vm321_vm1 = vcmp.ne.f32.partialorder %v267_v1, 0.0  ;;  %vm322_vm2 = vcmp.ne.f32.partialorder %v268_v2, 0.0  ;;  %v264_v4 = vld [vmem:[%s8972_s2] sm:$0xff]  ;;  %v265_v7 = vld [vmem:[%s8972_s2 + $0x8] sm:$0xff]  ;;  %v266_v8 = vld [vmem:[%s8972_s2 + $0x10] sm:$0xff]  ;;  %v4094_v30 = vcombine.low %v8979_v3, %v8979_v3 }
   0xf   : > { %v4955_v5 = vsel %vm368_vm0, 1, %v8979_v3  ;;  %v4958_v6 = vsel %vm321_vm1, 1, %v8979_v3  ;;  %vm318_vm3 = vcmp.ne.f32.partialorder %v264_v4, 0.0  ;;  %2160 = vmatprep.subr.bf16.mxu0 %v8979_v3  ;;  %1935 = vmatprep.subr.bf16.mxu1 %v8979_v3  ;;  %v4971_v9 = vsel %vm322_vm2, 1, %v8979_v3  ;;  %v269_v11 = vld [vmem:[%s8972_s2 + $0x28] sm:$0xff]  ;;  %v270_v12 = vld [vmem:[%s8972_s2 + $0x30] sm:$0xff] }
  0x10   : > { %9354 = vst [vmem:[#allocation2_spill] sm:$0xff] %v4955_v5  ;;  %861 = vperm.xlu1 %4809, %v4955_v5   ;;  %720 = vperm.xlu0 %4808, %v4958_v6   ;;  %v656_v10 = vsel %vm318_vm3, 1, %v8979_v3  ;;  %vm319_vm4 = vcmp.ne.f32.partialorder %v265_v7, 0.0  ;;  %vm320_vm5 = vcmp.ne.f32.partialorder %v266_v8, 0.0  ;;  %vm323_vm6 = vcmp.ne.f32.partialorder %v269_v11, 0.0  ;;  %v271_v15 = vld [vmem:[%s8972_s2 + $0x38] sm:$0xff] }
  0x11   : > { %v657_v13 = vsel %vm319_vm4, 1, %v8979_v3  ;;  %v658_v14 = vsel %vm320_vm5, 1, %v8979_v3  ;;  %vm324_vm7 = vcmp.ne.f32.partialorder %v270_v12, 0.0  ;;  %v272_v16 = vld [vmem:[%s8972_s2 + $0x40] sm:$0xff]  ;;  %v4990_v17 = vsel %vm323_vm6, 1, %v8979_v3  ;;  %v273_v19 = vld [vmem:[%s8972_s2 + $0x48] sm:$0xff] }
  0x12   : > { %v4993_v18 = vsel %vm324_vm7, 1, %v8979_v3  ;;  %vm325_vm8 = vcmp.ne.f32.partialorder %v271_v15, 0.0  ;;  %vm326_vm9 = vcmp.ne.f32.partialorder %v272_v16, 0.0  ;;  %v274_v20 = vld [vmem:[%s8972_s2 + $0x50] sm:$0xff]  ;;  %vm327_vm10 = vcmp.ne.f32.partialorder %v273_v19, 0.0  ;;  %v275_v23 = vld [vmem:[%s8972_s2 + $0x58] sm:$0xff] }
  0x13   : > { %v5004_v21 = vsel %vm325_vm8, 1, %v8979_v3  ;;  %v5007_v22 = vsel %vm326_vm9, 1, %v8979_v3  ;;  %vm328_vm11 = vcmp.ne.f32.partialorder %v274_v20, 0.0  ;;  %v276_v24 = vld [vmem:[%s8972_s2 + $0x60] sm:$0xff]  ;;  %v5020_v25 = vsel %vm327_vm10, 1, %v8979_v3  ;;  %v277_v27 = vld [vmem:[%s8972_s2 + $0x68] sm:$0xff] }
  0x14   : > { %723 = vperm.xlu0 %4808, %v4971_v9   ;;  %711 = vperm.xlu1 %4809, %v656_v10   ;;  %v5023_v26 = vsel %vm328_vm11, 1, %v8979_v3  ;;  %vm329_vm12 = vcmp.ne.f32.partialorder %v275_v23, 0.0  ;;  %vm330_vm13 = vcmp.ne.f32.partialorder %v276_v24, 0.0  ;;  %v278_v28 = vld [vmem:[%s8972_s2 + $0x70] sm:$0xff]  ;;  %v4810_v29 = vld [vmem:[%s8971_s1 + $0x80] sm:$0xff]   ;;  %s10422_s22 = smov (!%p249_p3, %s3796_s22), 1  ;;  %v4095_v31 = vcombine.high %v8979_v3, %v8979_v3 }
  0x15   : > { %v5045_v32 = vsel %vm329_vm12, 1, %v8979_v3  ;;  %v5048_v33 = vsel %vm330_vm13, 1, %v8979_v3  ;;  %vm331_vm14 = vcmp.ne.f32.partialorder %v277_v27, 0.0  ;;  %v279_v34 = vld [vmem:[%s8972_s2 + $0x78] sm:$0xff]  ;;  %s4798_s13 = smul.u32 216, %s10422_s22  ;;  %vm332_vm15 = vcmp.ne.f32.partialorder %v278_v28, 0.0  ;;  %2161 = vmatpush1.bf16.msra.mxu0 %v4810_v29 }
  0x16   : > { %v4811_v35 = vld [vmem:[%s8971_s1 + $0x88] sm:$0xff]   ;;  %v280_v36 = vld [vmem:[%s8972_s2 + $0x80] sm:$0xff]  ;;  %2162 = vmatprep.subr.bf16.mxu0 %v8979_v3  ;;  %v5078_v37 = vsel %vm331_vm14, 1, %v8979_v3  ;;  %v5081_v38 = vsel %vm332_vm15, 1, %v8979_v3  ;;  %vm333_vm0 = vcmp.ne.f32.partialorder %v279_v34, 0.0  ;;  %v4812_v40 = vld [vmem:[%s8971_s1 + $0x90] sm:$0xff]  }
  0x17   : > { %s5066_s20 = scalar_lea.vmem %s8975_s5, %s4798_s13  ;;  %v281_v39 = vld [vmem:[%s8972_s2 + $0x88] sm:$0xff]  ;;  %vm334_vm1 = vcmp.ne.f32.partialorder %v280_v36, 0.0  ;;  %v282_v41 = vld [vmem:[%s8972_s2 + $0x90] sm:$0xff]  ;;  %v5096_v42 = vsel %vm333_vm0, 1, %v8979_v3  ;;  %v283_v44 = vld [vmem:[%s8972_s2 + $0x98] sm:$0xff]  ;;  %s5301_s25 = scalar_lea.vmem %s8970_s0, %s4798_s13 }
  0x18   : > { %714 = vperm.xlu0 %4808, %v657_v13   ;;  %717 = vperm.xlu1 %4809, %v658_v14   ;;  %3656 = vst [vmem:[%s5066_s20] sm:$0xf] %v4094_v30  ;;  %3657 = vst [vmem:[%s5066_s20 + $0x4] sm:$0xf] %v4095_v31  ;;  %v5099_v43 = vsel %vm334_vm1, 1, %v8979_v3  ;;  %vm335_vm2 = vcmp.ne.f32.partialorder %v281_v39, 0.0  ;;  %vm336_vm3 = vcmp.ne.f32.partialorder %v282_v41, 0.0 }
  0x19   : > { %3658 = vst [vmem:[%s5066_s20 + $0x8] sm:$0xf] %v4094_v30  ;;  %3707 = vst [vmem:[%s5066_s20 + $0xcc] sm:$0xf] %v4094_v30  ;;  %2163 = vmatpush1.bf16.msra.mxu0 %v4811_v35  ;;  %v4813_v45 = vld [vmem:[%s8971_s1 + $0x98] sm:$0xff]   ;;  %v5109_v46 = vsel %vm335_vm2, 1, %v8979_v3 }
  0x1a   : > { %3708 = vst [vmem:[%s5066_s20 + $0xd0] sm:$0xf] %v4095_v31  ;;  %3709 = vst [vmem:[%s5066_s20 + $0xd4] sm:$0xf] %v4094_v30  ;;  %2164 = vmatprep.subr.bf16.mxu0 %v8979_v3  ;;  %v284_v47 = vld [vmem:[%s8972_s2 + $0xa0] sm:$0xff]  ;;  %v5117_v48 = vsel %vm336_vm3, 1, %v8979_v3 }
  0x1b   : > { %vm337_vm4 = vcmp.ne.f32.partialorder %v283_v44, 0.0  ;;  %v311_v49 = vld [vmem:[%s8972_s2 + $0x178] sm:$0xff]  ;;  %v4814_v50 = vld [vmem:[%s8971_s1 + $0xa0] sm:$0xff]   ;;  %vm338_vm5 = vcmp.ne.f32.partialorder %v284_v47, 0.0  ;;  %v285_v51 = vld [vmem:[%s8972_s2 + $0xa8] sm:$0xff] }
  0x1c   : > { %726 = vperm.xlu0 %4808, %v4990_v17   ;;  %729 = vperm.xlu1 %4809, %v4993_v18   ;;  %vm365_vm6 = vcmp.ne.f32.partialorder %v311_v49, 0.0  ;;  %v4820_v52 = vld [vmem:[%s8971_s1] sm:$0xff]   ;;  %v5135_v53 = vsel %vm337_vm4, 1, %v8979_v3  ;;  %v4815_v54 = vld [vmem:[%s8971_s1 + $0xa8] sm:$0xff]   ;;  %v5141_v55 = vsel %vm338_vm5, 1, %v8979_v3  ;;  %vm339_vm7 = vcmp.ne.f32.partialorder %v285_v51, 0.0 }
  0x1d   : > { %2165 = vmatpush1.bf16.msra.mxu0 %v4812_v40  ;;  %1936 = vmatpush1.bf16.msra.mxu1 %v4820_v52  ;;  %v4822_v56 = vld [vmem:[%s8971_s1 + $0x8] sm:$0xff]   ;;  %v286_v57 = vld [vmem:[%s8972_s2 + $0xb0] sm:$0xff]  ;;  %v287_v58 = vld [vmem:[%s8972_s2 + $0xb8] sm:$0xff]  ;;  %v5158_v59 = vsel %vm365_vm6, 1, %v8979_v3  ;;  %v5164_v61 = vsel %vm339_vm7, 1, %v8979_v3 }
  0x1e   : > { %2166 = vmatprep.subr.bf16.mxu0 %v8979_v3  ;;  %1937 = vmatprep.subr.bf16.mxu1 %v8979_v3  ;;  %9355 = vst [vmem:[#allocation3_spill] sm:$0xff] %v5158_v59  ;;  %v288_v60 = vld [vmem:[%s8972_s2 + $0xc0] sm:$0xff]  ;;  %vm340_vm8 = vcmp.ne.f32.partialorder %v286_v57, 0.0  ;;  %v4816_v62 = vld [vmem:[%s8971_s1 + $0xb0] sm:$0xff]   ;;  %vm341_vm9 = vcmp.ne.f32.partialorder %v287_v58, 0.0  ;;  %v289_v0 = vld [vmem:[%s8972_s2 + $0xc8] sm:$0xff] }
  0x1f   : > { %v4824_v63 = vld [vmem:[%s8971_s1 + $0x10] sm:$0xff]   ;;  %vm342_vm10 = vcmp.ne.f32.partialorder %v288_v60, 0.0  ;;  %v5180_v1 = vsel %vm340_vm8, 1, %v8979_v3  ;;  %v4817_v2 = vld [vmem:[%s8971_s1 + $0xb8] sm:$0xff]   ;;  %v5186_v4 = vsel %vm341_vm9, 1, %v8979_v3  ;;  %vm343_vm11 = vcmp.ne.f32.partialorder %v289_v0, 0.0 }
  0x20   : > { %732 = vperm.xlu0 %4808, %v5004_v21   ;;  %735 = vperm.xlu1 %4809, %v5007_v22   ;;  %v4826_v7 = vld [vmem:[%s8971_s1 + $0x18] sm:$0xff]   ;;  %v290_v8 = vld [vmem:[%s8972_s2 + $0xd0] sm:$0xff]  ;;  %v292_v11 = vld [vmem:[%s8972_s2 + $0xe0] sm:$0xff]  ;;  %v5206_v12 = vsel %vm342_vm10, 1, %v8979_v3  ;;  %v5209_v13 = vsel %vm343_vm11, 1, %v8979_v3 }
  0x21   : > { %2167 = vmatpush1.bf16.msra.mxu0 %v4813_v45  ;;  %1938 = vmatpush1.bf16.msra.mxu1 %v4822_v56  ;;  %v291_v10 = vld [vmem:[%s8972_s2 + $0xd8] sm:$0xff]  ;;  %v4818_v14 = vld [vmem:[%s8971_s1 + $0xc0] sm:$0xff]   ;;  %vm344_vm12 = vcmp.ne.f32.partialorder %v290_v8, 0.0  ;;  %v293_v16 = vld [vmem:[%s8972_s2 + $0xe8] sm:$0xff]  ;;  %vm346_vm14 = vcmp.ne.f32.partialorder %v292_v11, 0.0 }
  0x22   : > { %2168 = vmatprep.subr.bf16.mxu0 %v8979_v3  ;;  %1939 = vmatprep.subr.bf16.mxu1 %v8979_v3  ;;  %v4828_v15 = vld [vmem:[%s8971_s1 + $0x20] sm:$0xff]   ;;  %vm345_vm13 = vcmp.ne.f32.partialorder %v291_v10, 0.0  ;;  %v5225_v19 = vsel %vm344_vm12, 1, %v8979_v3  ;;  %v4819_v23 = vld [vmem:[%s8971_s1 + $0xc8] sm:$0xff]   ;;  %vm347_vm15 = vcmp.ne.f32.partialorder %v293_v16, 0.0  ;;  %v294_v27 = vld [vmem:[%s8972_s2 + $0xf0] sm:$0xff] }
  0x23   : > { %v5228_v20 = vsel %vm345_vm13, 1, %v8979_v3  ;;  %v4830_v24 = vld [vmem:[%s8971_s1 + $0x28] sm:$0xff]   ;;  %v295_v28 = vld [vmem:[%s8972_s2 + $0xf8] sm:$0xff]  ;;  %v5247_v29 = vsel %vm346_vm14, 1, %v8979_v3  ;;  %v296_v30 = vld [vmem:[%s8972_s2 + $0x100] sm:$0xff]  ;;  %v5253_v31 = vsel %vm347_vm15, 1, %v8979_v3 }
  0x24   : > { %738 = vperm.xlu0 %4808, %v5020_v25   ;;  %741 = vperm.xlu1 %4809, %v5023_v26   ;;  %vm348_vm0 = vcmp.ne.f32.partialorder %v294_v27, 0.0  ;;  %v297_v34 = vld [vmem:[%s8972_s2 + $0x108] sm:$0xff]  ;;  %v4821_v35 = vld [vmem:[%s8971_s1 + $0xd0] sm:$0xff]   ;;  %vm349_vm1 = vcmp.ne.f32.partialorder %v295_v28, 0.0  ;;  %v299_v40 = vld [vmem:[%s8972_s2 + $0x118] sm:$0xff]  ;;  %vm350_vm2 = vcmp.ne.f32.partialorder %v296_v30, 0.0 }
  0x25   : > { %2169 = vmatpush1.bf16.msra.mxu0 %v4814_v50  ;;  %1940 = vmatpush1.bf16.msra.mxu1 %v4824_v63  ;;  %v4832_v36 = vld [vmem:[%s8971_s1 + $0x30] sm:$0xff]   ;;  %v300_v41 = vld [vmem:[%s8972_s2 + $0x120] sm:$0xff]  ;;  %v5278_v44 = vsel %vm348_vm0, 1, %v8979_v3  ;;  %v4823_v45 = vld [vmem:[%s8971_s1 + $0xd8] sm:$0xff]   ;;  %v5284_v47 = vsel %vm349_vm1, 1, %v8979_v3  ;;  %v5290_v50 = vsel %vm350_vm2, 1, %v8979_v3 }
  0x26   : > { %2170 = vmatprep.subr.bf16.mxu0 %v8979_v3  ;;  %1941 = vmatprep.subr.bf16.mxu1 %v8979_v3  ;;  %v298_v39 = vld [vmem:[%s8972_s2 + $0x110] sm:$0xff]  ;;  %v4834_v49 = vld [vmem:[%s8971_s1 + $0x38] sm:$0xff]   ;;  %vm351_vm3 = vcmp.ne.f32.partialorder %v297_v34, 0.0  ;;  %v301_v51 = vld [vmem:[%s8972_s2 + $0x128] sm:$0xff]  ;;  %vm353_vm5 = vcmp.ne.f32.partialorder %v299_v40, 0.0  ;;  %vm354_vm6 = vcmp.ne.f32.partialorder %v300_v41, 0.0 }
  0x27   : > { %vm352_vm4 = vcmp.ne.f32.partialorder %v298_v39, 0.0  ;;  %v4825_v52 = vld [vmem:[%s8971_s1 + $0xe0] sm:$0xff]   ;;  %v5314_v57 = vsel %vm351_vm3, 1, %v8979_v3  ;;  %vm355_vm7 = vcmp.ne.f32.partialorder %v301_v51, 0.0  ;;  %v4426_v58 = vld [vmem:[%s5301_s25 + $0x50] sm:$0xff]   ;;  %v5322_v63 = vsel %vm353_vm5, 1, %v8979_v3 }
  0x28   : > { %744 = vperm.xlu0 %4808, %v5045_v32   ;;  %747 = vperm.xlu1 %4809, %v5048_v33   ;;  %v4835_v56 = vld [vmem:[%s8971_s1 + $0x40] sm:$0xff]   ;;  %v302_v0 = vld [vmem:[%s8972_s2 + $0x130] sm:$0xff]  ;;  %v5334_v10 = vsel %vm354_vm6, 1, %v8979_v3  ;;  %v5346_v16 = vsel %vm355_vm7, 1, %v8979_v3  ;;  %v4827_v27 = vld [vmem:[%s8971_s1 + $0xe8] sm:$0xff]  }
  0x29   : > { %2171 = vmatpush1.bf16.msra.mxu0 %v4815_v54  ;;  %1942 = vmatpush1.bf16.msra.mxu1 %v4826_v7  ;;  %v4427_v54 = vld [vmem:[%s5301_s25 + $0x58] sm:$0xff]   ;;  %v4428_v60 = vld [vmem:[%s5301_s25 + $0x60] sm:$0xff]   ;;  %v4237_v7 = vunpack.c.h.bf16 %v4426_v58  ;;  %vm356_vm8 = vcmp.ne.f32.partialorder %v302_v0, 0.0  ;;  %v5368_v40 = vld [vmem:[%s8972_s2 + $0x148] sm:$0xff] }
  0x2a   : > { %2172 = vmatprep.subr.bf16.mxu0 %v8979_v3  ;;  %1943 = vmatprep.subr.bf16.mxu1 %v8979_v3  ;;  %v4240_v8 = vunpack.c.l.bf16 %v4427_v54  ;;  %v5339_v11 = vld [vmem:[%s8973_s3] ss:$0 sm:$0xff]  ;;  %v4244_v34 = vunpack.c.l.bf16 %v4428_v60  ;;  %v4245_v39 = vunpack.c.h.bf16 %v4428_v60  ;;  %vm359_vm11 = vcmp.ne.f32.partialorder %v5368_v40, 0.0 }
  0x2b   : > { %v508_v28 = vmul.f32 %v4237_v7, %v5339_v11 }
  0x2c   : > { %750 = vperm.xlu0 %4808, %v5078_v37   ;;  %753 = vperm.xlu1 %4809, %v5081_v38   ;;  %v509_v30 = vmul.f32 %v4240_v8, %v5339_v11  ;;  %v512_v60 = vmul.f32 %v4245_v39, %v5339_v11  ;;  %v5394_v8 = vsel %vm356_vm8, 1, %v8979_v3  ;;  %v4432_v39 = vld [vmem:[%s5301_s25 + $0x80] sm:$0xff]  }
  0x2d   : > { %2173 = vmatpush1.bf16.msra.mxu0 %v4816_v62  ;;  %1944 = vmatpush1.bf16.msra.mxu1 %v4828_v15  ;;  %v5319_v62 = vsel %vm352_vm4, 1, %v8979_v3  ;;  %v4429_v15 = vld [vmem:[%s5301_s25 + $0x68] sm:$0xff]  }
  0x2e   : > { %2174 = vmatprep.subr.bf16.mxu0 %v8979_v3  ;;  %1945 = vmatprep.subr.bf16.mxu1 %v8979_v3  ;;  %v4248_v51 = vunpack.c.l.bf16 %v4429_v15  ;;  %v4249_v7 = vunpack.c.h.bf16 %v4429_v15 }
  0x30   : > { %756 = vperm.xlu0 %4808, %v5096_v42   ;;  %759 = vperm.xlu1 %4809, %v5099_v43   ;;  %v514_v0 = vmul.f32 %v4249_v7, %v5339_v11  ;;  %v4433_v7 = vld [vmem:[%s5301_s25 + $0x88] sm:$0xff]  }
  0x31   : > { %2175 = vmatpush1.bf16.msra.mxu0 %v4817_v2  ;;  %1946 = vmatpush1.bf16.msra.mxu1 %v4830_v24  ;;  %v303_v2 = vld [vmem:[%s8972_s2 + $0x138] sm:$0xff]  ;;  %v5354_v24 = vld [vmem:[%s8974_s4] ss:$0 sm:$0xff] }
  0x32   : > { %2176 = vmatprep.subr.bf16.mxu0 %v8979_v3  ;;  %1947 = vmatprep.subr.bf16.mxu1 %v8979_v3  ;;  %v5373_v41 = vadd.f32 %v5354_v24, %v508_v28  ;;  %vm357_vm9 = vcmp.ne.f32.partialorder %v303_v2, 0.0  ;;  %v5407_v15 = vadd.f32 %v5354_v24, %v512_v60 }
  0x33   : > { %v5413_v5 = vsel %vm357_vm9, 1, %v8979_v3 }
  0x34   : > { %762 = vperm.xlu0 %4808, %v5109_v46   ;;  %765 = vperm.xlu1 %4809, %v5117_v48   ;;  %9357 = vst [vmem:[#allocation5_spill] sm:$0xff] %v5407_v15  ;;  %9358 = vst [vmem:[#allocation6_spill] sm:$0xff] %v5413_v5 }
  0x35   : > { %2177 = vmatpush1.bf16.msra.mxu0 %v4818_v14  ;;  %1948 = vmatpush1.bf16.msra.mxu1 %v4832_v36  ;;  %v4241_v14 = vunpack.c.h.bf16 %v4427_v54  ;;  %v4829_v54 = vld [vmem:[%s8971_s1 + $0xf0] sm:$0xff]  }
  0x36   : > { %2178 = vmatprep.subr.bf16.mxu0 %v8979_v3  ;;  %1949 = vmatprep.subr.bf16.mxu1 %v8979_v3 }
  0x37   : > { %v510_v36 = vmul.f32 %v4241_v14, %v5339_v11  ;;  %v5399_v14 = vld [vmem:[%s8972_s2 + $0x150] sm:$0xff] }
  0x38   : > { %768 = vperm.xlu0 %4808, %v5135_v53   ;;  %771 = vperm.xlu1 %4809, %v5141_v55   ;;  %vm360_vm12 = vcmp.ne.f32.partialorder %v5399_v14, 0.0  ;;  %v312_v14 = vld [vmem:[%s8972_s2 + $0x180] sm:$0xff] }
  0x39   : > { %2179 = vmatpush1.bf16.msra.mxu0 %v4819_v23  ;;  %1950 = vmatpush1.bf16.msra.mxu1 %v4834_v49  ;;  %v304_v23 = vld [vmem:[%s8972_s2 + $0x140] sm:$0xff]  ;;  %v511_v49 = vmul.f32 %v4244_v34, %v5339_v11  ;;  %v5387_v58 = vadd.f32 %v5354_v24, %v510_v36  ;;  %v4431_v34 = vld [vmem:[%s5301_s25 + $0x78] sm:$0xff]   ;;  %vm366_vm1 = vcmp.ne.f32.partialorder %v312_v14, 0.0 }
  0x3a   : > { %2180 = vmatprep.subr.bf16.mxu0 %v8979_v3  ;;  %1951 = vmatprep.subr.bf16.mxu1 %v8979_v3  ;;  %vm358_vm10 = vcmp.ne.f32.partialorder %v304_v23, 0.0  ;;  %v4256_v60 = vunpack.c.l.bf16 %v4431_v34 }
  0x3b   : > { %v5402_v28 = vadd.f32 %v5354_v24, %v511_v49  ;;  %v307_v49 = vld [vmem:[%s8972_s2 + $0x158] sm:$0xff] }
  0x3c   : > { %852 = vperm.xlu0 %4808, %v5158_v59   ;;  %774 = vperm.xlu1 %4809, %v5164_v61   ;;  %v5433_v59 = vsel %vm358_vm10, 1, %v8979_v3  ;;  %vm361_vm13 = vcmp.ne.f32.partialorder %v307_v49, 0.0 }
  0x3d   : > { %2181 = vmatpush1.bf16.msra.mxu0 %v4821_v35  ;;  %1952 = vmatpush1.bf16.msra.mxu1 %v4835_v56  ;;  %v4836_v35 = vld [vmem:[%s8971_s1 + $0x48] sm:$0xff]   ;;  %v4838_v56 = vld [vmem:[%s8971_s1 + $0x50] sm:$0xff]   ;;  %9356 = vst [vmem:[#allocation4_spill] sm:$0xff] %v5402_v28  ;;  %9361 = vst [vmem:[#allocation9_spill] sm:$0xff] %v5433_v59 }
  0x3e   : > { %2182 = vmatprep.subr.bf16.mxu0 %v8979_v3  ;;  %1953 = vmatprep.subr.bf16.mxu1 %v8979_v3 }
  0x40   : > { %777 = vperm.xlu0 %4808, %v5180_v1   ;;  %780 = vperm.xlu1 %4809, %v5186_v4  }
  0x41   : > { %2183 = vmatpush1.bf16.msra.mxu0 %v4823_v45  ;;  %v5376_v45 = vadd.f32 %v5354_v24, %v509_v30  ;;  %v513_v30 = vmul.f32 %v4248_v51, %v5339_v11  ;;  %1954 = vmatpush1.bf16.msra.mxu1 %v4836_v35  ;;  %v5425_v51 = vadd.f32 %v5354_v24, %v514_v0  ;;  %v4257_v0 = vunpack.c.h.bf16 %v4431_v34  ;;  %v308_v34 = vld [vmem:[%s8972_s2 + $0x160] sm:$0xff] }
  0x42   : > { %2184 = vmatprep.subr.bf16.mxu0 %v8979_v3  ;;  %1955 = vmatprep.subr.bf16.mxu1 %v8979_v3  ;;  %vm362_vm14 = vcmp.ne.f32.partialorder %v308_v34, 0.0 }
  0x43   : > { %9360 = vst [vmem:[#allocation8_spill] sm:$0xff] %v5425_v51  ;;  %v4260_v51 = vunpack.c.l.bf16 %v4432_v39 }
  0x44   : > { %783 = vperm.xlu0 %4808, %v5206_v12   ;;  %786 = vperm.xlu1 %4809, %v5209_v13  }
  0x45   : > { %2185 = vmatpush1.bf16.msra.mxu0 %v4825_v52  ;;  %v4430_v52 = vld [vmem:[%s5301_s25 + $0x70] sm:$0xff]   ;;  %1956 = vmatpush1.bf16.msra.mxu1 %v4838_v56  ;;  %v518_v56 = vmul.f32 %v4257_v0, %v5339_v11  ;;  %v519_v15 = vmul.f32 %v4260_v51, %v5339_v11 }
  0x46   : > { %2186 = vmatprep.subr.bf16.mxu0 %v8979_v3  ;;  %v4252_v36 = vunpack.c.l.bf16 %v4430_v52  ;;  %v4253_v35 = vunpack.c.h.bf16 %v4430_v52  ;;  %v4831_v52 = vld [vmem:[%s8971_s1 + $0xf8] sm:$0xff]  }
  0x47   : > { %v5476_v0 = vadd.f32 %v5354_v24, %v518_v56 }
  0x48   : > { %789 = vperm.xlu0 %4808, %v5225_v19   ;;  %792 = vperm.xlu1 %4809, %v5228_v20   ;;  %v515_v2 = vmul.f32 %v4252_v36, %v5339_v11  ;;  %v4839_v36 = vld [vmem:[%s8971_s1 + $0x58] sm:$0xff]  }
  0x49   : > { %2187 = vmatpush1.bf16.msra.mxu0 %v4827_v27  ;;  %v5421_v27 = vadd.f32 %v5354_v24, %v513_v30  ;;  %v516_v30 = vmul.f32 %v4253_v35, %v5339_v11  ;;  %v9363_v35 = vmov 0   ;;  %9367 = vst [vmem:[#allocation14_spill] sm:$0xff] %v5476_v0 }
  0x4a   : > { %2188 = vmatprep.subr.bf16.mxu0 %v8979_v3  ;;  %v5444_v23 = vadd.f32 %v5354_v24, %v515_v2  ;;  %v517_v3 = vmul.f32 %v4256_v60, %v5339_v11  ;;  %1957 = vmatprep.subr.bf16.mxu1 %v9363_v35  ;;  %v4264_v2 = vunpack.c.l.bf16 %v4433_v7  ;;  %v5470_v51 = vsel %vm359_vm11, 1, %v9363_v35 }
  0x4b   : > { %9359 = vst [vmem:[#allocation7_spill] sm:$0xff] %v5421_v27  ;;  %v4261_v27 = vunpack.c.h.bf16 %v4432_v39  ;;  %v309_v39 = vld [vmem:[%s8972_s2 + $0x168] sm:$0xff]  ;;  %9366 = vst [vmem:[#allocation13_spill] sm:$0xff] %v5470_v51  ;;  %1958 = vmatpush1.bf16.msra.mxu1 %v4839_v36  ;;  %v5489_v56 = vsel %vm360_vm12, 1, %v9363_v35  ;;  %v4436_v36 = vld [vmem:[%s5301_s25 + $0xa0] sm:$0xff]  }
  0x4c   : > { %795 = vperm.xlu0 %4808, %v5247_v29   ;;  %798 = vperm.xlu1 %4809, %v5253_v31   ;;  %9362 = vst [vmem:[#allocation10_spill] sm:$0xff] %v5444_v23  ;;  %v4434_v23 = vld [vmem:[%s5301_s25 + $0x90] sm:$0xff]   ;;  %v5462_v60 = vadd.f32 %v5354_v24, %v517_v3  ;;  %v5479_v3 = vadd.f32 %v5354_v24, %v519_v15  ;;  %9370 = vst [vmem:[#allocation17_spill] sm:$0xff] %v5489_v56  ;;  %v5493_v15 = vsel %vm361_vm13, 1, %v9363_v35 }
  0x4d   : > { %2189 = vmatpush1.bf16.msra.mxu0 %v4829_v54  ;;  %v5453_v54 = vadd.f32 %v5354_v24, %v516_v30  ;;  %v520_v28 = vmul.f32 %v4261_v27, %v5339_v11  ;;  %v4840_v30 = vld [vmem:[%s8971_s1 + $0x60] sm:$0xff]   ;;  %v521_v27 = vmul.f32 %v4264_v2, %v5339_v11  ;;  %9371 = vst [vmem:[#allocation18_spill] sm:$0xff] %v5493_v15  ;;  %vm363_vm15 = vcmp.ne.f32.partialorder %v309_v39, 0.0 }
  0x4e   : > { %2190 = vmatprep.subr.bf16.mxu0 %v9363_v35  ;;  %9365 = vst [vmem:[#allocation12_spill] sm:$0xff] %v5462_v60  ;;  %9368 = vst [vmem:[#allocation15_spill] sm:$0xff] %v5479_v3  ;;  %v4265_v60 = vunpack.c.h.bf16 %v4433_v7  ;;  %1959 = vmatprep.subr.bf16.mxu1 %v9363_v35  ;;  %v4269_v7 = vunpack.c.h.bf16 %v4434_v23  ;;  %v4276_v0 = vunpack.c.l.bf16 %v4436_v36  ;;  %v4277_v34 = vunpack.c.h.bf16 %v4436_v36 }
  0x4f   : > { %9364 = vst [vmem:[#allocation11_spill] sm:$0xff] %v5453_v54  ;;  %v5483_v40 = vadd.f32 %v5354_v24, %v520_v28  ;;  %v4268_v54 = vunpack.c.l.bf16 %v4434_v23  ;;  %v5501_v28 = vadd.f32 %v5354_v24, %v521_v27  ;;  %v5513_v27 = vsel %vm362_vm14, 1, %v9363_v35  ;;  %v4842_v23 = vld [vmem:[%s8971_s1 + $0x68] sm:$0xff]   ;;  %1960 = vmatpush1.bf16.msra.mxu1 %v4840_v30 }
  0x50   : > { %801 = vperm.xlu0 %4808, %v5278_v44   ;;  %804 = vperm.xlu1 %4809, %v5284_v47   ;;  %v522_v49 = vmul.f32 %v4265_v60, %v5339_v11  ;;  %9373 = vst [vmem:[#allocation20_spill] sm:$0xff] %v5513_v27  ;;  %v313_v30 = vld [vmem:[%s8972_s2 + $0x188] sm:$0xff]  ;;  %v528_v36 = vmul.f32 %v4277_v34, %v5339_v11 }
  0x51   : > { %2191 = vmatpush1.bf16.msra.mxu0 %v4831_v52  ;;  %9369 = vst [vmem:[#allocation16_spill] sm:$0xff] %v5483_v40  ;;  %v310_v52 = vld [vmem:[%s8972_s2 + $0x170] sm:$0xff]  ;;  %9372 = vst [vmem:[#allocation19_spill] sm:$0xff] %v5501_v28  ;;  %v523_v2 = vmul.f32 %v4268_v54, %v5339_v11  ;;  %v524_v28 = vmul.f32 %v4269_v7, %v5339_v11  ;;  %1961 = vmatprep.subr.bf16.mxu1 %v9363_v35  ;;  %vm367_vm2 = vcmp.ne.f32.partialorder %v313_v30, 0.0 }
  0x52   : > { %2385 = vmatprep.subr.bf16.mxu0 %v9363_v35  ;;  %v5520_v54 = vadd.f32 %v5354_v24, %v522_v49  ;;  %vm364_vm0 = vcmp.ne.f32.partialorder %v310_v52, 0.0  ;;  %v527_v49 = vmul.f32 %v4276_v0, %v5339_v11  ;;  %v5556_v39 = vadd.f32 %v5354_v24, %v528_v36  ;;  %v4844_v52 = vld [vmem:[%s8971_s1 + $0x78] sm:$0xff]  }
  0x53   : > { %v5523_v60 = vadd.f32 %v5354_v24, %v523_v2  ;;  %1962 = vmatpush1.bf16.msra.mxu1 %v4842_v23  ;;  %v317_v23 = vld [vmem:[%s8972_s2 + $0x1a8] sm:$0xff]  ;;  %v315_v36 = vld [vmem:[%s8972_s2 + $0x198] sm:$0xff] }
  0x54   : > { %807 = vperm.xlu0 %4808, %v5290_v50   ;;  %810 = vperm.xlu1 %4809, %v5314_v57   ;;  %9374 = vst [vmem:[#allocation21_spill] sm:$0xff] %v5520_v54  ;;  %v5553_v34 = vadd.f32 %v5354_v24, %v527_v49  ;;  %9381 = vst [vmem:[#allocation28_spill] sm:$0xff] %v5556_v39  ;;  %v4438_v49 = vld [vmem:[%s5301_s25 + $0xb0] sm:$0xff]   ;;  %v5582_v39 = vld [vmem:[%s5301_s25 + $0xb8] sm:$0xff]   ;;  %vm371_vm3 = vcmp.ne.f32.partialorder %v317_v23, 0.0  ;;  %vm369_vm4 = vcmp.ne.f32.partialorder %v315_v36, 0.0 }
  0x55   : > { %9375 = vst [vmem:[#allocation22_spill] sm:$0xff] %v5523_v60  ;;  %1963 = vmatprep.subr.bf16.mxu1 %v9363_v35  ;;  %v4284_v14 = vunpack.c.l.bf16 %v4438_v49  ;;  %v709_v30 = vsel %vm371_vm3, 1, %v9363_v35 }
  0x56   : > { %9380 = vst [vmem:[#allocation27_spill] sm:$0xff] %v5553_v34  ;;  %v4285_v34 = vunpack.c.h.bf16 %v4438_v49  ;;  %v4288_v49 = vunpack.c.l.bf16 %v5582_v39 }
  0x58   : > { %813 = vperm.xlu0 %4808, %v5319_v62   ;;  %816 = vperm.xlu1 %4809, %v5322_v63  }
  0x5c   : > { %819 = vperm.xlu0 %4808, %v5334_v10   ;;  %822 = vperm.xlu1 %4809, %v5346_v16  }
  0x60   : > { %825 = vperm.xlu0 %4808, %v5394_v8   ;;  %828 = vperm.xlu1 %4809, %v5413_v5   ;;  %v4435_v5 = vld [vmem:[%s5301_s25 + $0x98] sm:$0xff]  }
  0x61   : > { %v4272_v40 = vunpack.c.l.bf16 %v4435_v5  ;;  %v4273_v3 = vunpack.c.h.bf16 %v4435_v5  ;;  %v4437_v5 = vld [vmem:[%s5301_s25 + $0xa8] sm:$0xff]  }
  0x62   : > { %v4280_v2 = vunpack.c.l.bf16 %v4437_v5 }
  0x63   : > { %v526_v7 = vmul.f32 %v4273_v3, %v5339_v11  ;;  %v4843_v3 = vld [vmem:[%s8971_s1 + $0x70] sm:$0xff]  }
  0x64   : > { %831 = vperm.xlu0 %4808, %v5433_v59   ;;  %834 = vperm.xlu1 %4809, %v5470_v51   ;;  %v5527_v51 = vadd.f32 %v5354_v24, %v524_v28  ;;  %v525_v59 = vmul.f32 %v4272_v40, %v5339_v11  ;;  %v5541_v40 = vsel %vm363_vm15, 1, %v9363_v35 }
  0x65   : > { %9377 = vst [vmem:[#allocation24_spill] sm:$0xff] %v5541_v40  ;;  %v5550_v0 = vadd.f32 %v5354_v24, %v526_v7  ;;  %v529_v7 = vmul.f32 %v4280_v2, %v5339_v11  ;;  %1964 = vmatpush1.bf16.msra.mxu1 %v4843_v3  ;;  %v316_v3 = vld [vmem:[%s8972_s2 + $0x1a0] sm:$0xff] }
  0x66   : > { %9376 = vst [vmem:[#allocation23_spill] sm:$0xff] %v5527_v51  ;;  %v5547_v28 = vadd.f32 %v5354_v24, %v525_v59  ;;  %v4281_v51 = vunpack.c.h.bf16 %v4437_v5  ;;  %v5564_v59 = vsel %vm366_vm1, 1, %v9363_v35  ;;  %1965 = vmatprep.subr.bf16.mxu1 %v9363_v35  ;;  %vm370_vm5 = vcmp.ne.f32.partialorder %v316_v3, 0.0 }
  0x67   : > { %9379 = vst [vmem:[#allocation26_spill] sm:$0xff] %v5550_v0  ;;  %9383 = vst [vmem:[#allocation30_spill] sm:$0xff] %v5564_v59  ;;  %v5585_v2 = vadd.f32 %v5354_v24, %v529_v7  ;;  %v708_v36 = vsel %vm370_vm5, 1, %v9363_v35 }
  0x68   : > { %837 = vperm.xlu0 %4808, %v5489_v56   ;;  %840 = vperm.xlu1 %4809, %v5493_v15   ;;  %9378 = vst [vmem:[#allocation25_spill] sm:$0xff] %v5547_v28  ;;  %v5560_v15 = vsel %vm364_vm0, 1, %v9363_v35  ;;  %v530_v5 = vmul.f32 %v4281_v51, %v5339_v11  ;;  %v531_v51 = vmul.f32 %v4284_v14, %v5339_v11  ;;  %v4440_v28 = vld [vmem:[%s5301_s25 + $0xc0] sm:$0xff]   ;;  %v4423_v56 = vld [vmem:[%s5301_s25 + $0x38] sm:$0xff]  }
  0x69   : > { %9382 = vst [vmem:[#allocation29_spill] sm:$0xff] %v5560_v15  ;;  %9384 = vst [vmem:[#allocation31_spill] sm:$0xff] %v5585_v2  ;;  %v4292_v23 = vunpack.c.l.bf16 %v4440_v28  ;;  %1966 = vmatpush1.bf16.msra.mxu1 %v4844_v52  ;;  %v707_v52 = vsel %vm369_vm4, 1, %v9363_v35  ;;  %v5751_v2 = vld [vmem:[%s5301_s25 + $0x30] sm:$0xff]  }
  0x6a   : > { %v5588_v0 = vadd.f32 %v5354_v24, %v530_v5  ;;  %v5602_v7 = vadd.f32 %v5354_v24, %v531_v51  ;;  %v533_v5 = vmul.f32 %v4288_v49, %v5339_v11  ;;  %4562 = vmatprep.subr.bf16.mxu1 %v9363_v35  ;;  %v4442_v51 = vld [vmem:[%s5301_s25 + $0xd0] sm:$0xff]   ;;  %v4221_v54 = vunpack.c.h.bf16 %v5751_v2 }
  0x6b   : > { %v535_v14 = vmul.f32 %v4292_v23, %v5339_v11  ;;  %v4441_v23 = vld [vmem:[%s5301_s25 + $0xc8] sm:$0xff]  }
  0x6c   : > { %843 = vperm.xlu0 %4808, %v5513_v27   ;;  %846 = vperm.xlu1 %4809, %v5541_v40   ;;  %9385 = vst [vmem:[#allocation32_spill] sm:$0xff] %v5588_v0  ;;  %v532_v40 = vmul.f32 %v4285_v34, %v5339_v11  ;;  %v5596_v27 = vsel %vm367_vm2, 1, %v9363_v35  ;;  %9387 = vst [vmem:[#allocation34_spill] sm:$0xff] %v5602_v7  ;;  %v5616_v7 = vadd.f32 %v5354_v24, %v533_v5 }
  0x6d   : > { %9386 = vst [vmem:[#allocation33_spill] sm:$0xff] %v5596_v27 }
  0x6e   : > { %v5608_v34 = vadd.f32 %v5354_v24, %v532_v40  ;;  %9389 = vst [vmem:[#allocation36_spill] sm:$0xff] %v5616_v7  ;;  %v4293_v40 = vunpack.c.h.bf16 %v4440_v28  ;;  %v4297_v28 = vunpack.c.h.bf16 %v4441_v23 }
  0x70   : > { %849 = vperm.xlu0 %4808, %v5560_v15   ;;  %855 = vperm.xlu1 %4809, %v5564_v59   ;;  %9388 = vst [vmem:[#allocation35_spill] sm:$0xff] %v5608_v34  ;;  %v5619_v59 = vadd.f32 %v5354_v24, %v535_v14  ;;  %v4301_v34 = vunpack.c.h.bf16 %v4442_v51  ;;  %v536_v3 = vmul.f32 %v4293_v40, %v5339_v11 }
  0x72   : > { %9390 = vst [vmem:[#allocation37_spill] sm:$0xff] %v5619_v59  ;;  %v540_v49 = vmul.f32 %v4301_v34, %v5339_v11  ;;  %v5628_v5 = vadd.f32 %v5354_v24, %v536_v3  ;;  %v4300_v59 = vunpack.c.l.bf16 %v4442_v51 }
  0x74   : > { %858 = vperm.xlu0 %4808, %v5596_v27   ;;  %870 = vperm.xlu1 %4809, %v709_v30   ;;  %9391 = vst [vmem:[#allocation38_spill] sm:$0xff] %v5628_v5  ;;  %v5631_v14 = vadd.f32 %v5354_v24, %v540_v49  ;;  %v538_v30 = vmul.f32 %v4297_v28, %v5339_v11 }
  0x75   : > { %v539_v27 = vmul.f32 %v4300_v59, %v5339_v11 }
  0x76   : > { %9392 = vst [vmem:[#allocation39_spill] sm:$0xff] %v5631_v14  ;;  %v5636_v34 = vadd.f32 %v5354_v24, %v538_v30  ;;  %v8990_v51 = vmax.f32 %v5631_v14, 0.0 }
  0x77   : > { %v5639_v40 = vadd.f32 %v5354_v24, %v539_v27  ;;  %v4296_v27 = vunpack.c.l.bf16 %v4441_v23 }
  0x78   : > { %864 = vperm.xlu0 %4808, %v707_v52   ;;  %867 = vperm.xlu1 %4809, %v708_v36   ;;  %9393 = vst [vmem:[#allocation40_spill] sm:$0xff] %v5636_v34  ;;  %v4417_v36 = vld [vmem:[%s5301_s25 + $0x8] sm:$0xff]  }
  0x79   : > { %9394 = vst [vmem:[#allocation41_spill] sm:$0xff] %v5639_v40  ;;  %v8989_v52 = vmax.f32 %v5639_v40, 0.0  ;;  %v4201_v3 = vunpack.c.h.bf16 %v4417_v36  ;;  %v537_v49 = vmul.f32 %v4296_v27, %v5339_v11  ;;  %v1028_v27 = vlaneseq }
  0x7b   : > { %v5650_v59 = vpack.c.bf16 %v8990_v51, %v8989_v52  ;;  %v490_v28 = vmul.f32 %v4201_v3, %v5339_v11  ;;  %v598_v23 = vadd.f32 %v5354_v24, %v537_v49 }
  0x7c   : > { %3061 = vperm.xlu0 %4808, %v4958_v6   ;;  %3064 = vperm.xlu1 %4809, %v4971_v9   ;;  %v4418_v6 = vld [vmem:[%s5301_s25 + $0x10] sm:$0xff]   ;;  %v4195_v9 = vld [vmem:[%s5301_s25] sm:$0xff]  }
  0x7d   : > { %9395 = vst [vmem:[#allocation42_spill] sm:$0xff] %v5650_v59  ;;  %v4204_v30 = vunpack.c.l.bf16 %v4418_v6  ;;  %v4197_v52 = vunpack.c.h.bf16 %v4195_v9  ;;  %v4196_v51 = vunpack.c.l.bf16 %v4195_v9  ;;  %v4419_v59 = vld [vmem:[%s5301_s25 + $0x18] sm:$0xff]  }
  0x7f   : > { %v488_v3 = vmul.f32 %v4197_v52, %v5339_v11  ;;  %v487_v40 = vmul.f32 %v4196_v51, %v5339_v11  ;;  %v5678_v52 = vshrl.u32 %v1028_v27, 7  ;;  %v4209_v51 = vunpack.c.h.bf16 %v4419_v59 }
  0x80   : > { %3067 = vperm.xlu0 %4808, %v4990_v17   ;;  %3070 = vperm.xlu1 %4809, %v4993_v18   ;;  %v4200_v17 = vunpack.c.l.bf16 %v4417_v36  ;;  %v4205_v18 = vunpack.c.h.bf16 %v4418_v6  ;;  %v4420_v36 = vld [vmem:[%s5301_s25 + $0x20] sm:$0xff]   ;;  %v5673_v6 = vmax.f32 %v598_v23, 0.0 }
  0x81   : > { %9398 = vst [vmem:[#allocation45_spill] sm:$0xff] %v5678_v52  ;;  %vm9076_vm8 = vcmp.lt.s32.totalorder %v5678_v52, 1  ;;  %vm9077_vm9 = vcmp.lt.s32.totalorder %v5678_v52, 7 }
  0x82   : > { %9396 = vst [vmem:[#allocation43_spill] sm:$0xff] %v5673_v6 }
  0x84   : > { %3073 = vperm.xlu0 %4808, %v5004_v21   ;;  %3076 = vperm.xlu1 %4809, %v5007_v22   ;;  %v551_v21 = vadd.f32 %v5354_v24, %v490_v28  ;;  %v491_v22 = vmul.f32 %v4204_v30, %v5339_v11  ;;  %v4208_v28 = vunpack.c.l.bf16 %v4419_v59 }
  0x86   : > { %v5675_v9 = vmax.f32 %v551_v21, 0.0  ;;  %v552_v49 = vadd.f32 %v5354_v24, %v491_v22  ;;  %v4421_v21 = vld [vmem:[%s5301_s25 + $0x28] sm:$0xff]  }
  0x87   : > { %v4216_v34 = vunpack.c.l.bf16 %v4421_v21  ;;  %v4217_v5 = vunpack.c.h.bf16 %v4421_v21 }
  0x88   : > { %3079 = vperm.xlu0 %4808, %v5020_v25   ;;  %3082 = vperm.xlu1 %4809, %v5023_v26   ;;  %v489_v25 = vmul.f32 %v4200_v17, %v5339_v11  ;;  %v492_v26 = vmul.f32 %v4205_v18, %v5339_v11  ;;  %9397 = vst [vmem:[#allocation44_spill] sm:$0xff] %v5675_v9  ;;  %v4212_v18 = vunpack.c.l.bf16 %v4420_v36  ;;  %v5705_v27 = vmax.f32 %v552_v49, 0.0 }
  0x89   : > { %v548_v17 = vadd.f32 %v5354_v24, %v487_v40 }
  0x8a   : > { %v5691_v23 = vadd.f32 %v5354_v24, %v489_v25  ;;  %v553_v59 = vadd.f32 %v5354_v24, %v492_v26  ;;  %9401 = vst [vmem:[#allocation48_spill] sm:$0xff] %v5705_v27  ;;  %v495_v14 = vmul.f32 %v4212_v18, %v5339_v11 }
  0x8c   : > { %3085 = vperm.xlu0 %4808, %v5045_v32   ;;  %3088 = vperm.xlu1 %4809, %v5048_v33   ;;  %v549_v33 = vadd.f32 %v5354_v24, %v488_v3  ;;  %v4213_v3 = vunpack.c.h.bf16 %v4420_v36 }
  0x8f   : > { %v5680_v30 = vpop.permute.xlu1 %861  ;;  %v5682_v32 = vpop.permute.xlu0 %720 }
  0x90   : > { %9399 = vst [vmem:[#allocation46_spill] sm:$0xff] %v5680_v30  ;;  %vm9023_vm6 = vcmp.eq.s32.totalorder %v5680_v30, 1  ;;  %vm9045_vm7 = vcmp.eq.s32.totalorder %v5682_v32, 1  ;;  %3091 = vperm.xlu0 %4808, %v5078_v37   ;;  %3094 = vperm.xlu1 %4809, %v5081_v38   ;;  %v493_v37 = vmul.f32 %v4208_v28, %v5339_v11  ;;  %v494_v38 = vmul.f32 %v4209_v51, %v5339_v11 }
  0x91   : > { %v5698_v22 = vsel %vm9023_vm6, %v5673_v6, 0.0  ;;  %v5703_v40 = vsel %vm9045_vm7, %v5675_v9, 0.0  ;;  %v603_v30 = vmax.f32 %v549_v33, 0.0  ;;  %v602_v6 = vmax.f32 %v548_v17, 0.0 }
  0x92   : > { %9400 = vst [vmem:[#allocation47_spill] sm:$0xff] %v5698_v22  ;;  %v5715_v49 = vrot.slane %v5698_v22, 7  ;;  %v5718_v28 = vrot.slane %v5703_v40, 7  ;;  %v9404_v51 = vmov 0  ;;  %v555_v18 = vadd.f32 %v5354_v24, %v494_v38 }
  0x93   : > { %v5710_v25 = vpop.permute.xlu0 %723  ;;  %v712_v26 = vpop.permute.xlu1 %711  ;;  %v496_v22 = vmul.f32 %v4213_v3, %v5339_v11  ;;  %v556_v33 = vadd.f32 %v5354_v24, %v495_v14 }
  0x94   : > { %9402 = vst [vmem:[#allocation49_spill] sm:$0xff] %v5710_v25  ;;  %9403 = vst [vmem:[#allocation50_spill] sm:$0xff] %v5715_v49  ;;  %vm9044_vm10 = vcmp.eq.s32.totalorder %v5710_v25, 1  ;;  %3097 = vperm.xlu0 %4808, %v5096_v42   ;;  %3100 = vperm.xlu1 %4809, %v5099_v43   ;;  %vm872_vm11 = vcmp.eq.s32.totalorder %v712_v26, 1  ;;  %v5737_v42 = vmax.f32 %v553_v59, 0.0  ;;  %v554_v43 = vadd.f32 %v5354_v24, %v493_v37 }
  0x95   : > { %v5726_v36 = vsel %vm9044_vm10, %v5705_v27, 0.0  ;;  %vm5732_vm12 = vmpackc.low %vm9044_vm10, %vm9045_vm7  ;;  %v5746_v0 = vsel %vm872_vm11, %v602_v6, 0.0  ;;  %v497_v59 = vmul.f32 %v4216_v34, %v5339_v11  ;;  %v1254_v14 = vsel %vm9076_vm8, %v5715_v49, %v5718_v28 }
  0x96   : > { %v9405_v51 = vsel %vm5732_vm12, 4294967295, %v9404_v51  ;;  %9407 = vst [vmem:[#allocation52_spill] sm:$0xff] %v5737_v42  ;;  %v984_v17 = vrot.slane %v5726_v36, 7  ;;  %v9004_v3 = vrot.slane %v5746_v0, 1 }
  0x97   : > { %9406 = vst [vmem:[#allocation51_spill] sm:$0xff] %v9405_v51  ;;  %v715_v7 = vpop.permute.xlu0 %714  ;;  %v5743_v15 = vpop.permute.xlu1 %717  ;;  %v3879_v51 = vpack.c.bf16 %v603_v30, %v602_v6 }
  0x98   : > { %vm873_vm13 = vcmp.eq.s32.totalorder %v715_v7, 1  ;;  %vm874_vm14 = vcmp.eq.s32.totalorder %v5743_v15, 1  ;;  %3103 = vperm.xlu0 %4808, %v5109_v46   ;;  %3106 = vperm.xlu1 %4809, %v5117_v48   ;;  %v5759_v21 = vsel %vm9076_vm8, %v5718_v28, %v984_v17  ;;  %v9409_v7 = vmax.f32 %v5691_v23, 0.0 }
  0x99   : > { %9408 = vst [vmem:[#allocation53_spill] sm:$0xff] %v5759_v21  ;;  %v5765_v34 = vsel %vm873_vm13, %v603_v30, 0.0  ;;  %v5773_v46 = vmax.f32 %v554_v43, 0.0  ;;  %v1255_v48 = vpack.c.bf16 %v5759_v21, %v1254_v14  ;;  %vm3878_vm15 = vmpackc.low %vm873_vm13, %vm872_vm11  ;;  %v4220_v30 = vunpack.c.l.bf16 %v5751_v2 }
  0x9a   : > { %v5771_v6 = vsel %vm874_vm14, %v9409_v7, 0.0  ;;  %v1128_v37 = vrot.slane %v5765_v34, 1  ;;  %3880 = vmatprep.mubr.msk.bf16.mxu1 %vm3878_vm15, %v3879_v51  ;;  %v5785_v43 = vmax.f32 %v555_v18, 0.0  ;;  %v5787_v7 = vmax.f32 %v556_v33, 0.0 }
  0x9b   : > { %9410 = vst [vmem:[#allocation54_spill] sm:$0xff] %v5773_v46  ;;  %v1129_v38 = vrot.slane %v5771_v6, 1  ;;  %v5781_v49 = vpop.permute.xlu0 %726  ;;  %v5783_v60 = vpop.permute.xlu1 %729  ;;  %2192 = vmatprep.mubr.bf16.mxu0 %v1255_v48  ;;  %v557_v14 = vadd.f32 %v5354_v24, %v496_v22  ;;  %v498_v21 = vmul.f32 %v4217_v5, %v5339_v11  ;;  %v4833_v5 = vld [vmem:[%s8971_s1 + $0x100] sm:$0xff]   ;;  %v558_v33 = vadd.f32 %v5354_v24, %v497_v59 }
  0x9c   : > { %9411 = vst [vmem:[#allocation55_spill] sm:$0xff] %v5781_v49  ;;  %9412 = vst [vmem:[#allocation56_spill] sm:$0xff] %v5783_v60  ;;  %vm9041_vm0 = vcmp.eq.s32.totalorder %v5781_v49, 1  ;;  %vm9040_vm1 = vcmp.eq.s32.totalorder %v5783_v60, 1  ;;  %3109 = vperm.xlu0 %4808, %v5135_v53   ;;  %3112 = vperm.xlu1 %4809, %v5141_v55   ;;  %v1222_v51 = vsel %vm9077_vm9, %v9004_v3, %v1128_v37  ;;  %v9521_v15 = vrot.slane %v5746_v0, 1 }
  0x9d   : > { %9413 = vst [vmem:[#allocation57_spill] sm:$0xff] %v5785_v43  ;;  %9414 = vst [vmem:[#allocation58_spill] sm:$0xff] %v5787_v7  ;;  %v1221_v26 = vsel %vm9077_vm9, %v1128_v37, %v1129_v38  ;;  %v5807_v22 = vsel %vm9041_vm0, %v5737_v42, 0.0  ;;  %v932_v53 = vsel %vm9040_vm1, %v5773_v46, 0.0  ;;  %v9416_v37 = vmov 0 }
  0x9e   : > { %v1224_v55 = vpack.c.bf16 %v1221_v26, %v1222_v51  ;;  %v985_v18 = vrot.slane %v5807_v22, 7  ;;  %v5814_v48 = vrot.slane %v932_v53, 7  ;;  %vm5820_vm2 = vmpackc.low %vm9040_vm1, %vm9041_vm0  ;;  %v499_v3 = vmul.f32 %v4220_v30, %v5339_v11 }
  0x9f   : > { %v9417_v37 = vsel %vm5820_vm2, 4294967295, %v9416_v37  ;;  %v5827_v26 = vrot.slane %v5703_v40, 1  ;;  %v5830_v51 = vpop.permute.xlu0 %732  ;;  %v5832_v25 = vpop.permute.xlu1 %735  ;;  %v5834_v49 = vmax.f32 %v557_v14, 0.0  ;;  %v559_v60 = vadd.f32 %v5354_v24, %v498_v21  ;;  %v4837_v40 = vld [vmem:[%s8971_s1 + $0x108] sm:$0xff]  }
  0xa0   : > { %9415 = vst [vmem:[#allocation59_spill] sm:$0xff] %v5814_v48  ;;  %9418 = vst [vmem:[#allocation60_spill] sm:$0xff] %v9417_v37  ;;  %2193 = vmatmul.mubr.bf16.vlgmr.msra.gmra.mrb[0].mxu0 %v1224_v55  ;;  %v5840_v30 = vsel %vm9076_vm8, %v984_v17, %v985_v18  ;;  %vm9029_vm3 = vcmp.eq.s32.totalorder %v5830_v51, 1  ;;  %vm9028_vm4 = vcmp.eq.s32.totalorder %v5832_v25, 1  ;;  %3115 = vperm.xlu0 %4808, %v5164_v61   ;;  %v5864_v61 = vmax.f32 %v558_v33, 0.0 }
  0xa1   : > { %9419 = vst [vmem:[#allocation61_spill] sm:$0xff] %v5827_v26  ;;  %9420 = vst [vmem:[#allocation62_spill] sm:$0xff] %v5830_v51  ;;  %2386 = vmatpush1.bf16.msra.mxu0 %v4833_v5  ;;  %v5848_v2 = vsel %vm9076_vm8, %v985_v18, %v5814_v48  ;;  %v5856_v17 = vsel %vm9029_vm3, %v5785_v43, 0.0  ;;  %v5861_v21 = vsel %vm9028_vm4, %v5787_v7, 0.0  ;;  %3118 = vperm.xlu1 %4809, %v5180_v1   ;;  %v9426_v18 = vmov 0  ;;  %v4424_v7 = vld [vmem:[%s5301_s25 + $0x40] sm:$0xff]  }
  0xa2   : > { %9421 = vst [vmem:[#allocation63_spill] sm:$0xff] %v5832_v25  ;;  %9422 = vst [vmem:[#allocation64_spill] sm:$0xff] %v5834_v49  ;;  %v1256_v14 = vpack.c.bf16 %v5848_v2, %v5840_v30  ;;  %2387 = vmatprep.subr.bf16.mxu0 %v9363_v35  ;;  %v987_v5 = vrot.slane %v5856_v17, 7  ;;  %v988_v55 = vrot.slane %v5861_v21, 7  ;;  %v1220_v1 = vsel %vm9077_vm9, %v1129_v38, %v5827_v26 }
  0xa3   : > { %9423 = vst [vmem:[#allocation65_spill] sm:$0xff] %v5840_v30  ;;  %9424 = vst [vmem:[#allocation66_spill] sm:$0xff] %v5848_v2  ;;  %v4224_v33 = vunpack.c.l.bf16 %v4423_v56  ;;  %v1132_v59 = vrot.slane %v5807_v22, 1  ;;  %v5883_v37 = vpop.permute.xlu0 %738  ;;  %v5885_v2 = vpop.permute.xlu1 %741  ;;  %v560_v51 = vadd.f32 %v5354_v24, %v499_v3  ;;  %v9431_v25 = vrot.slane %v5726_v36, 1 }
  0xa4   : > { %9425 = vst [vmem:[#allocation67_spill] sm:$0xff] %v5864_v61  ;;  %vm5875_vm5 = vmpackc.low %vm9028_vm4, %vm9029_vm3  ;;  %2200 = vmatprep.mubr.bf16.mxu0 %v1256_v14  ;;  %v4225_v30 = vunpack.c.h.bf16 %v4423_v56  ;;  %vm9026_vm11 = vcmp.eq.s32.totalorder %v5883_v37, 1  ;;  %vm9025_vm13 = vcmp.eq.s32.totalorder %v5885_v2, 1  ;;  %3121 = vperm.xlu0 %4808, %v5186_v4   ;;  %v5901_v38 = vsel %vm9076_vm8, %v987_v5, %v988_v55 }
  0xa5   : > { %v9427_v18 = vsel %vm5875_vm5, 4294967295, %v9426_v18  ;;  %9429 = vst [vmem:[#allocation69_spill] sm:$0xff] %v5883_v37  ;;  %9430 = vst [vmem:[#allocation70_spill] sm:$0xff] %v5885_v2  ;;  %v5906_v3 = vsel %vm9076_vm8, %v5814_v48, %v987_v5  ;;  %2388 = vmatpush1.bf16.msra.mxu0 %v4837_v40  ;;  %v5911_v56 = vsel %vm9026_vm11, %v5834_v49, 0.0  ;;  %3124 = vperm.xlu1 %4809, %v5206_v12   ;;  %v4841_v40 = vld [vmem:[%s8971_s1 + $0x110] sm:$0xff]   ;;  %v5926_v14 = vrot.slane %v932_v53, 1 }
  0xa6   : > { %9428 = vst [vmem:[#allocation68_spill] sm:$0xff] %v9427_v18  ;;  %v5893_v18 = vsel %vm9077_vm9, %v5827_v26, %v9431_v25  ;;  %9433 = vst [vmem:[#allocation72_spill] sm:$0xff] %v5901_v38  ;;  %v5916_v25 = vsel %vm9025_vm13, %v5864_v61, 0.0  ;;  %v1257_v22 = vpack.c.bf16 %v5901_v38, %v5906_v3  ;;  %2389 = vmatprep.subr.bf16.mxu0 %v9363_v35  ;;  %v9436_v5 = vmov 0 }
  0xa7   : > { %9432 = vst [vmem:[#allocation71_spill] sm:$0xff] %v5893_v18  ;;  %9434 = vst [vmem:[#allocation73_spill] sm:$0xff] %v5906_v3  ;;  %v1225_v4 = vpack.c.bf16 %v5893_v18, %v1220_v1  ;;  %v500_v12 = vmul.f32 %v4221_v54, %v5339_v11  ;;  %v501_v1 = vmul.f32 %v4224_v33, %v5339_v11  ;;  %v4228_v48 = vunpack.c.l.bf16 %v4424_v7  ;;  %v5940_v3 = vpop.permute.xlu0 %744  ;;  %v5944_v37 = vpop.permute.xlu1 %747  ;;  %v4846_v18 = vld [vmem:[%s8971_s1 + $0x120] sm:$0xff]  }
  0xa8   : > { %9435 = vst [vmem:[#allocation74_spill] sm:$0xff] %v5926_v14  ;;  %vm5932_vm15 = vmpackc.low %vm9025_vm13, %vm9026_vm11  ;;  %v989_v26 = vrot.slane %v5911_v56, 7  ;;  %v5942_v53 = vmax.f32 %v559_v60, 0.0  ;;  %vm9039_vm6 = vcmp.eq.s32.totalorder %v5940_v3, 1  ;;  %vm9032_vm13 = vcmp.eq.s32.totalorder %v5944_v37, 1  ;;  %3127 = vperm.xlu0 %4808, %v5209_v13  }
  0xa9   : > { %v9437_v5 = vsel %vm5932_vm15, 4294967295, %v9436_v5  ;;  %9439 = vst [vmem:[#allocation76_spill] sm:$0xff] %v5940_v3  ;;  %9441 = vst [vmem:[#allocation78_spill] sm:$0xff] %v5944_v37  ;;  %2201 = vmatmul.mubr.bf16.gmra.mrb[4].mxu0 %v1225_v4  ;;  %v9443_v54 = vrot.slane %v5726_v36, 1  ;;  %3130 = vperm.xlu1 %4809, %v5225_v19   ;;  %v502_v60 = vmul.f32 %v4225_v30, %v5339_v11  ;;  %v4229_v4 = vunpack.c.h.bf16 %v4424_v7 }
  0xaa   : > { %9438 = vst [vmem:[#allocation75_spill] sm:$0xff] %v9437_v5  ;;  %9440 = vst [vmem:[#allocation77_spill] sm:$0xff] %v5942_v53  ;;  %v5947_v5 = vmax.f32 %v560_v51, 0.0  ;;  %2208 = vmatprep.mubr.bf16.mxu0 %v1257_v22  ;;  %2390 = vmatpush1.bf16.msra.mxu0 %v4841_v40  ;;  %v4845_v51 = vld [vmem:[%s8971_s1 + $0x118] sm:$0xff]   ;;  %v9445_v13 = vmov 0  ;;  %v561_v36 = vadd.f32 %v5354_v24, %v500_v12  ;;  %v562_v19 = vadd.f32 %v5354_v24, %v501_v1  ;;  %v4425_v22 = vld [vmem:[%s5301_s25 + $0x48] sm:$0xff]  }
  0xab   : > { %v5955_v33 = vsel %vm9077_vm9, %v9443_v54, %v1132_v59  ;;  %vm5966_vm11 = vmpackc.low %vm9032_vm13, %vm9039_vm6  ;;  %v503_v30 = vmul.f32 %v4228_v48, %v5339_v11  ;;  %v5976_v7 = vsel %vm9077_vm9, %v1132_v59, %v5926_v14  ;;  %2391 = vmatprep.subr.bf16.mxu0 %v9363_v35  ;;  %v1134_v40 = vrot.slane %v5856_v17, 1  ;;  %v5981_v54 = vpop.permute.xlu0 %750  ;;  %v5983_v38 = vpop.permute.xlu1 %753 }
  0xac   : > { %9442 = vst [vmem:[#allocation79_spill] sm:$0xff] %v5947_v5  ;;  %9444 = vst [vmem:[#allocation80_spill] sm:$0xff] %v5955_v33  ;;  %v9446_v13 = vsel %vm5966_vm11, 4294967295, %v9445_v13  ;;  %v9451_v12 = vrot.slane %v5916_v25, 7  ;;  %v5993_v48 = vsel %vm9076_vm8, %v988_v55, %v989_v26  ;;  %v6000_v17 = vsel %vm9039_vm6, %v5942_v53, 0.0  ;;  %3133 = vperm.xlu0 %4808, %v5228_v20  }
  0xad   : > { %9447 = vst [vmem:[#allocation81_spill] sm:$0xff] %v9446_v13  ;;  %9448 = vst [vmem:[#allocation82_spill] sm:$0xff] %v5976_v7  ;;  %v6005_v13 = vsel %vm9032_vm13, %v5947_v5, 0.0  ;;  %vm9051_vm4 = vcmp.eq.s32.totalorder %v5981_v54, 1  ;;  %vm9046_vm3 = vcmp.eq.s32.totalorder %v5983_v38, 1  ;;  %3136 = vperm.xlu1 %4809, %v5247_v29   ;;  %v504_v55 = vmul.f32 %v4229_v4, %v5339_v11 }
  0xae   : > { %9449 = vst [vmem:[#allocation83_spill] sm:$0xff] %v5981_v54  ;;  %9450 = vst [vmem:[#allocation84_spill] sm:$0xff] %v5983_v38  ;;  %v5989_v1 = vsel %vm9076_vm8, %v989_v26, %v9451_v12  ;;  %v1226_v26 = vpack.c.bf16 %v5976_v7, %v5955_v33  ;;  %v4232_v12 = vunpack.c.l.bf16 %v4425_v22  ;;  %v4289_v59 = vunpack.c.h.bf16 %v5582_v39  ;;  %2392 = vmatpush1.bf16.msra.mxu0 %v4845_v51  ;;  %v4882_v39 = vld [vmem:[%s5301_s25 + $0x50] sm:$0xff]  }
  0xaf   : > { %vm6023_vm13 = vmpackc.low %vm9046_vm3, %vm9051_vm4  ;;  %v9452_v20 = vmov 0  ;;  %v1258_v29 = vpack.c.bf16 %v5989_v1, %v5993_v48  ;;  %v4233_v11 = vunpack.c.h.bf16 %v4425_v22  ;;  %v4236_v4 = vunpack.c.l.bf16 %v4882_v39  ;;  %2393 = vmatprep.subr.bf16.mxu0 %v9363_v35  ;;  %v6035_v3 = vpop.permute.xlu0 %756  ;;  %v6038_v5 = vpop.permute.xlu1 %759 }
  0xb0   : > { %v9453_v20 = vsel %vm6023_vm13, 4294967295, %v9452_v20  ;;  %v991_v51 = vrot.slane %v6000_v17, 7  ;;  %v6033_v33 = vmax.f32 %v561_v36, 0.0  ;;  %9456 = vst [vmem:[#allocation87_spill] sm:$0xff] %v6035_v3  ;;  %v563_v2 = vadd.f32 %v5354_v24, %v502_v60  ;;  %9457 = vst [vmem:[#allocation88_spill] sm:$0xff] %v6038_v5  ;;  %3139 = vperm.xlu0 %4808, %v5253_v31   ;;  %v4847_v31 = vld [vmem:[%s8971_s1 + $0x128] sm:$0xff]  }
  0xb1   : > { %9454 = vst [vmem:[#allocation85_spill] sm:$0xff] %v9453_v20  ;;  %2209 = vmatmul.mubr.bf16.gmra.mrb[8].mxu0 %v1226_v26  ;;  %v6040_v20 = vmax.f32 %v562_v19, 0.0  ;;  %vm9068_vm6 = vcmp.eq.s32.totalorder %v6035_v3, 1  ;;  %vm9063_vm1 = vcmp.eq.s32.totalorder %v6038_v5, 1  ;;  %v6048_v36 = vsel %vm9077_vm9, %v5926_v14, %v1134_v40  ;;  %3142 = vperm.xlu1 %4809, %v5278_v44   ;;  %v4883_v60 = vld [vmem:[%s8973_s3] ss:$0 sm:$0xff] }
  0xb2   : > { %9455 = vst [vmem:[#allocation86_spill] sm:$0xff] %v6033_v33  ;;  %2216 = vmatprep.mubr.bf16.mxu0 %v1258_v29  ;;  %9459 = vst [vmem:[#allocation90_spill] sm:$0xff] %v6048_v36  ;;  %v564_v22 = vadd.f32 %v5354_v24, %v503_v30  ;;  %v505_v19 = vmul.f32 %v4883_v60, %v4232_v12  ;;  %v534_v26 = vmul.f32 %v4883_v60, %v4289_v59  ;;  %v9460_v29 = vmov 0  ;;  %v4884_v44 = vld [vmem:[%s8974_s4] ss:$0 sm:$0xff]  ;;  %v9512_v3 = vld [vmem:[#allocation7_spill] sm:$0xff] }
  0xb3   : > { %9458 = vst [vmem:[#allocation89_spill] sm:$0xff] %v6040_v20  ;;  %2394 = vmatpush1.bf16.msra.mxu0 %v4846_v18  ;;  %vm6062_vm0 = vmpackc.low %vm9063_vm1, %vm9068_vm6  ;;  %v565_v24 = vadd.f32 %v4884_v44, %v504_v55  ;;  %v506_v30 = vmul.f32 %v4883_v60, %v4233_v11  ;;  %v507_v59 = vmul.f32 %v4883_v60, %v4236_v4  ;;  %v9463_v18 = vrot.slane %v5861_v21, 1  ;;  %v6077_v37 = vpop.permute.xlu0 %762 }
  0xb4   : > { %v9461_v29 = vsel %vm6062_vm0, 4294967295, %v9460_v29  ;;  %2395 = vmatprep.subr.bf16.mxu0 %v9363_v35  ;;  %v1136_v39 = vrot.slane %v5911_v56, 1  ;;  %9465 = vst [vmem:[#allocation93_spill] sm:$0xff] %v6077_v37  ;;  %v9467_v14 = vrot.slane %v6005_v13, 7  ;;  %v9468_v11 = vrot.slane %v5916_v25, 7  ;;  %3145 = vperm.xlu0 %4808, %v5284_v47  }
  0xb5   : > { %9462 = vst [vmem:[#allocation91_spill] sm:$0xff] %v9461_v29  ;;  %v6073_v12 = vsel %vm9077_vm9, %v1134_v40, %v9463_v18  ;;  %v6079_v29 = vpop.permute.xlu1 %765  ;;  %v6098_v56 = vsel %vm9051_vm4, %v6033_v33, 0.0  ;;  %v6103_v60 = vsel %vm9046_vm3, %v6040_v20, 0.0  ;;  %vm9053_vm10 = vcmp.eq.s32.totalorder %v6077_v37, 1  ;;  %3148 = vperm.xlu1 %4809, %v5290_v50  }
  0xb6   : > { %9464 = vst [vmem:[#allocation92_spill] sm:$0xff] %v6073_v12  ;;  %9466 = vst [vmem:[#allocation94_spill] sm:$0xff] %v6079_v29  ;;  %v6085_v55 = vsel %vm9076_vm8, %v991_v51, %v9467_v14  ;;  %v6091_v40 = vsel %vm9076_vm8, %v9468_v11, %v991_v51  ;;  %vm9052_vm7 = vcmp.eq.s32.totalorder %v6079_v29, 1  ;;  %v566_v14 = vadd.f32 %v4884_v44, %v505_v19  ;;  %v4849_v11 = vld [vmem:[%s8971_s1 + $0x130] sm:$0xff]  }
  0xb7   : > { %v6111_v51 = vpack.c.bf16 %v6073_v12, %v6048_v36  ;;  %v595_v18 = vadd.f32 %v4884_v44, %v534_v26  ;;  %2396 = vmatpush1.bf16.msra.mxu0 %v4847_v31  ;;  %vm6121_vm3 = vmpackc.low %vm9052_vm7, %vm9053_vm10  ;;  %v9470_v47 = vmov 0  ;;  %v567_v50 = vadd.f32 %v4884_v44, %v506_v30  ;;  %v6132_v36 = vpop.permute.xlu0 %768 }
  0xb8   : > { %v9471_v47 = vsel %vm6121_vm3, 4294967295, %v9470_v47  ;;  %v568_v19 = vadd.f32 %v4884_v44, %v507_v59  ;;  %v1259_v26 = vpack.c.bf16 %v6085_v55, %v6091_v40  ;;  %2397 = vmatprep.subr.bf16.mxu0 %v9363_v35  ;;  %v993_v31 = vrot.slane %v6098_v56, 7  ;;  %9474 = vst [vmem:[#allocation98_spill] sm:$0xff] %v6132_v36  ;;  %3151 = vperm.xlu0 %4808, %v5314_v57   ;;  %v4851_v57 = vld [vmem:[%s8971_s1 + $0x138] sm:$0xff]  }
  0xb9   : > { %9469 = vst [vmem:[#allocation95_spill] sm:$0xff] %v6111_v51  ;;  %9472 = vst [vmem:[#allocation96_spill] sm:$0xff] %v9471_v47  ;;  %v6130_v4 = vmax.f32 %v563_v2, 0.0  ;;  %v6134_v38 = vpop.permute.xlu1 %771  ;;  %2217 = vmatmul.mubr.bf16.gmra.mrb[12].mxu0 %v6111_v51  ;;  %v6137_v47 = vmax.f32 %v564_v22, 0.0  ;;  %vm9075_vm4 = vcmp.eq.s32.totalorder %v6132_v36, 1  ;;  %v9477_v44 = vrot.slane %v5861_v21, 1  ;;  %3154 = vperm.xlu1 %4809, %v5319_v62  }
  0xba   : > { %9475 = vst [vmem:[#allocation99_spill] sm:$0xff] %v6134_v38  ;;  %vm9055_vm7 = vcmp.eq.s32.totalorder %v6134_v38, 1  ;;  %2224 = vmatprep.mubr.bf16.mxu0 %v1259_v26  ;;  %v9479_v30 = vmax.f32 %v5691_v23, 0.0  ;;  %v6153_v22 = vmax.f32 %v565_v24, 0.0  ;;  %v6156_v7 = vmax.f32 %v595_v18, 0.0 }
  0xbb   : > { %9473 = vst [vmem:[#allocation97_spill] sm:$0xff] %v6130_v4  ;;  %9476 = vst [vmem:[#allocation100_spill] sm:$0xff] %v6137_v47  ;;  %v6146_v2 = vsel %vm9077_vm9, %v9477_v44, %v1136_v39  ;;  %2398 = vmatpush1.bf16.msra.mxu0 %v4849_v11  ;;  %v6161_v21 = vmax.f32 %v566_v14, 0.0  ;;  %v6163_v26 = vmax.f32 %v567_v50, 0.0  ;;  %v6165_v44 = vmax.f32 %v568_v19, 0.0  ;;  %v6183_v18 = vpop.permute.xlu0 %852 }
  0xbc   : > { %9478 = vst [vmem:[#allocation101_spill] sm:$0xff] %v6146_v2  ;;  %v6151_v59 = vpack.c.bf16 %v5675_v9, %v9479_v30  ;;  %9480 = vst [vmem:[#allocation102_spill] sm:$0xff] %v6153_v22  ;;  %v9485_v23 = vmov 0  ;;  %v9488_v62 = vrot.slane %v5916_v25, 1  ;;  %2399 = vmatprep.subr.bf16.mxu0 %v9363_v35  ;;  %v9492_v50 = vrot.slane %v6103_v60, 7  ;;  %3157 = vperm.xlu0 %4808, %v5322_v63   ;;  %v4853_v63 = vld [vmem:[%s8971_s1 + $0x140] sm:$0xff]  }
  0xbd   : > { %9481 = vst [vmem:[#allocation103_spill] sm:$0xff] %v6156_v7  ;;  %9482 = vst [vmem:[#allocation104_spill] sm:$0xff] %v6161_v21  ;;  %v6185_v11 = vpop.permute.xlu1 %774  ;;  %v9493_v30 = vrot.slane %v6005_v13, 7  ;;  %v1138_v14 = vrot.slane %v6000_v17, 1  ;;  %v6205_v51 = vsel %vm9068_vm6, %v6130_v4, 0.0  ;;  %3160 = vperm.xlu1 %4809, %v5334_v10   ;;  %v6286_v54 = vmax.f32 %v9512_v3, 0.0 }
  0xbe   : > { %9483 = vst [vmem:[#allocation105_spill] sm:$0xff] %v6163_v26  ;;  %9484 = vst [vmem:[#allocation106_spill] sm:$0xff] %v6165_v44  ;;  %v6179_v24 = vsel %vm9077_vm9, %v1136_v39, %v9488_v62  ;;  %v6191_v19 = vsel %vm9076_vm8, %v993_v31, %v9492_v50  ;;  %v6210_v50 = vsel %vm9063_vm1, %v6137_v47, 0.0  ;;  %v995_v10 = vrot.slane %v6205_v51, 7 }
  0xbf   : > { %vm6171_vm10 = vmpackc.low %vm9055_vm7, %vm9075_vm4  ;;  %9489 = vst [vmem:[#allocation108_spill] sm:$0xff] %v6179_v24  ;;  %v6197_v39 = vsel %vm9076_vm8, %v9493_v30, %v993_v31  ;;  %vm9064_vm7 = vcmp.eq.s32.totalorder %v6183_v18, 1  ;;  %v980_v31 = vrot.slane %v5746_v0, 7  ;;  %v6219_v30 = vmax.f32 %v5373_v41, 0.0  ;;  %2400 = vmatpush1.bf16.msra.mxu0 %v4851_v57  ;;  %v6242_v9 = vpop.permute.xlu0 %777  ;;  %v9525_v0 = vld [vmem:[#allocation6_spill] sm:$0xff] }
  0xc0   : > { %v9486_v23 = vsel %vm6171_vm10, 4294967295, %v9485_v23  ;;  %9490 = vst [vmem:[#allocation109_spill] sm:$0xff] %v6183_v18  ;;  %9491 = vst [vmem:[#allocation110_spill] sm:$0xff] %v6185_v11  ;;  %v973_v17 = vsel %vm9064_vm7, %v6156_v7, 0.0  ;;  %v6224_v62 = vpack.c.bf16 %v6179_v24, %v6146_v2  ;;  %v6233_v7 = vmax.f32 %v5376_v45, 0.0  ;;  %2401 = vmatprep.subr.bf16.mxu0 %v9363_v35  ;;  %3163 = vperm.xlu0 %4808, %v5346_v16  }
  0xc1   : > { %9487 = vst [vmem:[#allocation107_spill] sm:$0xff] %v9486_v23  ;;  %9494 = vst [vmem:[#allocation111_spill] sm:$0xff] %v6219_v30  ;;  %v6230_v12 = vrot.slane %v973_v17, 7  ;;  %v1260_v41 = vpack.c.bf16 %v6191_v19, %v6197_v39  ;;  %v6240_v2 = vrot.slane %v973_v17, 1  ;;  %v6244_v5 = vpop.permute.xlu1 %780  ;;  %v9501_v45 = vrot.slane %v5765_v34, 7  ;;  %3166 = vperm.xlu1 %4809, %v5394_v8  }
  0xc2   : > { %9495 = vst [vmem:[#allocation112_spill] sm:$0xff] %v6224_v62  ;;  %9497 = vst [vmem:[#allocation114_spill] sm:$0xff] %v6233_v7  ;;  %2225 = vmatmul.mubr.bf16.gmra.mrb[16].mxu0 %v6224_v62  ;;  %vm9073_vm1 = vcmp.eq.s32.totalorder %v6185_v11, 1  ;;  %vm9074_vm7 = vcmp.eq.s32.totalorder %v6242_v9, 1  ;;  %v9502_v57 = vrot.slane %v5916_v25, 1  ;;  %v982_v18 = vrot.slane %v5771_v6, 7 }
  0xc3   : > { %9496 = vst [vmem:[#allocation113_spill] sm:$0xff] %v6230_v12  ;;  %9498 = vst [vmem:[#allocation115_spill] sm:$0xff] %v6240_v2  ;;  %v1077_v23 = vsel %vm9076_vm8, %v980_v31, %v9501_v45  ;;  %2232 = vmatprep.mubr.bf16.mxu0 %v1260_v41  ;;  %v1078_v17 = vsel %vm9076_vm8, %v6230_v12, %v980_v31  ;;  %v9504_v45 = vmov 0  ;;  %v6273_v16 = vmax.f32 %v5387_v58, 0.0  ;;  %v9508_v25 = vld [vmem:[#allocation4_spill] sm:$0xff]  ;;  %v4848_v6 = vld [vmem:[%s8971_s1 + $0x180] sm:$0xff]   ;;  %2402 = vmatpush1.bf16.msra.mxu0 %v4853_v63  ;;  %v6304_v3 = vpop.permute.xlu0 %783 }
  0xc4   : > { %9499 = vst [vmem:[#allocation116_spill] sm:$0xff] %v6242_v9  ;;  %9500 = vst [vmem:[#allocation117_spill] sm:$0xff] %v6244_v5  ;;  %v6261_v62 = vsel %vm9077_vm9, %v9502_v57, %v1138_v14  ;;  %v6277_v31 = vmax.f32 %v9508_v25, 0.0  ;;  %v1079_v41 = vpack.c.bf16 %v1077_v23, %v1078_v17  ;;  %v9510_v57 = vld [vmem:[#allocation5_spill] sm:$0xff]  ;;  %v9514_v58 = vrot.slane %v6005_v13, 1  ;;  %2403 = vmatprep.subr.bf16.mxu0 %v9363_v35  ;;  %v4855_v63 = vld [vmem:[%s8971_s1 + $0x148] sm:$0xff]  }
  0xc5   : > { %9503 = vst [vmem:[#allocation118_spill] sm:$0xff] %v6261_v62  ;;  %vm6268_vm6 = vmpackc.low %vm9074_vm7, %vm9073_vm1  ;;  %v6283_v12 = vmax.f32 %v9510_v57, 0.0  ;;  %vm9516_vm1 = vcmp.eq.s32.totalorder %v5682_v32, 1  ;;  %v6306_v17 = vpop.permute.xlu1 %786  ;;  %v9520_v57 = vrot.slane %v6103_v60, 7  ;;  %v6325_v32 = vsel %vm9077_vm9, %v6240_v2, %v9521_v15  ;;  %3169 = vperm.xlu0 %4808, %v9525_v0   ;;  %v9529_v15 = vld [vmem:[#allocation9_spill] sm:$0xff]  ;;  %v9533_v0 = vld [vmem:[#allocation10_spill] sm:$0xff] }
  0xc6   : > { %v9505_v45 = vsel %vm6268_vm6, 4294967295, %v9504_v45  ;;  %9507 = vst [vmem:[#allocation120_spill] sm:$0xff] %v6273_v16  ;;  %9509 = vst [vmem:[#allocation4_spill] sm:$0xff] %v6277_v31  ;;  %v6292_v8 = vsel %vm9077_vm9, %v1138_v14, %v9514_v58  ;;  %1968 = vmatmul.mubr.bf16.vlgmr.msra.gmra.mrb[0].mxu1 %v1079_v41  ;;  %v9519_v14 = vrot.slane %v6210_v50, 7  ;;  %vm9097_vm4 = vcmp.eq.s32.totalorder %v6244_v5, 1  ;;  %3172 = vperm.xlu1 %4809, %v9529_v15   ;;  %v9530_v41 = vld [vmem:[#allocation8_spill] sm:$0xff] }
  0xc7   : > { %9506 = vst [vmem:[#allocation119_spill] sm:$0xff] %v9505_v45  ;;  %9511 = vst [vmem:[#allocation5_spill] sm:$0xff] %v6283_v12  ;;  %v6318_v58 = vsel %vm9076_vm8, %v9520_v57, %v995_v10  ;;  %v9526_v57 = vmov 0  ;;  %v6353_v23 = vmax.f32 %v9530_v41, 0.0  ;;  %v6357_v45 = vpack.c.bf16 %v6292_v8, %v6261_v62  ;;  %4578 = vmatpush1.bf16.msra.mxu1 %v4848_v6  ;;  %2404 = vmatpush1.bf16.msra.mxu0 %v4855_v63  ;;  %v6382_v41 = vpop.permute.xlu0 %789  ;;  %v9544_v63 = vld [vmem:[#allocation12_spill] sm:$0xff]  ;;  %v9552_v2 = vld [vmem:[#allocation15_spill] sm:$0xff] }
  0xc8   : > { %9513 = vst [vmem:[#allocation7_spill] sm:$0xff] %v6286_v54  ;;  %9515 = vst [vmem:[#allocation121_spill] sm:$0xff] %v6292_v8  ;;  %v6312_v25 = vsel %vm9076_vm8, %v995_v10, %v9519_v14  ;;  %vm9098_vm8 = vcmp.eq.s32.totalorder %v6304_v3, 1  ;;  %v6360_v24 = vmax.f32 %v9533_v0, 0.0  ;;  %v1140_v15 = vrot.slane %v6098_v56, 1  ;;  %4563 = vmatprep.subr.bf16.mxu1 %v9363_v35  ;;  %2405 = vmatprep.subr.bf16.mxu0 %v9363_v35 }
  0xc9   : > { %vm3881_vm7 = vmpackc.low %vm9516_vm1, %vm874_vm14  ;;  %9517 = vst [vmem:[#allocation122_spill] sm:$0xff] %v6304_v3  ;;  %vm9523_vm14 = vcmp.eq.s32.totalorder %v6077_v37, 1  ;;  %vm9524_vm1 = vcmp.eq.s32.totalorder %v6079_v29, 1  ;;  %v1261_v8 = vpack.c.bf16 %v6312_v25, %v6318_v58  ;;  %v9536_v62 = vrot.slane %v5765_v34, 7  ;;  %v6384_v29 = vpop.permute.xlu1 %792  ;;  %v9540_v34 = vld [vmem:[#allocation11_spill] sm:$0xff] }
  0xca   : > { %9518 = vst [vmem:[#allocation123_spill] sm:$0xff] %v6306_v17  ;;  %9522 = vst [vmem:[#allocation124_spill] sm:$0xff] %v6325_v32  ;;  %v6332_v14 = vsel %vm9523_vm14, %v6153_v22, 0.0  ;;  %v6337_v10 = vsel %vm9524_vm1, %v6161_v21, 0.0  ;;  %3883 = vmatprep.mubr.msk.bf16.mxu1 %vm3881_vm7, %v6151_v59  ;;  %vm9535_vm7 = vcmp.lt.s32.totalorder %v5678_v52, 1  ;;  %2233 = vmatmul.mubr.bf16.gmra.mrb[20].mxu0 %v6357_v45  ;;  %v6388_v32 = vmax.f32 %v9540_v34, 0.0 }
  0xcb   : > { %vm6347_vm9 = vmpackc.low %vm9098_vm8, %vm9097_vm4  ;;  %9531 = vst [vmem:[#allocation9_spill] sm:$0xff] %v6353_v23  ;;  %v1075_v59 = vsel %vm9535_vm7, %v982_v18, %v5718_v28  ;;  %v4857_v28 = vld [vmem:[%s8971_s1 + $0x150] sm:$0xff]   ;;  %v997_v6 = vrot.slane %v6332_v14, 7  ;;  %vm9095_vm1 = vcmp.eq.s32.totalorder %v6306_v17, 1  ;;  %2240 = vmatprep.mubr.bf16.mxu0 %v1261_v8  ;;  %v6399_v56 = vmax.f32 %v9544_v63, 0.0 }
  0xcc   : > { %v9527_v57 = vsel %vm6347_vm9, 4294967295, %v9526_v57  ;;  %9532 = vst [vmem:[#allocation8_spill] sm:$0xff] %v6357_v45  ;;  %9534 = vst [vmem:[#allocation10_spill] sm:$0xff] %v6360_v24  ;;  %v9546_v45 = vld [vmem:[#allocation14_spill] sm:$0xff]  ;;  %v9548_v34 = vmov 0  ;;  %v9554_v8 = vld [vmem:[#allocation16_spill] sm:$0xff]  ;;  %2406 = vmatpush1.bf16.msra.mxu0 %v4857_v28 }
  0xcd   : > { %9528 = vst [vmem:[#allocation6_spill] sm:$0xff] %v9527_v57  ;;  %v4850_v57 = vld [vmem:[%s8971_s1 + $0x188] sm:$0xff]   ;;  %vm9537_vm14 = vmmov %vm9535_vm7  ;;  %vm9094_vm7 = vcmp.eq.s32.totalorder %v6382_v41, 1  ;;  %v6402_v37 = vmax.f32 %v9546_v45, 0.0  ;;  %v6417_v63 = vmax.f32 %v9554_v8, 0.0  ;;  %vm9574_vm8 = vcmp.lt.s32.totalorder %v5678_v52, 1  ;;  %2407 = vmatprep.subr.bf16.mxu0 %v9363_v35 }
  0xce   : > { %v1076_v0 = vsel %vm9537_vm14, %v9536_v62, %v982_v18  ;;  %9538 = vst [vmem:[#allocation125_spill] sm:$0xff] %v6382_v41  ;;  %9539 = vst [vmem:[#allocation126_spill] sm:$0xff] %v6384_v29  ;;  %v6392_v18 = vpack.c.bf16 %v5785_v43, %v5773_v46  ;;  %v9543_v62 = vld [vmem:[#allocation13_spill] sm:$0xff]  ;;  %4579 = vmatpush1.bf16.msra.mxu1 %v4850_v57  ;;  %v6443_v57 = vpack.c.bf16 %v5942_v53, %v5864_v61 }
  0xcf   : > { %9541 = vst [vmem:[#allocation11_spill] sm:$0xff] %v6388_v32  ;;  %3175 = vperm.xlu0 %4808, %v9543_v62   ;;  %9545 = vst [vmem:[#allocation13_spill] sm:$0xff] %v6399_v56  ;;  %v9551_v43 = vld [vmem:[#allocation17_spill] sm:$0xff]  ;;  %v1080_v46 = vpack.c.bf16 %v1075_v59, %v1076_v0  ;;  %v6414_v62 = vmax.f32 %v9552_v2, 0.0  ;;  %v9556_v56 = vld [vmem:[#allocation58_spill] sm:$0xff]  ;;  %v9561_v2 = vrot.slane %v6005_v13, 1  ;;  %4564 = vmatprep.subr.bf16.mxu1 %v9363_v35 }
  0xd0   : > { %9542 = vst [vmem:[#allocation127_spill] sm:$0xff] %v6392_v18  ;;  %9547 = vst [vmem:[#allocation12_spill] sm:$0xff] %v6402_v37  ;;  %3178 = vperm.xlu1 %4809, %v9551_v43   ;;  %v6421_v45 = vpack.c.bf16 %v5834_v49, %v9556_v56  ;;  %v4852_v37 = vld [vmem:[%s8971_s1 + $0x190] sm:$0xff]   ;;  %v9564_v0 = vld [vmem:[#allocation19_spill] sm:$0xff]  ;;  %v9576_v28 = vrot.slane %v6210_v50, 7 }
  0xd1   : > { %vm6408_vm14 = vmpackc.low %vm9094_vm7, %vm9095_vm1  ;;  %9553 = vst [vmem:[#allocation17_spill] sm:$0xff] %v6414_v62  ;;  %vm9559_vm7 = vcmp.lt.s32.totalorder %v5678_v52, 7  ;;  %v6439_v8 = vmax.f32 %v9564_v0, 0.0  ;;  %v9567_v49 = vld [vmem:[#allocation49_spill] sm:$0xff]  ;;  %v9569_v13 = vld [vmem:[#allocation55_spill] sm:$0xff]  ;;  %1976 = vmatmul.mubr.bf16.gmra.mrb[4].mxu1 %v1080_v46  ;;  %v9573_v0 = vrot.slane %v6337_v10, 7 }
  0xd2   : > { %v9549_v34 = vsel %vm6408_vm14, 4294967295, %v9548_v34  ;;  %9555 = vst [vmem:[#allocation15_spill] sm:$0xff] %v6417_v63  ;;  %9557 = vst [vmem:[#allocation16_spill] sm:$0xff] %v6421_v45  ;;  %vm9570_vm4 = vcmp.eq.s32.totalorder %v9569_v13, 1  ;;  %v9580_v56 = vld [vmem:[#allocation22_spill] sm:$0xff]  ;;  %4580 = vmatpush1.bf16.msra.mxu1 %v4852_v37 }
  0xd3   : > { %9550 = vst [vmem:[#allocation14_spill] sm:$0xff] %v9549_v34  ;;  %v9558_v34 = vrot.slane %v6103_v60, 1  ;;  %vm9562_vm1 = vmmov %vm9559_vm7  ;;  %v6461_v53 = vsel %vm9574_vm8, %v997_v6, %v9573_v0  ;;  %4565 = vmatprep.subr.bf16.mxu1 %v9363_v35  ;;  %v4861_v37 = vld [vmem:[%s8971_s1 + $0x160] sm:$0xff]  }
  0xd4   : > { %v6436_v59 = vsel %vm9562_vm1, %v9561_v2, %v1140_v15  ;;  %9565 = vst [vmem:[#allocation19_spill] sm:$0xff] %v6439_v8  ;;  %9566 = vst [vmem:[#allocation130_spill] sm:$0xff] %v6443_v57  ;;  %v6455_v2 = vpop.permute.xlu1 %798  ;;  %v6473_v8 = vmax.f32 %v9580_v56, 0.0  ;;  %v9585_v56 = vpack.c.bf16 %v5737_v42, %v5705_v27 }
  0xd5   : > { %v6430_v43 = vsel %vm9559_vm7, %v1140_v15, %v9558_v34  ;;  %9563 = vst [vmem:[#allocation129_spill] sm:$0xff] %v6436_v59  ;;  %v4859_v34 = vld [vmem:[%s8971_s1 + $0x158] sm:$0xff]   ;;  %vm9568_vm7 = vcmp.eq.s32.totalorder %v9567_v49, 1  ;;  %v6453_v15 = vpop.permute.xlu0 %795  ;;  %9572 = vst [vmem:[#allocation55_spill] sm:$0xff] %v6455_v2 }
  0xd6   : > { %9560 = vst [vmem:[#allocation128_spill] sm:$0xff] %v6430_v43  ;;  %vm3884_vm1 = vmpackc.low %vm9570_vm4, %vm9568_vm7  ;;  %v9578_v49 = vld [vmem:[#allocation21_spill] sm:$0xff]  ;;  %vm9582_vm4 = vcmp.eq.s32.totalorder %v6132_v36, 1  ;;  %vm9119_vm7 = vcmp.eq.s32.totalorder %v6453_v15, 1  ;;  %2408 = vmatpush1.bf16.msra.mxu0 %v4859_v34  ;;  %v9606_v34 = vld [vmem:[#allocation24_spill] sm:$0xff] }
  0xd7   : > { %9571 = vst [vmem:[#allocation49_spill] sm:$0xff] %v6453_v15  ;;  %9575 = vst [vmem:[#allocation131_spill] sm:$0xff] %v6461_v53  ;;  %v6470_v13 = vmax.f32 %v9578_v49, 0.0  ;;  %v6479_v46 = vsel %vm9582_vm4, %v6163_v26, 0.0  ;;  %3886 = vmatprep.mubr.msk.bf16.mxu1 %vm3884_vm1, %v9585_v56  ;;  %v9589_v49 = vld [vmem:[#allocation20_spill] sm:$0xff]  ;;  %v9593_v36 = vld [vmem:[#allocation25_spill] sm:$0xff]  ;;  %2409 = vmatprep.subr.bf16.mxu0 %v9363_v35 }
  0xd8   : > { %vm9577_vm14 = vmmov %vm9574_vm8  ;;  %9581 = vst [vmem:[#allocation22_spill] sm:$0xff] %v6473_v8  ;;  %vm9583_vm8 = vcmp.eq.s32.totalorder %v6134_v38, 1  ;;  %3184 = vperm.xlu1 %4809, %v9589_v49   ;;  %v6503_v38 = vpack.c.bf16 %v6430_v43, %v6436_v59  ;;  %v6509_v42 = vmax.f32 %v9593_v36, 0.0  ;;  %v9595_v56 = vld [vmem:[#allocation26_spill] sm:$0xff]  ;;  %v1142_v49 = vrot.slane %v6205_v51, 1  ;;  %v9598_v59 = vld [vmem:[#allocation27_spill] sm:$0xff]  ;;  %v6534_v43 = vpop.permute.xlu1 %804 }
  0xd9   : > { %v6467_v61 = vsel %vm9577_vm14, %v9576_v28, %v997_v6  ;;  %9579 = vst [vmem:[#allocation21_spill] sm:$0xff] %v6470_v13  ;;  %v6484_v0 = vsel %vm9583_vm8, %v6165_v44, 0.0  ;;  %vm9129_vm14 = vcmp.eq.s32.totalorder %v6384_v29, 1  ;;  %v9584_v6 = vld [vmem:[#allocation18_spill] sm:$0xff]  ;;  %v9586_v28 = vmov 0  ;;  %v9591_v44 = vld [vmem:[#allocation23_spill] sm:$0xff]  ;;  %v6532_v51 = vpop.permute.xlu0 %801 }
  0xda   : > { %3181 = vperm.xlu0 %4808, %v9584_v6   ;;  %vm6496_vm4 = vmpackc.low %vm9119_vm7, %vm9129_vm14  ;;  %9590 = vst [vmem:[#allocation20_spill] sm:$0xff] %v6503_v38  ;;  %v6506_v6 = vmax.f32 %v9591_v44, 0.0  ;;  %v6512_v27 = vmax.f32 %v9595_v56, 0.0  ;;  %v1262_v44 = vpack.c.bf16 %v6461_v53, %v6467_v61  ;;  %v999_v36 = vrot.slane %v6479_v46, 7  ;;  %2241 = vmatmul.mubr.bf16.gmra.mrb[24].mxu0 %v6503_v38  ;;  %v9602_v53 = vld [vmem:[#allocation28_spill] sm:$0xff]  ;;  %v9609_v8 = vld [vmem:[#allocation79_spill] sm:$0xff] }
  0xdb   : > { %v9587_v28 = vsel %vm6496_vm4, 4294967295, %v9586_v28  ;;  %9594 = vst [vmem:[#allocation25_spill] sm:$0xff] %v6509_v42  ;;  %9600 = vst [vmem:[#allocation133_spill] sm:$0xff] %v6532_v51  ;;  %vm9125_vm1 = vcmp.eq.s32.totalorder %v6455_v2, 1  ;;  %vm9124_vm8 = vcmp.eq.s32.totalorder %v6532_v51, 1  ;;  %v9607_v56 = vld [vmem:[#allocation32_spill] sm:$0xff]  ;;  %v6552_v38 = vpack.c.bf16 %v6033_v33, %v9609_v8  ;;  %2410 = vmatpush1.bf16.msra.mxu0 %v4861_v37 }
  0xdc   : > { %9588 = vst [vmem:[#allocation18_spill] sm:$0xff] %v9587_v28  ;;  %9592 = vst [vmem:[#allocation23_spill] sm:$0xff] %v6506_v6  ;;  %v6517_v28 = vld [vmem:[%s8971_s1 + $0x198] sm:$0xff]   ;;  %v6524_v6 = vmax.f32 %v9598_v59, 0.0  ;;  %v6538_v59 = vmax.f32 %v9602_v53, 0.0  ;;  %2248 = vmatprep.mubr.bf16.mxu0 %v1262_v44  ;;  %v6548_v42 = vmax.f32 %v9607_v56, 0.0  ;;  %2411 = vmatprep.subr.bf16.mxu0 %v9363_v35 }
  0xdd   : > { %9596 = vst [vmem:[#allocation26_spill] sm:$0xff] %v6512_v27  ;;  %9597 = vst [vmem:[#allocation132_spill] sm:$0xff] %v6517_v28  ;;  %v9611_v53 = vld [vmem:[#allocation53_spill] sm:$0xff]  ;;  %v9617_v44 = vld [vmem:[#allocation34_spill] sm:$0xff]  ;;  %4581 = vmatpush1.bf16.msra.mxu1 %v6517_v28  ;;  %v6597_v28 = vpack.c.bf16 %v6130_v4, %v6040_v20  ;;  %v6613_v4 = vpop.permute.xlu0 %807  ;;  %v6615_v20 = vpop.permute.xlu1 %810  ;;  %v9642_v37 = vrot.slane %v6484_v0, 7  ;;  %vm9149_vm4 = vcmp.eq.s32.totalorder %v6534_v43, 1 }
  0xde   : > { %9599 = vst [vmem:[#allocation27_spill] sm:$0xff] %v6524_v6  ;;  %9601 = vst [vmem:[#allocation134_spill] sm:$0xff] %v6534_v43  ;;  %v9604_v6 = vld [vmem:[#allocation31_spill] sm:$0xff]  ;;  %3187 = vperm.xlu0 %4808, %v9606_v34   ;;  %v9616_v34 = vld [vmem:[#allocation29_spill] sm:$0xff]  ;;  %v6566_v56 = vmax.f32 %v9617_v44, 0.0  ;;  %v9627_v44 = vrot.slane %v6103_v60, 1  ;;  %4566 = vmatprep.subr.bf16.mxu1 %v9363_v35 }
  0xdf   : > { %9603 = vst [vmem:[#allocation28_spill] sm:$0xff] %v6538_v59  ;;  %v6541_v27 = vmax.f32 %v9604_v6, 0.0  ;;  %9608 = vst [vmem:[#allocation24_spill] sm:$0xff] %v6548_v42  ;;  %v9612_v59 = vld [vmem:[#allocation65_spill] sm:$0xff]  ;;  %3190 = vperm.xlu1 %4809, %v9616_v34   ;;  %v9619_v42 = vld [vmem:[#allocation35_spill] sm:$0xff]  ;;  %vm9148_vm9 = vcmp.eq.s32.totalorder %v6613_v4, 1 }
  0xe0   : > { %9610 = vst [vmem:[#allocation32_spill] sm:$0xff] %v6552_v38  ;;  %v1081_v6 = vpack.c.bf16 %v9612_v59, %v9611_v53  ;;  %vm6560_vm7 = vmpackc.low %vm9124_vm8, %vm9125_vm1  ;;  %v6569_v13 = vmax.f32 %v9619_v42, 0.0  ;;  %v9621_v33 = vld [vmem:[#allocation36_spill] sm:$0xff]  ;;  %v6578_v59 = vld [vmem:[%s8971_s1 + $0x1a0] sm:$0xff]   ;;  %v9624_v53 = vrot.slane %v6210_v50, 1  ;;  %vm9625_vm8 = vcmp.lt.s32.totalorder %v5678_v52, 7 }
  0xe1   : > { %9605 = vst [vmem:[#allocation31_spill] sm:$0xff] %v6541_v27  ;;  %v9613_v27 = vmov 0  ;;  %9618 = vst [vmem:[#allocation65_spill] sm:$0xff] %v6566_v56  ;;  %v6572_v8 = vmax.f32 %v9621_v33, 0.0  ;;  %v9630_v33 = vld [vmem:[#allocation37_spill] sm:$0xff]  ;;  %v9635_v60 = vld [vmem:[#allocation62_spill] sm:$0xff]  ;;  %4582 = vmatpush1.bf16.msra.mxu1 %v6578_v59 }
  0xe2   : > { %v9614_v27 = vsel %vm6560_vm7, 4294967295, %v9613_v27  ;;  %9620 = vst [vmem:[#allocation29_spill] sm:$0xff] %v6569_v13  ;;  %9623 = vst [vmem:[#allocation35_spill] sm:$0xff] %v6578_v59  ;;  %v6584_v34 = vsel %vm9625_vm8, %v1142_v49, %v9624_v53  ;;  %v4863_v53 = vld [vmem:[%s8971_s1 + $0x168] sm:$0xff]   ;;  %v9633_v13 = vld [vmem:[#allocation56_spill] sm:$0xff]  ;;  %vm9636_vm14 = vcmp.eq.s32.totalorder %v9635_v60, 1  ;;  %1984 = vmatmul.mubr.bf16.gmra.mrb[8].mxu1 %v1081_v6  ;;  %4567 = vmatprep.subr.bf16.mxu1 %v9363_v35 }
  0xe3   : > { %9615 = vst [vmem:[#allocation53_spill] sm:$0xff] %v9614_v27  ;;  %9622 = vst [vmem:[#allocation34_spill] sm:$0xff] %v6572_v8  ;;  %v6593_v27 = vmax.f32 %v9630_v33, 0.0  ;;  %vm9643_vm7 = vcmp.lt.s32.totalorder %v5678_v52, 1  ;;  %v9645_v60 = vrot.slane %v6337_v10, 7  ;;  %v9648_v6 = vld [vmem:[#allocation3_spill] sm:$0xff]  ;;  %2412 = vmatpush1.bf16.msra.mxu0 %v4863_v53 }
  0xe4   : > { %9626 = vst [vmem:[#allocation36_spill] sm:$0xff] %v6584_v34  ;;  %vm9628_vm1 = vmmov %vm9625_vm8  ;;  %vm9634_vm8 = vcmp.eq.s32.totalorder %v9633_v13, 1  ;;  %v6621_v13 = vsel %vm9643_vm7, %v999_v36, %v9642_v37  ;;  %3193 = vperm.xlu0 %4808, %v9648_v6   ;;  %v9649_v37 = vld [vmem:[#allocation38_spill] sm:$0xff]  ;;  %v1147_v59 = vrot.slane %v6484_v0, 1  ;;  %2413 = vmatprep.subr.bf16.mxu0 %v9363_v35 }
  0xe5   : > { %v6590_v42 = vsel %vm9628_vm1, %v9627_v44, %v1142_v49  ;;  %9631 = vst [vmem:[#allocation37_spill] sm:$0xff] %v6593_v27  ;;  %9632 = vst [vmem:[#allocation136_spill] sm:$0xff] %v6597_v28  ;;  %v9637_v49 = vmov 0  ;;  %v1144_v44 = vrot.slane %v6332_v14, 1  ;;  %v9654_v33 = vld [vmem:[#allocation30_spill] sm:$0xff] }
  0xe6   : > { %9629 = vst [vmem:[#allocation135_spill] sm:$0xff] %v6590_v42  ;;  %vm6607_vm1 = vmpackc.low %vm9636_vm14, %vm9634_vm8  ;;  %vm9647_vm8 = vcmp.eq.s32.totalorder %v6242_v9, 1  ;;  %3196 = vperm.xlu1 %4809, %v9654_v33   ;;  %v6655_v6 = vpack.c.bf16 %v6584_v34, %v6590_v42  ;;  %v9656_v9 = vld [vmem:[#allocation40_spill] sm:$0xff]  ;;  %v6670_v33 = vld [vmem:[%s8971_s1 + $0x1a8] sm:$0xff]   ;;  %v1146_v42 = vrot.slane %v6479_v46, 1 }
  0xe7   : > { %v9638_v49 = vsel %vm6607_vm1, 4294967295, %v9637_v49  ;;  %9640 = vst [vmem:[#allocation62_spill] sm:$0xff] %v6613_v4  ;;  %9641 = vst [vmem:[#allocation137_spill] sm:$0xff] %v6615_v20  ;;  %v6633_v14 = vsel %vm9647_vm8, %v6233_v7, 0.0  ;;  %3889 = vmatprep.mubr.msk.bf16.mxu1 %vm6607_vm1, %v6392_v18  ;;  %v6664_v18 = vpack.c.bf16 %v6163_v26, %v6161_v21  ;;  %v9661_v26 = vld [vmem:[#allocation66_spill] sm:$0xff]  ;;  %v9662_v21 = vld [vmem:[#allocation73_spill] sm:$0xff]  ;;  %v6688_v7 = vpop.permute.xlu0 %813  ;;  %4583 = vmatpush1.bf16.msra.mxu1 %v6670_v33 }
  0xe8   : > { %9639 = vst [vmem:[#allocation56_spill] sm:$0xff] %v9638_v49  ;;  %9644 = vst [vmem:[#allocation138_spill] sm:$0xff] %v6621_v13  ;;  %2249 = vmatmul.mubr.bf16.gmra.mrb[28].mxu0 %v6655_v6  ;;  %vm9666_vm8 = vcmp.lt.s32.totalorder %v5678_v52, 7  ;;  %v4865_v46 = vld [vmem:[%s8971_s1 + $0x170] sm:$0xff]   ;;  %4568 = vmatprep.subr.bf16.mxu1 %v9363_v35 }
  0xe9   : > { %vm9646_vm14 = vmmov %vm9643_vm7  ;;  %9655 = vst [vmem:[#allocation30_spill] sm:$0xff] %v6655_v6  ;;  %2414 = vmatpush1.bf16.msra.mxu0 %v4865_v46  ;;  %v4867_v46 = vld [vmem:[%s8971_s1 + $0x178] sm:$0xff]  }
  0xea   : > { %v6627_v27 = vsel %vm9646_vm14, %v9645_v60, %v999_v36  ;;  %v6642_v36 = vmax.f32 %v9649_v37, 0.0  ;;  %vm6648_vm7 = vmpackc.low %vm9148_vm9, %vm9149_vm4  ;;  %v9651_v60 = vmov 0  ;;  %v6660_v37 = vpack.c.bf16 %v6153_v22, %v6137_v47  ;;  %9658 = vst [vmem:[#allocation140_spill] sm:$0xff] %v6670_v33  ;;  %2415 = vmatprep.subr.bf16.mxu0 %v9363_v35 }
  0xeb   : > { %v9652_v60 = vsel %vm6648_vm7, 4294967295, %v9651_v60  ;;  %vm9660_vm14 = vcmp.eq.s32.totalorder %v6185_v11, 1  ;;  %v1263_v22 = vpack.c.bf16 %v6621_v13, %v6627_v27  ;;  %v1082_v47 = vpack.c.bf16 %v9662_v21, %v9661_v26  ;;  %v6690_v11 = vpop.permute.xlu1 %816 }
  0xec   : > { %9650 = vst [vmem:[#allocation3_spill] sm:$0xff] %v6642_v36  ;;  %9653 = vst [vmem:[#allocation38_spill] sm:$0xff] %v9652_v60  ;;  %v9659_v60 = vld [vmem:[#allocation47_spill] sm:$0xff]  ;;  %v6678_v49 = vsel %vm9660_vm14, %v6219_v30, 0.0  ;;  %v9665_v13 = vrot.slane %v6337_v10, 1  ;;  %vm9668_vm14 = vcmp.eq.s32.totalorder %v6304_v3, 1 }
  0xed   : > { %9657 = vst [vmem:[#allocation139_spill] sm:$0xff] %v6660_v37  ;;  %v6673_v34 = vrot.slane %v9659_v60, 1  ;;  %9663 = vst [vmem:[#allocation47_spill] sm:$0xff] %v6688_v7  ;;  %v6705_v53 = vsel %vm9668_vm14, %v6277_v31, 0.0  ;;  %vm9155_vm9 = vcmp.eq.s32.totalorder %v6615_v20, 1  ;;  %vm9154_vm4 = vcmp.eq.s32.totalorder %v6688_v7, 1  ;;  %2256 = vmatprep.mubr.bf16.mxu0 %v1263_v22  ;;  %1992 = vmatmul.mubr.bf16.gmra.mrb[12].mxu1 %v1082_v47 }
  0xee   : > { %9664 = vst [vmem:[#allocation66_spill] sm:$0xff] %v6690_v11  ;;  %v6697_v26 = vsel %vm9666_vm8, %v1144_v44, %v9665_v13  ;;  %v9669_v60 = vld [vmem:[#allocation33_spill] sm:$0xff]  ;;  %v9670_v21 = vrot.slane %v6210_v50, 1  ;;  %v1001_v6 = vrot.slane %v6678_v49, 7  ;;  %vm6721_vm14 = vmpackc.low %vm9154_vm4, %vm9155_vm9  ;;  %v9672_v3 = vmov 0  ;;  %v9675_v31 = vld [vmem:[#allocation2_spill] sm:$0xff]  ;;  %2416 = vmatpush1.bf16.msra.mxu0 %v4867_v46 }
  0xef   : > { %9667 = vst [vmem:[#allocation141_spill] sm:$0xff] %v6697_v26  ;;  %3199 = vperm.xlu0 %4808, %v9669_v60   ;;  %v9673_v3 = vsel %vm6721_vm14, 4294967295, %v9672_v3  ;;  %3202 = vperm.xlu1 %4809, %v9675_v31   ;;  %v9676_v60 = vld [vmem:[#allocation72_spill] sm:$0xff]  ;;  %v6736_v50 = vpack.c.bf16 %v6197_v39, %v6085_v55  ;;  %v6756_v55 = vpack.c.bf16 %v6467_v61, %v6312_v25  ;;  %v9686_v39 = vld [vmem:[#allocation69_spill] sm:$0xff]  ;;  %v1148_v31 = vrot.slane %v6678_v49, 1  ;;  %v6772_v61 = vpop.permute.xlu1 %822  ;;  %v6895_v46 = vld [vmem:[%s8971_s1 + $0x1c0] sm:$0xff]  }
  0xf0   : > { %v6714_v13 = vsel %vm9666_vm8, %v9670_v21, %v1144_v44  ;;  %9674 = vst [vmem:[#allocation142_spill] sm:$0xff] %v9673_v3  ;;  %v6728_v22 = vpack.c.bf16 %v5993_v48, %v9676_v60  ;;  %v6732_v21 = vpack.c.bf16 %v6091_v40, %v5989_v1  ;;  %v6742_v44 = vld [vmem:[%s8971_s1 + $0x1b0] sm:$0xff]   ;;  %vm9681_vm8 = vcmp.eq.s32.totalorder %v6244_v5, 1  ;;  %v9684_v40 = vld [vmem:[#allocation63_spill] sm:$0xff]  ;;  %9692 = vst [vmem:[#allocation147_spill] sm:$0xff] %v6772_v61 }
  0xf1   : > { %9671 = vst [vmem:[#allocation33_spill] sm:$0xff] %v6714_v13  ;;  %9679 = vst [vmem:[#allocation143_spill] sm:$0xff] %v6736_v50  ;;  %v6748_v48 = vsel %vm9681_vm8, %v6273_v16, 0.0  ;;  %v6752_v1 = vpack.c.bf16 %v6318_v58, %v6191_v19  ;;  %vm9685_vm4 = vcmp.eq.s32.totalorder %v9684_v40, 1  ;;  %vm9687_vm9 = vcmp.eq.s32.totalorder %v9686_v39, 1  ;;  %v6770_v58 = vpop.permute.xlu0 %819  ;;  %4584 = vmatpush1.bf16.msra.mxu1 %v6742_v44  ;;  %2610 = vmatprep.subr.bf16.mxu0 %v9363_v35 }
  0xf2   : > { %9677 = vst [vmem:[#allocation2_spill] sm:$0xff] %v6728_v22  ;;  %9678 = vst [vmem:[#allocation72_spill] sm:$0xff] %v6732_v21  ;;  %v9688_v60 = vmov 0  ;;  %v1004_v19 = vrot.slane %v6705_v53, 7  ;;  %v6776_v25 = vpack.c.bf16 %v6697_v26, %v6714_v13  ;;  %v9694_v40 = vrot.slane %v6633_v14, 7  ;;  %4569 = vmatprep.subr.bf16.mxu1 %v9363_v35 }
  0xf3   : > { %9680 = vst [vmem:[#allocation144_spill] sm:$0xff] %v6742_v44  ;;  %9682 = vst [vmem:[#allocation145_spill] sm:$0xff] %v6752_v1  ;;  %vm9178_vm8 = vcmp.eq.s32.totalorder %v6690_v11, 1  ;;  %vm9170_vm14 = vcmp.eq.s32.totalorder %v6770_v58, 1  ;;  %vm9698_vm7 = vcmp.lt.s32.totalorder %v5678_v52, 7  ;;  %v9706_v13 = vrot.slane %v6337_v10, 1 }
  0xf4   : > { %9683 = vst [vmem:[#allocation146_spill] sm:$0xff] %v6756_v55  ;;  %vm6764_vm1 = vmpackc.low %vm9687_vm9, %vm9685_vm4  ;;  %vm9695_vm9 = vcmp.lt.s32.totalorder %v5678_v52, 1  ;;  %vm9697_vm4 = vcmp.eq.s32.totalorder %v6306_v17, 1  ;;  %v6796_v47 = vsel %vm9698_vm7, %v1146_v42, %v1147_v59  ;;  %vm9704_vm7 = vcmp.lt.s32.totalorder %v5678_v52, 1  ;;  %2257 = vmatmul.mubr.bf16.gmra.mrb[32].mxu0 %v6776_v25 }
  0xf5   : > { %v9689_v60 = vsel %vm6764_vm1, 4294967295, %v9688_v60  ;;  %9691 = vst [vmem:[#allocation69_spill] sm:$0xff] %v6770_v58  ;;  %9693 = vst [vmem:[#allocation148_spill] sm:$0xff] %v6776_v25  ;;  %v6782_v39 = vsel %vm9695_vm9, %v1001_v6, %v9694_v40  ;;  %v6787_v49 = vsel %vm9697_vm4, %v6283_v12, 0.0  ;;  %3892 = vmatprep.mubr.msk.bf16.mxu1 %vm6764_vm1, %v6421_v45  ;;  %v1003_v40 = vrot.slane %v6748_v48, 7 }
  0xf6   : > { %9690 = vst [vmem:[#allocation63_spill] sm:$0xff] %v9689_v60  ;;  %9696 = vst [vmem:[#allocation149_spill] sm:$0xff] %v6782_v39  ;;  %vm9699_vm9 = vcmp.eq.s32.totalorder %v6382_v41, 1  ;;  %v9700_v60 = vmov 0  ;;  %v9703_v45 = vrot.slane %v6484_v0, 7  ;;  %vm9707_vm1 = vcmp.lt.s32.totalorder %v5678_v52, 7  ;;  %2000 = vmatmul.mubr.bf16.gmra.mrb[16].mxu1 %v6728_v22 }
  0xf7   : > { %v6806_v3 = vsel %vm9699_vm9, %v6286_v54, 0.0  ;;  %vm6812_vm4 = vmpackc.low %vm9170_vm14, %vm9178_vm8  ;;  %v6826_v33 = vsel %vm9707_vm1, %v9706_v13, %v1146_v42  ;;  %v6832_v41 = vld [vmem:[%s8971_s1 + $0x1b8] sm:$0xff]   ;;  %v1151_v0 = vrot.slane %v6705_v53, 1  ;;  %v9710_v10 = vrot.slane %v6633_v14, 1  ;;  %v6853_v53 = vpop.permute.xlu1 %828  ;;  %9725 = vst [vmem:[#allocation162_spill] sm:$0xff] %v6895_v46 }
  0xf8   : > { %v9701_v60 = vsel %vm6812_vm4, 4294967295, %v9700_v60  ;;  %v6820_v26 = vsel %vm9704_vm7, %v9703_v45, %v1001_v6  ;;  %9708 = vst [vmem:[#allocation152_spill] sm:$0xff] %v6826_v33  ;;  %9709 = vst [vmem:[#allocation153_spill] sm:$0xff] %v6832_v41  ;;  %v1005_v6 = vrot.slane %v6787_v49, 7  ;;  %v6858_v44 = vsel %vm9704_vm7, %v1003_v40, %v1004_v19  ;;  %4585 = vmatpush1.bf16.msra.mxu1 %v6832_v41  ;;  %v9732_v41 = vld [vmem:[#allocation76_spill] sm:$0xff] }
  0xf9   : > { %9702 = vst [vmem:[#allocation150_spill] sm:$0xff] %v9701_v60  ;;  %9705 = vst [vmem:[#allocation151_spill] sm:$0xff] %v6820_v26  ;;  %v1150_v60 = vrot.slane %v6748_v48, 1  ;;  %v1264_v45 = vpack.c.bf16 %v6782_v39, %v6820_v26  ;;  %v6851_v48 = vpop.permute.xlu0 %825  ;;  %v1006_v54 = vrot.slane %v6806_v3, 7  ;;  %v1152_v25 = vrot.slane %v6787_v49, 1  ;;  %4570 = vmatprep.subr.bf16.mxu1 %v9363_v35 }
  0xfa   : > { %vm9711_vm9 = vmmov %vm9707_vm1  ;;  %vm9713_vm1 = vcmp.eq.s32.totalorder %v6384_v29, 1  ;;  %9714 = vst [vmem:[#allocation155_spill] sm:$0xff] %v6851_v48  ;;  %v1153_v29 = vrot.slane %v6806_v3, 1  ;;  %vm9174_vm14 = vcmp.eq.s32.totalorder %v6851_v48, 1  ;;  %v9721_v3 = vrot.slane %v6633_v14, 7 }
  0xfb   : > { %v6842_v42 = vsel %vm9711_vm9, %v1148_v31, %v9710_v10  ;;  %v6849_v13 = vsel %vm9713_vm1, %v6353_v23, 0.0  ;;  %9715 = vst [vmem:[#allocation156_spill] sm:$0xff] %v6853_v53  ;;  %9716 = vst [vmem:[#allocation157_spill] sm:$0xff] %v6858_v44  ;;  %v6862_v10 = vsel %vm9711_vm9, %v1147_v59, %v1148_v31  ;;  %vm9175_vm1 = vcmp.eq.s32.totalorder %v6772_v61, 1  ;;  %2264 = vmatprep.mubr.bf16.mxu0 %v1264_v45 }
  0xfc   : > { %9712 = vst [vmem:[#allocation154_spill] sm:$0xff] %v6842_v42  ;;  %vm6873_vm7 = vmpackc.low %vm9174_vm14, %vm9175_vm1  ;;  %v9717_v23 = vmov 0  ;;  %v6879_v59 = vpack.c.bf16 %v6796_v47, %v6826_v33  ;;  %vm9722_vm9 = vcmp.lt.s32.totalorder %v5678_v52, 1  ;;  %v6889_v49 = vpack.c.bf16 %v6842_v42, %v6862_v10  ;;  %v9730_v33 = vld [vmem:[#allocation70_spill] sm:$0xff]  ;;  %4586 = vmatpush1.bf16.msra.mxu1 %v6895_v46  ;;  %v10013_v42 = vld [vmem:[#allocation55_spill] sm:$0xff] }
  0xfd   : > { %v9718_v23 = vsel %vm6873_vm7, 4294967295, %v9717_v23  ;;  %v6885_v31 = vsel %vm9722_vm9, %v9721_v3, %v1003_v40  ;;  %v1007_v45 = vrot.slane %v6849_v13, 7  ;;  %vm9726_vm14 = vcmp.eq.s32.totalorder %v6453_v15, 1  ;;  %v9737_v15 = vld [vmem:[#allocation13_spill] sm:$0xff]  ;;  %4571 = vmatprep.subr.bf16.mxu1 %v9363_v35 }
  0xfe   : > { %9719 = vst [vmem:[#allocation158_spill] sm:$0xff] %v9718_v23  ;;  %9720 = vst [vmem:[#allocation159_spill] sm:$0xff] %v6879_v59  ;;  %v6902_v40 = vsel %vm9726_vm14, %v6360_v24, 0.0  ;;  %vm9727_vm9 = vcmp.eq.s32.totalorder %v6455_v2, 1  ;;  %vm9728_vm1 = vcmp.lt.s32.totalorder %v5678_v52, 7  ;;  %vm9731_vm8 = vcmp.eq.s32.totalorder %v9730_v33, 1  ;;  %v6929_v24 = vpop.permute.xlu1 %834  ;;  %2265 = vmatmul.mubr.bf16.gmra.mrb[36].mxu0 %v6879_v59 }
  0xff   : > { %9723 = vst [vmem:[#allocation160_spill] sm:$0xff] %v6885_v31  ;;  %9724 = vst [vmem:[#allocation161_spill] sm:$0xff] %v6889_v49  ;;  %v6907_v3 = vsel %vm9727_vm9, %v6388_v32, 0.0  ;;  %v6911_v23 = vsel %vm9728_vm1, %v1150_v60, %v1151_v0  ;;  %vm9733_vm7 = vcmp.eq.s32.totalorder %v9732_v41, 1  ;;  %v9734_v17 = vmov 0  ;;  %v6927_v32 = vpop.permute.xlu0 %831 }
 0x100   : > { %9729 = vst [vmem:[#allocation163_spill] sm:$0xff] %v6911_v23  ;;  %vm6918_vm4 = vmpackc.low %vm9733_vm7, %vm9731_vm8  ;;  %vm9738_vm14 = vcmp.eq.s32.totalorder %v6532_v51, 1  ;;  %v1265_v33 = vpack.c.bf16 %v6858_v44, %v6885_v31  ;;  %vm9741_vm1 = vcmp.lt.s32.totalorder %v5678_v52, 1  ;;  %v9743_v39 = vrot.slane %v6633_v14, 1 }
 0x101   : > { %v9735_v17 = vsel %vm6918_vm4, 4294967295, %v9734_v17  ;;  %v6925_v2 = vsel %vm9738_vm14, %v9737_v15, 0.0  ;;  %9739 = vst [vmem:[#allocation76_spill] sm:$0xff] %v6927_v32  ;;  %9740 = vst [vmem:[#allocation164_spill] sm:$0xff] %v6929_v24  ;;  %v6936_v41 = vsel %vm9741_vm1, %v1004_v19, %v1005_v6  ;;  %vm9744_vm8 = vcmp.lt.s32.totalorder %v5678_v52, 7  ;;  %3895 = vmatprep.mubr.msk.bf16.mxu1 %vm6918_vm4, %v6443_v57  ;;  %v9755_v15 = vld [vmem:[#allocation12_spill] sm:$0xff] }
 0x102   : > { %9736 = vst [vmem:[#allocation70_spill] sm:$0xff] %v9735_v17  ;;  %9742 = vst [vmem:[#allocation165_spill] sm:$0xff] %v6936_v41  ;;  %v6942_v51 = vsel %vm9744_vm8, %v9743_v39, %v1150_v60  ;;  %vm9202_vm7 = vcmp.eq.s32.totalorder %v6853_v53, 1  ;;  %vm9194_vm9 = vcmp.eq.s32.totalorder %v6927_v32, 1  ;;  %v1154_v14 = vrot.slane %v6849_v13, 1  ;;  %v6976_v13 = vld [vmem:[%s8971_s1 + $0x1c8] sm:$0xff]   ;;  %v6995_v26 = vpop.permute.xlu1 %840  ;;  %2272 = vmatprep.mubr.bf16.mxu0 %v1265_v33  ;;  %2008 = vmatmul.mubr.bf16.gmra.mrb[20].mxu1 %v6732_v21 }
 0x103   : > { %9745 = vst [vmem:[#allocation166_spill] sm:$0xff] %v6942_v51  ;;  %vm9746_vm14 = vmmov %vm9741_vm1  ;;  %v1008_v60 = vrot.slane %v6902_v40, 7  ;;  %v1009_v39 = vrot.slane %v6907_v3, 7  ;;  %v9750_v17 = vmov 0  ;;  %v1010_v57 = vrot.slane %v6925_v2, 7  ;;  %v6993_v5 = vpop.permute.xlu0 %837  ;;  %4587 = vmatpush1.bf16.msra.mxu1 %v6976_v13 }
 0x104   : > { %v6951_v22 = vsel %vm9746_vm14, %v1005_v6, %v1006_v54  ;;  %vm9748_vm1 = vmmov %vm9744_vm8  ;;  %v6970_v6 = vpack.c.bf16 %v6911_v23, %v6942_v51  ;;  %9754 = vst [vmem:[#allocation171_spill] sm:$0xff] %v6976_v13  ;;  %vm9756_vm14 = vcmp.eq.s32.totalorder %v6534_v43, 1  ;;  %v1155_v46 = vrot.slane %v6902_v40, 1  ;;  %4572 = vmatprep.subr.bf16.mxu1 %v9363_v35  ;;  %v9780_v13 = vld [vmem:[#allocation83_spill] sm:$0xff] }
 0x105   : > { %9747 = vst [vmem:[#allocation167_spill] sm:$0xff] %v6951_v22  ;;  %v6955_v19 = vsel %vm9748_vm1, %v1152_v25, %v1153_v29  ;;  %vm6964_vm8 = vmpackc.low %vm9194_vm9, %vm9202_vm7  ;;  %v957_v44 = vsel %vm9756_vm14, %v9755_v15, 0.0  ;;  %vm9757_vm1 = vcmp.lt.s32.totalorder %v5678_v52, 1  ;;  %vm9759_vm9 = vcmp.lt.s32.totalorder %v5678_v52, 7 }
 0x106   : > { %9749 = vst [vmem:[#allocation168_spill] sm:$0xff] %v6955_v19  ;;  %v9751_v17 = vsel %vm6964_vm8, 4294967295, %v9750_v17  ;;  %9753 = vst [vmem:[#allocation170_spill] sm:$0xff] %v6970_v6  ;;  %v6988_v31 = vsel %vm9759_vm9, %v1151_v0, %v1152_v25  ;;  %v1156_v12 = vrot.slane %v6907_v3, 1  ;;  %vm9764_vm9 = vcmp.eq.s32.totalorder %v6613_v4, 1  ;;  %v7040_v4 = vld [vmem:[%s8971_s1 + $0x1d0] sm:$0xff]   ;;  %2273 = vmatmul.mubr.bf16.gmra.mrb[40].mxu0 %v6889_v49 }
 0x107   : > { %9752 = vst [vmem:[#allocation169_spill] sm:$0xff] %v9751_v17  ;;  %v6984_v17 = vsel %vm9757_vm1, %v1006_v54, %v1007_v45  ;;  %9760 = vst [vmem:[#allocation173_spill] sm:$0xff] %v6988_v31  ;;  %v1266_v54 = vpack.c.bf16 %v6951_v22, %v6936_v41  ;;  %v7002_v43 = vpack.c.bf16 %v6955_v19, %v6988_v31  ;;  %v7007_v25 = vsel %vm9764_vm9, %v6414_v62, 0.0  ;;  %v7069_v22 = vpop.permute.xlu0 %843  ;;  %v9815_v49 = vld [vmem:[#allocation26_spill] sm:$0xff] }
 0x108   : > { %9758 = vst [vmem:[#allocation172_spill] sm:$0xff] %v6984_v17  ;;  %9761 = vst [vmem:[#allocation174_spill] sm:$0xff] %v6993_v5  ;;  %vm9766_vm14 = vcmp.eq.s32.totalorder %v6615_v20, 1  ;;  %vm9214_vm1 = vcmp.eq.s32.totalorder %v6929_v24, 1  ;;  %vm9213_vm7 = vcmp.eq.s32.totalorder %v6993_v5, 1  ;;  %v1011_v40 = vrot.slane %v957_v44, 7  ;;  %4588 = vmatpush1.bf16.msra.mxu1 %v7040_v4 }
 0x109   : > { %9762 = vst [vmem:[#allocation175_spill] sm:$0xff] %v6995_v26  ;;  %9763 = vst [vmem:[#allocation176_spill] sm:$0xff] %v7002_v43  ;;  %v7012_v0 = vsel %vm9766_vm14, %v6417_v63, 0.0  ;;  %v9767_v3 = vmov 0  ;;  %vm9770_vm9 = vcmp.lt.s32.totalorder %v5678_v52, 1  ;;  %vm9773_vm8 = vcmp.lt.s32.totalorder %v5678_v52, 7  ;;  %4573 = vmatprep.subr.bf16.mxu1 %v9363_v35  ;;  %2280 = vmatprep.mubr.bf16.mxu0 %v1266_v54 }
 0x10a   : > { %9765 = vst [vmem:[#allocation177_spill] sm:$0xff] %v7007_v25  ;;  %vm7020_vm4 = vmpackc.low %vm9213_vm7, %vm9214_vm1  ;;  %v7026_v59 = vsel %vm9770_vm9, %v1007_v45, %v1008_v60  ;;  %v7034_v33 = vsel %vm9773_vm8, %v1153_v29, %v1154_v14  ;;  %v1158_v63 = vrot.slane %v957_v44, 1  ;;  %v9776_v45 = vld [vmem:[#allocation19_spill] sm:$0xff]  ;;  %v9778_v29 = vld [vmem:[#allocation78_spill] sm:$0xff]  ;;  %vm9781_vm7 = vcmp.eq.s32.totalorder %v9780_v13, 1 }
 0x10b   : > { %v9768_v3 = vsel %vm7020_vm4, 4294967295, %v9767_v3  ;;  %9771 = vst [vmem:[#allocation179_spill] sm:$0xff] %v7026_v59  ;;  %vm9772_vm14 = vmmov %vm9770_vm9  ;;  %vm9777_vm9 = vcmp.eq.s32.totalorder %v6688_v7, 1  ;;  %vm9779_vm8 = vcmp.eq.s32.totalorder %v9778_v29, 1  ;;  %v9782_v15 = vmov 0  ;;  %v7071_v29 = vpop.permute.xlu1 %846  ;;  %v9922_v19 = vld [vmem:[#allocation98_spill] sm:$0xff] }
 0x10c   : > { %9769 = vst [vmem:[#allocation178_spill] sm:$0xff] %v9768_v3  ;;  %v7030_v20 = vsel %vm9772_vm14, %v1008_v60, %v1009_v39  ;;  %9774 = vst [vmem:[#allocation180_spill] sm:$0xff] %v7034_v33  ;;  %v1157_v3 = vrot.slane %v6925_v2, 1  ;;  %v7046_v62 = vsel %vm9777_vm9, %v9776_v45, 0.0  ;;  %v7050_v60 = vsel %vm9772_vm14, %v1009_v39, %v1010_v57  ;;  %v9785_v45 = vld [vmem:[#allocation21_spill] sm:$0xff] }
 0x10d   : > { %9775 = vst [vmem:[#allocation181_spill] sm:$0xff] %v7040_v4  ;;  %vm7057_vm1 = vmpackc.low %vm9781_vm7, %vm9779_vm8  ;;  %v1159_v44 = vrot.slane %v7007_v25, 1  ;;  %v1160_v7 = vrot.slane %v7012_v0, 1  ;;  %vm9786_vm9 = vcmp.eq.s32.totalorder %v6690_v11, 1  ;;  %vm9225_vm7 = vcmp.eq.s32.totalorder %v6995_v26, 1  ;;  %v9804_v4 = vld [vmem:[#allocation23_spill] sm:$0xff] }
 0x10e   : > { %v9783_v15 = vsel %vm7057_vm1, 4294967295, %v9782_v15  ;;  %v7067_v39 = vsel %vm9786_vm9, %v9785_v45, 0.0  ;;  %9788 = vst [vmem:[#allocation182_spill] sm:$0xff] %v7069_v22  ;;  %9789 = vst [vmem:[#allocation183_spill] sm:$0xff] %v7071_v29  ;;  %vm9223_vm14 = vcmp.eq.s32.totalorder %v7069_v22, 1  ;;  %3898 = vmatprep.mubr.msk.bf16.mxu1 %vm7057_vm1, %v6552_v38  ;;  %vm9790_vm8 = vcmp.lt.s32.totalorder %v5678_v52, 7  ;;  %2281 = vmatmul.mubr.bf16.gmra.mrb[44].mxu0 %v6970_v6 }
 0x10f   : > { %9784 = vst [vmem:[#allocation78_spill] sm:$0xff] %v9783_v15  ;;  %9787 = vst [vmem:[#allocation83_spill] sm:$0xff] %v7067_v39  ;;  %v7083_v2 = vsel %vm9790_vm8, %v1154_v14, %v1155_v46  ;;  %v1161_v11 = vrot.slane %v7046_v62, 1  ;;  %v9792_v21 = vmov 0  ;;  %vm9795_vm1 = vcmp.lt.s32.totalorder %v5678_v52, 1  ;;  %v7108_v38 = vld [vmem:[%s8971_s1 + $0x1d8] sm:$0xff]   ;;  %2016 = vmatmul.mubr.bf16.gmra.mrb[24].mxu1 %v6736_v50 }
 0x110   : > { %9791 = vst [vmem:[#allocation184_spill] sm:$0xff] %v7083_v2  ;;  %vm7090_vm9 = vmpackc.low %vm9223_vm14, %vm9225_vm7  ;;  %v7098_v13 = vsel %vm9795_vm1, %v1010_v57, %v1011_v40  ;;  %v7102_v14 = vsel %vm9790_vm8, %v1155_v46, %v1156_v12  ;;  %v9798_v45 = vld [vmem:[#allocation22_spill] sm:$0xff]  ;;  %vm9799_vm14 = vcmp.eq.s32.totalorder %v6770_v58, 1  ;;  %vm9805_vm7 = vcmp.eq.s32.totalorder %v6772_v61, 1  ;;  %v856_v58 = vpop.permute.xlu1 %855  ;;  %4589 = vmatpush1.bf16.msra.mxu1 %v7108_v38  ;;  %v9874_v6 = vld [vmem:[#allocation115_spill] sm:$0xff] }
 0x111   : > { %v9793_v21 = vsel %vm7090_vm9, 4294967295, %v9792_v21  ;;  %9796 = vst [vmem:[#allocation186_spill] sm:$0xff] %v7102_v14  ;;  %9797 = vst [vmem:[#allocation187_spill] sm:$0xff] %v7108_v38  ;;  %v7114_v15 = vsel %vm9799_vm14, %v9798_v45, 0.0  ;;  %v7128_v41 = vsel %vm9805_vm7, %v9804_v4, 0.0  ;;  %v9808_v45 = vrot.slane %v7007_v25, 7  ;;  %4574 = vmatprep.subr.bf16.mxu1 %v9363_v35 }
 0x112   : > { %9794 = vst [vmem:[#allocation185_spill] sm:$0xff] %v9793_v21  ;;  %v1162_v21 = vrot.slane %v7067_v39, 1  ;;  %vm9800_vm1 = vmmov %vm9790_vm8  ;;  %v7130_v39 = vpop.permute.xlu0 %849  ;;  %vm9809_vm14 = vcmp.lt.s32.totalorder %v5678_v52, 1  ;;  %v9813_v4 = vld [vmem:[#allocation25_spill] sm:$0xff]  ;;  %vm9814_vm7 = vcmp.eq.s32.totalorder %v6851_v48, 1  ;;  %vm9816_vm9 = vcmp.eq.s32.totalorder %v6853_v53, 1 }
 0x113   : > { %v7118_v57 = vsel %vm9800_vm1, %v1156_v12, %v1157_v3  ;;  %vm9802_vm8 = vmmov %vm9800_vm1  ;;  %9806 = vst [vmem:[#allocation190_spill] sm:$0xff] %v7128_v41  ;;  %v7137_v12 = vsel %vm9809_vm14, %v1011_v40, %v9808_v45  ;;  %v7150_v16 = vsel %vm9814_vm7, %v9813_v4, 0.0  ;;  %v7155_v25 = vsel %vm9816_vm9, %v9815_v49, 0.0  ;;  %v9820_v40 = vld [vmem:[#allocation87_spill] sm:$0xff]  ;;  %v9831_v49 = vld [vmem:[#allocation28_spill] sm:$0xff] }
 0x114   : > { %9801 = vst [vmem:[#allocation188_spill] sm:$0xff] %v7118_v57  ;;  %v7122_v46 = vsel %vm9802_vm8, %v1157_v3, %v1158_v63  ;;  %9807 = vst [vmem:[#allocation191_spill] sm:$0xff] %v7130_v39  ;;  %v7141_v3 = vsel %vm9800_vm1, %v1158_v63, %v1159_v44  ;;  %vm9243_vm14 = vcmp.eq.s32.totalorder %v7130_v39, 1  ;;  %v9818_v63 = vld [vmem:[#allocation84_spill] sm:$0xff]  ;;  %vm9821_vm6 = vcmp.eq.s32.totalorder %v9820_v40, 1  ;;  %v9828_v40 = vld [vmem:[#allocation27_spill] sm:$0xff] }
 0x115   : > { %9803 = vst [vmem:[#allocation189_spill] sm:$0xff] %v7122_v46  ;;  %9810 = vst [vmem:[#allocation192_spill] sm:$0xff] %v7141_v3  ;;  %v9822_v45 = vmov 0  ;;  %vm9244_vm7 = vcmp.eq.s32.totalorder %v7071_v29, 1  ;;  %v7171_v53 = vsel %vm9243_vm14, %v6572_v8, 0.0  ;;  %vm9826_vm9 = vcmp.lt.s32.totalorder %v5678_v52, 7 }
 0x116   : > { %vm9811_vm8 = vmmov %vm9800_vm1  ;;  %9817 = vst [vmem:[#allocation194_spill] sm:$0xff] %v7155_v25  ;;  %vm9819_vm1 = vcmp.eq.s32.totalorder %v9818_v63, 1  ;;  %v7175_v54 = vsel %vm9826_vm9, %v1160_v7, %v1161_v11  ;;  %v1164_v63 = vrot.slane %v7128_v41, 1  ;;  %vm9837_vm4 = vcmp.lt.s32.totalorder %v5678_v52, 7  ;;  %v9842_v39 = vld [vmem:[#allocation24_spill] sm:$0xff]  ;;  %v7221_v41 = vpop.permute.xlu0 %858  ;;  %v7244_v50 = vld [vmem:[%s8971_s1 + $0x1e0] sm:$0xff]  }
 0x117   : > { %v7145_v61 = vsel %vm9811_vm8, %v1159_v44, %v1160_v7  ;;  %vm7162_vm8 = vmpackc.low %vm9821_vm6, %vm9819_vm1  ;;  %v1163_v44 = vrot.slane %v7114_v15, 1  ;;  %9825 = vst [vmem:[#allocation87_spill] sm:$0xff] %v7171_v53  ;;  %vm9829_vm6 = vcmp.eq.s32.totalorder %v6927_v32, 1  ;;  %vm9832_vm1 = vcmp.eq.s32.totalorder %v6929_v24, 1  ;;  %v9839_v32 = vld [vmem:[#allocation31_spill] sm:$0xff]  ;;  %4590 = vmatpush1.bf16.msra.mxu1 %v7244_v50 }
 0x118   : > { %9812 = vst [vmem:[#allocation193_spill] sm:$0xff] %v7145_v61  ;;  %v9823_v45 = vsel %vm7162_vm8, 4294967295, %v9822_v45  ;;  %9827 = vst [vmem:[#allocation195_spill] sm:$0xff] %v7175_v54  ;;  %v7182_v48 = vsel %vm9829_vm6, %v9828_v40, 0.0  ;;  %v7187_v4 = vsel %vm9832_vm1, %v9831_v49, 0.0  ;;  %v9834_v7 = vmov 0  ;;  %3901 = vmatprep.mubr.msk.bf16.mxu1 %vm7162_vm8, %v6597_v28  ;;  %4575 = vmatprep.subr.bf16.mxu1 %v9363_v35 }
 0x119   : > { %9824 = vst [vmem:[#allocation84_spill] sm:$0xff] %v9823_v45  ;;  %9830 = vst [vmem:[#allocation196_spill] sm:$0xff] %v7182_v48  ;;  %v7199_v38 = vsel %vm9837_vm4, %v1161_v11, %v1162_v21  ;;  %v1165_v8 = vrot.slane %v7150_v16, 1  ;;  %v1166_v24 = vrot.slane %v7155_v25, 1  ;;  %vm9840_vm6 = vcmp.eq.s32.totalorder %v6993_v5, 1  ;;  %v7223_v25 = vpop.permute.xlu1 %870  ;;  %2024 = vmatmul.mubr.bf16.gmra.mrb[28].mxu1 %v6752_v1 }
 0x11a   : > { %9833 = vst [vmem:[#allocation197_spill] sm:$0xff] %v7187_v4  ;;  %vm7193_vm9 = vmpackc.low %vm9243_vm14, %vm9244_vm7  ;;  %v7207_v49 = vsel %vm9840_vm6, %v9839_v32, 0.0  ;;  %vm9843_vm1 = vcmp.eq.s32.totalorder %v6995_v26, 1  ;;  %vm9847_vm4 = vcmp.eq.s32.totalorder %v856_v58, 1  ;;  %v9848_v11 = vmov 0  ;;  %v9855_v26 = vld [vmem:[#allocation29_spill] sm:$0xff] }
 0x11b   : > { %v9835_v7 = vsel %vm7193_vm9, 4294967295, %v9834_v7  ;;  %9838 = vst [vmem:[#allocation199_spill] sm:$0xff] %v7199_v38  ;;  %9841 = vst [vmem:[#allocation200_spill] sm:$0xff] %v7207_v49  ;;  %v7212_v40 = vsel %vm9843_vm1, %v9842_v39, 0.0  ;;  %vm9853_vm6 = vcmp.eq.s32.totalorder %v7069_v22, 1  ;;  %vm9856_vm1 = vcmp.eq.s32.totalorder %v7071_v29, 1 }
 0x11c   : > { %9836 = vst [vmem:[#allocation198_spill] sm:$0xff] %v9835_v7  ;;  %9844 = vst [vmem:[#allocation201_spill] sm:$0xff] %v7212_v40  ;;  %v9845_v7 = vld [vmem:[#allocation109_spill] sm:$0xff]  ;;  %v7229_v5 = vsel %vm9853_vm6, %v6566_v56, 0.0  ;;  %v1173_v39 = vrot.slane %v7171_v53, 1  ;;  %v1168_v22 = vrot.slane %v7187_v4, 1 }
 0x11d   : > { %vm9846_vm14 = vcmp.eq.s32.totalorder %v9845_v7, 1  ;;  %9851 = vst [vmem:[#allocation203_spill] sm:$0xff] %v7221_v41  ;;  %9852 = vst [vmem:[#allocation204_spill] sm:$0xff] %v7223_v25  ;;  %v7234_v7 = vsel %vm9856_vm1, %v9855_v26, 0.0  ;;  %v9859_v29 = vld [vmem:[#allocation37_spill] sm:$0xff]  ;;  %vm9860_vm6 = vcmp.lt.s32.totalorder %v5678_v52, 7  ;;  %v7276_v4 = vpop.permute.xlu1 %867 }
 0x11e   : > { %vm7217_vm7 = vmpackc.low %vm9847_vm4, %vm9846_vm14  ;;  %9854 = vst [vmem:[#allocation205_spill] sm:$0xff] %v7229_v5  ;;  %vm9263_vm14 = vcmp.eq.s32.totalorder %v7221_v41, 1  ;;  %v7250_v26 = vsel %vm9847_vm4, %v9859_v29, 0.0  ;;  %v7254_v56 = vsel %vm9860_vm6, %v1162_v21, %v1163_v44  ;;  %v1169_v45 = vrot.slane %v7207_v49, 1 }
 0x11f   : > { %v9849_v11 = vsel %vm7217_vm7, 4294967295, %v9848_v11  ;;  %9857 = vst [vmem:[#allocation206_spill] sm:$0xff] %v7234_v7  ;;  %9858 = vst [vmem:[#allocation207_spill] sm:$0xff] %v7244_v50  ;;  %v1170_v28 = vrot.slane %v7212_v40, 1  ;;  %v7261_v32 = vsel %vm9263_vm14, %v6642_v36, 0.0  ;;  %v9863_v53 = vmov 0  ;;  %v7274_v40 = vpop.permute.xlu0 %864 }
 0x120   : > { %9850 = vst [vmem:[#allocation202_spill] sm:$0xff] %v9849_v11  ;;  %v1167_v11 = vrot.slane %v7182_v48, 1  ;;  %9861 = vst [vmem:[#allocation208_spill] sm:$0xff] %v7254_v56  ;;  %v1171_v21 = vrot.slane %v7229_v5, 1  ;;  %v1172_v29 = vrot.slane %v7234_v7, 1  ;;  %v7281_v58 = vsel %vm9860_vm6, %v1164_v63, %v1165_v8 }
 0x121   : > { %vm9862_vm1 = vmmov %vm9847_vm4  ;;  %9866 = vst [vmem:[#allocation210_spill] sm:$0xff] %v7274_v40  ;;  %v9871_v36 = vpack.c.bf16 %v7026_v59, %v6984_v17  ;;  %v9878_v59 = vld [vmem:[#allocation39_spill] sm:$0xff]  ;;  %v9884_v17 = vmax.f32 %v9656_v9, 0.0  ;;  %v9904_v9 = vld [vmem:[#allocation41_spill] sm:$0xff]  ;;  %v10000_v31 = vmov 0  ;;  %v10015_v51 = vmov 0 }
 0x122   : > { %vm7266_vm8 = vmpackc.low %vm9263_vm14, %vm9862_vm1  ;;  %9867 = vst [vmem:[#allocation211_spill] sm:$0xff] %v7276_v4  ;;  %vm9275_vm14 = vcmp.eq.s32.totalorder %v7274_v40, 1  ;;  %v1303_v40 = vrot.slane %v7250_v26, 1 }
 0x123   : > { %v9864_v53 = vsel %vm7266_vm8, 4294967295, %v9863_v53  ;;  %9868 = vst [vmem:[#allocation212_spill] sm:$0xff] %v7281_v58  ;;  %vm9869_vm1 = vmmov %vm9860_vm6  ;;  %2288 = vmatprep.mubr.bf16.mxu0 %v9871_v36  ;;  %v9879_v36 = vmax.f32 %v9878_v59, 0.0  ;;  %v7323_v49 = vsel %vm9275_vm14, %v9884_v17, 0.0  ;;  %v9895_v17 = vmov 0 }
 0x124   : > { %9865 = vst [vmem:[#allocation209_spill] sm:$0xff] %v9864_v53  ;;  %v7285_v41 = vsel %vm9869_vm1, %v1163_v44, %v1164_v63  ;;  %v1248_v53 = vrot.slane %v7250_v26, 7  ;;  %vm9872_vm4 = vmmov %vm9869_vm1  ;;  %v7305_v44 = vld [vmem:[%s8971_s1 + $0x1e8] sm:$0xff]   ;;  %v1249_v63 = vrot.slane %v7261_v32, 7  ;;  %v1304_v26 = vrot.slane %v7261_v32, 1  ;;  %2289 = vmatmul.mubr.bf16.gmra.mrb[48].mxu0 %v7002_v43  ;;  %v7415_v43 = vld [vmem:[%s8971_s1 + $0x1f8] sm:$0xff]  }
 0x125   : > { %9870 = vst [vmem:[#allocation213_spill] sm:$0xff] %v7285_v41  ;;  %v7294_v50 = vsel %vm9872_vm4, %v1165_v8, %v1166_v24  ;;  %vm9875_vm6 = vmmov %vm9869_vm1  ;;  %vm9880_vm1 = vcmp.eq.s32.totalorder %v7223_v25, 1  ;;  %4591 = vmatpush1.bf16.msra.mxu1 %v7305_v44  ;;  %v9893_v25 = vld [vmem:[#allocation93_spill] sm:$0xff]  ;;  %v1334_v1 = vrot.slane %v7323_v49, 7 }
 0x126   : > { %9873 = vst [vmem:[#allocation214_spill] sm:$0xff] %v7294_v50  ;;  %v7299_v7 = vsel %vm9875_vm6, %v1173_v39, %v9874_v6  ;;  %9877 = vst [vmem:[#allocation215_spill] sm:$0xff] %v7305_v44  ;;  %v7312_v8 = vsel %vm9880_vm1, %v9879_v36, 0.0  ;;  %v9905_v44 = vmax.f32 %v9904_v9, 0.0  ;;  %4576 = vmatprep.subr.bf16.mxu1 %v9363_v35 }
 0x127   : > { %9876 = vst [vmem:[#allocation115_spill] sm:$0xff] %v7299_v7  ;;  %9881 = vst [vmem:[#allocation39_spill] sm:$0xff] %v7312_v8  ;;  %v1350_v32 = vrot.slane %v7312_v8, 1 }
 0x128   : > { %vm9882_vm6 = vmmov %vm9872_vm4 }
 0x129   : > { %v7317_v5 = vsel %vm9882_vm6, %v1166_v24, %v1167_v11  ;;  %vm9885_vm7 = vmmov %vm9872_vm4  ;;  %v9891_v24 = vld [vmem:[#allocation88_spill] sm:$0xff] }
 0x12a   : > { %9883 = vst [vmem:[#allocation216_spill] sm:$0xff] %v7317_v5  ;;  %v7327_v48 = vsel %vm9885_vm7, %v1168_v22, %v1169_v45  ;;  %vm9887_vm9 = vmmov %vm9872_vm4  ;;  %vm9892_vm6 = vcmp.eq.s32.totalorder %v9891_v24, 1 }
 0x12b   : > { %9886 = vst [vmem:[#allocation217_spill] sm:$0xff] %v7327_v48  ;;  %v7331_v59 = vsel %vm9887_vm9, %v1167_v11, %v1168_v22  ;;  %vm9889_vm1 = vmmov %vm9872_vm4  ;;  %vm9894_vm4 = vcmp.eq.s32.totalorder %v9893_v25, 1  ;;  %v7361_v25 = vld [vmem:[%s8971_s1 + $0x1f0] sm:$0xff]  }
 0x12c   : > { %9888 = vst [vmem:[#allocation218_spill] sm:$0xff] %v7331_v59  ;;  %v7335_v36 = vsel %vm9889_vm1, %v1169_v45, %v1170_v28  ;;  %vm7342_vm14 = vmpackc.low %vm9894_vm4, %vm9892_vm6  ;;  %vm9906_vm4 = vcmp.eq.s32.totalorder %v7276_v4, 1  ;;  %4592 = vmatpush1.bf16.msra.mxu1 %v7361_v25 }
 0x12d   : > { %9890 = vst [vmem:[#allocation219_spill] sm:$0xff] %v7335_v36  ;;  %v9896_v17 = vsel %vm7342_vm14, 4294967295, %v9895_v17  ;;  %vm9898_vm7 = vmmov %vm9889_vm1  ;;  %3904 = vmatprep.mubr.msk.bf16.mxu1 %vm7342_vm14, %v6660_v37  ;;  %4577 = vmatprep.subr.bf16.mxu1 %v9363_v35  ;;  %vm9973_vm14 = vcmp.lt.s32.totalorder %v5678_v52, 1 }
 0x12e   : > { %9897 = vst [vmem:[#allocation88_spill] sm:$0xff] %v9896_v17  ;;  %v7350_v22 = vsel %vm9898_vm7, %v1170_v28, %v1171_v21  ;;  %vm9900_vm9 = vmmov %vm9889_vm1  ;;  %v978_v28 = vsel %vm9906_vm4, %v9905_v44, 0.0  ;;  %vm9908_vm1 = vcmp.lt.s32.totalorder %v5678_v52, 1  ;;  %v9912_v44 = vld [vmem:[#allocation50_spill] sm:$0xff]  ;;  %2032 = vmatmul.mubr.bf16.gmra.mrb[32].mxu1 %v6756_v55 }
 0x12f   : > { %9899 = vst [vmem:[#allocation93_spill] sm:$0xff] %v7350_v22  ;;  %v7354_v45 = vsel %vm9900_vm9, %v1171_v21, %v1172_v29  ;;  %9903 = vst [vmem:[#allocation221_spill] sm:$0xff] %v7361_v25  ;;  %v9907_v21 = vld [vmem:[#allocation113_spill] sm:$0xff]  ;;  %v1348_v25 = vrot.slane %v7323_v49, 1  ;;  %v1349_v11 = vrot.slane %v978_v28, 1 }
 0x130   : > { %9901 = vst [vmem:[#allocation220_spill] sm:$0xff] %v7354_v45  ;;  %v7375_v24 = vsel %vm9908_vm1, %v9907_v21, %v1248_v53  ;;  %vm9910_vm6 = vmmov %vm9898_vm7  ;;  %4593 = vmatpush1.bf16.msra.mxu1 %v7415_v43 }
 0x131   : > { %9909 = vst [vmem:[#allocation41_spill] sm:$0xff] %v7375_v24  ;;  %v7382_v9 = vsel %vm9910_vm6, %v1172_v29, %v1173_v39  ;;  %vm9913_vm7 = vmmov %vm9908_vm1  ;;  %v1335_v29 = vrot.slane %v978_v28, 7  ;;  %v9917_v39 = vpack.c.bf16 %v7050_v60, %v7030_v20  ;;  %v9920_v28 = vld [vmem:[#allocation94_spill] sm:$0xff]  ;;  %vm9923_vm6 = vcmp.eq.s32.totalorder %v9922_v19, 1 }
 0x132   : > { %9911 = vst [vmem:[#allocation113_spill] sm:$0xff] %v7382_v9  ;;  %v7387_v17 = vsel %vm9913_vm7, %v1249_v63, %v9912_v44  ;;  %vm9915_vm9 = vmmov %vm9908_vm1  ;;  %v9930_v19 = vrot.slane %v7312_v8, 7 }
 0x133   : > { %9914 = vst [vmem:[#allocation50_spill] sm:$0xff] %v7387_v17  ;;  %v7391_v37 = vsel %vm9915_vm9, %v1248_v53, %v1249_v63  ;;  %2296 = vmatprep.mubr.bf16.mxu0 %v9917_v39  ;;  %vm9918_vm4 = vmmov %vm9908_vm1  ;;  %vm9921_vm1 = vcmp.eq.s32.totalorder %v9920_v28, 1  ;;  %vm9926_vm9 = vcmp.lt.s32.totalorder %v5678_v52, 7  ;;  %v7472_v63 = vpack.c.bf16 %v7083_v2, %v7034_v33  ;;  %v9946_v2 = vld [vmem:[#allocation74_spill] sm:$0xff]  ;;  %v10146_v39 = vld [vmem:[#allocation89_spill] sm:$0xff] }
 0x134   : > { %9916 = vst [vmem:[#allocation222_spill] sm:$0xff] %v7391_v37  ;;  %v7439_v49 = vsel %vm9918_vm4, %v9912_v44, %v1334_v1  ;;  %vm7445_vm7 = vmpackc.low %vm9923_vm6, %vm9921_vm1  ;;  %v7454_v4 = vsel %vm9926_vm9, %v1303_v40, %v1304_v26  ;;  %vm9931_vm1 = vcmp.lt.s32.totalorder %v5678_v52, 1  ;;  %v1269_v53 = vpack.c.bf16 %v7137_v12, %v7098_v13 }
 0x135   : > { %9919 = vst [vmem:[#allocation223_spill] sm:$0xff] %v7439_v49  ;;  %9927 = vst [vmem:[#allocation94_spill] sm:$0xff] %v7454_v4  ;;  %v7465_v28 = vsel %vm9931_vm1, %v1335_v29, %v9930_v19  ;;  %3907 = vmatprep.mubr.msk.bf16.mxu1 %vm7445_vm7, %v6664_v18  ;;  %2297 = vmatmul.mubr.bf16.gmra.mrb[52].mxu0 %v7472_v63  ;;  %v9950_v49 = vld [vmem:[#allocation131_spill] sm:$0xff]  ;;  %v9978_v4 = vld [vmem:[#allocation190_spill] sm:$0xff]  ;;  %v10164_v33 = vpack.c.bf16 %v6862_v10, %v6796_v47 }
 0x136   : > { %vm9928_vm4 = vmmov %vm9926_vm9  ;;  %9932 = vst [vmem:[#allocation224_spill] sm:$0xff] %v7465_v28  ;;  %2304 = vmatprep.mubr.bf16.mxu0 %v1269_v53 }
 0x137   : > { %v7459_v44 = vsel %vm9928_vm4, %v9874_v6, %v1303_v40  ;;  %9933 = vst [vmem:[#allocation225_spill] sm:$0xff] %v7472_v63  ;;  %v9934_v40 = vld [vmem:[#allocation61_spill] sm:$0xff]  ;;  %vm9935_vm6 = vmmov %vm9928_vm4  ;;  %v7491_v8 = vsel %vm9928_vm4, %v1304_v26, %v6673_v34  ;;  %v9964_v63 = vld [vmem:[#allocation83_spill] sm:$0xff] }
 0x138   : > { %9929 = vst [vmem:[#allocation98_spill] sm:$0xff] %v7459_v44  ;;  %v7482_v19 = vsel %vm9935_vm6, %v6673_v34, %v9934_v40  ;;  %vm9937_vm9 = vmmov %vm9931_vm1  ;;  %v10158_v44 = vld [vmem:[#allocation207_spill] sm:$0xff] }
 0x139   : > { %9936 = vst [vmem:[#allocation61_spill] sm:$0xff] %v7482_v19  ;;  %v7486_v55 = vsel %vm9937_vm9, %v1334_v1, %v1335_v29  ;;  %9939 = vst [vmem:[#allocation227_spill] sm:$0xff] %v7491_v8  ;;  %v1014_v29 = vrot.slane %v7046_v62, 7  ;;  %v9949_v8 = vld [vmem:[#allocation106_spill] sm:$0xff]  ;;  %v1015_v19 = vrot.slane %v9964_v63, 7 }
 0x13a   : > { %9938 = vst [vmem:[#allocation226_spill] sm:$0xff] %v7486_v55  ;;  %vm9940_vm1 = vmmov %vm9928_vm4  ;;  %v9962_v62 = vld [vmem:[#allocation114_spill] sm:$0xff] }
 0x13b   : > { %v7497_v6 = vsel %vm9940_vm1, %v1348_v25, %v1349_v11  ;;  %vm9942_vm6 = vmmov %vm9940_vm1  ;;  %v9965_v55 = vld [vmem:[#allocation138_spill] sm:$0xff] }
 0x13c   : > { %9941 = vst [vmem:[#allocation228_spill] sm:$0xff] %v7497_v6  ;;  %v7508_v26 = vsel %vm9942_vm6, %v6673_v34, %v1348_v25  ;;  %vm9944_vm9 = vmmov %vm9940_vm1  ;;  %v7525_v34 = vpack.c.bf16 %v6219_v30, %v9949_v8  ;;  %v1013_v25 = vrot.slane %v7012_v0, 7  ;;  %v9953_v6 = vld [vmem:[#allocation110_spill] sm:$0xff]  ;;  %v9959_v0 = vld [vmem:[#allocation177_spill] sm:$0xff] }
 0x13d   : > { %9943 = vst [vmem:[#allocation229_spill] sm:$0xff] %v7508_v26  ;;  %v7516_v40 = vsel %vm9944_vm9, %v1349_v11, %v1350_v32  ;;  %vm9947_vm4 = vmmov %vm9940_vm1  ;;  %v7532_v26 = vpack.c.bf16 %v6627_v27, %v9950_v49  ;;  %v9951_v11 = vld [vmem:[#allocation99_spill] sm:$0xff]  ;;  %vm9954_vm6 = vcmp.eq.s32.totalorder %v9953_v6, 1  ;;  %v7552_v27 = vpack.c.bf16 %v7118_v57, %v7102_v14  ;;  %v10010_v30 = vld [vmem:[#allocation172_spill] sm:$0xff] }
 0x13e   : > { %9945 = vst [vmem:[#allocation230_spill] sm:$0xff] %v7516_v40  ;;  %v7521_v1 = vsel %vm9947_vm4, %v1350_v32, %v9946_v2  ;;  %vm9952_vm1 = vcmp.eq.s32.totalorder %v9951_v11, 1  ;;  %vm9957_vm4 = vcmp.lt.s32.totalorder %v5678_v52, 1  ;;  %v9960_v53 = vrot.slane %v9959_v0, 7  ;;  %v9963_v40 = vld [vmem:[#allocation120_spill] sm:$0xff]  ;;  %v9966_v0 = vld [vmem:[#allocation151_spill] sm:$0xff]  ;;  %vm9975_vm8 = vmmov %vm9973_vm14 }
 0x13f   : > { %9948 = vst [vmem:[#allocation74_spill] sm:$0xff] %v7521_v1  ;;  %vm7538_vm9 = vmpackc.low %vm9954_vm6, %vm9952_vm1  ;;  %2040 = vmatmul.mubr.bf16.gmra.mrb[36].mxu1 %v7532_v26  ;;  %v7545_v32 = vsel %vm9957_vm4, %v1013_v25, %v1014_v29  ;;  %v1016_v11 = vrot.slane %v7114_v15, 7  ;;  %2305 = vmatmul.mubr.bf16.gmra.mrb[56].mxu0 %v7552_v27  ;;  %v7566_v1 = vpack.c.bf16 %v9963_v40, %v9962_v62  ;;  %v1017_v57 = vrot.slane %v9978_v4, 7  ;;  %v10009_v62 = vld [vmem:[#allocation167_spill] sm:$0xff]  ;;  %v4877_v2 = vld [vmem:[%s8971_s1 + $0x218] sm:$0xff]  }
 0x140   : > { %3910 = vmatprep.mubr.msk.bf16.mxu1 %vm7538_vm9, %v7525_v34  ;;  %9958 = vst [vmem:[#allocation106_spill] sm:$0xff] %v7552_v27  ;;  %vm9961_vm1 = vmmov %vm9957_vm4  ;;  %v7571_v28 = vpack.c.bf16 %v9966_v0, %v9965_v55  ;;  %v7591_v55 = vpack.c.bf16 %v7141_v3, %v7122_v46  ;;  %v7595_v63 = vsel %vm9975_vm8, %v1014_v29, %v1015_v19  ;;  %v1018_v0 = vrot.slane %v7150_v16, 7  ;;  %v9979_v3 = vld [vmem:[#allocation149_spill] sm:$0xff]  ;;  %v9980_v46 = vld [vmem:[#allocation160_spill] sm:$0xff] }
 0x141   : > { %v7558_v49 = vsel %vm9961_vm1, %v9960_v53, %v1013_v25  ;;  %v9967_v25 = vld [vmem:[#allocation116_spill] sm:$0xff]  ;;  %v9969_v53 = vld [vmem:[#allocation117_spill] sm:$0xff]  ;;  %v7584_v15 = vsel %vm9973_vm14, %v1015_v19, %v1016_v11  ;;  %v7608_v14 = vpack.c.bf16 %v9980_v46, %v9979_v3  ;;  %v9981_v19 = vld [vmem:[#allocation122_spill] sm:$0xff]  ;;  %v7628_v4 = vpack.c.bf16 %v7175_v54, %v7145_v61 }
 0x142   : > { %v1270_v6 = vpack.c.bf16 %v7545_v32, %v7558_v49  ;;  %vm9968_vm6 = vcmp.eq.s32.totalorder %v9967_v25, 1  ;;  %vm9970_vm4 = vcmp.eq.s32.totalorder %v9969_v53, 1  ;;  %9974 = vst [vmem:[#allocation131_spill] sm:$0xff] %v7591_v55  ;;  %v9976_v25 = vld [vmem:[#allocation4_spill] sm:$0xff]  ;;  %v9977_v53 = vld [vmem:[#allocation5_spill] sm:$0xff]  ;;  %vm9982_vm8 = vcmp.eq.s32.totalorder %v9981_v19, 1 }
 0x143   : > { %vm7577_vm1 = vmpackc.low %vm9970_vm4, %vm9968_vm6  ;;  %v7603_v27 = vpack.c.bf16 %v9977_v53, %v9976_v25  ;;  %v9983_v29 = vld [vmem:[#allocation123_spill] sm:$0xff]  ;;  %vm9987_vm4 = vcmp.lt.s32.totalorder %v5678_v52, 1  ;;  %9988 = vst [vmem:[#allocation99_spill] sm:$0xff] %v7628_v4  ;;  %v9993_v25 = vld [vmem:[#allocation194_spill] sm:$0xff] }
 0x144   : > { %2312 = vmatprep.mubr.bf16.mxu0 %v1270_v6  ;;  %v1271_v6 = vpack.c.bf16 %v7584_v15, %v7595_v63  ;;  %vm9984_vm14 = vcmp.eq.s32.totalorder %v9983_v29, 1  ;;  %v7621_v16 = vsel %vm9987_vm4, %v1017_v57, %v1018_v0  ;;  %vm9989_vm10 = vmmov %vm9987_vm4  ;;  %v9991_v29 = vld [vmem:[#allocation7_spill] sm:$0xff]  ;;  %v1019_v40 = vrot.slane %v9993_v25, 7  ;;  %v9994_v54 = vld [vmem:[#allocation157_spill] sm:$0xff] }
 0x145   : > { %vm7614_vm6 = vmpackc.low %vm9984_vm14, %vm9982_vm8  ;;  %v7632_v46 = vsel %vm9989_vm10, %v1016_v11, %v1017_v57  ;;  %v9995_v61 = vld [vmem:[#allocation165_spill] sm:$0xff]  ;;  %v9998_v11 = vld [vmem:[#allocation126_spill] sm:$0xff] }
 0x146   : > { %v1272_v3 = vpack.c.bf16 %v7621_v16, %v7632_v46  ;;  %v7645_v23 = vpack.c.bf16 %v9995_v61, %v9994_v54  ;;  %v9996_v57 = vld [vmem:[#allocation125_spill] sm:$0xff]  ;;  %vm9999_vm8 = vcmp.eq.s32.totalorder %v9998_v11, 1  ;;  %v7663_v25 = vld [vmem:[%s8971_s1 + $0x200] sm:$0xff]   ;;  %v7670_v61 = vpack.c.bf16 %v7254_v56, %v7199_v38 }
 0x147   : > { %2048 = vmatmul.mubr.bf16.gmra.mrb[40].mxu1 %v7571_v28  ;;  %2313 = vmatmul.mubr.bf16.gmra.mrb[60].mxu0 %v7591_v55  ;;  %v9992_v55 = vld [vmem:[#allocation9_spill] sm:$0xff]  ;;  %vm9997_vm10 = vcmp.eq.s32.totalorder %v9996_v57, 1  ;;  %v10004_v57 = vld [vmem:[#allocation200_spill] sm:$0xff] }
 0x148   : > { %3913 = vmatprep.mubr.msk.bf16.mxu1 %vm7577_vm1, %v7566_v1  ;;  %2320 = vmatprep.mubr.bf16.mxu0 %v1271_v6  ;;  %v9990_v6 = vld [vmem:[#allocation196_spill] sm:$0xff]  ;;  %v7640_v53 = vpack.c.bf16 %v9992_v55, %v9991_v29  ;;  %vm7651_vm14 = vmpackc.low %vm9999_vm8, %vm9997_vm10  ;;  %10002 = vst [vmem:[#allocation110_spill] sm:$0xff] %v7670_v61  ;;  %v1022_v11 = vrot.slane %v10004_v57, 7  ;;  %v10006_v55 = vld [vmem:[#allocation11_spill] sm:$0xff] }
 0x149   : > { %v1020_v19 = vrot.slane %v9990_v6, 7  ;;  %v10001_v31 = vsel %vm7651_vm14, 4294967295, %v10000_v31  ;;  %vm10003_vm10 = vmmov %vm9987_vm4  ;;  %4498 = vmatprep.subr.bf16.mxu1 %v7663_v25  ;;  %v10008_v56 = vld [vmem:[#allocation197_spill] sm:$0xff] }
 0x14a   : > { %v7674_v54 = vsel %vm10003_vm10, %v1018_v0, %v1019_v40  ;;  %v1021_v38 = vrot.slane %v10008_v56, 7  ;;  %v10011_v0 = vld [vmem:[#allocation49_spill] sm:$0xff] }
 0x14b   : > { %vm10012_vm8 = vcmp.eq.s32.totalorder %v10011_v0, 1  ;;  %v10022_v0 = vld [vmem:[#allocation13_spill] sm:$0xff] }
 0x14f   : > { %2056 = vmatmul.mubr.bf16.gmra.mrb[44].mxu1 %v7608_v14  ;;  %2321 = vmatmul.mubr.bf16.gmra.mrb[64].mxu0 %v7628_v4  ;;  %v10005_v4 = vld [vmem:[#allocation10_spill] sm:$0xff] }
 0x150   : > { %3916 = vmatprep.mubr.msk.bf16.mxu1 %vm7614_vm6, %v7603_v27  ;;  %2328 = vmatprep.mubr.bf16.mxu0 %v1272_v3  ;;  %v7658_v3 = vsel %vm9987_vm4, %v1019_v40, %v1020_v19  ;;  %v7683_v29 = vpack.c.bf16 %v10006_v55, %v10005_v4  ;;  %v7688_v40 = vpack.c.bf16 %v10010_v30, %v10009_v62  ;;  %vm10014_vm4 = vcmp.eq.s32.totalorder %v10013_v42, 1  ;;  %v10021_v62 = vld [vmem:[#allocation205_spill] sm:$0xff] }
 0x151   : > { %v1273_v6 = vpack.c.bf16 %v7658_v3, %v7674_v54  ;;  %vm7694_vm10 = vmpackc.low %vm10014_vm4, %vm10012_vm8  ;;  %v7708_v30 = vpack.c.bf16 %v7281_v58, %v7285_v41  ;;  %v1024_v57 = vrot.slane %v10021_v62, 7  ;;  %v10024_v4 = vld [vmem:[#allocation201_spill] sm:$0xff]  ;;  %v10025_v58 = vld [vmem:[#allocation179_spill] sm:$0xff]  ;;  %vm10033_vm4 = vcmp.lt.s32.totalorder %v5678_v52, 1 }
 0x152   : > { %10007 = vst [vmem:[#allocation177_spill] sm:$0xff] %v7683_v29  ;;  %v10016_v51 = vsel %vm7694_vm10, 4294967295, %v10015_v51  ;;  %v7725_v41 = vpack.c.bf16 %v7030_v20, %v10025_v58  ;;  %v7745_v20 = vpack.c.bf16 %v7317_v5, %v7294_v50  ;;  %v10036_v62 = vld [vmem:[#allocation87_spill] sm:$0xff]  ;;  %v7762_v5 = vpack.c.bf16 %v7098_v13, %v7050_v60 }
 0x153   : > { %10017 = vst [vmem:[#allocation83_spill] sm:$0xff] %v10016_v51  ;;  %10019 = vst [vmem:[#allocation138_spill] sm:$0xff] %v7708_v30  ;;  %v1023_v51 = vrot.slane %v10024_v4, 7  ;;  %v7782_v60 = vpack.c.bf16 %v7327_v48, %v7331_v59  ;;  %v10050_v48 = vld [vmem:[#allocation47_spill] sm:$0xff]  ;;  %v10052_v59 = vld [vmem:[#allocation66_spill] sm:$0xff] }
 0x154   : > { %10034 = vst [vmem:[#allocation116_spill] sm:$0xff] %v7745_v20 }
 0x155   : > { %10046 = vst [vmem:[#allocation117_spill] sm:$0xff] %v7782_v60 }
 0x157   : > { %2064 = vmatmul.mubr.bf16.gmra.mrb[48].mxu1 %v7645_v23  ;;  %2329 = vmatmul.mubr.bf16.gmra.mrb[68].mxu0 %v7670_v61  ;;  %v10023_v61 = vld [vmem:[#allocation12_spill] sm:$0xff] }
 0x158   : > { %3919 = vmatprep.mubr.msk.bf16.mxu1 %vm7651_vm14, %v7640_v53  ;;  %2336 = vmatprep.mubr.bf16.mxu0 %v1273_v6  ;;  %vm10018_vm14 = vcmp.lt.s32.totalorder %v5678_v52, 1  ;;  %v7720_v55 = vpack.c.bf16 %v10023_v61, %v10022_v0  ;;  %v10039_v0 = vld [vmem:[#allocation206_spill] sm:$0xff]  ;;  %v10063_v52 = vmov 0 }
 0x159   : > { %v7701_v6 = vsel %vm10018_vm14, %v1021_v38, %v1022_v11  ;;  %vm10020_vm3 = vmmov %vm10018_vm14 }
 0x15a   : > { %v7712_v56 = vsel %vm10020_vm3, %v1020_v19, %v1021_v38  ;;  %v10026_v38 = vld [vmem:[#allocation133_spill] sm:$0xff]  ;;  %v10028_v19 = vld [vmem:[#allocation134_spill] sm:$0xff] }
 0x15b   : > { %v1274_v42 = vpack.c.bf16 %v7701_v6, %v7712_v56  ;;  %vm10027_vm3 = vcmp.eq.s32.totalorder %v10026_v38, 1  ;;  %vm10029_vm14 = vcmp.eq.s32.totalorder %v10028_v19, 1  ;;  %v1026_v38 = vrot.slane %v10036_v62, 7  ;;  %v10037_v19 = vld [vmem:[#allocation17_spill] sm:$0xff]  ;;  %v10048_v62 = vld [vmem:[#allocation19_spill] sm:$0xff] }
 0x15c   : > { %vm7731_vm8 = vmpackc.low %vm10029_vm14, %vm10027_vm3 }
 0x15f   : > { %2072 = vmatmul.mubr.bf16.gmra.mrb[52].mxu1 %v7688_v40  ;;  %2337 = vmatmul.mubr.bf16.gmra.mrb[72].mxu0 %v7708_v30  ;;  %v10038_v30 = vld [vmem:[#allocation15_spill] sm:$0xff] }
 0x160   : > { %3922 = vmatprep.mubr.msk.bf16.mxu1 %vm7694_vm10, %v7683_v29  ;;  %2344 = vmatprep.mubr.bf16.mxu0 %v1274_v42  ;;  %v10030_v29 = vmov 0  ;;  %v7738_v42 = vsel %vm10033_vm4, %v1023_v51, %v1024_v57  ;;  %vm10035_vm10 = vmmov %vm10033_vm4  ;;  %v7757_v61 = vpack.c.bf16 %v10038_v30, %v10037_v19 }
 0x161   : > { %v10031_v29 = vsel %vm7731_vm8, 4294967295, %v10030_v29  ;;  %v7749_v58 = vsel %vm10035_vm10, %v1022_v11, %v1023_v51  ;;  %v10040_v51 = vld [vmem:[#allocation62_spill] sm:$0xff]  ;;  %v10042_v11 = vld [vmem:[#allocation137_spill] sm:$0xff] }
 0x162   : > { %10032 = vst [vmem:[#allocation151_spill] sm:$0xff] %v10031_v29  ;;  %v1275_v4 = vpack.c.bf16 %v7738_v42, %v7749_v58  ;;  %v1025_v29 = vrot.slane %v10039_v0, 7  ;;  %vm10041_vm10 = vcmp.eq.s32.totalorder %v10040_v51, 1  ;;  %vm10043_vm3 = vcmp.eq.s32.totalorder %v10042_v11, 1  ;;  %v10049_v51 = vld [vmem:[#allocation21_spill] sm:$0xff] }
 0x163   : > { %vm7768_vm14 = vmpackc.low %vm10043_vm3, %vm10041_vm10  ;;  %v7793_v11 = vpack.c.bf16 %v10049_v51, %v10048_v62  ;;  %vm10051_vm10 = vcmp.eq.s32.totalorder %v10050_v48, 1  ;;  %vm10053_vm3 = vcmp.eq.s32.totalorder %v10052_v59, 1  ;;  %v7818_v48 = vpack.c.bf16 %v7350_v22, %v7335_v36  ;;  %v10057_v59 = vld [vmem:[#allocation22_spill] sm:$0xff]  ;;  %v10070_v22 = vld [vmem:[#allocation156_spill] sm:$0xff] }
 0x164   : > { %v10081_v36 = vld [vmem:[#allocation44_spill] sm:$0xff] }
 0x165   : > { %10056 = vst [vmem:[#allocation190_spill] sm:$0xff] %v7818_v48 }
 0x167   : > { %2080 = vmatmul.mubr.bf16.gmra.mrb[56].mxu1 %v7725_v41  ;;  %2345 = vmatmul.mubr.bf16.gmra.mrb[76].mxu0 %v7745_v20  ;;  %v7797_v20 = vpack.c.bf16 %v7558_v49, %v7137_v12  ;;  %v10058_v49 = vld [vmem:[#allocation23_spill] sm:$0xff] }
 0x168   : > { %3925 = vmatprep.mubr.msk.bf16.mxu1 %vm7731_vm8, %v7720_v55  ;;  %2352 = vmatprep.mubr.bf16.mxu0 %v1275_v4  ;;  %v7775_v4 = vsel %vm10033_vm4, %v1025_v29, %v1026_v38  ;;  %vm10047_vm8 = vmmov %vm10033_vm4 }
 0x169   : > { %v7786_v13 = vsel %vm10047_vm8, %v1024_v57, %v1025_v29  ;;  %vm7803_vm8 = vmpackc.low %vm10053_vm3, %vm10051_vm10  ;;  %v7811_v57 = vsel %vm10033_vm4, %v1026_v38, %v9907_v21  ;;  %v7829_v21 = vpack.c.bf16 %v7595_v63, %v7545_v32  ;;  %v10059_v38 = vld [vmem:[#allocation69_spill] sm:$0xff]  ;;  %v1278_v32 = vpack.c.bf16 %v7387_v17, %v7391_v37 }
 0x16a   : > { %v1276_v0 = vpack.c.bf16 %v7775_v4, %v7786_v13  ;;  %v1277_v12 = vpack.c.bf16 %v7375_v24, %v7811_v57  ;;  %vm10060_vm10 = vcmp.eq.s32.totalorder %v10059_v38, 1  ;;  %v10066_v63 = vld [vmem:[#allocation25_spill] sm:$0xff]  ;;  %v10068_v24 = vld [vmem:[#allocation155_spill] sm:$0xff] }
 0x16f   : > { %2088 = vmatmul.mubr.bf16.gmra.mrb[60].mxu1 %v7762_v5  ;;  %2353 = vmatmul.mubr.bf16.gmra.mrb[80].mxu0 %v7782_v60  ;;  %v10061_v60 = vld [vmem:[#allocation147_spill] sm:$0xff] }
 0x170   : > { %3928 = vmatprep.mubr.msk.bf16.mxu1 %vm7768_vm14, %v7757_v61  ;;  %2360 = vmatprep.mubr.bf16.mxu0 %v1276_v0  ;;  %v7825_v0 = vpack.c.bf16 %v10058_v49, %v10057_v59  ;;  %vm10062_vm3 = vcmp.eq.s32.totalorder %v10061_v60, 1  ;;  %v10067_v60 = vld [vmem:[#allocation26_spill] sm:$0xff]  ;;  %v10083_v49 = vld [vmem:[#allocation76_spill] sm:$0xff] }
 0x171   : > { %vm7835_vm4 = vmpackc.low %vm10062_vm3, %vm10060_vm10  ;;  %v7852_v38 = vpack.c.bf16 %v10067_v60, %v10066_v63  ;;  %vm10069_vm10 = vcmp.eq.s32.totalorder %v10068_v24, 1  ;;  %vm10071_vm3 = vcmp.eq.s32.totalorder %v10070_v22, 1  ;;  %v10079_v24 = vld [vmem:[#allocation27_spill] sm:$0xff]  ;;  %v10080_v22 = vld [vmem:[#allocation28_spill] sm:$0xff] }
 0x172   : > { %v10064_v52 = vsel %vm7835_vm4, 4294967295, %v10063_v52  ;;  %v7878_v37 = vpack.c.bf16 %v10080_v22, %v10079_v24  ;;  %v10082_v60 = vld [vmem:[#allocation48_spill] sm:$0xff] }
 0x173   : > { %v3951_v63 = vpack.c.bf16 %v10082_v60, %v10081_v36  ;;  %v10085_v59 = vld [vmem:[#allocation164_spill] sm:$0xff]  ;;  %v4885_v36 = vld [vmem:[%s8971_s1 + $0x180] sm:$0xff]  }
 0x174   : > { %v10094_v60 = vld [vmem:[#allocation24_spill] sm:$0xff] }
 0x177   : > { %2096 = vmatmul.mubr.bf16.gmra.mrb[64].mxu1 %v7797_v20  ;;  %2361 = vmatmul.mubr.bf16.gmra.mrb[84].mxu0 %v7818_v48  ;;  %v7856_v48 = vpack.c.bf16 %v7632_v46, %v7584_v15  ;;  %v10076_v15 = vld [vmem:[#allocation80_spill] sm:$0xff]  ;;  %v10077_v46 = vld [vmem:[#allocation71_spill] sm:$0xff] }
 0x178   : > { %3931 = vmatprep.mubr.msk.bf16.mxu1 %vm7803_vm8, %v7793_v11  ;;  %2368 = vmatprep.mubr.bf16.mxu0 %v1277_v12  ;;  %v7845_v12 = vpack.c.bf16 %v7382_v9, %v7354_v45  ;;  %v10072_v9 = vmov 0  ;;  %v10078_v17 = vpack.c.bf16 %v10076_v15, %v10077_v46  ;;  %v7882_v45 = vpack.c.bf16 %v7674_v54, %v7621_v16  ;;  %v10090_v16 = vld [vmem:[#allocation90_spill] sm:$0xff]  ;;  %v10097_v46 = vld [vmem:[#allocation175_spill] sm:$0xff] }
 0x179   : > { %v10091_v54 = vld [vmem:[#allocation82_spill] sm:$0xff]  ;;  %v7912_v15 = vpack.c.bf16 %v7712_v56, %v7658_v3  ;;  %v4886_v3 = vld [vmem:[%s8971_s1 + $0x188] sm:$0xff]  }
 0x17a   : > { %10065 = vst [vmem:[#allocation149_spill] sm:$0xff] %v7845_v12  ;;  %v10111_v56 = vld [vmem:[#allocation183_spill] sm:$0xff] }
 0x17f   : > { %2104 = vmatmul.mubr.bf16.gmra.mrb[68].mxu1 %v7829_v21  ;;  %2369 = vmatmul.mubr.bf16.gmra.mrb[88].mxu0 %v7845_v12 }
 0x180   : > { %3934 = vmatprep.mubr.msk.bf16.mxu1 %vm7835_vm4, %v7825_v0  ;;  %2376 = vmatprep.mubr.bf16.mxu0 %v1278_v32  ;;  %vm7862_vm4 = vmpackc.low %vm10071_vm3, %vm10069_vm10  ;;  %v10074_v32 = vld [vmem:[#allocation124_spill] sm:$0xff]  ;;  %vm10084_vm10 = vcmp.eq.s32.totalorder %v10083_v49, 1  ;;  %vm10086_vm3 = vcmp.eq.s32.totalorder %v10085_v59, 1  ;;  %v10092_v59 = vpack.c.bf16 %v10090_v16, %v10091_v54  ;;  %v10093_v49 = vld [vmem:[#allocation31_spill] sm:$0xff] }
 0x181   : > { %v10073_v9 = vsel %vm7862_vm4, 4294967295, %v10072_v9  ;;  %v10075_v12 = vpack.c.bf16 %v10074_v32, %v7299_v7  ;;  %v7908_v32 = vpack.c.bf16 %v10094_v60, %v10093_v49  ;;  %v10102_v16 = vld [vmem:[#allocation54_spill] sm:$0xff]  ;;  %v10107_v7 = vld [vmem:[#allocation65_spill] sm:$0xff]  ;;  %v4887_v60 = vld [vmem:[%s8971_s1 + $0x190] sm:$0xff]  }
 0x182   : > { %v10123_v49 = vld [vmem:[#allocation103_spill] sm:$0xff] }
 0x187   : > { %2112 = vmatmul.mubr.bf16.gmra.mrb[72].mxu1 %v7856_v48  ;;  %2377 = vmatmul.mubr.bf16.gmra.mrb[92].mxu0 %v10075_v12 }
 0x188   : > { %3937 = vmatprep.mubr.msk.bf16.mxu1 %vm7862_vm4, %v7852_v38  ;;  %2417 = vmatprep.mubr.bf16.mxu0 %v10078_v17  ;;  %vm7890_vm4 = vmpackc.low %vm10086_vm3, %vm10084_vm10  ;;  %vm10098_vm10 = vcmp.eq.s32.totalorder %v10097_v46, 1 }
 0x18f   : > { %2120 = vmatmul.mubr.bf16.gmra.mrb[76].mxu1 %v7882_v45  ;;  %3952 = vmatmul.mubr.msk.bf16.vlgmr.msra.gmra.mrb[0].mxu0 %vm5732_vm12, %v3951_v63  ;;  %v10095_v63 = vld [vmem:[#allocation174_spill] sm:$0xff] }
 0x190   : > { %3940 = vmatprep.mubr.msk.bf16.mxu1 %vm7890_vm4, %v7878_v37  ;;  %2611 = vmatpush1.bf16.msra.mxu0 %v4885_v36  ;;  %vm10096_vm12 = vcmp.eq.s32.totalorder %v10095_v63, 1  ;;  %v10101_v36 = vld [vmem:[#allocation52_spill] sm:$0xff] }
 0x191   : > { %2425 = vmatprep.mubr.bf16.mxu0 %v10092_v59  ;;  %2612 = vmatprep.subr.bf16.mxu0 %v9363_v35  ;;  %vm7919_vm3 = vmpackc.low %vm10098_vm10, %vm10096_vm12  ;;  %v3954_v54 = vpack.c.bf16 %v10102_v16, %v10101_v36  ;;  %v10104_v59 = vld [vmem:[#allocation101_spill] sm:$0xff]  ;;  %v10105_v63 = vld [vmem:[#allocation92_spill] sm:$0xff]  ;;  %vm10112_vm12 = vcmp.eq.s32.totalorder %v10111_v56, 1 }
 0x192   : > { %v10106_v46 = vpack.c.bf16 %v10104_v59, %v10105_v63  ;;  %v10108_v36 = vld [vmem:[#allocation29_spill] sm:$0xff] }
 0x193   : > { %v7940_v16 = vpack.c.bf16 %v10108_v36, %v10107_v7  ;;  %v10115_v63 = vld [vmem:[#allocation57_spill] sm:$0xff]  ;;  %v10122_v7 = vld [vmem:[#allocation34_spill] sm:$0xff] }
 0x194   : > { %2613 = vmatpush1.bf16.msra.mxu0 %v4886_v3  ;;  %v7947_v3 = vpack.c.bf16 %v7749_v58, %v7701_v6  ;;  %v10117_v6 = vld [vmem:[#allocation132_spill] sm:$0xff]  ;;  %v7973_v22 = vpack.c.bf16 %v10123_v49, %v10122_v7  ;;  %v10127_v58 = vld [vmem:[#allocation109_spill] sm:$0xff] }
 0x195   : > { %2614 = vmatprep.subr.bf16.mxu0 %v9363_v35  ;;  %v10137_v49 = vld [vmem:[#allocation144_spill] sm:$0xff] }
 0x197   : > { %2128 = vmatmul.mubr.bf16.gmra.mrb[80].mxu1 %v7912_v15  ;;  %3955 = vmatmul.mubr.msk.bf16.gmra.mrb[4].mxu0 %vm5820_vm2, %v3954_v54  ;;  %v10109_v54 = vld [vmem:[#allocation182_spill] sm:$0xff] }
 0x198   : > { %3943 = vmatprep.mubr.msk.bf16.mxu1 %vm7919_vm3, %v7908_v32  ;;  %2433 = vmatprep.mubr.bf16.mxu0 %v10106_v46  ;;  %vm10110_vm2 = vcmp.eq.s32.totalorder %v10109_v54, 1  ;;  %v10116_v46 = vld [vmem:[#allocation58_spill] sm:$0xff]  ;;  %v10120_v54 = vld [vmem:[#allocation108_spill] sm:$0xff] }
 0x199   : > { %2615 = vmatpush1.bf16.msra.mxu0 %v4887_v60  ;;  %vm7954_vm10 = vmpackc.low %vm10112_vm12, %vm10110_vm2  ;;  %v3957_v36 = vpack.c.bf16 %v10116_v46, %v10115_v63  ;;  %v10119_v60 = vld [vmem:[#allocation118_spill] sm:$0xff]  ;;  %v10124_v63 = vld [vmem:[#allocation35_spill] sm:$0xff]  ;;  %v7978_v46 = vpack.c.bf16 %v7786_v13, %v7738_v42 }
 0x19a   : > { %2616 = vmatprep.subr.bf16.mxu0 %v9363_v35  ;;  %v10121_v56 = vpack.c.bf16 %v10119_v60, %v10120_v54  ;;  %v10131_v60 = vld [vmem:[#allocation64_spill] sm:$0xff]  ;;  %v10132_v54 = vld [vmem:[#allocation67_spill] sm:$0xff]  ;;  %v10134_v13 = vld [vmem:[#allocation121_spill] sm:$0xff] }
 0x19b   : > { %v10133_v42 = vld [vmem:[#allocation140_spill] sm:$0xff] }
 0x19d   : > { %2617 = vmatpush1.bf16.msra.mxu0 %v10117_v6  ;;  %v10125_v6 = vld [vmem:[#allocation191_spill] sm:$0xff] }
 0x19e   : > { %2618 = vmatprep.subr.bf16.mxu0 %v9363_v35  ;;  %vm10126_vm2 = vcmp.eq.s32.totalorder %v10125_v6, 1 }
 0x19f   : > { %2136 = vmatmul.mubr.bf16.gmra.mrb[84].mxu1 %v7947_v3  ;;  %3958 = vmatmul.mubr.msk.bf16.gmra.mrb[8].mxu0 %vm5875_vm5, %v3957_v36  ;;  %vm10128_vm5 = vcmp.eq.s32.totalorder %v10127_v58, 1  ;;  %v10253_v36 = vld [vmem:[#allocation28_spill] sm:$0xff] }
 0x1a0   : > { %3946 = vmatprep.mubr.msk.bf16.mxu1 %vm7954_vm10, %v7940_v16  ;;  %2441 = vmatprep.mubr.bf16.mxu0 %v10121_v56  ;;  %vm7985_vm12 = vmpackc.low %vm10128_vm5, %vm10126_vm2  ;;  %v3960_v56 = vpack.c.bf16 %v10132_v54, %v10131_v60  ;;  %v8004_v60 = vpack.c.bf16 %v7811_v57, %v7775_v4  ;;  %v10138_v54 = vld [vmem:[#allocation77_spill] sm:$0xff]  ;;  %v10144_v57 = vld [vmem:[#allocation162_spill] sm:$0xff]  ;;  %vm10221_vm5 = vnez %v10073_v9 }
 0x1a1   : > { %2619 = vmatpush1.bf16.msra.mxu0 %v10124_v63  ;;  %v10135_v63 = vld [vmem:[#allocation129_spill] sm:$0xff]  ;;  %v10154_v4 = vld [vmem:[#allocation187_spill] sm:$0xff] }
 0x1a2   : > { %2620 = vmatprep.subr.bf16.mxu0 %v9363_v35  ;;  %v1314_v6 = vpack.c.bf16 %v10135_v63, %v10134_v13  ;;  %v10140_v13 = vld [vmem:[#allocation153_spill] sm:$0xff] }
 0x1a5   : > { %2621 = vmatpush1.bf16.msra.mxu0 %v10133_v42  ;;  %v10139_v42 = vld [vmem:[#allocation79_spill] sm:$0xff] }
 0x1a6   : > { %2622 = vmatprep.subr.bf16.mxu0 %v9363_v35  ;;  %v3963_v7 = vpack.c.bf16 %v10139_v42, %v10138_v54  ;;  %v10147_v54 = vld [vmem:[#allocation171_spill] sm:$0xff]  ;;  %v10148_v42 = vld [vmem:[#allocation36_spill] sm:$0xff] }
 0x1a7   : > { %2144 = vmatmul.mubr.bf16.gmra.mrb[88].mxu1 %v7978_v46  ;;  %3961 = vmatmul.mubr.msk.bf16.gmra.mrb[12].mxu0 %vm5932_vm15, %v3960_v56  ;;  %v10142_v56 = vld [vmem:[#allocation135_spill] sm:$0xff] }
 0x1a8   : > { %3949 = vmatprep.mubr.msk.bf16.mxu1 %vm7985_vm12, %v7973_v22  ;;  %2449 = vmatprep.mubr.bf16.mxu0 %v1314_v6  ;;  %v4875_v6 = vld [vmem:[%s8971_s1 + $0x208] sm:$0xff]  }
 0x1a9   : > { %2623 = vmatpush1.bf16.msra.mxu0 %v10137_v49  ;;  %v10141_v49 = vld [vmem:[#allocation128_spill] sm:$0xff] }
 0x1aa   : > { %2624 = vmatprep.subr.bf16.mxu0 %v9363_v35  ;;  %v1315_v63 = vpack.c.bf16 %v10142_v56, %v10141_v49  ;;  %v10153_v56 = vld [vmem:[#allocation100_spill] sm:$0xff] }
 0x1ad   : > { %2625 = vmatpush1.bf16.msra.mxu0 %v10140_v13  ;;  %v10149_v13 = vld [vmem:[#allocation33_spill] sm:$0xff] }
 0x1ae   : > { %2626 = vmatprep.subr.bf16.mxu0 %v9363_v35  ;;  %v1316_v49 = vpack.c.bf16 %v10149_v13, %v10148_v42  ;;  %v10161_v42 = vld [vmem:[#allocation215_spill] sm:$0xff]  ;;  %v4880_v13 = vld [vmem:[%s8971_s1 + $0x230] sm:$0xff]  }
 0x1af   : > { %2152 = vmatmul.mubr.bf16.gmra.mrb[92].mxu1 %v8004_v60  ;;  %3964 = vmatmul.mubr.msk.bf16.gmra.mrb[16].mxu0 %vm5966_vm11, %v3963_v7  ;;  %v4876_v7 = vld [vmem:[%s8971_s1 + $0x210] sm:$0xff]   ;;  %vm10167_vm11 = vnez %v10001_v31  ;;  %v10173_v31 = vld [vmem:[#allocation111_spill] sm:$0xff] }
 0x1b0   : > { %4042 = vmatprep.mubr.msk.bf16.mxu1 %vm7445_vm7, %v6664_v18  ;;  %2457 = vmatprep.mubr.bf16.mxu0 %v1315_v63  ;;  %v10145_v18 = vld [vmem:[#allocation86_spill] sm:$0xff] }
 0x1b1   : > { %2627 = vmatpush1.bf16.msra.mxu0 %v10144_v57  ;;  %v3966_v58 = vpack.c.bf16 %v10146_v39, %v10145_v18  ;;  %v4878_v57 = vld [vmem:[%s8971_s1 + $0x220] sm:$0xff]   ;;  %v10156_v18 = vld [vmem:[#allocation152_spill] sm:$0xff] }
 0x1b2   : > { %2628 = vmatprep.subr.bf16.mxu0 %v9363_v35 }
 0x1b5   : > { %2629 = vmatpush1.bf16.msra.mxu0 %v10147_v54 }
 0x1b6   : > { %2630 = vmatprep.subr.bf16.mxu0 %v9363_v35 }
 0x1b7   : > { %2691 = vmatmul.mubr.bf16.vlgmr.msra.gmra.mrb[96].mxu1 %v7532_v26  ;;  %3967 = vmatmul.mubr.msk.bf16.gmra.mrb[20].mxu0 %vm6023_vm13, %v3966_v58  ;;  %v10159_v58 = vld [vmem:[#allocation102_spill] sm:$0xff]  ;;  %v10162_v26 = vld [vmem:[#allocation96_spill] sm:$0xff] }
 0x1b8   : > { %4045 = vmatprep.mubr.msk.bf16.mxu1 %vm7538_vm9, %v7525_v34  ;;  %4499 = vmatpush3.bf16.msra.mxu1 %v7663_v25  ;;  %v10151_v34 = vld [vmem:[#allocation181_spill] sm:$0xff] }
 0x1b9   : > { %4500 = vmatprep.subr.bf16.mxu1 %v4875_v6  ;;  %2465 = vmatprep.mubr.bf16.mxu0 %v1316_v49  ;;  %v10152_v25 = vld [vmem:[#allocation97_spill] sm:$0xff]  ;;  %v8075_v49 = vpop.f32.mrb[0].mxu1 }
 0x1ba   : > { %2631 = vmatpush1.bf16.msra.mxu0 %v10151_v34  ;;  %v3969_v63 = vpack.c.bf16 %v10153_v56, %v10152_v25  ;;  %v4881_v25 = vld [vmem:[%s8971_s1 + $0x238] sm:$0xff]  }
 0x1bb   : > { %2632 = vmatprep.subr.bf16.mxu0 %v9363_v35  ;;  %v10166_v56 = vld [vmem:[#allocation105_spill] sm:$0xff] }
 0x1bc   : > { %4501 = vmatpush3.bf16.msra.mxu1 %v4875_v6  ;;  %v10155_v6 = vld [vmem:[#allocation141_spill] sm:$0xff] }
 0x1bd   : > { %4502 = vmatprep.subr.bf16.mxu1 %v4876_v7  ;;  %v1317_v39 = vpack.c.bf16 %v10156_v18, %v10155_v6 }
 0x1be   : > { %2633 = vmatpush1.bf16.msra.mxu0 %v10154_v4  ;;  %v10168_v4 = vld [vmem:[#allocation107_spill] sm:$0xff] }
 0x1bf   : > { %2699 = vmatmul.mubr.bf16.gmra.mrb[100].mxu1 %v7571_v28  ;;  %2634 = vmatprep.subr.bf16.mxu0 %v9363_v35  ;;  %vm10169_vm13 = vnez %v10168_v4 }
 0x1c0   : > { %4048 = vmatprep.mubr.msk.bf16.mxu1 %vm7577_vm1, %v7566_v1  ;;  %4503 = vmatpush3.bf16.msra.mxu1 %v4876_v7  ;;  %v4879_v1 = vld [vmem:[%s8971_s1 + $0x228] sm:$0xff]   ;;  %v10160_v7 = vld [vmem:[#allocation104_spill] sm:$0xff] }
 0x1c1   : > { %4504 = vmatprep.subr.bf16.mxu1 %v4877_v2  ;;  %3970 = vmatmul.mubr.msk.bf16.gmra.mrb[24].mxu0 %vm6062_vm0, %v3969_v63  ;;  %v3972_v54 = vpack.c.bf16 %v10160_v7, %v10159_v58  ;;  %vm10163_vm0 = vnez %v10162_v26  ;;  %v3975_v63 = vpack.c.bf16 %v9949_v8, %v10166_v56  ;;  %v10180_v7 = vld [vmem:[#allocation173_spill] sm:$0xff] }
 0x1c2   : > { %2473 = vmatprep.mubr.bf16.mxu0 %v1317_v39  ;;  %2635 = vmatpush1.bf16.msra.mxu0 %v10158_v44  ;;  %v10176_v39 = vld [vmem:[#allocation83_spill] sm:$0xff] }
 0x1c3   : > { %2636 = vmatprep.subr.bf16.mxu0 %v9363_v35  ;;  %vm10177_vm15 = vnez %v10176_v39 }
 0x1c4   : > { %4505 = vmatpush3.bf16.msra.mxu1 %v4877_v2  ;;  %v10165_v2 = vld [vmem:[#allocation221_spill] sm:$0xff] }
 0x1c5   : > { %4506 = vmatprep.subr.bf16.mxu1 %v4878_v57 }
 0x1c6   : > { %2637 = vmatpush1.bf16.msra.mxu0 %v10161_v42 }
 0x1c7   : > { %2707 = vmatmul.mubr.bf16.gmra.mrb[104].mxu1 %v7608_v14  ;;  %2638 = vmatprep.subr.bf16.mxu0 %v9363_v35  ;;  %v1971_v14 = vpop.f32.mrb[1].mxu1 }
 0x1c8   : > { %4051 = vmatprep.mubr.msk.bf16.mxu1 %vm7614_vm6, %v7603_v27  ;;  %4507 = vmatpush3.bf16.msra.mxu1 %v4878_v57  ;;  %v8080_v34 = vpop.f32.mrb[2].mxu1  ;;  %v10171_v57 = vld [vmem:[#allocation154_spill] sm:$0xff]  ;;  %v10184_v14 = vld [vmem:[#allocation4_spill] sm:$0xff] }
 0x1c9   : > { %4508 = vmatprep.subr.bf16.mxu1 %v4879_v1  ;;  %3973 = vmatmul.mubr.msk.bf16.gmra.mrb[28].mxu0 %vm10163_vm0, %v3972_v54  ;;  %v1974_v27 = vpop.f32.mrb[3].mxu1  ;;  %v10181_v54 = vld [vmem:[#allocation163_spill] sm:$0xff] }
 0x1ca   : > { %2481 = vmatprep.mubr.bf16.mxu0 %v10164_v33  ;;  %2639 = vmatpush1.bf16.msra.mxu0 %v10165_v2  ;;  %v8097_v47 = vpop.f32.mrb[4].mxu1  ;;  %v10182_v42 = vpack.c.bf16 %v10180_v7, %v10181_v54  ;;  %v10185_v33 = vld [vmem:[#allocation151_spill] sm:$0xff]  ;;  %v10206_v54 = vld [vmem:[#allocation18_spill] sm:$0xff] }
 0x1cb   : > { %2640 = vmatprep.subr.bf16.mxu0 %v9363_v35  ;;  %v1979_v10 = vpop.f32.mrb[5].mxu1  ;;  %vm10186_vm9 = vnez %v10185_v33  ;;  %v10213_v33 = vld [vmem:[#allocation13_spill] sm:$0xff] }
 0x1cc   : > { %4509 = vmatpush3.bf16.msra.mxu1 %v4879_v1  ;;  %v8101_v35 = vpop.f32.mrb[6].mxu1  ;;  %v10178_v1 = vld [vmem:[#allocation119_spill] sm:$0xff]  ;;  %v10192_v10 = vld [vmem:[#allocation168_spill] sm:$0xff] }
 0x1cd   : > { %4510 = vmatprep.subr.bf16.mxu1 %v4880_v13  ;;  %v1982_v8 = vpop.f32.mrb[7].mxu1  ;;  %vm10179_vm7 = vnez %v10178_v1  ;;  %v10204_v1 = vld [vmem:[#allocation10_spill] sm:$0xff] }
 0x1ce   : > { %2641 = vmatpush1.bf16.msra.mxu0 %v7415_v43  ;;  %v10175_v43 = vld [vmem:[#allocation177_spill] sm:$0xff]  ;;  %v8112_v28 = vpop.f32.mrb[8].mxu1 }
 0x1cf   : > { %2715 = vmatmul.mubr.bf16.gmra.mrb[108].mxu1 %v7645_v23  ;;  %v10170_v23 = vld [vmem:[#allocation166_spill] sm:$0xff]  ;;  %v1987_v44 = vpop.f32.mrb[9].mxu1 }
 0x1d0   : > { %4054 = vmatprep.mubr.msk.bf16.mxu1 %vm10167_vm11, %v7640_v53  ;;  %4511 = vmatpush3.bf16.msra.mxu1 %v4880_v13  ;;  %v10172_v6 = vpack.c.bf16 %v10170_v23, %v10171_v57  ;;  %v10174_v53 = vld [vmem:[#allocation114_spill] sm:$0xff]  ;;  %v8116_v58 = vpop.f32.mrb[10].mxu1  ;;  %v10183_v13 = vld [vmem:[#allocation120_spill] sm:$0xff]  ;;  %v10194_v23 = vld [vmem:[#allocation5_spill] sm:$0xff] }
 0x1d1   : > { %4512 = vmatprep.subr.bf16.mxu1 %v4881_v25  ;;  %3976 = vmatmul.mubr.msk.bf16.gmra.mrb[32].mxu0 %vm10169_vm13, %v3975_v63  ;;  %v3978_v18 = vpack.c.bf16 %v10174_v53, %v10173_v31  ;;  %v3981_v26 = vpack.c.bf16 %v10184_v14, %v10183_v13  ;;  %v10191_v63 = vld [vmem:[#allocation180_spill] sm:$0xff]  ;;  %v10195_v57 = vld [vmem:[#allocation7_spill] sm:$0xff]  ;;  %v10197_v31 = vld [vmem:[#allocation14_spill] sm:$0xff] }
 0x1d2   : > { %2489 = vmatprep.mubr.bf16.mxu0 %v10172_v6  ;;  %v10193_v4 = vpack.c.bf16 %v10191_v63, %v10192_v10  ;;  %v3984_v6 = vpack.c.bf16 %v10195_v57, %v10194_v23  ;;  %vm10198_vm6 = vnez %v10197_v31  ;;  %v10203_v44 = vld [vmem:[#allocation9_spill] sm:$0xff]  ;;  %v10210_v13 = vld [vmem:[#allocation188_spill] sm:$0xff]  ;;  %v10224_v31 = vld [vmem:[#allocation199_spill] sm:$0xff] }
 0x1d3   : > { %v3987_v7 = vpack.c.bf16 %v10204_v1, %v10203_v44  ;;  %v10217_v10 = vld [vmem:[#allocation193_spill] sm:$0xff]  ;;  %v10220_v23 = vld [vmem:[#allocation12_spill] sm:$0xff] }
 0x1d4   : > { %4513 = vmatpush3.bf16.msra.mxu1 %v4881_v25  ;;  %v10188_v25 = vld [vmem:[#allocation6_spill] sm:$0xff]  ;;  %v3993_v57 = vpack.c.bf16 %v10037_v19, %v10220_v23  ;;  %v3996_v19 = vpack.c.bf16 %v10048_v62, %v10038_v30  ;;  %v10229_v44 = vld [vmem:[#allocation213_spill] sm:$0xff]  ;;  %v10230_v1 = vld [vmem:[#allocation208_spill] sm:$0xff] }
 0x1d5   : > { %vm10189_vm1 = vnez %v10188_v25  ;;  %v10215_v25 = vld [vmem:[#allocation53_spill] sm:$0xff]  ;;  %v10232_v30 = vld [vmem:[#allocation22_spill] sm:$0xff] }
 0x1d6   : > { %vm10216_vm2 = vnez %v10215_v25  ;;  %v3999_v62 = vpack.c.bf16 %v10232_v30, %v10049_v51  ;;  %v10238_v51 = vld [vmem:[#allocation23_spill] sm:$0xff]  ;;  %v10243_v25 = vld [vmem:[#allocation216_spill] sm:$0xff] }
 0x1d7   : > { %2723 = vmatmul.mubr.bf16.gmra.mrb[112].mxu1 %v7688_v40  ;;  %v1990_v40 = vpop.f32.mrb[11].mxu1 }
 0x1d8   : > { %4057 = vmatprep.mubr.msk.bf16.mxu1 %vm10177_vm15, %v10175_v43  ;;  %v8127_v27 = vpop.f32.mrb[12].mxu1  ;;  %v10201_v43 = vld [vmem:[#allocation184_spill] sm:$0xff]  ;;  %v10209_v40 = vld [vmem:[#allocation189_spill] sm:$0xff] }
 0x1d9   : > { %3979 = vmatmul.mubr.msk.bf16.gmra.mrb[36].mxu0 %vm10179_vm7, %v3978_v18  ;;  %10187 = vst [vmem:[#allocation160_spill] sm:$0xff] %v8127_v27  ;;  %v1995_v2 = vpop.f32.mrb[13].mxu1  ;;  %v10200_v18 = vld [vmem:[#allocation186_spill] sm:$0xff]  ;;  %v10211_v14 = vpack.c.bf16 %v10209_v40, %v10210_v13  ;;  %v10236_v13 = vld [vmem:[#allocation212_spill] sm:$0xff] }
 0x1da   : > { %2497 = vmatprep.mubr.bf16.mxu0 %v10182_v42  ;;  %v8131_v56 = vpop.f32.mrb[14].mxu1  ;;  %v10202_v39 = vpack.c.bf16 %v10200_v18, %v10201_v43  ;;  %v10225_v18 = vld [vmem:[#allocation195_spill] sm:$0xff]  ;;  %v10235_v40 = vld [vmem:[#allocation214_spill] sm:$0xff] }
 0x1db   : > { %10190 = vst [vmem:[#allocation122_spill] sm:$0xff] %v8131_v56  ;;  %v10226_v43 = vpack.c.bf16 %v10224_v31, %v10225_v18  ;;  %v10252_v31 = vld [vmem:[#allocation3_spill] sm:$0xff]  ;;  %v10361_v56 = vld [vmem:[#allocation230_spill] sm:$0xff] }
 0x1df   : > { %2731 = vmatmul.mubr.bf16.gmra.mrb[116].mxu1 %v7725_v41  ;;  %v1998_v41 = vpop.f32.mrb[15].mxu1 }
 0x1e0   : > { %4060 = vmatprep.mubr.msk.bf16.mxu1 %vm10186_vm9, %v7720_v55  ;;  %v8142_v55 = vpop.f32.mrb[16].mxu1 }
 0x1e1   : > { %3982 = vmatmul.mubr.msk.bf16.gmra.mrb[40].mxu0 %vm10189_vm1, %v3981_v26  ;;  %10196 = vst [vmem:[#allocation123_spill] sm:$0xff] %v8142_v55  ;;  %v2003_v8 = vpop.f32.mrb[17].mxu1  ;;  %v10212_v26 = vld [vmem:[#allocation11_spill] sm:$0xff] }
 0x1e2   : > { %2505 = vmatprep.mubr.bf16.mxu0 %v10193_v4  ;;  %v8146_v53 = vpop.f32.mrb[18].mxu1  ;;  %v3990_v2 = vpack.c.bf16 %v10213_v33, %v10212_v26  ;;  %v10218_v4 = vld [vmem:[#allocation192_spill] sm:$0xff]  ;;  %v10240_v33 = vld [vmem:[#allocation158_spill] sm:$0xff] }
 0x1e3   : > { %10199 = vst [vmem:[#allocation196_spill] sm:$0xff] %v8146_v53  ;;  %v10219_v41 = vpack.c.bf16 %v10217_v10, %v10218_v4  ;;  %v10245_v4 = vld [vmem:[#allocation26_spill] sm:$0xff]  ;;  %v10358_v53 = vld [vmem:[#allocation229_spill] sm:$0xff] }
 0x1e7   : > { %2739 = vmatmul.mubr.bf16.gmra.mrb[120].mxu1 %v7762_v5  ;;  %v2006_v5 = vpop.f32.mrb[19].mxu1 }
 0x1e8   : > { %4063 = vmatprep.mubr.msk.bf16.mxu1 %vm7768_vm14, %v7757_v61  ;;  %v8157_v50 = vpop.f32.mrb[20].mxu1  ;;  %vm10207_vm14 = vnez %v10206_v54 }
 0x1e9   : > { %3985 = vmatmul.mubr.msk.bf16.gmra.mrb[44].mxu0 %vm10198_vm6, %v3984_v6  ;;  %10205 = vst [vmem:[#allocation194_spill] sm:$0xff] %v8157_v50  ;;  %v2011_v61 = vpop.f32.mrb[21].mxu1  ;;  %v10222_v6 = vld [vmem:[#allocation38_spill] sm:$0xff] }
 0x1ea   : > { %2513 = vmatprep.mubr.bf16.mxu0 %v10202_v39  ;;  %v8161_v42 = vpop.f32.mrb[22].mxu1  ;;  %vm10223_vm0 = vnez %v10222_v6  ;;  %v10227_v39 = vld [vmem:[#allocation142_spill] sm:$0xff] }
 0x1eb   : > { %10208 = vst [vmem:[#allocation157_spill] sm:$0xff] %v8161_v42  ;;  %vm10228_vm11 = vnez %v10227_v39  ;;  %v10233_v61 = vld [vmem:[#allocation150_spill] sm:$0xff] }
 0x1ec   : > { %v10257_v39 = vld [vmem:[#allocation178_spill] sm:$0xff] }
 0x1ed   : > { %vm10258_vm13 = vnez %v10257_v39  ;;  %v10289_v39 = vld [vmem:[#allocation198_spill] sm:$0xff] }
 0x1ef   : > { %2747 = vmatmul.mubr.bf16.gmra.mrb[124].mxu1 %v7797_v20  ;;  %v2014_v20 = vpop.f32.mrb[23].mxu1 }
 0x1f0   : > { %4066 = vmatprep.mubr.msk.bf16.mxu1 %vm7803_vm8, %v7793_v11  ;;  %vm10214_vm8 = vnez %v10064_v52  ;;  %v8172_v11 = vpop.f32.mrb[24].mxu1  ;;  %v10239_v20 = vld [vmem:[#allocation25_spill] sm:$0xff] }
 0x1f1   : > { %3988 = vmatmul.mubr.msk.bf16.gmra.mrb[48].mxu0 %vm10207_vm14, %v3987_v7  ;;  %v2019_v29 = vpop.f32.mrb[25].mxu1  ;;  %v10231_v7 = vpack.c.bf16 %v10229_v44, %v10230_v1  ;;  %v4002_v26 = vpack.c.bf16 %v10239_v20, %v10238_v51  ;;  %v10259_v44 = vld [vmem:[#allocation43_spill] sm:$0xff]  ;;  %v10260_v1 = vld [vmem:[#allocation40_spill] sm:$0xff] }
 0x1f2   : > { %2521 = vmatprep.mubr.bf16.mxu0 %v10211_v14  ;;  %v8176_v63 = vpop.f32.mrb[26].mxu1  ;;  %v10237_v14 = vpack.c.bf16 %v10235_v40, %v10236_v13  ;;  %v10242_v29 = vld [vmem:[#allocation218_spill] sm:$0xff]  ;;  %v10272_v20 = vld [vmem:[#allocation24_spill] sm:$0xff] }
 0x1f3   : > { %v10244_v10 = vpack.c.bf16 %v10242_v29, %v10243_v25  ;;  %v10265_v40 = vld [vmem:[#allocation46_spill] sm:$0xff]  ;;  %v10274_v25 = vld [vmem:[#allocation185_spill] sm:$0xff] }
 0x1f4   : > { %vm10266_vm15 = vcmp.eq.s32.totalorder %v10265_v40, 1  ;;  %v10267_v13 = vld [vmem:[#allocation210_spill] sm:$0xff]  ;;  %vm10275_vm1 = vnez %v10274_v25  ;;  %v10301_v25 = vld [vmem:[#allocation61_spill] sm:$0xff] }
 0x1f5   : > { %vm10268_vm7 = vcmp.eq.s32.totalorder %v10267_v13, 1  ;;  %v10318_v40 = vld [vmem:[#allocation30_spill] sm:$0xff] }
 0x1f6   : > { %vm4088_vm9 = vmpackc.low %vm10268_vm7, %vm10266_vm15 }
 0x1f7   : > { %2755 = vmatmul.mubr.bf16.gmra.mrb[128].mxu1 %v7829_v21  ;;  %v2022_v21 = vpop.f32.mrb[27].mxu1 }
 0x1f8   : > { %4069 = vmatprep.mubr.msk.bf16.mxu1 %vm10214_vm8, %v7825_v0  ;;  %v8187_v52 = vpop.f32.mrb[28].mxu1  ;;  %v10246_v21 = vld [vmem:[#allocation169_spill] sm:$0xff] }
 0x1f9   : > { %3991 = vmatmul.mubr.msk.bf16.gmra.mrb[52].mxu0 %vm10216_vm2, %v3990_v2  ;;  %v2027_v0 = vpop.f32.mrb[29].mxu1  ;;  %vm10290_vm2 = vnez %v10289_v39  ;;  %v10315_v39 = vld [vmem:[#allocation45_spill] sm:$0xff] }
 0x1fa   : > { %2529 = vmatprep.mubr.bf16.mxu0 %v10219_v41  ;;  %v8191_v8 = vpop.f32.mrb[30].mxu1  ;;  %v4005_v41 = vpack.c.bf16 %v10079_v24, %v10245_v4  ;;  %v10249_v0 = vld [vmem:[#allocation217_spill] sm:$0xff] }
 0x1fb   : > { %v10277_v4 = vld [vmem:[#allocation113_spill] sm:$0xff] }
 0x1ff   : > { %2763 = vmatmul.mubr.bf16.gmra.mrb[132].mxu1 %v7856_v48  ;;  %v2030_v48 = vpop.f32.mrb[31].mxu1 }
 0x200   : > { %4072 = vmatprep.mubr.msk.bf16.mxu1 %vm10221_vm5, %v7852_v38  ;;  %v10255_v48 = vld [vmem:[#allocation209_spill] sm:$0xff] }
 0x201   : > { %3994 = vmatmul.mubr.msk.bf16.gmra.mrb[56].mxu0 %vm10223_vm0, %v3993_v57  ;;  %v8202_v9 = vpop.f32.mrb[32].mxu1  ;;  %v10248_v57 = vld [vmem:[#allocation219_spill] sm:$0xff] }
 0x202   : > { %2537 = vmatprep.mubr.bf16.mxu0 %v10226_v43  ;;  %v2035_v38 = vpop.f32.mrb[33].mxu1  ;;  %v10250_v6 = vpack.c.bf16 %v10248_v57, %v10249_v0  ;;  %v10281_v57 = vld [vmem:[#allocation204_spill] sm:$0xff]  ;;  %v10283_v0 = vld [vmem:[#allocation223_spill] sm:$0xff] }
 0x203   : > { %v8206_v5 = vpop.f32.mrb[34].mxu1  ;;  %vm10282_vm14 = vcmp.eq.s32.totalorder %v10281_v57, 1  ;;  %v10305_v57 = vld [vmem:[#allocation8_spill] sm:$0xff] }
 0x207   : > { %2771 = vmatmul.mubr.bf16.gmra.mrb[136].mxu1 %v7882_v45  ;;  %v2038_v45 = vpop.f32.mrb[35].mxu1 }
 0x208   : > { %4075 = vmatprep.mubr.msk.bf16.mxu1 %vm7890_vm4, %v7878_v37  ;;  %vm10234_vm4 = vnez %v10233_v61 }
 0x209   : > { %3997 = vmatmul.mubr.msk.bf16.gmra.mrb[60].mxu0 %vm10228_vm11, %v3996_v19  ;;  %vm10308_vm11 = vmmov %vm10266_vm15 }
 0x20a   : > { %2545 = vmatprep.mubr.bf16.mxu0 %v10231_v7  ;;  %v10261_v7 = vmax.f32 %v10260_v1, 0.0 }
 0x20c   : > { %v4089_v45 = vpack.c.bf16 %v10261_v7, %v10259_v44  ;;  %v10291_v7 = vld [vmem:[#allocation94_spill] sm:$0xff] }
 0x20f   : > { %2779 = vmatmul.mubr.bf16.gmra.mrb[140].mxu1 %v7912_v15 }
 0x210   : > { %4078 = vmatprep.mubr.msk.bf16.mxu1 %vm7919_vm3, %v7908_v32  ;;  %vm10241_vm3 = vnez %v10240_v33 }
 0x211   : > { %4000 = vmatmul.mubr.msk.bf16.gmra.mrb[64].mxu0 %vm10234_vm4, %v3999_v62  ;;  %v10262_v62 = vld [vmem:[#allocation220_spill] sm:$0xff] }
 0x212   : > { %v8217_v37 = vpop.f32.mrb[36].mxu1  ;;  %2553 = vmatprep.mubr.bf16.mxu0 %v10237_v14  ;;  %v10269_v14 = vld [vmem:[#allocation222_spill] sm:$0xff] }
 0x213   : > { %v2043_v12 = vpop.f32.mrb[37].mxu1 }
 0x214   : > { %v8221_v54 = vpop.f32.mrb[38].mxu1 }
 0x215   : > { %v2046_v15 = vpop.f32.mrb[39].mxu1 }
 0x216   : > { %v10270_v15 = vld [vmem:[#allocation41_spill] sm:$0xff] }
 0x217   : > { %2787 = vmatmul.mubr.bf16.gmra.mrb[144].mxu1 %v7947_v3  ;;  %v10271_v51 = vpack.c.bf16 %v10269_v14, %v10270_v15  ;;  %v10297_v14 = vld [vmem:[#allocation103_spill] sm:$0xff] }
 0x218   : > { %4081 = vmatprep.mubr.msk.bf16.mxu1 %vm7954_vm10, %v7940_v16  ;;  %vm10247_vm10 = vnez %v10246_v21  ;;  %v10279_v21 = vld [vmem:[#allocation211_spill] sm:$0xff] }
 0x219   : > { %4003 = vmatmul.mubr.msk.bf16.gmra.mrb[68].mxu0 %vm10241_vm3, %v4002_v26  ;;  %v10273_v26 = vld [vmem:[#allocation65_spill] sm:$0xff]  ;;  %vm10280_vm6 = vcmp.eq.s32.totalorder %v10279_v21, 1  ;;  %v10304_v21 = vld [vmem:[#allocation112_spill] sm:$0xff] }
 0x21a   : > { %v8232_v32 = vpop.f32.mrb[40].mxu1  ;;  %2561 = vmatprep.mubr.bf16.mxu0 %v10244_v10  ;;  %vm4091_vm8 = vmpackc.low %vm10282_vm14, %vm10280_vm6 }
 0x21b   : > { %v2051_v17 = vpop.f32.mrb[41].mxu1 }
 0x21c   : > { %v8236_v2 = vpop.f32.mrb[42].mxu1  ;;  %v4011_v17 = vpack.c.bf16 %v10273_v26, %v10272_v20 }
 0x21d   : > { %v2054_v3 = vpop.f32.mrb[43].mxu1 }
 0x21e   : > { %v10276_v3 = vld [vmem:[#allocation115_spill] sm:$0xff] }
 0x21f   : > { %2795 = vmatmul.mubr.bf16.gmra.mrb[148].mxu1 %v7978_v46  ;;  %v10251_v46 = vld [vmem:[#allocation37_spill] sm:$0xff] }
 0x220   : > { %4084 = vmatprep.mubr.msk.bf16.mxu1 %vm7985_vm12, %v7973_v22  ;;  %v4086_v18 = vpack.c.bf16 %v10252_v31, %v10251_v46  ;;  %v10254_v22 = vld [vmem:[#allocation31_spill] sm:$0xff]  ;;  %vm10256_vm12 = vnez %v10255_v48  ;;  %v4017_v15 = vpack.c.bf16 %v10251_v46, %v10297_v14  ;;  %v4020_v46 = vpack.c.bf16 %v10259_v44, %v10252_v31 }
 0x221   : > { %4006 = vmatmul.mubr.msk.bf16.gmra.mrb[72].mxu0 %vm10247_vm10, %v4005_v41  ;;  %v4008_v43 = vpack.c.bf16 %v10254_v22, %v10253_v36  ;;  %v10278_v41 = vpack.c.bf16 %v10276_v3, %v10277_v4  ;;  %v10287_v36 = vld [vmem:[#allocation34_spill] sm:$0xff]  ;;  %v10302_v4 = vld [vmem:[#allocation227_spill] sm:$0xff]  ;;  %vm10316_vm10 = vcmp.lt.s32.totalorder %v10315_v39, 1 }
 0x222   : > { %v8247_v16 = vpop.f32.mrb[44].mxu1  ;;  %2569 = vmatprep.mubr.bf16.mxu0 %v10250_v6  ;;  %v10284_v6 = vld [vmem:[#allocation50_spill] sm:$0xff]  ;;  %v10313_v31 = vld [vmem:[#allocation39_spill] sm:$0xff] }
 0x223   : > { %v2059_v59 = vpop.f32.mrb[45].mxu1  ;;  %v10314_v44 = vrot.slane %v10313_v31, 7 }
 0x224   : > { %v8251_v23 = vpop.f32.mrb[46].mxu1 }
 0x225   : > { %v2062_v24 = vpop.f32.mrb[47].mxu1 }
 0x226   : > { %v10286_v24 = vld [vmem:[#allocation29_spill] sm:$0xff] }
 0x227   : > { %2803 = vmatmul.mubr.bf16.gmra.mrb[152].mxu1 %v8004_v60  ;;  %v10263_v60 = vld [vmem:[#allocation93_spill] sm:$0xff]  ;;  %v4014_v22 = vpack.c.bf16 %v10287_v36, %v10286_v24  ;;  %v10309_v36 = vld [vmem:[#allocation127_spill] sm:$0xff] }
 0x228   : > { %4087 = vmatprep.mubr.msk.bf16.mxu1 %vm10256_vm12, %v4086_v18  ;;  %v10264_v12 = vpack.c.bf16 %v10262_v62, %v10263_v60  ;;  %v10285_v18 = vpack.c.bf16 %v10283_v0, %v10284_v6  ;;  %v10306_v0 = vld [vmem:[#allocation203_spill] sm:$0xff] }
 0x229   : > { %4009 = vmatmul.mubr.msk.bf16.gmra.mrb[76].mxu0 %vm10258_vm13, %v4008_v43  ;;  %v10288_v43 = vld [vmem:[#allocation42_spill] sm:$0xff]  ;;  %vm10307_vm0 = vcmp.eq.s32.totalorder %v10306_v0, 1 }
 0x22a   : > { %v8263_v19 = vpop.f32.mrb[48].mxu1  ;;  %2577 = vmatprep.mubr.bf16.mxu0 %v10264_v12  ;;  %v10294_v12 = vld [vmem:[#allocation224_spill] sm:$0xff]  ;;  %vm4019_vm4 = vmpackc.low %vm10308_vm11, %vm10307_vm0  ;;  %v10326_v0 = vld [vmem:[#allocation130_spill] sm:$0xff] }
 0x22b   : > { %v2067_v38 = vpop.f32.mrb[49].mxu1 }
 0x22c   : > { %v8270_v30 = vpop.f32.mrb[50].mxu1 }
 0x22d   : > { %v2070_v61 = vpop.f32.mrb[51].mxu1 }
 0x22e   : > { %v10295_v61 = vld [vmem:[#allocation226_spill] sm:$0xff] }
 0x22f   : > { %2811 = vmatmul.mubr.bf16.gmra.mrb[156].mxu1 %v10271_v51  ;;  %v10296_v13 = vpack.c.bf16 %v10294_v12, %v10295_v61  ;;  %v10298_v51 = vld [vmem:[#allocation95_spill] sm:$0xff]  ;;  %v10319_v12 = vld [vmem:[#allocation73_spill] sm:$0xff] }
 0x230   : > { %4090 = vmatprep.mubr.msk.bf16.mxu1 %vm4088_vm9, %v4089_v45  ;;  %v10292_v45 = vld [vmem:[#allocation98_spill] sm:$0xff] }
 0x231   : > { %4012 = vmatmul.mubr.msk.bf16.gmra.mrb[80].mxu0 %vm10275_vm1, %v4011_v17  ;;  %v10293_v62 = vpack.c.bf16 %v10291_v7, %v10292_v45  ;;  %v10299_v17 = vld [vmem:[#allocation202_spill] sm:$0xff] }
 0x232   : > { %v8284_v33 = vpop.f32.mrb[52].mxu1  ;;  %2585 = vmatprep.mubr.bf16.mxu0 %v10278_v41  ;;  %vm10300_vm5 = vnez %v10299_v17  ;;  %v10303_v41 = vpack.c.bf16 %v10301_v25, %v10302_v4  ;;  %v10323_v25 = vld [vmem:[#allocation148_spill] sm:$0xff] }
 0x233   : > { %v2075_v29 = vpop.f32.mrb[53].mxu1 }
 0x234   : > { %v8288_v10 = vpop.f32.mrb[54].mxu1 }
 0x235   : > { %v2078_v59 = vpop.f32.mrb[55].mxu1 }
 0x237   : > { %2819 = vmatmul.mubr.bf16.gmra.mrb[160].mxu1 %v10285_v18 }
 0x238   : > { %4093 = vmatprep.mubr.msk.bf16.mxu1 %vm4091_vm8, %v10288_v43 }
 0x239   : > { %4015 = vmatmul.mubr.msk.bf16.gmra.mrb[84].mxu0 %vm10290_vm2, %v4014_v22  ;;  %v10310_v22 = vld [vmem:[#allocation56_spill] sm:$0xff] }
 0x23a   : > { %v8303_v48 = vpop.f32.mrb[56].mxu1  ;;  %2593 = vmatprep.mubr.bf16.mxu0 %v10293_v62  ;;  %vm10311_vm3 = vnez %v10310_v22  ;;  %v10329_v22 = vld [vmem:[#allocation161_spill] sm:$0xff] }
 0x23b   : > { %v2083_v38 = vpop.f32.mrb[57].mxu1 }
 0x23c   : > { %v8307_v1 = vpop.f32.mrb[58].mxu1  ;;  %v10312_v38 = vld [vmem:[#allocation59_spill] sm:$0xff] }
 0x23d   : > { %v2086_v60 = vpop.f32.mrb[59].mxu1  ;;  %v1340_v62 = vsel %vm10316_vm10, %v10314_v44, %v10312_v38  ;;  %v10331_v44 = vld [vmem:[#allocation72_spill] sm:$0xff] }
 0x23e   : > { %v10317_v60 = vld [vmem:[#allocation20_spill] sm:$0xff]  ;;  %v1341_v61 = vpack.c.bf16 %v10319_v12, %v1340_v62 }
 0x23f   : > { %2827 = vmatmul.mubr.bf16.gmra.mrb[164].mxu1 %v10296_v13  ;;  %v10332_v62 = vld [vmem:[#allocation32_spill] sm:$0xff] }
 0x240   : > { %4514 = vmatprep.mubr.bf16.mxu1 %v10298_v51  ;;  %v10320_v51 = vld [vmem:[#allocation16_spill] sm:$0xff] }
 0x241   : > { %4018 = vmatmul.mubr.msk.bf16.gmra.mrb[88].mxu0 %vm10300_vm5, %v4017_v15  ;;  %v10335_v12 = vld [vmem:[#allocation176_spill] sm:$0xff] }
 0x242   : > { %v8318_v20 = vpop.f32.mrb[60].mxu1  ;;  %2601 = vmatprep.mubr.bf16.mxu0 %v10303_v41  ;;  %v10324_v41 = vld [vmem:[#allocation159_spill] sm:$0xff] }
 0x243   : > { %v2091_v26 = vpop.f32.mrb[61].mxu1 }
 0x244   : > { %v8322_v29 = vpop.f32.mrb[62].mxu1  ;;  %v10321_v26 = vld [vmem:[#allocation63_spill] sm:$0xff] }
 0x245   : > { %v2094_v59 = vpop.f32.mrb[63].mxu1  ;;  %vm10322_vm12 = vnez %v10321_v26  ;;  %v10337_v26 = vld [vmem:[#allocation143_spill] sm:$0xff] }
 0x247   : > { %4515 = vmatmul.mubr.bf16.vlgmr.msra.gmra.mrb[168].mxu1 %v10304_v21 }
 0x248   : > { %4518 = vmatprep.mubr.bf16.mxu1 %v10305_v57 }
 0x249   : > { %4021 = vmatmul.mubr.msk.bf16.gmra.mrb[92].mxu0 %vm4019_vm4, %v4020_v46  ;;  %v10325_v46 = vld [vmem:[#allocation2_spill] sm:$0xff] }
 0x24a   : > { %v8335_v6 = vpop.f32.mrb[64].mxu1  ;;  %4024 = vmatprep.mubr.msk.bf16.mxu0 %vm10311_vm3, %v10309_v36 }
 0x24b   : > { %v2099_v18 = vpop.f32.mrb[65].mxu1 }
 0x24c   : > { %v8337_v24 = vpop.f32.mrb[66].mxu1  ;;  %v10327_v18 = vld [vmem:[#allocation70_spill] sm:$0xff] }
 0x24d   : > { %v2102_v43 = vpop.f32.mrb[67].mxu1  ;;  %vm10328_vm13 = vnez %v10327_v18 }
 0x24e   : > { %v10330_v43 = vld [vmem:[#allocation170_spill] sm:$0xff] }
 0x24f   : > { %4519 = vmatmul.mubr.bf16.gmra.mrb[172].mxu1 %v10317_v60  ;;  %v10333_v60 = vld [vmem:[#allocation78_spill] sm:$0xff] }
 0x250   : > { %4522 = vmatprep.mubr.bf16.mxu1 %v10318_v40  ;;  %vm10334_vm15 = vnez %v10333_v60  ;;  %v10347_v60 = vld [vmem:[#allocation99_spill] sm:$0xff] }
 0x251   : > { %2643 = vmatmul.mubr.bf16.vlgmr.msra.gmra.mrb[0].mxu0 %v1341_v61  ;;  %v10336_v61 = vld [vmem:[#allocation225_spill] sm:$0xff] }
 0x252   : > { %v8350_v13 = vpop.f32.mrb[68].mxu1  ;;  %4027 = vmatprep.mubr.msk.bf16.mxu0 %vm10322_vm12, %v10320_v51 }
 0x253   : > { %v2107_v14 = vpop.f32.mrb[69].mxu1 }
 0x254   : > { %v8352_v15 = vpop.f32.mrb[70].mxu1 }
 0x255   : > { %v2110_v17 = vpop.f32.mrb[71].mxu1 }
 0x257   : > { %4523 = vmatmul.mubr.bf16.gmra.mrb[176].mxu1 %v10323_v25  ;;  %v10338_v25 = vld [vmem:[#allocation136_spill] sm:$0xff] }
 0x258   : > { %4526 = vmatprep.mubr.bf16.mxu1 %v10324_v41  ;;  %v10339_v41 = vld [vmem:[#allocation84_spill] sm:$0xff] }
 0x259   : > { %2651 = vmatmul.mubr.bf16.gmra.mrb[4].mxu0 %v10325_v46  ;;  %vm10340_vm7 = vnez %v10339_v41  ;;  %v10341_v46 = vld [vmem:[#allocation106_spill] sm:$0xff] }
 0x25a   : > { %v8359_v59 = vpop.f32.mrb[72].mxu1  ;;  %4030 = vmatprep.mubr.msk.bf16.mxu0 %vm10328_vm13, %v10326_v0  ;;  %v10342_v0 = vld [vmem:[#allocation131_spill] sm:$0xff]  ;;  %v10350_v41 = vld [vmem:[#allocation138_spill] sm:$0xff] }
 0x25b   : > { %v2115_v21 = vpop.f32.mrb[73].mxu1 }
 0x25c   : > { %v8362_v57 = vpop.f32.mrb[74].mxu1 }
 0x25d   : > { %v2118_v36 = vpop.f32.mrb[75].mxu1 }
 0x25f   : > { %4527 = vmatmul.mubr.bf16.gmra.mrb[180].mxu1 %v10329_v22  ;;  %v10343_v22 = vld [vmem:[#allocation145_spill] sm:$0xff] }
 0x260   : > { %4530 = vmatprep.mubr.bf16.mxu1 %v10330_v43 }
 0x261   : > { %2659 = vmatmul.mubr.bf16.gmra.mrb[8].mxu0 %v10331_v44  ;;  %v10345_v44 = vld [vmem:[#allocation88_spill] sm:$0xff] }
 0x262   : > { %v8369_v38 = vpop.f32.mrb[76].mxu1  ;;  %4033 = vmatprep.mubr.msk.bf16.mxu0 %vm10334_vm15, %v10332_v62  ;;  %vm10346_vm9 = vnez %v10345_v44  ;;  %v10353_v44 = vld [vmem:[#allocation190_spill] sm:$0xff] }
 0x263   : > { %v2123_v31 = vpop.f32.mrb[77].mxu1 }
 0x264   : > { %v8372_v39 = vpop.f32.mrb[78].mxu1  ;;  %v10344_v31 = vld [vmem:[#allocation139_spill] sm:$0xff] }
 0x265   : > { %v2126_v40 = vpop.f32.mrb[79].mxu1 }
 0x266   : > { %v10348_v40 = vld [vmem:[#allocation110_spill] sm:$0xff] }
 0x267   : > { %4531 = vmatmul.mubr.bf16.gmra.mrb[184].mxu1 %v10335_v12 }
 0x268   : > { %4534 = vmatprep.mubr.bf16.mxu1 %v10336_v61 }
 0x269   : > { %2667 = vmatmul.mubr.bf16.gmra.mrb[12].mxu0 %v10337_v26 }
 0x26a   : > { %v8379_v14 = vpop.f32.mrb[80].mxu1  ;;  %4036 = vmatprep.mubr.msk.bf16.mxu0 %vm10340_vm7, %v10338_v25 }
 0x26b   : > { %v2131_v51 = vpop.f32.mrb[81].mxu1 }
 0x26c   : > { %v8382_v17 = vpop.f32.mrb[82].mxu1  ;;  %v10349_v51 = vld [vmem:[#allocation146_spill] sm:$0xff] }
 0x26d   : > { %v2134_v21 = vpop.f32.mrb[83].mxu1 }
 0x26e   : > { %v10351_v21 = vld [vmem:[#allocation116_spill] sm:$0xff] }
 0x26f   : > { %4535 = vmatmul.mubr.bf16.gmra.mrb[188].mxu1 %v10341_v46 }
 0x270   : > { %4538 = vmatprep.mubr.bf16.mxu1 %v10342_v0 }
 0x271   : > { %2675 = vmatmul.mubr.bf16.gmra.mrb[16].mxu0 %v10343_v22 }
 0x272   : > { %v8389_v18 = vpop.f32.mrb[84].mxu1  ;;  %4039 = vmatprep.mubr.msk.bf16.mxu0 %vm10346_vm9, %v10344_v31  ;;  %v10352_v31 = vld [vmem:[#allocation117_spill] sm:$0xff] }
 0x273   : > { %v2139_v36 = vpop.f32.mrb[85].mxu1 }
 0x274   : > { %v8392_v43 = vpop.f32.mrb[86].mxu1 }
 0x275   : > { %v2142_v62 = vpop.f32.mrb[87].mxu1 }
 0x277   : > { %4539 = vmatmul.mubr.bf16.gmra.mrb[192].mxu1 %v10347_v60 }
 0x278   : > { %4542 = vmatprep.mubr.bf16.mxu1 %v10348_v40 }
 0x279   : > { %2683 = vmatmul.mubr.bf16.gmra.mrb[20].mxu0 %v10349_v51  ;;  %v10354_v51 = vld [vmem:[#allocation149_spill] sm:$0xff] }
 0x27a   : > { %v8399_v12 = vpop.f32.mrb[88].mxu1 }
 0x27b   : > { %v2147_v61 = vpop.f32.mrb[89].mxu1 }
 0x27c   : > { %v8402_v26 = vpop.f32.mrb[90].mxu1 }
 0x27d   : > { %v2150_v25 = vpop.f32.mrb[91].mxu1 }
 0x27e   : > { %v10355_v25 = vpack.c.bf16 %v10292_v45, %v10276_v3 }
 0x27f   : > { %4543 = vmatmul.mubr.bf16.gmra.mrb[196].mxu1 %v10350_v41 }
 0x280   : > { %4546 = vmatprep.mubr.bf16.mxu1 %v10351_v21 }
 0x282   : > { %v8406_v46 = vpop.f32.mrb[92].mxu1 }
 0x283   : > { %v2155_v0 = vpop.f32.mrb[93].mxu1 }
 0x284   : > { %v8408_v36 = vpop.f32.mrb[94].mxu1 }
 0x285   : > { %v2158_v22 = vpop.f32.mrb[95].mxu1 }
 0x287   : > { %4547 = vmatmul.mubr.bf16.gmra.mrb[200].mxu1 %v10352_v31 }
 0x288   : > { %4550 = vmatprep.mubr.bf16.mxu1 %v10353_v44  ;;  %v10356_v44 = vpack.c.bf16 %v10302_v4, %v10291_v7 }
 0x28a   : > { %v2692_v62 = vpop.f32.mrb[96].mxu1 }
 0x28b   : > { %v2694_v60 = vpop.f32.mrb[97].mxu1 }
 0x28c   : > { %v2695_v40 = vpop.f32.mrb[98].mxu1 }
 0x28d   : > { %v2697_v61 = vpop.f32.mrb[99].mxu1 }
 0x28e   : > { %v10357_v61 = vld [vmem:[#allocation228_spill] sm:$0xff] }
 0x28f   : > { %4551 = vmatmul.mubr.bf16.gmra.mrb[204].mxu1 %v10354_v51  ;;  %v10359_v51 = vpack.c.bf16 %v10357_v61, %v10358_v53 }
 0x290   : > { %4554 = vmatprep.mubr.bf16.mxu1 %v10355_v25 }
 0x292   : > { %v2700_v41 = vpop.f32.mrb[100].mxu1 }
 0x293   : > { %v2702_v21 = vpop.f32.mrb[101].mxu1 }
 0x294   : > { %v2703_v0 = vpop.f32.mrb[102].mxu1  ;;  %v2467_v50 = vpop.f32.mrb[24].mxu0 }
 0x295   : > { %v2705_v42 = vpop.f32.mrb[103].mxu1  ;;  %v4606_v22 = vadd.f32 %v2467_v50, %v8172_v11  ;;  %v2469_v31 = vpop.f32.mrb[25].mxu0 }
 0x296   : > { %v2470_v60 = vpop.f32.mrb[26].mxu0 }
 0x297   : > { %4555 = vmatmul.mubr.bf16.gmra.mrb[208].mxu1 %v10356_v44  ;;  %v4608_v3 = vadd.f32 %v2470_v60, %v8176_v63  ;;  %v2472_v45 = vpop.f32.mrb[27].mxu0  ;;  %v8424_v25 = vadd.f32 %v4606_v22, %v2692_v62  ;;  %v10360_v44 = vld [vmem:[#allocation74_spill] sm:$0xff] }
 0x298   : > { %4558 = vmatprep.mubr.bf16.mxu1 %v10359_v51  ;;  %v10362_v27 = vpack.c.bf16 %v10360_v44, %v10361_v56 }
 0x299   : > { %v8426_v55 = vadd.f32 %v4608_v3, %v2695_v40 }
 0x29a   : > { %v2708_v21 = vpop.f32.mrb[104].mxu1 }
 0x29b   : > { %v2710_v42 = vpop.f32.mrb[105].mxu1 }
 0x29c   : > { %v2711_v50 = vpop.f32.mrb[106].mxu1  ;;  %v2475_v31 = vpop.f32.mrb[28].mxu0 }
 0x29d   : > { %v2713_v11 = vpop.f32.mrb[107].mxu1  ;;  %v4610_v7 = vadd.f32 %v2475_v31, %v8187_v52  ;;  %v2477_v4 = vpop.f32.mrb[29].mxu0 }
 0x29e   : > { %v2478_v53 = vpop.f32.mrb[30].mxu0 }
 0x29f   : > { %4559 = vmatmul.mubr.bf16.gmra.mrb[212].mxu1 %v10362_v27  ;;  %v4612_v63 = vadd.f32 %v2478_v53, %v8191_v8  ;;  %v2480_v60 = vpop.f32.mrb[31].mxu0  ;;  %v8433_v62 = vadd.f32 %v4610_v7, %v2700_v41 }
 0x2a1   : > { %v8435_v40 = vadd.f32 %v4612_v63, %v2703_v0 }
 0x2a2   : > { %v2716_v22 = vpop.f32.mrb[108].mxu1 }
 0x2a3   : > { %v2718_v61 = vpop.f32.mrb[109].mxu1 }
 0x2a4   : > { %v2719_v51 = vpop.f32.mrb[110].mxu1  ;;  %v2483_v45 = vpop.f32.mrb[32].mxu0 }
 0x2a5   : > { %v2721_v3 = vpop.f32.mrb[111].mxu1  ;;  %v4614_v52 = vadd.f32 %v2483_v45, %v8202_v9  ;;  %v2485_v42 = vpop.f32.mrb[33].mxu0 }
 0x2a6   : > { %v2486_v11 = vpop.f32.mrb[34].mxu0 }
 0x2a7   : > { %v4616_v56 = vadd.f32 %v2486_v11, %v8206_v5  ;;  %v2488_v27 = vpop.f32.mrb[35].mxu0  ;;  %v8439_v31 = vadd.f32 %v4614_v52, %v2708_v21 }
 0x2a9   : > { %v8441_v41 = vadd.f32 %v4616_v56, %v2711_v50 }
 0x2aa   : > { %v2724_v8 = vpop.f32.mrb[112].mxu1 }
 0x2ab   : > { %v2726_v4 = vpop.f32.mrb[113].mxu1 }
 0x2ac   : > { %v2727_v7 = vpop.f32.mrb[114].mxu1  ;;  %v2491_v0 = vpop.f32.mrb[36].mxu0 }
 0x2ad   : > { %v2729_v44 = vpop.f32.mrb[115].mxu1  ;;  %v4618_v53 = vadd.f32 %v2491_v0, %v8217_v37  ;;  %v2493_v63 = vpop.f32.mrb[37].mxu0 }
 0x2ae   : > { %v2494_v60 = vpop.f32.mrb[38].mxu0 }
 0x2af   : > { %v4620_v9 = vadd.f32 %v2494_v60, %v8221_v54  ;;  %v2496_v61 = vpop.f32.mrb[39].mxu0  ;;  %v8445_v3 = vadd.f32 %v4618_v53, %v2716_v22 }
 0x2b1   : > { %v8447_v21 = vadd.f32 %v4620_v9, %v2719_v51 }
 0x2b2   : > { %v2732_v5 = vpop.f32.mrb[116].mxu1 }
 0x2b3   : > { %v2734_v45 = vpop.f32.mrb[117].mxu1 }
 0x2b4   : > { %v2735_v52 = vpop.f32.mrb[118].mxu1  ;;  %v2499_v50 = vpop.f32.mrb[40].mxu0 }
 0x2b5   : > { %v2737_v42 = vpop.f32.mrb[119].mxu1  ;;  %v4622_v11 = vadd.f32 %v2499_v50, %v8232_v32  ;;  %v2501_v56 = vpop.f32.mrb[41].mxu0 }
 0x2b6   : > { %v2502_v27 = vpop.f32.mrb[42].mxu0 }
 0x2b7   : > { %v4624_v37 = vadd.f32 %v2502_v27, %v8236_v2  ;;  %v2504_v4 = vpop.f32.mrb[43].mxu0  ;;  %v8451_v44 = vadd.f32 %v4622_v11, %v2724_v8 }
 0x2b9   : > { %v8453_v22 = vadd.f32 %v4624_v37, %v2727_v7 }
 0x2ba   : > { %v2740_v54 = vpop.f32.mrb[120].mxu1 }
 0x2bb   : > { %v2742_v0 = vpop.f32.mrb[121].mxu1 }
 0x2bc   : > { %v2743_v53 = vpop.f32.mrb[122].mxu1  ;;  %v2507_v51 = vpop.f32.mrb[44].mxu0 }
 0x2bd   : > { %v2745_v63 = vpop.f32.mrb[123].mxu1  ;;  %v4626_v60 = vadd.f32 %v2507_v51, %v8247_v16  ;;  %v2509_v9 = vpop.f32.mrb[45].mxu0 }
 0x2be   : > { %v2510_v61 = vpop.f32.mrb[46].mxu0 }
 0x2bf   : > { %v4628_v32 = vadd.f32 %v2510_v61, %v8251_v23  ;;  %v2512_v45 = vpop.f32.mrb[47].mxu0  ;;  %v8457_v42 = vadd.f32 %v4626_v60, %v2732_v5 }
 0x2c1   : > { %v8459_v8 = vadd.f32 %v4628_v32, %v2735_v52 }
 0x2c2   : > { %v2748_v2 = vpop.f32.mrb[124].mxu1 }
 0x2c3   : > { %v2750_v50 = vpop.f32.mrb[125].mxu1 }
 0x2c4   : > { %v2751_v11 = vpop.f32.mrb[126].mxu1  ;;  %v2515_v7 = vpop.f32.mrb[48].mxu0 }
 0x2c5   : > { %v2753_v56 = vpop.f32.mrb[127].mxu1  ;;  %v4630_v27 = vadd.f32 %v2515_v7, %v8263_v19  ;;  %v2517_v37 = vpop.f32.mrb[49].mxu0 }
 0x2c6   : > { %v2518_v4 = vpop.f32.mrb[50].mxu0 }
 0x2c7   : > { %v4632_v16 = vadd.f32 %v2518_v4, %v8270_v30  ;;  %v2520_v0 = vpop.f32.mrb[51].mxu0  ;;  %v8463_v63 = vadd.f32 %v4630_v27, %v2740_v54 }
 0x2c9   : > { %v8465_v5 = vadd.f32 %v4632_v16, %v2743_v53 }
 0x2ca   : > { %v2756_v23 = vpop.f32.mrb[128].mxu1 }
 0x2cb   : > { %v2758_v51 = vpop.f32.mrb[129].mxu1  ;;  %10363 = vst [vmem:[#allocation165_spill] sm:$0xff] %v8465_v5 }
 0x2cc   : > { %v2759_v60 = vpop.f32.mrb[130].mxu1  ;;  %v2523_v52 = vpop.f32.mrb[52].mxu0 }
 0x2cd   : > { %v2761_v9 = vpop.f32.mrb[131].mxu1  ;;  %v4634_v61 = vadd.f32 %v2523_v52, %v8284_v33  ;;  %v2525_v32 = vpop.f32.mrb[53].mxu0 }
 0x2ce   : > { %v2526_v45 = vpop.f32.mrb[54].mxu0 }
 0x2cf   : > { %v4636_v19 = vadd.f32 %v2526_v45, %v8288_v10  ;;  %v2528_v50 = vpop.f32.mrb[55].mxu0  ;;  %v8469_v56 = vadd.f32 %v4634_v61, %v2748_v2 }
 0x2d1   : > { %v8471_v54 = vadd.f32 %v4636_v19, %v2751_v11 }
 0x2d2   : > { %v2764_v30 = vpop.f32.mrb[132].mxu1 }
 0x2d3   : > { %v2766_v7 = vpop.f32.mrb[133].mxu1 }
 0x2d4   : > { %v2767_v27 = vpop.f32.mrb[134].mxu1  ;;  %v2531_v53 = vpop.f32.mrb[56].mxu0 }
 0x2d5   : > { %v2769_v37 = vpop.f32.mrb[135].mxu1  ;;  %v4638_v4 = vadd.f32 %v2531_v53, %v8303_v48  ;;  %v2533_v16 = vpop.f32.mrb[57].mxu0 }
 0x2d6   : > { %v2534_v0 = vpop.f32.mrb[58].mxu0 }
 0x2d7   : > { %v4640_v33 = vadd.f32 %v2534_v0, %v8307_v1  ;;  %v2536_v51 = vpop.f32.mrb[59].mxu0  ;;  %v8475_v9 = vadd.f32 %v4638_v4, %v2756_v23 }
 0x2d8   : > { %v8486_v51 = vpop.permute.xlu1 %3064 }
 0x2d9   : > { %10364 = vst [vmem:[#allocation125_spill] sm:$0xff] %v8475_v9  ;;  %v8477_v2 = vadd.f32 %v4640_v33, %v2759_v60  ;;  %vm3205_vm6 = vcmp.eq.s32.totalorder %v8486_v51, 1 }
 0x2da   : > { %v2772_v10 = vpop.f32.mrb[136].mxu1 }
 0x2db   : > { %v2774_v52 = vpop.f32.mrb[137].mxu1  ;;  %10365 = vst [vmem:[#allocation126_spill] sm:$0xff] %v8477_v2 }
 0x2dc   : > { %v2775_v61 = vpop.f32.mrb[138].mxu1  ;;  %v2539_v11 = vpop.f32.mrb[60].mxu0 }
 0x2dd   : > { %v2777_v32 = vpop.f32.mrb[139].mxu1  ;;  %v4642_v45 = vadd.f32 %v2539_v11, %v8318_v20  ;;  %v2541_v19 = vpop.f32.mrb[61].mxu0 }
 0x2de   : > { %v2542_v50 = vpop.f32.mrb[62].mxu0 }
 0x2df   : > { %v4644_v48 = vadd.f32 %v2542_v50, %v8322_v29  ;;  %v2544_v7 = vpop.f32.mrb[63].mxu0  ;;  %v8481_v37 = vadd.f32 %v4642_v45, %v2764_v30  ;;  %v8491_v30 = vpop.permute.xlu0 %3061 }
 0x2e0   : > { %vm3204_vm1 = vcmp.eq.s32.totalorder %v8491_v30, 1 }
 0x2e1   : > { %10366 = vst [vmem:[#allocation200_spill] sm:$0xff] %v8481_v37  ;;  %v8483_v23 = vadd.f32 %v4644_v48, %v2767_v27  ;;  %v8495_v48 = vpop.permute.xlu1 %3070 }
 0x2e2   : > { %v2780_v1 = vpop.f32.mrb[140].mxu1  ;;  %vm3207_vm8 = vcmp.eq.s32.totalorder %v8495_v48, 1 }
 0x2e3   : > { %v2782_v53 = vpop.f32.mrb[141].mxu1  ;;  %10367 = vst [vmem:[#allocation197_spill] sm:$0xff] %v8483_v23 }
 0x2e4   : > { %v2783_v4 = vpop.f32.mrb[142].mxu1  ;;  %v2547_v60 = vpop.f32.mrb[64].mxu0 }
 0x2e5   : > { %v2785_v16 = vpop.f32.mrb[143].mxu1  ;;  %v4646_v0 = vadd.f32 %v2547_v60, %v8335_v6  ;;  %v2549_v33 = vpop.f32.mrb[65].mxu0 }
 0x2e6   : > { %v2550_v20 = vpop.f32.mrb[66].mxu0  ;;  %v8498_v16 = vpop.permute.xlu0 %3067 }
 0x2e7   : > { %v4648_v52 = vadd.f32 %v2550_v20, %v8337_v24  ;;  %v2552_v32 = vpop.f32.mrb[67].mxu0  ;;  %v8489_v29 = vadd.f32 %v4646_v0, %v2772_v10  ;;  %vm3206_vm14 = vcmp.eq.s32.totalorder %v8498_v16, 1 }
 0x2e9   : > { %10368 = vst [vmem:[#allocation167_spill] sm:$0xff] %v8489_v29  ;;  %v8493_v27 = vadd.f32 %v4648_v52, %v2775_v61  ;;  %v8505_v52 = vpop.permute.xlu1 %3076 }
 0x2ea   : > { %v2788_v11 = vpop.f32.mrb[144].mxu1  ;;  %vm3209_vm11 = vcmp.eq.s32.totalorder %v8505_v52, 1 }
 0x2eb   : > { %v2790_v45 = vpop.f32.mrb[145].mxu1  ;;  %10369 = vst [vmem:[#allocation172_spill] sm:$0xff] %v8493_v27 }
 0x2ec   : > { %v2791_v19 = vpop.f32.mrb[146].mxu1  ;;  %v2555_v6 = vpop.f32.mrb[68].mxu0 }
 0x2ed   : > { %v2793_v50 = vpop.f32.mrb[147].mxu1  ;;  %v4650_v7 = vadd.f32 %v2555_v6, %v8350_v13  ;;  %v2557_v53 = vpop.f32.mrb[69].mxu0 }
 0x2ee   : > { %v2558_v24 = vpop.f32.mrb[70].mxu0  ;;  %v8507_v50 = vpop.permute.xlu0 %3073 }
 0x2ef   : > { %v4652_v10 = vadd.f32 %v2558_v24, %v8352_v15  ;;  %v2560_v60 = vpop.f32.mrb[71].mxu0  ;;  %v8501_v0 = vadd.f32 %v4650_v7, %v2780_v1  ;;  %v8513_v7 = vpop.permute.xlu1 %3082  ;;  %vm3208_vm0 = vcmp.eq.s32.totalorder %v8507_v50, 1 }
 0x2f0   : > { %vm3211_vm15 = vcmp.eq.s32.totalorder %v8513_v7, 1 }
 0x2f1   : > { %10370 = vst [vmem:[#allocation49_spill] sm:$0xff] %v8501_v0  ;;  %v8503_v61 = vadd.f32 %v4652_v10, %v2783_v4 }
 0x2f2   : > { %v2796_v33 = vpop.f32.mrb[148].mxu1 }
 0x2f3   : > { %v2798_v20 = vpop.f32.mrb[149].mxu1  ;;  %10371 = vst [vmem:[#allocation55_spill] sm:$0xff] %v8503_v61 }
 0x2f4   : > { %v2799_v32 = vpop.f32.mrb[150].mxu1  ;;  %v2563_v13 = vpop.f32.mrb[72].mxu0 }
 0x2f5   : > { %v2801_v45 = vpop.f32.mrb[151].mxu1  ;;  %v4654_v6 = vadd.f32 %v2563_v13, %v8359_v59  ;;  %v2565_v53 = vpop.f32.mrb[73].mxu0 }
 0x2f6   : > { %v2566_v27 = vpop.f32.mrb[74].mxu0  ;;  %v8517_v20 = vpop.permute.xlu0 %3079 }
 0x2f7   : > { %v4656_v15 = vadd.f32 %v2566_v27, %v8362_v57  ;;  %v2568_v24 = vpop.f32.mrb[75].mxu0  ;;  %v8511_v1 = vadd.f32 %v4654_v6, %v2788_v11  ;;  %v8520_v53 = vpop.permute.xlu1 %3088  ;;  %vm3210_vm13 = vcmp.eq.s32.totalorder %v8517_v20, 1 }
 0x2f9   : > { %10372 = vst [vmem:[#allocation205_spill] sm:$0xff] %v8511_v1  ;;  %v8515_v60 = vadd.f32 %v4656_v15, %v2791_v19 }
 0x2fa   : > { %v2804_v4 = vpop.f32.mrb[152].mxu1  ;;  %v8525_v24 = vpop.permute.xlu0 %3085 }
 0x2fb   : > { %v2806_v10 = vpop.f32.mrb[153].mxu1  ;;  %10373 = vst [vmem:[#allocation201_spill] sm:$0xff] %v8515_v60  ;;  %v8529_v1 = vpop.permute.xlu1 %3094 }
 0x2fc   : > { %v2807_v45 = vpop.f32.mrb[154].mxu1  ;;  %v2571_v29 = vpop.f32.mrb[76].mxu0  ;;  %10376 = vst [vmem:[#allocation134_spill] sm:$0xff] %v8529_v1 }
 0x2fd   : > { %v2809_v61 = vpop.f32.mrb[155].mxu1  ;;  %v4658_v59 = vadd.f32 %v2571_v29, %v8369_v38  ;;  %v2573_v13 = vpop.f32.mrb[77].mxu0 }
 0x2fe   : > { %v2574_v57 = vpop.f32.mrb[78].mxu0  ;;  %v8532_v0 = vpop.permute.xlu0 %3091 }
 0x2ff   : > { %v4660_v11 = vadd.f32 %v2574_v57, %v8372_v39  ;;  %v2576_v27 = vpop.f32.mrb[79].mxu0  ;;  %v8523_v6 = vadd.f32 %v4658_v59, %v2796_v33 }
 0x301   : > { %10374 = vst [vmem:[#allocation179_spill] sm:$0xff] %v8523_v6  ;;  %v8527_v10 = vadd.f32 %v4660_v11, %v2799_v32  ;;  %v8539_v11 = vpop.permute.xlu1 %3100 }
 0x302   : > { %v2812_v19 = vpop.f32.mrb[156].mxu1  ;;  %v8541_v6 = vpop.permute.xlu0 %3097  ;;  %vm3217_vm2 = vcmp.eq.s32.totalorder %v8539_v11, 1 }
 0x303   : > { %v2814_v15 = vpop.f32.mrb[157].mxu1  ;;  %10375 = vst [vmem:[#allocation133_spill] sm:$0xff] %v8527_v10  ;;  %10379 = vst [vmem:[#allocation15_spill] sm:$0xff] %v8541_v6 }
 0x304   : > { %v2815_v60 = vpop.f32.mrb[158].mxu1  ;;  %v2579_v38 = vpop.f32.mrb[80].mxu0 }
 0x305   : > { %v2817_v61 = vpop.f32.mrb[159].mxu1  ;;  %v4662_v29 = vadd.f32 %v2579_v38, %v8379_v14  ;;  %v2581_v13 = vpop.f32.mrb[81].mxu0 }
 0x306   : > { %v2582_v39 = vpop.f32.mrb[82].mxu0 }
 0x307   : > { %v4664_v33 = vadd.f32 %v2582_v39, %v8382_v17  ;;  %v2584_v59 = vpop.f32.mrb[83].mxu0  ;;  %v8535_v57 = vadd.f32 %v4662_v29, %v2804_v4  ;;  %v8547_v29 = vpop.permute.xlu1 %3106 }
 0x308   : > { %vm3219_vm4 = vcmp.eq.s32.totalorder %v8547_v29, 1  ;;  %v10389_v29 = vld [vmem:[#allocation160_spill] sm:$0xff] }
 0x309   : > { %10377 = vst [vmem:[#allocation87_spill] sm:$0xff] %v8535_v57  ;;  %v8537_v32 = vadd.f32 %v4664_v33, %v2807_v45 }
 0x30a   : > { %v2820_v27 = vpop.f32.mrb[160].mxu1 }
 0x30b   : > { %v2822_v15 = vpop.f32.mrb[161].mxu1  ;;  %10378 = vst [vmem:[#allocation17_spill] sm:$0xff] %v8537_v32 }
 0x30c   : > { %v2823_v61 = vpop.f32.mrb[162].mxu1  ;;  %v2587_v14 = vpop.f32.mrb[84].mxu0 }
 0x30d   : > { %v2825_v10 = vpop.f32.mrb[163].mxu1  ;;  %v4666_v38 = vadd.f32 %v2587_v14, %v8389_v18  ;;  %v2589_v13 = vpop.f32.mrb[85].mxu0 }
 0x30e   : > { %v2590_v2 = vpop.f32.mrb[86].mxu0  ;;  %v8551_v15 = vpop.permute.xlu0 %3103 }
 0x30f   : > { %v4668_v17 = vadd.f32 %v2590_v2, %v8392_v43  ;;  %v2592_v39 = vpop.f32.mrb[87].mxu0  ;;  %v8545_v4 = vadd.f32 %v4666_v38, %v2812_v19  ;;  %v8554_v13 = vpop.permute.xlu1 %3112  ;;  %vm3218_vm5 = vcmp.eq.s32.totalorder %v8551_v15, 1 }
 0x310   : > { %vm3221_vm10 = vcmp.eq.s32.totalorder %v8554_v13, 1 }
 0x311   : > { %10380 = vst [vmem:[#allocation206_spill] sm:$0xff] %v8545_v4  ;;  %v8549_v59 = vadd.f32 %v4668_v17, %v2815_v60 }
 0x312   : > { %v2828_v45 = vpop.f32.mrb[164].mxu1  ;;  %v8559_v39 = vpop.permute.xlu0 %3109 }
 0x313   : > { %v2830_v33 = vpop.f32.mrb[165].mxu1  ;;  %10381 = vst [vmem:[#allocation62_spill] sm:$0xff] %v8549_v59  ;;  %v8563_v4 = vpop.permute.xlu1 %3118  ;;  %vm3220_vm3 = vcmp.eq.s32.totalorder %v8559_v39, 1 }
 0x314   : > { %v2831_v10 = vpop.f32.mrb[166].mxu1  ;;  %v2595_v57 = vpop.f32.mrb[88].mxu0  ;;  %vm3223_vm7 = vcmp.eq.s32.totalorder %v8563_v4, 1 }
 0x315   : > { %v2833_v32 = vpop.f32.mrb[167].mxu1  ;;  %v4670_v18 = vadd.f32 %v2595_v57, %v8399_v12  ;;  %v2597_v14 = vpop.f32.mrb[89].mxu0 }
 0x316   : > { %v2598_v43 = vpop.f32.mrb[90].mxu0  ;;  %v8566_v23 = vpop.permute.xlu0 %3115 }
 0x317   : > { %v4672_v2 = vadd.f32 %v2598_v43, %v8402_v26  ;;  %v2600_v19 = vpop.f32.mrb[91].mxu0  ;;  %v8557_v38 = vadd.f32 %v4670_v18, %v2820_v27  ;;  %vm3222_vm12 = vcmp.eq.s32.totalorder %v8566_v23, 1 }
 0x319   : > { %10382 = vst [vmem:[#allocation137_spill] sm:$0xff] %v8557_v38  ;;  %v8561_v33 = vadd.f32 %v4672_v2, %v2823_v61 }
 0x31a   : > { %v4516_v60 = vpop.f32.mrb[168].mxu1 }
 0x31b   : > { %v2869_v17 = vpop.f32.mrb[169].mxu1  ;;  %10383 = vst [vmem:[#allocation19_spill] sm:$0xff] %v8561_v33  ;;  %v8577_v33 = vpop.permute.xlu1 %3124 }
 0x31c   : > { %v4517_v59 = vpop.f32.mrb[170].mxu1  ;;  %v2603_v12 = vpop.f32.mrb[92].mxu0 }
 0x31d   : > { %v2872_v32 = vpop.f32.mrb[171].mxu1  ;;  %v4674_v57 = vadd.f32 %v2603_v12, %v8406_v46  ;;  %v2605_v14 = vpop.f32.mrb[93].mxu0 }
 0x31e   : > { %v2606_v26 = vpop.f32.mrb[94].mxu0  ;;  %v8583_v12 = vpop.permute.xlu0 %3121 }
 0x31f   : > { %v4676_v27 = vadd.f32 %v2606_v26, %v8408_v36  ;;  %v2608_v18 = vpop.f32.mrb[95].mxu0  ;;  %v8569_v43 = vadd.f32 %v4674_v57, %v2828_v45  ;;  %vm3224_vm9 = vcmp.eq.s32.totalorder %v8583_v12, 1 }
 0x321   : > { %10384 = vst [vmem:[#allocation21_spill] sm:$0xff] %v8569_v43  ;;  %v8575_v2 = vadd.f32 %v4676_v27, %v2831_v10  ;;  %v8588_v10 = vpop.permute.xlu1 %3130 }
 0x322   : > { %v8571_v19 = vpop.f32.mrb[172].mxu1 }
 0x323   : > { %v8573_v61 = vpop.f32.mrb[173].mxu1  ;;  %10385 = vst [vmem:[#allocation47_spill] sm:$0xff] %v8575_v2 }
 0x324   : > { %v8579_v38 = vpop.f32.mrb[174].mxu1  ;;  %v2644_v14 = vpop.f32.mrb[0].mxu0 }
 0x325   : > { %v8581_v46 = vpop.f32.mrb[175].mxu1  ;;  %v4594_v36 = vadd.f32 %v2644_v14, %v8075_v49  ;;  %v2646_v26 = vpop.f32.mrb[1].mxu0 }
 0x326   : > { %v2647_v45 = vpop.f32.mrb[2].mxu0  ;;  %v8595_v49 = vpop.permute.xlu0 %3127 }
 0x327   : > { %v2870_v57 = vadd.f32 %v4594_v36, %v2869_v17  ;;  %v4595_v18 = vadd.f32 %v2647_v45, %v8080_v34  ;;  %v2649_v43 = vpop.f32.mrb[3].mxu0 }
 0x329   : > { %v3252_v2 = vsel %vm3204_vm1, %v2870_v57, 0.0  ;;  %v2873_v9 = vadd.f32 %v4595_v18, %v2872_v32  ;;  %v8603_v18 = vpop.permute.xlu1 %3136  ;;  %vm3225_vm1 = vcmp.eq.s32.totalorder %v8577_v33, 1 }
 0x32a   : > { %v8590_v27 = vpop.f32.mrb[176].mxu1  ;;  %v4146_v14 = vpack.c.bf16 %v3252_v2, %v3252_v2  ;;  %v3353_v43 = vmul.f32 %v3252_v2, %v3252_v2  ;;  %10388 = vst [vmem:[#allocation147_spill] sm:$0xff] %v8603_v18 }
 0x32b   : > { %10386 = vst [vmem:[#allocation66_spill] sm:$0xff] %v8590_v27  ;;  %v8592_v37 = vpop.f32.mrb[177].mxu1  ;;  %v3253_v36 = vsel %vm3205_vm6, %v2873_v9, 0.0  ;;  %v8607_v9 = vpop.permute.xlu0 %3133  ;;  %vm3226_vm6 = vcmp.eq.s32.totalorder %v8595_v49, 1 }
 0x32c   : > { %v8597_v17 = vpop.f32.mrb[178].mxu1  ;;  %3659 = vst [vmem:[%s5066_s20 + $0xc] sm:$0xf] %v4146_v14  ;;  %v3300_v30 = vadd.f32 %v3253_v36, %v3252_v2  ;;  %v3354_v26 = vmul.f32 %v3253_v36, %v3253_v36  ;;  %v2652_v45 = vpop.f32.mrb[4].mxu0 }
 0x32d   : > { %10387 = vst [vmem:[#allocation69_spill] sm:$0xff] %v8597_v17  ;;  %v8599_v34 = vpop.f32.mrb[179].mxu1  ;;  %v4596_v57 = vadd.f32 %v2652_v45, %v8097_v47  ;;  %v2654_v32 = vpop.f32.mrb[5].mxu0 }
 0x32e   : > { %v3401_v6 = vadd.f32 %v3354_v26, %v3353_v43  ;;  %v2655_v51 = vpop.f32.mrb[6].mxu0 }
 0x32f   : > { %v2878_v1 = vadd.f32 %v4596_v57, %v4516_v60  ;;  %v4597_v27 = vadd.f32 %v2655_v51, %v8101_v35  ;;  %v2657_v5 = vpop.f32.mrb[7].mxu0  ;;  %v8615_v51 = vpop.permute.xlu1 %3142 }
 0x331   : > { %v3254_v2 = vsel %vm3206_vm14, %v2878_v1, 0.0  ;;  %v2881_v14 = vadd.f32 %v4597_v27, %v4517_v59  ;;  %vm3212_vm14 = vcmp.eq.s32.totalorder %v8525_v24, 1 }
 0x332   : > { %v4528_v17 = vpop.f32.mrb[180].mxu1  ;;  %v3301_v32 = vadd.f32 %v3300_v30, %v3254_v2  ;;  %v3355_v43 = vmul.f32 %v3254_v2, %v3254_v2  ;;  %v4305_v26 = vpack.c.bf16 %v3254_v2, %v3253_v36 }
 0x333   : > { %v2926_v47 = vadd.f32 %v8433_v62, %v4528_v17  ;;  %v2917_v45 = vpop.f32.mrb[181].mxu1  ;;  %v3255_v5 = vsel %vm3207_vm8, %v2881_v14, 0.0  ;;  %vm3213_vm8 = vcmp.eq.s32.totalorder %v8520_v53, 1 }
 0x334   : > { %v8612_v60 = vadd.f32 %v8424_v25, %v2917_v45  ;;  %v4529_v35 = vpop.f32.mrb[182].mxu1  ;;  %v3402_v18 = vadd.f32 %v3401_v6, %v3355_v43  ;;  %4443 = vst [vmem:[%s5066_s20 + $0x10] sm:$0xff] %v4305_v26   ;;  %v3302_v48 = vadd.f32 %v3301_v32, %v3255_v5  ;;  %v3356_v1 = vmul.f32 %v3255_v5, %v3255_v5  ;;  %v2660_v59 = vpop.f32.mrb[8].mxu0 }
 0x335   : > { %v2929_v16 = vadd.f32 %v8435_v40, %v4529_v35  ;;  %v2920_v57 = vpop.f32.mrb[183].mxu1  ;;  %v4598_v27 = vadd.f32 %v2660_v59, %v8112_v28  ;;  %v2662_v17 = vpop.f32.mrb[9].mxu0  ;;  %v8624_v30 = vsel %vm3218_vm5, %v2926_v47, 0.0  ;;  %vm3227_vm5 = vcmp.eq.s32.totalorder %v8588_v10, 1  ;;  %v10394_v10 = vld [vmem:[#allocation194_spill] sm:$0xff] }
 0x336   : > { %v2921_v62 = vadd.f32 %v8426_v55, %v2920_v57  ;;  %v8622_v25 = vpop.permute.xlu0 %3139  ;;  %v3403_v40 = vadd.f32 %v3402_v18, %v3356_v1  ;;  %v2663_v36 = vpop.f32.mrb[10].mxu0 }
 0x337   : > { %v2886_v2 = vadd.f32 %v4598_v27, %v8573_v61  ;;  %v4599_v55 = vadd.f32 %v2663_v36, %v8116_v58  ;;  %v2665_v14 = vpop.f32.mrb[11].mxu0  ;;  %v8636_v32 = vpop.permute.xlu1 %3148 }
 0x338   : > { %v8626_v6 = vsel %vm3217_vm2, %v2921_v62, 0.0  ;;  %v8646_v62 = vsel %vm3219_vm4, %v2929_v16, 0.0  ;;  %vm3214_vm2 = vcmp.eq.s32.totalorder %v8532_v0, 1  ;;  %vm3230_vm4 = vcmp.eq.s32.totalorder %v8622_v25, 1  ;;  %v10399_v25 = vld [vmem:[#allocation15_spill] sm:$0xff] }
 0x339   : > { %v4335_v28 = vpack.c.bf16 %v8624_v30, %v8626_v6  ;;  %v3256_v15 = vsel %vm3208_vm0, %v2886_v2, 0.0  ;;  %v2889_v18 = vadd.f32 %v4599_v55, %v8581_v46  ;;  %vm3228_vm0 = vcmp.eq.s32.totalorder %v8607_v9, 1 }
 0x33a   : > { %v4532_v11 = vpop.f32.mrb[184].mxu1  ;;  %v3303_v58 = vadd.f32 %v3302_v48, %v3256_v15  ;;  %v3357_v61 = vmul.f32 %v3256_v15, %v3256_v15  ;;  %v4310_v43 = vpack.c.bf16 %v3256_v15, %v3255_v5 }
 0x33b   : > { %v2942_v47 = vadd.f32 %v8445_v3, %v4532_v11  ;;  %v2933_v45 = vpop.f32.mrb[185].mxu1  ;;  %4449 = vst [vmem:[%s5066_s20 + $0x40] sm:$0xff] %v4335_v28   ;;  %v3257_v35 = vsel %vm3209_vm11, %v2889_v18, 0.0  ;;  %v8643_v3 = vpop.permute.xlu0 %3145 }
 0x33c   : > { %v2934_v50 = vadd.f32 %v8439_v31, %v2933_v45  ;;  %v4533_v26 = vpop.f32.mrb[186].mxu1  ;;  %v3404_v46 = vadd.f32 %v3403_v40, %v3357_v61  ;;  %4444 = vst [vmem:[%s5066_s20 + $0x18] sm:$0xff] %v4310_v43   ;;  %v3304_v1 = vadd.f32 %v3303_v58, %v3257_v35  ;;  %v3358_v59 = vmul.f32 %v3257_v35, %v3257_v35  ;;  %v2668_v48 = vpop.f32.mrb[12].mxu0 }
 0x33d   : > { %v2945_v52 = vadd.f32 %v8447_v21, %v4533_v26  ;;  %v2936_v57 = vpop.f32.mrb[187].mxu1  ;;  %v4600_v27 = vadd.f32 %v2668_v48, %v10389_v29  ;;  %v2670_v21 = vpop.f32.mrb[13].mxu0  ;;  %v8656_v36 = vsel %vm3222_vm12, %v2942_v47, 0.0  ;;  %vm3231_vm12 = vcmp.eq.s32.totalorder %v8615_v51, 1 }
 0x33e   : > { %v8648_v5 = vsel %vm3220_vm3, %v2934_v50, 0.0  ;;  %v2937_v31 = vadd.f32 %v8441_v41, %v2936_v57  ;;  %v3405_v39 = vadd.f32 %v3404_v46, %v3358_v59  ;;  %v2671_v40 = vpop.f32.mrb[14].mxu0  ;;  %v10390_v41 = vld [vmem:[#allocation122_spill] sm:$0xff]  ;;  %v8663_v13 = vpop.permute.xlu1 %3154  ;;  %v10392_v21 = vld [vmem:[#allocation196_spill] sm:$0xff] }
 0x33f   : > { %v4340_v17 = vpack.c.bf16 %v8648_v5, %v8646_v62  ;;  %v2894_v2 = vadd.f32 %v4600_v27, %v8571_v19  ;;  %v4601_v55 = vadd.f32 %v2671_v40, %v10390_v41  ;;  %v2673_v14 = vpop.f32.mrb[15].mxu0  ;;  %v8671_v47 = vpop.permute.xlu0 %3151  ;;  %v8679_v59 = vsel %vm3223_vm7, %v2945_v52, 0.0 }
 0x340   : > { %v8658_v16 = vsel %vm3221_vm10, %v2937_v31, 0.0  ;;  %vm3216_vm10 = vcmp.eq.s32.totalorder %v10399_v25, 1  ;;  %vm3234_vm7 = vcmp.eq.s32.totalorder %v8671_v47, 1 }
 0x341   : > { %4450 = vst [vmem:[%s5066_s20 + $0x48] sm:$0xff] %v4340_v17   ;;  %v4345_v23 = vpack.c.bf16 %v8656_v36, %v8658_v16  ;;  %v3258_v11 = vsel %vm3210_vm13, %v2894_v2, 0.0  ;;  %v2897_v15 = vadd.f32 %v4601_v55, %v8579_v38  ;;  %vm3232_vm13 = vcmp.eq.s32.totalorder %v8643_v3, 1 }
 0x342   : > { %v4536_v28 = vpop.f32.mrb[188].mxu1  ;;  %v3305_v20 = vadd.f32 %v3304_v1, %v3258_v11  ;;  %v3359_v45 = vmul.f32 %v3258_v11, %v3258_v11  ;;  %v4315_v58 = vpack.c.bf16 %v3258_v11, %v3257_v35  ;;  %v10391_v35 = vld [vmem:[#allocation123_spill] sm:$0xff]  ;;  %v3264_v0 = vsel %vm3216_vm10, %v8612_v60, 0.0 }
 0x343   : > { %v2958_v19 = vadd.f32 %v8457_v42, %v4536_v28  ;;  %v2949_v18 = vpop.f32.mrb[189].mxu1  ;;  %4451 = vst [vmem:[%s5066_s20 + $0x50] sm:$0xff] %v4345_v23   ;;  %v3259_v50 = vsel %vm3211_vm15, %v2897_v15, 0.0  ;;  %v8698_v33 = vpop.permute.xlu0 %3157  ;;  %vm3233_vm15 = vcmp.eq.s32.totalorder %v8636_v32, 1  ;;  %v3366_v3 = vmul.f32 %v8626_v6, %v8626_v6 }
 0x344   : > { %v2950_v61 = vadd.f32 %v8451_v44, %v2949_v18  ;;  %v4537_v43 = vpop.f32.mrb[190].mxu1  ;;  %v3406_v38 = vadd.f32 %v3405_v39, %v3359_v45  ;;  %4445 = vst [vmem:[%s5066_s20 + $0x20] sm:$0xff] %v4315_v58   ;;  %v3306_v42 = vadd.f32 %v3305_v20, %v3259_v50  ;;  %v3360_v57 = vmul.f32 %v3259_v50, %v3259_v50  ;;  %v2676_v46 = vpop.f32.mrb[16].mxu0 }
 0x345   : > { %v2961_v7 = vadd.f32 %v8459_v8, %v4537_v43  ;;  %v2952_v26 = vpop.f32.mrb[191].mxu1  ;;  %v4602_v4 = vadd.f32 %v2676_v46, %v10391_v35  ;;  %v2678_v48 = vpop.f32.mrb[17].mxu0  ;;  %v8691_v29 = vsel %vm3226_vm6, %v2958_v19, 0.0  ;;  %v3367_v32 = vmul.f32 %v8624_v30, %v8624_v30 }
 0x346   : > { %v8681_v1 = vsel %vm3224_vm9, %v2950_v61, 0.0  ;;  %v2953_v44 = vadd.f32 %v8453_v22, %v2952_v26  ;;  %v8687_v8 = vpop.permute.xlu1 %3160  ;;  %v3407_v12 = vadd.f32 %v3406_v38, %v3360_v57  ;;  %v2679_v52 = vpop.f32.mrb[18].mxu0  ;;  %v10393_v61 = vld [vmem:[#allocation165_spill] sm:$0xff]  ;;  %v10395_v26 = vld [vmem:[#allocation147_spill] sm:$0xff]  ;;  %vm3235_vm9 = vcmp.eq.s32.totalorder %v8663_v13, 1 }
 0x347   : > { %v4350_v31 = vpack.c.bf16 %v8681_v1, %v8679_v59  ;;  %v2902_v22 = vadd.f32 %v4602_v4, %v8592_v37  ;;  %v4603_v39 = vadd.f32 %v2679_v52, %v10392_v21  ;;  %v2681_v17 = vpop.f32.mrb[19].mxu0  ;;  %v8715_v58 = vsel %vm3227_vm5, %v2961_v7, 0.0  ;;  %v8723_v9 = vpop.permute.xlu0 %3163  ;;  %v10397_v4 = vld [vmem:[#allocation157_spill] sm:$0xff] }
 0x348   : > { %v8693_v27 = vsel %vm3225_vm1, %v2953_v44, 0.0  ;;  %vm3229_vm11 = vcmp.eq.s32.totalorder %v10395_v26, 1  ;;  %v10396_v44 = vld [vmem:[#allocation66_spill] sm:$0xff]  ;;  %v3365_v26 = vmul.f32 %v3264_v0, %v3264_v0  ;;  %vm3236_vm1 = vcmp.eq.s32.totalorder %v8698_v33, 1  ;;  %v10408_v33 = vld [vmem:[#allocation172_spill] sm:$0xff] }
 0x349   : > { %4452 = vst [vmem:[%s5066_s20 + $0x58] sm:$0xff] %v4350_v31   ;;  %v4355_v49 = vpack.c.bf16 %v8691_v29, %v8693_v27  ;;  %v3260_v2 = vsel %vm3212_vm14, %v2902_v22, 0.0  ;;  %v2905_v41 = vadd.f32 %v4603_v39, %v8599_v34  ;;  %v10398_v31 = vld [vmem:[#allocation134_spill] sm:$0xff]  ;;  %v10400_v39 = vld [vmem:[#allocation69_spill] sm:$0xff]  ;;  %vm3237_vm6 = vcmp.eq.s32.totalorder %v8687_v8, 1 }
 0x34a   : > { %v4540_v40 = vpop.f32.mrb[192].mxu1  ;;  %v3307_v14 = vadd.f32 %v3306_v42, %v3260_v2  ;;  %v3361_v23 = vmul.f32 %v3260_v2, %v3260_v2  ;;  %v4320_v24 = vpack.c.bf16 %v3260_v2, %v3259_v50  ;;  %vm3215_vm3 = vcmp.eq.s32.totalorder %v10398_v31, 1 }
 0x34b   : > { %v2974_v55 = vadd.f32 %v8469_v56, %v4540_v40  ;;  %v2965_v37 = vpop.f32.mrb[193].mxu1  ;;  %4453 = vst [vmem:[%s5066_s20 + $0x60] sm:$0xff] %v4355_v49   ;;  %v3261_v15 = vsel %vm3213_vm8, %v2905_v41, 0.0  ;;  %v8712_v56 = vpop.permute.xlu1 %3166  ;;  %v10401_v49 = vld [vmem:[#allocation200_spill] sm:$0xff]  ;;  %vm3238_vm14 = vcmp.eq.s32.totalorder %v8723_v9, 1 }
 0x34c   : > { %v2966_v28 = vadd.f32 %v8463_v63, %v2965_v37  ;;  %v4541_v11 = vpop.f32.mrb[194].mxu1  ;;  %v3408_v34 = vadd.f32 %v3407_v12, %v3361_v23  ;;  %4446 = vst [vmem:[%s5066_s20 + $0x28] sm:$0xff] %v4320_v24   ;;  %v3308_v18 = vadd.f32 %v3307_v14, %v3261_v15  ;;  %v3362_v20 = vmul.f32 %v3261_v15, %v3261_v15  ;;  %v2684_v45 = vpop.f32.mrb[20].mxu0  ;;  %v10402_v23 = vld [vmem:[#allocation125_spill] sm:$0xff] }
 0x34d   : > { %v2977_v53 = vadd.f32 %v8471_v54, %v4541_v11  ;;  %v2968_v19 = vpop.f32.mrb[195].mxu1  ;;  %v4604_v50 = vadd.f32 %v2684_v45, %v10394_v10  ;;  %v2686_v54 = vpop.f32.mrb[21].mxu0  ;;  %v8727_v57 = vsel %vm3230_vm4, %v2974_v55, 0.0  ;;  %vm3239_vm8 = vcmp.eq.s32.totalorder %v8712_v56, 1 }
 0x34e   : > { %v8717_v63 = vsel %vm3228_vm0, %v2966_v28, 0.0  ;;  %v2969_v43 = vadd.f32 %v10393_v61, %v2968_v19  ;;  %v3409_v38 = vadd.f32 %v3408_v34, %v3362_v20  ;;  %v2687_v7 = vpop.f32.mrb[22].mxu0  ;;  %v10403_v19 = vld [vmem:[#allocation197_spill] sm:$0xff]  ;;  %v8755_v45 = vpop.permute.xlu0 %3169 }
 0x34f   : > { %v4360_v42 = vpack.c.bf16 %v8717_v63, %v8715_v58  ;;  %v2910_v35 = vadd.f32 %v4604_v50, %v10396_v44  ;;  %v4605_v48 = vadd.f32 %v2687_v7, %v10397_v4  ;;  %v2689_v12 = vpop.f32.mrb[23].mxu0  ;;  %v8744_v41 = vpop.permute.xlu1 %3172  ;;  %v8761_v60 = vsel %vm3231_vm12, %v2977_v53, 0.0  ;;  %v10404_v50 = vld [vmem:[#allocation126_spill] sm:$0xff] }
 0x350   : > { %v8729_v46 = vsel %vm3229_vm11, %v2969_v43, 0.0  ;;  %v10405_v12 = vld [vmem:[#allocation49_spill] sm:$0xff]  ;;  %vm3241_vm5 = vcmp.eq.s32.totalorder %v8744_v41, 1  ;;  %v3374_v41 = vmul.f32 %v8693_v27, %v8693_v27 }
 0x351   : > { %4454 = vst [vmem:[%s5066_s20 + $0x68] sm:$0xff] %v4360_v42   ;;  %v4365_v52 = vpack.c.bf16 %v8727_v57, %v8729_v46  ;;  %v3262_v21 = vsel %vm3214_vm2, %v2910_v35, 0.0  ;;  %v2913_v17 = vadd.f32 %v4605_v48, %v10400_v39  ;;  %v10406_v39 = vld [vmem:[#allocation167_spill] sm:$0xff]  ;;  %vm3240_vm2 = vcmp.eq.s32.totalorder %v8755_v45, 1  ;;  %v10412_v45 = vld [vmem:[#allocation201_spill] sm:$0xff] }
 0x352   : > { %v4544_v22 = vpop.f32.mrb[196].mxu1  ;;  %v3309_v55 = vadd.f32 %v3308_v18, %v3262_v21  ;;  %v3363_v37 = vmul.f32 %v3262_v21, %v3262_v21  ;;  %v4325_v14 = vpack.c.bf16 %v3262_v21, %v3261_v15 }
 0x353   : > { %v2990_v40 = vadd.f32 %v10401_v49, %v4544_v22  ;;  %v2981_v2 = vpop.f32.mrb[197].mxu1  ;;  %4455 = vst [vmem:[%s5066_s20 + $0x70] sm:$0xff] %v4365_v52   ;;  %v3263_v11 = vsel %vm3215_vm3, %v2913_v17, 0.0  ;;  %v8777_v47 = vpop.permute.xlu1 %3178  ;;  %v3368_v49 = vmul.f32 %v8646_v62, %v8646_v62 }
 0x354   : > { %v2982_v24 = vadd.f32 %v10402_v23, %v2981_v2  ;;  %v4545_v28 = vpop.f32.mrb[198].mxu1  ;;  %v3410_v18 = vadd.f32 %v3409_v38, %v3363_v37  ;;  %4447 = vst [vmem:[%s5066_s20 + $0x30] sm:$0xff] %v4325_v14   ;;  %v3310_v15 = vadd.f32 %v3309_v55, %v3263_v11  ;;  %v3364_v61 = vmul.f32 %v3263_v11, %v3263_v11  ;;  %v3176_v52 = vpop.permute.xlu0 %3175 }
 0x355   : > { %v2993_v34 = vadd.f32 %v10403_v19, %v4545_v28  ;;  %v2984_v20 = vpop.f32.mrb[199].mxu1  ;;  %v4330_v43 = vpack.c.bf16 %v3264_v0, %v3263_v11  ;;  %v8771_v44 = vsel %vm3234_vm7, %v2990_v40, 0.0  ;;  %v10407_v40 = vld [vmem:[#allocation55_spill] sm:$0xff]  ;;  %vm3242_vm0 = vcmp.eq.s32.totalorder %v3176_v52, 1 }
 0x356   : > { %v8765_v10 = vsel %vm3232_vm13, %v2982_v24, 0.0  ;;  %v2985_v54 = vadd.f32 %v10404_v50, %v2984_v20  ;;  %v3311_v42 = vadd.f32 %v3310_v15, %v3264_v0  ;;  %v3411_v38 = vadd.f32 %v3410_v18, %v3364_v61 }
 0x357   : > { %4448 = vst [vmem:[%s5066_s20 + $0x38] sm:$0xff] %v4330_v43   ;;  %v4370_v7 = vpack.c.bf16 %v8765_v10, %v8761_v60  ;;  %v8806_v28 = vpop.permute.xlu1 %3184  ;;  %v3369_v0 = vmul.f32 %v8648_v5, %v8648_v5  ;;  %v3370_v20 = vmul.f32 %v8658_v16, %v8658_v16  ;;  %v10409_v43 = vld [vmem:[#allocation179_spill] sm:$0xff]  ;;  %vm3243_vm11 = vcmp.eq.s32.totalorder %v8777_v47, 1 }
 0x358   : > { %v8775_v51 = vsel %vm3233_vm15, %v2985_v54, 0.0  ;;  %v3312_v53 = vadd.f32 %v3311_v42, %v8626_v6  ;;  %v3412_v35 = vadd.f32 %v3411_v38, %v3365_v26  ;;  %v3371_v54 = vmul.f32 %v8656_v36, %v8656_v36  ;;  %v10410_v38 = vld [vmem:[#allocation205_spill] sm:$0xff] }
 0x359   : > { %4456 = vst [vmem:[%s5066_s20 + $0x78] sm:$0xff] %v4370_v7   ;;  %v4375_v4 = vpack.c.bf16 %v8771_v44, %v8775_v51  ;;  %vm3245_vm3 = vcmp.eq.s32.totalorder %v8806_v28, 1  ;;  %v3378_v28 = vmul.f32 %v8729_v46, %v8729_v46 }
 0x35a   : > { %v4548_v48 = vpop.f32.mrb[200].mxu1  ;;  %v3313_v22 = vadd.f32 %v3312_v53, %v8624_v30  ;;  %v3413_v21 = vadd.f32 %v3412_v35, %v3366_v3  ;;  %v8797_v30 = vsel %vm3235_vm9, %v2993_v34, 0.0  ;;  %v3182_v34 = vpop.permute.xlu0 %3181  ;;  %v10411_v53 = vld [vmem:[#allocation133_spill] sm:$0xff] }
 0x35b   : > { %v3006_v31 = vadd.f32 %v10405_v12, %v4548_v48  ;;  %v2997_v25 = vpop.f32.mrb[201].mxu1  ;;  %4457 = vst [vmem:[%s5066_s20 + $0x80] sm:$0xff] %v4375_v4   ;;  %v8832_v48 = vpop.permute.xlu1 %3190  ;;  %vm3244_vm4 = vcmp.eq.s32.totalorder %v3182_v34, 1  ;;  %v10416_v34 = vld [vmem:[#allocation17_spill] sm:$0xff] }
 0x35c   : > { %v2998_v17 = vadd.f32 %v10406_v39, %v2997_v25  ;;  %v4549_v6 = vpop.f32.mrb[202].mxu1  ;;  %v3314_v37 = vadd.f32 %v3313_v22, %v8646_v62  ;;  %v3414_v14 = vadd.f32 %v3413_v21, %v3367_v32  ;;  %v3373_v21 = vmul.f32 %v8681_v1, %v8681_v1 }
 0x35d   : > { %v3009_v2 = vadd.f32 %v10407_v40, %v4549_v6  ;;  %v3000_v55 = vpop.f32.mrb[203].mxu1  ;;  %v8811_v19 = vsel %vm3238_vm14, %v3006_v31, 0.0  ;;  %vm3247_vm12 = vcmp.eq.s32.totalorder %v8832_v48, 1 }
 0x35e   : > { %v8799_v23 = vsel %vm3236_vm1, %v2998_v17, 0.0  ;;  %v3001_v24 = vadd.f32 %v10408_v33, %v3000_v55  ;;  %v3315_v62 = vadd.f32 %v3314_v37, %v8648_v5  ;;  %v3415_v11 = vadd.f32 %v3414_v14, %v3368_v49  ;;  %v3188_v22 = vpop.permute.xlu0 %3187  ;;  %v10413_v55 = vld [vmem:[#allocation206_spill] sm:$0xff] }
 0x35f   : > { %v4380_v13 = vpack.c.bf16 %v8799_v23, %v8797_v30  ;;  %v8835_v31 = vsel %vm3239_vm8, %v3009_v2, 0.0  ;;  %v8857_v14 = vpop.permute.xlu1 %3196  ;;  %vm3246_vm10 = vcmp.eq.s32.totalorder %v3188_v22, 1  ;;  %vm3454_vm1 = vcmask 1040384  }
 0x360   : > { %v8814_v8 = vsel %vm3237_vm6, %v3001_v24, 0.0  ;;  %v3316_v9 = vadd.f32 %v3315_v62, %v8658_v16  ;;  %v3416_v18 = vadd.f32 %v3415_v11, %v3369_v0  ;;  %v3372_v16 = vmul.f32 %v8679_v59, %v8679_v59  ;;  %v10414_v0 = vld [vmem:[#allocation87_spill] sm:$0xff] }
 0x361   : > { %4458 = vst [vmem:[%s5066_s20 + $0x88] sm:$0xff] %v4380_v13   ;;  %v4385_v15 = vpack.c.bf16 %v8811_v19, %v8814_v8  ;;  %v3375_v13 = vmul.f32 %v8691_v29, %v8691_v29  ;;  %v3376_v11 = vmul.f32 %v8715_v58, %v8715_v58  ;;  %vm3249_vm15 = vcmp.eq.s32.totalorder %v8857_v14, 1 }
 0x362   : > { %v4552_v61 = vpop.f32.mrb[204].mxu1  ;;  %v3317_v26 = vadd.f32 %v3316_v9, %v8656_v36  ;;  %v3417_v42 = vadd.f32 %v3416_v18, %v3370_v20  ;;  %v10415_v20 = vld [vmem:[#allocation62_spill] sm:$0xff] }
 0x363   : > { %v3022_v5 = vadd.f32 %v10409_v43, %v4552_v61  ;;  %v3013_v50 = vpop.f32.mrb[205].mxu1  ;;  %4459 = vst [vmem:[%s5066_s20 + $0x90] sm:$0xff] %v4385_v15   ;;  %v3194_v15 = vpop.permute.xlu0 %3193 }
 0x364   : > { %v3014_v7 = vadd.f32 %v10410_v38, %v3013_v50  ;;  %v4553_v3 = vpop.f32.mrb[206].mxu1  ;;  %v3418_v12 = vadd.f32 %v3417_v42, %v3371_v54  ;;  %v3318_v36 = vadd.f32 %v3317_v26, %v8679_v59  ;;  %v3377_v54 = vmul.f32 %v8717_v63, %v8717_v63 }
 0x365   : > { %v3025_v35 = vadd.f32 %v10411_v53, %v4553_v3  ;;  %v3016_v4 = vpop.f32.mrb[207].mxu1  ;;  %v8846_v17 = vsel %vm3242_vm0, %v3022_v5, 0.0  ;;  %vm3248_vm13 = vcmp.eq.s32.totalorder %v3194_v15, 1 }
 0x366   : > { %v8837_v25 = vsel %vm3240_vm2, %v3014_v7, 0.0  ;;  %v3017_v32 = vadd.f32 %v10412_v45, %v3016_v4  ;;  %v3319_v39 = vadd.f32 %v3318_v36, %v8681_v1  ;;  %v3419_v59 = vadd.f32 %v3418_v12, %v3372_v16  ;;  %v3203_v7 = vpop.permute.xlu1 %3202 }
 0x367   : > { %v4390_v56 = vpack.c.bf16 %v8837_v25, %v8835_v31  ;;  %v3200_v36 = vpop.permute.xlu0 %3199  ;;  %vm3251_vm7 = vcmp.eq.s32.totalorder %v3203_v7, 1 }
 0x368   : > { %v8849_v6 = vsel %vm3241_vm5, %v3017_v32, 0.0  ;;  %v3320_v49 = vadd.f32 %v3319_v39, %v8693_v27  ;;  %v3420_v40 = vadd.f32 %v3419_v59, %v3373_v21  ;;  %v3380_v39 = vmul.f32 %v8761_v60, %v8761_v60  ;;  %v10419_v59 = vld [vmem:[#allocation47_spill] sm:$0xff] }
 0x369   : > { %4460 = vst [vmem:[%s5066_s20 + $0x98] sm:$0xff] %v4390_v56   ;;  %v4395_v52 = vpack.c.bf16 %v8846_v17, %v8849_v6  ;;  %v3379_v56 = vmul.f32 %v8727_v57, %v8727_v57  ;;  %vm3250_vm9 = vcmp.eq.s32.totalorder %v3200_v36, 1 }
 0x36a   : > { %v4556_v2 = vpop.f32.mrb[208].mxu1  ;;  %v3321_v33 = vadd.f32 %v3320_v49, %v8691_v29  ;;  %v3421_v24 = vadd.f32 %v3420_v40, %v3374_v41  ;;  %v8869_v29 = vsel %vm3243_vm11, %v3025_v35, 0.0 }
 0x36b   : > { %v3038_v37 = vadd.f32 %v10413_v55, %v4556_v2  ;;  %v3029_v1 = vpop.f32.mrb[209].mxu1  ;;  %4461 = vst [vmem:[%s5066_s20 + $0xa0] sm:$0xff] %v4395_v52  }
 0x36c   : > { %v3030_v62 = vadd.f32 %v10414_v0, %v3029_v1  ;;  %v4557_v27 = vpop.f32.mrb[210].mxu1  ;;  %v3322_v61 = vadd.f32 %v3321_v33, %v8715_v58  ;;  %v3422_v43 = vadd.f32 %v3421_v24, %v3375_v13  ;;  %v10420_v1 = vld [vmem:[#allocation19_spill] sm:$0xff]  ;;  %v3381_v24 = vmul.f32 %v8765_v10, %v8765_v10 }
 0x36d   : > { %v3041_v9 = vadd.f32 %v10415_v20, %v4557_v27  ;;  %v3032_v18 = vpop.f32.mrb[211].mxu1  ;;  %v8880_v58 = vsel %vm3246_vm10, %v3038_v37, 0.0  ;;  %v3382_v20 = vmul.f32 %v8775_v51, %v8775_v51 }
 0x36e   : > { %v8871_v5 = vsel %vm3244_vm4, %v3030_v62, 0.0  ;;  %v3033_v50 = vadd.f32 %v10416_v34, %v3032_v18  ;;  %v3323_v26 = vadd.f32 %v3322_v61, %v8717_v63  ;;  %v3423_v42 = vadd.f32 %v3422_v43, %v3376_v11  ;;  %v10417_v63 = vld [vmem:[#allocation21_spill] sm:$0xff] }
 0x36f   : > { %v4400_v47 = vpack.c.bf16 %v8871_v5, %v8869_v29  ;;  %v3384_v61 = vmul.f32 %v8797_v30, %v8797_v30 }
 0x370   : > { %v8883_v38 = vsel %vm3245_vm3, %v3033_v50, 0.0  ;;  %v3324_v3 = vadd.f32 %v3323_v26, %v8729_v46  ;;  %v3424_v16 = vadd.f32 %v3423_v42, %v3377_v54  ;;  %v10418_v46 = vld [vmem:[#allocation137_spill] sm:$0xff]  ;;  %v3387_v26 = vmul.f32 %v8811_v19, %v8811_v19 }
 0x371   : > { %4462 = vst [vmem:[%s5066_s20 + $0xa8] sm:$0xff] %v4400_v47   ;;  %v4405_v53 = vpack.c.bf16 %v8880_v58, %v8883_v38 }
 0x372   : > { %v4560_v35 = vpop.f32.mrb[212].mxu1  ;;  %v3325_v45 = vadd.f32 %v3324_v3, %v8727_v57  ;;  %v3425_v32 = vadd.f32 %v3424_v16, %v3378_v28  ;;  %v3295_v57 = vsel %vm3247_vm12, %v3041_v9, 0.0  ;;  %v3389_v16 = vmul.f32 %v8837_v25, %v8837_v25 }
 0x373   : > { %v3054_v4 = vadd.f32 %v10417_v63, %v4560_v35  ;;  %v3045_v12 = vpop.f32.mrb[213].mxu1  ;;  %4463 = vst [vmem:[%s5066_s20 + $0xb0] sm:$0xff] %v4405_v53   ;;  %v3390_v63 = vmul.f32 %v8849_v6, %v8849_v6 }
 0x374   : > { %v3046_v22 = vadd.f32 %v10418_v46, %v3045_v12  ;;  %v4561_v21 = vpop.f32.mrb[214].mxu1  ;;  %v3326_v40 = vadd.f32 %v3325_v45, %v8761_v60  ;;  %v3426_v52 = vadd.f32 %v3425_v32, %v3379_v56  ;;  %v3393_v45 = vmul.f32 %v8871_v5, %v8871_v5 }
 0x375   : > { %v3057_v41 = vadd.f32 %v10419_v59, %v4561_v21  ;;  %v3048_v49 = vpop.f32.mrb[215].mxu1  ;;  %v3298_v0 = vsel %vm3250_vm9, %v3054_v4, 0.0  ;;  %v3396_v59 = vmul.f32 %v3295_v57, %v3295_v57 }
 0x376   : > { %v3296_v2 = vsel %vm3248_vm13, %v3046_v22, 0.0  ;;  %v3049_v13 = vadd.f32 %v10420_v1, %v3048_v49  ;;  %v3327_v33 = vadd.f32 %v3326_v40, %v8765_v10  ;;  %v3427_v60 = vadd.f32 %v3426_v52, %v3380_v39 }
 0x377   : > { %v4410_v55 = vpack.c.bf16 %v3296_v2, %v3295_v57  ;;  %v8905_v37 = vsel %vm3251_vm7, %v3057_v41, 0.0  ;;  %v3383_v10 = vmul.f32 %v8771_v44, %v8771_v44  ;;  %v3394_v22 = vmul.f32 %v8883_v38, %v8883_v38 }
 0x378   : > { %v4193_v48 = vpack.c.bf16 %v8905_v37, %v8905_v37  ;;  %v3297_v62 = vsel %vm3249_vm15, %v3049_v13, 0.0  ;;  %v3428_v27 = vadd.f32 %v3427_v60, %v3381_v24  ;;  %v3328_v11 = vadd.f32 %v3327_v33, %v8775_v51 }
 0x379   : > { %4464 = vst [vmem:[%s5066_s20 + $0xb8] sm:$0xff] %v4410_v55   ;;  %v4415_v9 = vpack.c.bf16 %v3298_v0, %v3297_v62  ;;  %v3385_v51 = vmul.f32 %v8799_v23, %v8799_v23  ;;  %v3397_v40 = vmul.f32 %v3296_v2, %v3296_v2  ;;  %v3398_v1 = vmul.f32 %v3297_v62, %v3297_v62 }
 0x37a   : > { %3706 = vst [vmem:[%s5066_s20 + $0xc8] sm:$0xf] %v4193_v48  ;;  %v3329_v18 = vadd.f32 %v3328_v11, %v8771_v44  ;;  %v3429_v15 = vadd.f32 %v3428_v27, %v3382_v20  ;;  %v3386_v44 = vmul.f32 %v8814_v8, %v8814_v8  ;;  %v3399_v13 = vmul.f32 %v3298_v0, %v3298_v0 }
 0x37b   : > { %4465 = vst [vmem:[%s5066_s20 + $0xc0] sm:$0xff] %v4415_v9   ;;  %s3803_s20 = sshll.u32 %s10422_s22, 1 }
 0x37c   : > { %v3430_v14 = vadd.f32 %v3429_v15, %v3383_v10  ;;  %v3330_v43 = vadd.f32 %v3329_v18, %v8797_v30  ;;  %v3388_v30 = vmul.f32 %v8835_v31, %v8835_v31  ;;  %s262_s29 = scalar_lea.vmem %s8976_s6, %s3803_s20 }
 0x37e   : > { %v3331_v47 = vadd.f32 %v3330_v43, %v8799_v23  ;;  %v3431_v34 = vadd.f32 %v3430_v14, %v3384_v61 }
 0x380   : > { %v3432_v50 = vadd.f32 %v3431_v34, %v3385_v51  ;;  %v3332_v54 = vadd.f32 %v3331_v47, %v8814_v8 }
 0x382   : > { %v3333_v42 = vadd.f32 %v3332_v54, %v8811_v19  ;;  %v3433_v7 = vadd.f32 %v3432_v50, %v3386_v44  ;;  %v3391_v19 = vmul.f32 %v8846_v17, %v8846_v17 }
 0x384   : > { %v3434_v28 = vadd.f32 %v3433_v7, %v3387_v26  ;;  %v3334_v3 = vadd.f32 %v3333_v42, %v8835_v31  ;;  %v3392_v31 = vmul.f32 %v8869_v29, %v8869_v29 }
 0x386   : > { %v3335_v23 = vadd.f32 %v3334_v3, %v8837_v25  ;;  %v3435_v53 = vadd.f32 %v3434_v28, %v3388_v30 }
 0x388   : > { %v3436_v35 = vadd.f32 %v3435_v53, %v3389_v16  ;;  %v3336_v8 = vadd.f32 %v3335_v23, %v8849_v6 }
 0x38a   : > { %v3337_v4 = vadd.f32 %v3336_v8, %v8846_v17  ;;  %v3437_v12 = vadd.f32 %v3436_v35, %v3390_v63  ;;  %v3395_v17 = vmul.f32 %v8880_v58, %v8880_v58 }
 0x38c   : > { %v3438_v36 = vadd.f32 %v3437_v12, %v3391_v19  ;;  %v3338_v56 = vadd.f32 %v3337_v4, %v8869_v29 }
 0x38e   : > { %v3339_v25 = vadd.f32 %v3338_v56, %v8871_v5  ;;  %v3439_v32 = vadd.f32 %v3438_v36, %v3392_v31 }
 0x390   : > { %v3440_v46 = vadd.f32 %v3439_v32, %v3393_v45  ;;  %v3340_v6 = vadd.f32 %v3339_v25, %v8883_v38  ;;  %v3400_v38 = vmul.f32 %v8905_v37, %v8905_v37 }
 0x392   : > { %v3341_v21 = vadd.f32 %v3340_v6, %v8880_v58  ;;  %v3441_v39 = vadd.f32 %v3440_v46, %v3394_v22 }
 0x394   : > { %v3442_v29 = vadd.f32 %v3441_v39, %v3395_v17  ;;  %v3342_v41 = vadd.f32 %v3341_v21, %v3295_v57 }
 0x396   : > { %v3343_v49 = vadd.f32 %v3342_v41, %v3296_v2  ;;  %v3443_v52 = vadd.f32 %v3442_v29, %v3396_v59 }
 0x398   : > { %v3444_v5 = vadd.f32 %v3443_v52, %v3397_v40  ;;  %v3344_v55 = vadd.f32 %v3343_v49, %v3297_v62 }
 0x39a   : > { %v3345_v33 = vadd.f32 %v3344_v55, %v3298_v0  ;;  %v3445_v24 = vadd.f32 %v3444_v5, %v3398_v1 }
 0x39c   : > { %v3346_v60 = vadd.f32 %v3345_v33, %v8905_v37  ;;  %v3446_v58 = vadd.f32 %v3445_v24, %v3399_v13 }
 0x39e   : > { %v3347_v48 = vrot.slane %v3346_v60, 4  ;;  %v3447_v27 = vadd.f32 %v3446_v58, %v3400_v38 }
 0x3a0   : > { %v3348_v11 = vadd.f32 %v3347_v48, %v3346_v60  ;;  %v3448_v57 = vrot.slane %v3447_v27, 4 }
 0x3a2   : > { %v3349_v20 = vrot.slane %v3348_v11, 2  ;;  %v3449_v2 = vadd.f32 %v3448_v57, %v3447_v27 }
 0x3a4   : > { %v3350_v9 = vadd.f32 %v3349_v20, %v3348_v11  ;;  %v3450_v10 = vrot.slane %v3449_v2, 2 }
 0x3a6   : > { %v3351_v18 = vrot.slane %v3350_v9, 1  ;;  %v3451_v62 = vadd.f32 %v3450_v10, %v3449_v2 }
 0x3a8   : > { %v3452_v15 = vrot.slane %v3451_v62, 1  ;;  %v3352_v0 = vadd.f32 %v3351_v18, %v3350_v9 }
 0x3aa   : > { %v3453_v37 = vadd.f32 %v3452_v15, %v3451_v62 }
 0x3ac   : > { %v3455_v61 = vsel %vm3454_vm1, %v3352_v0, %v3453_v37 }
 0x3ad   : > { %3456 = vst [vmem:[%s262_s29] sm:$0x3] %v3455_v61 }
 0x3ae PF: > { %s17_s21 = sadd.s32 1, %s4894_s21  }
 0x3af   : > { %p14_p4 = scmp.ge.s32.totalorder %s17_s21, 4  }
 0x3b1   :  { %16 = sbr.rel (!%p14_p4) target bundleno = 1 (0x1), region = 82 }

</bundles_post_ra>
